<compile_context>
chip_gen: v6e
topology: v6e:2x2x1
jax: 0.10.0
libtpu: 0.0.40
codegen_flags: <defaults>
</compile_context>

<pallas_src>
import functools
import math

import jax
import jax.numpy as jnp
from jax.experimental import pallas as pl
from jax.experimental.pallas import tpu as pltpu


# ----------------------------------------------------------------------------
# One bidirectional GRU layer on a single batch row (in-kernel helper).
#   x_val:    (T, Din) f32 value          layer input
#   wih_ref:  (Din, 6H) bf16              columns = [fw r|z|n | bw r|z|n]  (W_ih^T)
#   whh_ref:  (2H, 6H) bf16               block-diag [[W_hh_fw^T, 0], [0, W_hh_bw^T]]
#   bgi_ref:  (1, 6H) f32                 b_ih (+ b_hh pre-summed for the r,z gates)
#   bhhn_ref: (1, 2H) f32                 [b_hh_n_fw | b_hh_n_bw]
#   gi_ref:   (T, 6H) f32 VMEM scratch    hoisted input projections
#   y_ref:    (T, 2H) f32 VMEM scratch    layer output [fw | bw] per timestep
# ----------------------------------------------------------------------------
def _run_bigru_layer(x_val, wih_ref, whh_ref, bgi_ref, bhhn_ref, gi_ref, y_ref,
                     *, hidden, seq_len):
    H, T = hidden, seq_len
    bf16 = jnp.bfloat16

    # Hoisted input projection: both directions, all timesteps, one MXU matmul.
    gi_ref[...] = (jnp.dot(x_val.astype(bf16), wih_ref[...],
                           preferred_element_type=jnp.float32)
                   + bgi_ref[...])                                    # (T, 6H) f32

    # Loaded once; reused by all T unrolled steps.
    whh = whh_ref[...]                                                # (2H, 6H) bf16
    bn_f = bhhn_ref[:, 0:H]                                           # (1, H)
    bn_b = bhhn_ref[:, H:2 * H]

    h = jnp.zeros((1, 2 * H), jnp.float32)                            # [hf | hb], h0 = 0

    # Fully unrolled time loop: fw consumes time t, bw consumes time T-1-t.
    for t in range(T):
        tb = T - 1 - t
        gi_f = gi_ref[pl.ds(t, 1), 0:3 * H]                           # (1, 3H)
        gi_b = gi_ref[pl.ds(tb, 1), 3 * H:6 * H]                      # (1, 3H)

        # Both directions' recurrent matmuls merged into one MXU push (block-diag RHS).
        gh = jnp.dot(h.astype(bf16), whh,
                     preferred_element_type=jnp.float32)              # (1, 6H)

        # PyTorch gate order (r, z, n); n = tanh(W_ih x + b_ih + r * (W_hh h + b_hh_n)).
        r_f = jax.nn.sigmoid(gi_f[:, 0:H] + gh[:, 0:H])
        z_f = jax.nn.sigmoid(gi_f[:, H:2 * H] + gh[:, H:2 * H])
        n_f = jnp.tanh(gi_f[:, 2 * H:3 * H] + r_f * (gh[:, 2 * H:3 * H] + bn_f))

        r_b = jax.nn.sigmoid(gi_b[:, 0:H] + gh[:, 3 * H:4 * H])
        z_b = jax.nn.sigmoid(gi_b[:, H:2 * H] + gh[:, 4 * H:5 * H])
        n_b = jnp.tanh(gi_b[:, 2 * H:3 * H] + r_b * (gh[:, 5 * H:6 * H] + bn_b))

        hf = (1.0 - z_f) * n_f + z_f * h[:, 0:H]
        hb = (1.0 - z_b) * n_b + z_b * h[:, H:2 * H]
        h = jnp.concatenate([hf, hb], axis=-1)                        # (1, 2H)

        y_ref[pl.ds(t, 1), 0:H] = hf
        y_ref[pl.ds(tb, 1), H:2 * H] = hb


# ----------------------------------------------------------------------------
# Fused kernel: all GRU layers + MLP head, one batch row.
# ref layout: [x, (wih, whh, bgi, bhhn) x L, (W, b) x 5, out, gi_scr, y0_scr, y1_scr]
# ----------------------------------------------------------------------------
def _fused_gru_mlp_kernel(*refs, hidden, seq_len, num_layers, num_fc):
    H, T = hidden, seq_len
    n_gru = 4 * num_layers
    x_ref = refs[0]
    gru_refs = refs[1:1 + n_gru]
    fc_refs = refs[1 + n_gru:1 + n_gru + 2 * num_fc]
    out_ref = refs[1 + n_gru + 2 * num_fc]
    gi_ref = refs[1 + n_gru + 2 * num_fc + 1]
    y_refs = refs[1 + n_gru + 2 * num_fc + 2:1 + n_gru + 2 * num_fc + 4]

    # Stacked GRU layers: layer l reads the previous layer's output (ping-pong scratch).
    xv = x_ref[...]                                                   # (T, input_size)
    for l in range(num_layers):
        wih, whh, bgi, bhhn = gru_refs[4 * l:4 * l + 4]
        y_ref = y_refs[l % 2]
        _run_bigru_layer(xv, wih, whh, bgi, bhhn, gi_ref, y_ref,
                         hidden=H, seq_len=T)
        xv = y_ref[...]                                               # (T, 2H)
        # inter-layer dropout p=0.1 -> identity (eval mode)

    # Fused MLP head on (T, 2H); widths padded to 128 lanes; Dropouts are identity.
    h = xv
    for i in range(num_fc):
        w = fc_refs[2 * i][...]
        b = fc_refs[2 * i + 1][...]
        h = jnp.dot(h.astype(jnp.bfloat16), w,
                    preferred_element_type=jnp.float32) + b
        if i < num_fc - 1:
            h = jnp.maximum(h, 0.0)
    out_ref[...] = h.astype(out_ref.dtype)


# ----------------------------------------------------------------------------
# Full forward, matching SentimentGRU_A.forward semantics (eval mode).
# PyTorch: x, _ = gru(x); x = fc(x); return x[-1]   -> last BATCH row, shape (T, 3).
# ----------------------------------------------------------------------------
def sentiment_gru_forward(x, params, hidden):
    B, T, D = x.shape
    num_layers = len(params["gru"])
    num_fc = len(params["fc"])
    gru_flat = [a for layer in params["gru"] for a in layer]
    fc_flat = [a for wb in params["fc"] for a in wb]
    out_pad = params["fc"][-1][0].shape[1]                            # 128 padded lanes

    last_b = B - 1  # x[-1] depends only on the last batch row (h0 = 0, rows independent)
    in_specs = [pl.BlockSpec((None, T, D), lambda i: (last_b, 0, 0))]
    for a in gru_flat + fc_flat:
        in_specs.append(pl.BlockSpec(a.shape, lambda i: (0, 0)))

    kernel = functools.partial(_fused_gru_mlp_kernel, hidden=hidden, seq_len=T,
                               num_layers=num_layers, num_fc=num_fc)
    out = pl.pallas_call(
        kernel,
        out_shape=jax.ShapeDtypeStruct((T, out_pad), jnp.float32),
        grid_spec=pltpu.PrefetchScalarGridSpec(
            num_scalar_prefetch=0,
            grid=(1,),
            in_specs=in_specs,
            out_specs=pl.BlockSpec((T, out_pad), lambda i: (0, 0)),
            scratch_shapes=[pltpu.VMEM((T, 6 * hidden), jnp.float32),
                            pltpu.VMEM((T, 2 * hidden), jnp.float32),
                            pltpu.VMEM((T, 2 * hidden), jnp.float32)],
        ),
        compiler_params=pltpu.CompilerParams(dimension_semantics=("arbitrary",)),
    )(x.astype(jnp.float32), *gru_flat, *fc_flat)
    return out[:, :3]                                                 # (T, 3)


# ----------------------------------------------------------------------------
# Parameter init (PyTorch-style uniform bounds) + one-time kernel-layout prep.
# ----------------------------------------------------------------------------
def _uniform(key, shape, bound):
    return jax.random.uniform(key, shape, jnp.float32, -bound, bound)


def _prepare_gru_layer(raw, H):
    """raw[dir] = dict(w_ih(3H,D), w_hh(3H,H), b_ih(3H,), b_hh(3H,)) -> kernel layout."""
    def prep_dir(p):
        wih_t = p["w_ih"].T                                 # (D, 3H), cols [r|z|n]
        whh_t = p["w_hh"].T                                 # (H, 3H)
        b_ih, b_hh = p["b_ih"], p["b_hh"]
        bgi = jnp.concatenate([b_ih[0:H] + b_hh[0:H],       # r: pre-sum both biases
                               b_ih[H:2 * H] + b_hh[H:2 * H],   # z: pre-sum
                               b_ih[2 * H:3 * H]])          # n: b_ih only
        return wih_t, whh_t, bgi, b_hh[2 * H:3 * H]

    wf, whf, bgif, bnf = prep_dir(raw["fw"])
    wb, whb, bgib, bnb = prep_dir(raw["bw"])
    wih = jnp.concatenate([wf, wb], axis=1).astype(jnp.bfloat16)          # (D, 6H)
    whh_bd = jnp.zeros((2 * H, 6 * H), jnp.float32)                       # block-diagonal
    whh_bd = whh_bd.at[0:H, 0:3 * H].set(whf).at[H:2 * H, 3 * H:6 * H].set(whb)
    whh_bd = whh_bd.astype(jnp.bfloat16)                                  # (2H, 6H)
    bgi = jnp.concatenate([bgif, bgib])[None, :].astype(jnp.float32)      # (1, 6H)
    bhhn = jnp.concatenate([bnf, bnb])[None, :].astype(jnp.float32)       # (1, 2H)
    return (wih, whh_bd, bgi, bhhn)


def init_params(key, input_size, hidden, num_layers):
    H = hidden
    bound = 1.0 / math.sqrt(H)
    gru_layers = []
    for l in range(num_layers):
        d_in = input_size if l == 0 else 2 * H
        raw = {}
        for dname in ("fw", "bw"):
            key, k1, k2, k3, k4 = jax.random.split(key, 5)
            raw[dname] = dict(
                w_ih=_uniform(k1, (3 * H, d_in), bound),
                w_hh=_uniform(k2, (3 * H, H), bound),
                b_ih=_uniform(k3, (3 * H,), bound),
                b_hh=_uniform(k4, (3 * H,), bound),
            )
        gru_layers.append(_prepare_gru_layer(raw, H))

    # fc head: zero-pad every output width to 128 lanes (and matching zero input rows on
    # later layers) so all head matmuls/stores are lane-dense. Padded lanes stay exactly
    # zero through bias-add and ReLU, so numerics are unchanged.
    fc_dims = [(2 * H, 128), (128, 128), (128, 64), (64, 64), (64, 3)]
    fc = []
    in_pad = 2 * H
    for i, (din, dout) in enumerate(fc_dims):
        key, k1, k2 = jax.random.split(key, 3)
        bnd = 1.0 / math.sqrt(din)
        W = _uniform(k1, (dout, din), bnd)                  # torch (out, in) layout
        bias = _uniform(k2, (dout,), bnd)
        dout_pad = max(128, -(-dout // 128) * 128)
        Wt = jnp.zeros((in_pad, dout_pad), jnp.float32).at[:din, :dout].set(W.T)
        bp = jnp.zeros((dout_pad,), jnp.float32).at[:dout].set(bias)
        fc.append((Wt.astype(jnp.bfloat16),                 # (in_pad, out_pad) bf16
                   bp[None, :].astype(jnp.float32)))        # (1, out_pad) f32
        in_pad = dout_pad
    return {"gru": gru_layers, "fc": fc}, key


if __name__ == "__main__":
    B, T, INPUT, HIDDEN, LAYERS = 2, 8, 16, 128, 2

    key = jax.random.PRNGKey(0)
    params, key = init_params(key, INPUT, HIDDEN, LAYERS)
    key, xk = jax.random.split(key)
    x = jax.random.normal(xk, (B, T, INPUT), dtype=jnp.float32)

    fwd = jax.jit(functools.partial(sentiment_gru_forward, hidden=HIDDEN))
    out = jax.block_until_ready(fwd(x, params))
    assert out.shape == (T, 3), out.shape
    assert bool(jnp.all(jnp.isfinite(out)))
    print("KERNEL_OK")
</pallas_src>

<mosaic_0001>
module attributes {stable_mosaic.version = 11 : i64} {
  func.func @_fused_gru_mlp_kernel(%arg0: i32, %arg1: memref<1x8x16xf32, #tpu.memory_space<vmem>>, %arg2: memref<16x768xbf16, #tpu.memory_space<vmem>>, %arg3: memref<256x768xbf16, #tpu.memory_space<vmem>>, %arg4: memref<1x768xf32, #tpu.memory_space<vmem>>, %arg5: memref<1x256xf32, #tpu.memory_space<vmem>>, %arg6: memref<256x768xbf16, #tpu.memory_space<vmem>>, %arg7: memref<256x768xbf16, #tpu.memory_space<vmem>>, %arg8: memref<1x768xf32, #tpu.memory_space<vmem>>, %arg9: memref<1x256xf32, #tpu.memory_space<vmem>>, %arg10: memref<256x128xbf16, #tpu.memory_space<vmem>>, %arg11: memref<1x128xf32, #tpu.memory_space<vmem>>, %arg12: memref<128x128xbf16, #tpu.memory_space<vmem>>, %arg13: memref<1x128xf32, #tpu.memory_space<vmem>>, %arg14: memref<128x128xbf16, #tpu.memory_space<vmem>>, %arg15: memref<1x128xf32, #tpu.memory_space<vmem>>, %arg16: memref<128x128xbf16, #tpu.memory_space<vmem>>, %arg17: memref<1x128xf32, #tpu.memory_space<vmem>>, %arg18: memref<128x128xbf16, #tpu.memory_space<vmem>>, %arg19: memref<1x128xf32, #tpu.memory_space<vmem>>, %arg20: memref<8x128xf32, #tpu.memory_space<vmem>>, %arg21: memref<8x768xf32, #tpu.memory_space<vmem>>, %arg22: memref<8x256xf32, #tpu.memory_space<vmem>>, %arg23: memref<8x256xf32, #tpu.memory_space<vmem>>) attributes {dimension_semantics = [#tpu.dimension_semantics<arbitrary>], iteration_bounds = array<i64: 1>, scalar_prefetch = 0 : i64, scratch_operands = 3 : i64, tpu.core_type = #tpu.core_type<tc>, window_params = [{transform_indices = @transform_0, window_bounds = array<i64: 1, 8, 16>}, {pipeline_mode = #tpu.pipeline_mode<synchronous>, transform_indices = @transform_1, window_bounds = array<i64: 16, 768>}, {pipeline_mode = #tpu.pipeline_mode<synchronous>, transform_indices = @transform_2, window_bounds = array<i64: 256, 768>}, {pipeline_mode = #tpu.pipeline_mode<synchronous>, transform_indices = @transform_3, window_bounds = array<i64: 1, 768>}, {pipeline_mode = #tpu.pipeline_mode<synchronous>, transform_indices = @transform_4, window_bounds = array<i64: 1, 256>}, {pipeline_mode = #tpu.pipeline_mode<synchronous>, transform_indices = @transform_5, window_bounds = array<i64: 256, 768>}, {pipeline_mode = #tpu.pipeline_mode<synchronous>, transform_indices = @transform_6, window_bounds = array<i64: 256, 768>}, {pipeline_mode = #tpu.pipeline_mode<synchronous>, transform_indices = @transform_7, window_bounds = array<i64: 1, 768>}, {pipeline_mode = #tpu.pipeline_mode<synchronous>, transform_indices = @transform_8, window_bounds = array<i64: 1, 256>}, {pipeline_mode = #tpu.pipeline_mode<synchronous>, transform_indices = @transform_9, window_bounds = array<i64: 256, 128>}, {pipeline_mode = #tpu.pipeline_mode<synchronous>, transform_indices = @transform_10, window_bounds = array<i64: 1, 128>}, {pipeline_mode = #tpu.pipeline_mode<synchronous>, transform_indices = @transform_11, window_bounds = array<i64: 128, 128>}, {pipeline_mode = #tpu.pipeline_mode<synchronous>, transform_indices = @transform_12, window_bounds = array<i64: 1, 128>}, {pipeline_mode = #tpu.pipeline_mode<synchronous>, transform_indices = @transform_13, window_bounds = array<i64: 128, 128>}, {pipeline_mode = #tpu.pipeline_mode<synchronous>, transform_indices = @transform_14, window_bounds = array<i64: 1, 128>}, {pipeline_mode = #tpu.pipeline_mode<synchronous>, transform_indices = @transform_15, window_bounds = array<i64: 128, 128>}, {pipeline_mode = #tpu.pipeline_mode<synchronous>, transform_indices = @transform_16, window_bounds = array<i64: 1, 128>}, {pipeline_mode = #tpu.pipeline_mode<synchronous>, transform_indices = @transform_17, window_bounds = array<i64: 128, 128>}, {pipeline_mode = #tpu.pipeline_mode<synchronous>, transform_indices = @transform_18, window_bounds = array<i64: 1, 128>}, {pipeline_mode = #tpu.pipeline_mode<synchronous>, transform_indices = @transform_19, window_bounds = array<i64: 8, 128>}]} {
    %c0 = arith.constant 0 : index
    %c0_0 = arith.constant 0 : index
    %c0_1 = arith.constant 0 : index
    %0 = vector.load %arg1[%c0, %c0_0, %c0_1] : memref<1x8x16xf32, #tpu.memory_space<vmem>>, vector<1x8x16xf32>
    %1 = vector.shape_cast %0 : vector<1x8x16xf32> to vector<8x16xf32>
    %2 = arith.truncf %1 : vector<8x16xf32> to vector<8x16xbf16>
    %c0_2 = arith.constant 0 : index
    %c0_3 = arith.constant 0 : index
    %3 = vector.load %arg2[%c0_2, %c0_3] : memref<16x768xbf16, #tpu.memory_space<vmem>>, vector<16x768xbf16>
    %cst = arith.constant dense<0.000000e+00> : vector<8x768xf32>
    %4 = tpu.matmul %2, %3, %cst {dimension_numbers = #tpu.dot_dimension_numbers<[1], [0], [0], [1], [0, 0, 1, 1], [], []>} : vector<8x16xbf16>, vector<16x768xbf16>, vector<8x768xf32> -> vector<8x768xf32>
    %c0_4 = arith.constant 0 : index
    %c0_5 = arith.constant 0 : index
    %5 = vector.load %arg4[%c0_4, %c0_5] : memref<1x768xf32, #tpu.memory_space<vmem>>, vector<1x768xf32>
    %6 = vector.broadcast %5 : vector<1x768xf32> to vector<8x768xf32>
    %7 = arith.addf %4, %6 : vector<8x768xf32>
    %c0_6 = arith.constant 0 : index
    %c0_7 = arith.constant 0 : index
    %8 = vector.load %arg21[%c0_6, %c0_7] : memref<8x768xf32, #tpu.memory_space<vmem>>, vector<8x768xf32>
    tpu.vector_store %arg21[%c0_6, %c0_7], %7 {strides = array<i32>} : memref<8x768xf32, #tpu.memory_space<vmem>>, vector<8x768xf32>,
    %c0_8 = arith.constant 0 : index
    %c0_9 = arith.constant 0 : index
    %9 = vector.load %arg3[%c0_8, %c0_9] : memref<256x768xbf16, #tpu.memory_space<vmem>>, vector<256x768xbf16>
    %c0_10 = arith.constant 0 : index
    %c0_11 = arith.constant 0 : index
    %10 = vector.load %arg5[%c0_10, %c0_11] : memref<1x256xf32, #tpu.memory_space<vmem>>, vector<1x128xf32>
    %c0_12 = arith.constant 0 : index
    %c128 = arith.constant 128 : index
    %11 = vector.load %arg5[%c0_12, %c128] : memref<1x256xf32, #tpu.memory_space<vmem>>, vector<1x128xf32>
    %cst_13 = arith.constant 0.000000e+00 : f32
    %12 = vector.broadcast %cst_13 : f32 to vector<1x256xf32>
    %c0_14 = arith.constant 0 : index
    %c0_15 = arith.constant 0 : index
    %13 = vector.load %arg21[%c0_14, %c0_15] : memref<8x768xf32, #tpu.memory_space<vmem>>, vector<1x384xf32>
    %c7 = arith.constant 7 : index
    %c384 = arith.constant 384 : index
    %14 = vector.load %arg21[%c7, %c384] : memref<8x768xf32, #tpu.memory_space<vmem>>, vector<1x384xf32>
    %15 = arith.truncf %12 : vector<1x256xf32> to vector<1x256xbf16>
    %cst_16 = arith.constant dense<0.000000e+00> : vector<1x768xf32>
    %16 = tpu.matmul %15, %9, %cst_16 {dimension_numbers = #tpu.dot_dimension_numbers<[1], [0], [0], [1], [0, 0, 1, 1], [], []>} : vector<1x256xbf16>, vector<256x768xbf16>, vector<1x768xf32> -> vector<1x768xf32>
    %17 = vector.extract_strided_slice %13 {offsets = [0, 0], sizes = [1, 128], strides = [1, 1]} : vector<1x384xf32> to vector<1x128xf32>
    %18 = vector.extract_strided_slice %16 {offsets = [0, 0], sizes = [1, 128], strides = [1, 1]} : vector<1x768xf32> to vector<1x128xf32>
    %19 = arith.addf %17, %18 : vector<1x128xf32>
    %20 = arith.negf %19 : vector<1x128xf32>
    %21 = math.exp %20 : vector<1x128xf32>
    %cst_17 = arith.constant 1.000000e+00 : f32
    %22 = vector.broadcast %cst_17 : f32 to vector<1x128xf32>
    %23 = arith.addf %22, %21 : vector<1x128xf32>
    %24 = arith.divf %22, %23 : vector<1x128xf32>
    %25 = vector.extract_strided_slice %13 {offsets = [0, 128], sizes = [1, 128], strides = [1, 1]} : vector<1x384xf32> to vector<1x128xf32>
    %26 = vector.extract_strided_slice %16 {offsets = [0, 128], sizes = [1, 128], strides = [1, 1]} : vector<1x768xf32> to vector<1x128xf32>
    %27 = arith.addf %25, %26 : vector<1x128xf32>
    %28 = arith.negf %27 : vector<1x128xf32>
    %29 = math.exp %28 : vector<1x128xf32>
    %cst_18 = arith.constant 1.000000e+00 : f32
    %30 = vector.broadcast %cst_18 : f32 to vector<1x128xf32>
    %31 = arith.addf %30, %29 : vector<1x128xf32>
    %32 = arith.divf %30, %31 : vector<1x128xf32>
    %33 = vector.extract_strided_slice %13 {offsets = [0, 256], sizes = [1, 128], strides = [1, 1]} : vector<1x384xf32> to vector<1x128xf32>
    %34 = vector.extract_strided_slice %16 {offsets = [0, 256], sizes = [1, 128], strides = [1, 1]} : vector<1x768xf32> to vector<1x128xf32>
    %35 = arith.addf %34, %10 : vector<1x128xf32>
    %36 = arith.mulf %24, %35 : vector<1x128xf32>
    %37 = arith.addf %33, %36 : vector<1x128xf32>
    %38 = math.tanh %37 : vector<1x128xf32>
    %39 = vector.extract_strided_slice %14 {offsets = [0, 0], sizes = [1, 128], strides = [1, 1]} : vector<1x384xf32> to vector<1x128xf32>
    %40 = vector.extract_strided_slice %16 {offsets = [0, 384], sizes = [1, 128], strides = [1, 1]} : vector<1x768xf32> to vector<1x128xf32>
    %41 = arith.addf %39, %40 : vector<1x128xf32>
    %42 = arith.negf %41 : vector<1x128xf32>
    %43 = math.exp %42 : vector<1x128xf32>
    %cst_19 = arith.constant 1.000000e+00 : f32
    %44 = vector.broadcast %cst_19 : f32 to vector<1x128xf32>
    %45 = arith.addf %44, %43 : vector<1x128xf32>
    %46 = arith.divf %44, %45 : vector<1x128xf32>
    %47 = vector.extract_strided_slice %14 {offsets = [0, 128], sizes = [1, 128], strides = [1, 1]} : vector<1x384xf32> to vector<1x128xf32>
    %48 = vector.extract_strided_slice %16 {offsets = [0, 512], sizes = [1, 128], strides = [1, 1]} : vector<1x768xf32> to vector<1x128xf32>
    %49 = arith.addf %47, %48 : vector<1x128xf32>
    %50 = arith.negf %49 : vector<1x128xf32>
    %51 = math.exp %50 : vector<1x128xf32>
    %cst_20 = arith.constant 1.000000e+00 : f32
    %52 = vector.broadcast %cst_20 : f32 to vector<1x128xf32>
    %53 = arith.addf %52, %51 : vector<1x128xf32>
    %54 = arith.divf %52, %53 : vector<1x128xf32>
    %55 = vector.extract_strided_slice %14 {offsets = [0, 256], sizes = [1, 128], strides = [1, 1]} : vector<1x384xf32> to vector<1x128xf32>
    %56 = vector.extract_strided_slice %16 {offsets = [0, 640], sizes = [1, 128], strides = [1, 1]} : vector<1x768xf32> to vector<1x128xf32>
    %57 = arith.addf %56, %11 : vector<1x128xf32>
    %58 = arith.mulf %46, %57 : vector<1x128xf32>
    %59 = arith.addf %55, %58 : vector<1x128xf32>
    %60 = math.tanh %59 : vector<1x128xf32>
    %cst_21 = arith.constant 1.000000e+00 : f32
    %61 = vector.broadcast %cst_21 : f32 to vector<1x128xf32>
    %62 = arith.subf %61, %32 : vector<1x128xf32>
    %63 = arith.mulf %62, %38 : vector<1x128xf32>
    %64 = vector.extract_strided_slice %12 {offsets = [0, 0], sizes = [1, 128], strides = [1, 1]} : vector<1x256xf32> to vector<1x128xf32>
    %65 = arith.mulf %32, %64 : vector<1x128xf32>
    %66 = arith.addf %63, %65 : vector<1x128xf32>
    %cst_22 = arith.constant 1.000000e+00 : f32
    %67 = vector.broadcast %cst_22 : f32 to vector<1x128xf32>
    %68 = arith.subf %67, %54 : vector<1x128xf32>
    %69 = arith.mulf %68, %60 : vector<1x128xf32>
    %70 = vector.extract_strided_slice %12 {offsets = [0, 128], sizes = [1, 128], strides = [1, 1]} : vector<1x256xf32> to vector<1x128xf32>
    %71 = arith.mulf %54, %70 : vector<1x128xf32>
    %72 = arith.addf %69, %71 : vector<1x128xf32>
    %73 = tpu.concatenate %66, %72 in 1 : vector<1x128xf32>, vector<1x128xf32> -> vector<1x256xf32>
    %c0_23 = arith.constant 0 : index
    %c0_24 = arith.constant 0 : index
    %74 = vector.load %arg22[%c0_23, %c0_24] : memref<8x256xf32, #tpu.memory_space<vmem>>, vector<1x128xf32>
    tpu.vector_store %arg22[%c0_23, %c0_24], %66 {strides = array<i32>} : memref<8x256xf32, #tpu.memory_space<vmem>>, vector<1x128xf32>,
    %c7_25 = arith.constant 7 : index
    %c128_26 = arith.constant 128 : index
    %75 = vector.load %arg22[%c7_25, %c128_26] : memref<8x256xf32, #tpu.memory_space<vmem>>, vector<1x128xf32>
    tpu.vector_store %arg22[%c7_25, %c128_26], %72 {strides = array<i32>} : memref<8x256xf32, #tpu.memory_space<vmem>>, vector<1x128xf32>,
    %c1 = arith.constant 1 : index
    %c0_27 = arith.constant 0 : index
    %76 = vector.load %arg21[%c1, %c0_27] : memref<8x768xf32, #tpu.memory_space<vmem>>, vector<1x384xf32>
    %c6 = arith.constant 6 : index
    %c384_28 = arith.constant 384 : index
    %77 = vector.load %arg21[%c6, %c384_28] : memref<8x768xf32, #tpu.memory_space<vmem>>, vector<1x384xf32>
    %78 = arith.truncf %73 : vector<1x256xf32> to vector<1x256xbf16>
    %cst_29 = arith.constant dense<0.000000e+00> : vector<1x768xf32>
    %79 = tpu.matmul %78, %9, %cst_29 {dimension_numbers = #tpu.dot_dimension_numbers<[1], [0], [0], [1], [0, 0, 1, 1], [], []>} : vector<1x256xbf16>, vector<256x768xbf16>, vector<1x768xf32> -> vector<1x768xf32>
    %80 = vector.extract_strided_slice %76 {offsets = [0, 0], sizes = [1, 128], strides = [1, 1]} : vector<1x384xf32> to vector<1x128xf32>
    %81 = vector.extract_strided_slice %79 {offsets = [0, 0], sizes = [1, 128], strides = [1, 1]} : vector<1x768xf32> to vector<1x128xf32>
    %82 = arith.addf %80, %81 : vector<1x128xf32>
    %83 = arith.negf %82 : vector<1x128xf32>
    %84 = math.exp %83 : vector<1x128xf32>
    %cst_30 = arith.constant 1.000000e+00 : f32
    %85 = vector.broadcast %cst_30 : f32 to vector<1x128xf32>
    %86 = arith.addf %85, %84 : vector<1x128xf32>
    %87 = arith.divf %85, %86 : vector<1x128xf32>
    %88 = vector.extract_strided_slice %76 {offsets = [0, 128], sizes = [1, 128], strides = [1, 1]} : vector<1x384xf32> to vector<1x128xf32>
    %89 = vector.extract_strided_slice %79 {offsets = [0, 128], sizes = [1, 128], strides = [1, 1]} : vector<1x768xf32> to vector<1x128xf32>
    %90 = arith.addf %88, %89 : vector<1x128xf32>
    %91 = arith.negf %90 : vector<1x128xf32>
    %92 = math.exp %91 : vector<1x128xf32>
    %cst_31 = arith.constant 1.000000e+00 : f32
    %93 = vector.broadcast %cst_31 : f32 to vector<1x128xf32>
    %94 = arith.addf %93, %92 : vector<1x128xf32>
    %95 = arith.divf %93, %94 : vector<1x128xf32>
    %96 = vector.extract_strided_slice %76 {offsets = [0, 256], sizes = [1, 128], strides = [1, 1]} : vector<1x384xf32> to vector<1x128xf32>
    %97 = vector.extract_strided_slice %79 {offsets = [0, 256], sizes = [1, 128], strides = [1, 1]} : vector<1x768xf32> to vector<1x128xf32>
    %98 = arith.addf %97, %10 : vector<1x128xf32>
    %99 = arith.mulf %87, %98 : vector<1x128xf32>
    %100 = arith.addf %96, %99 : vector<1x128xf32>
    %101 = math.tanh %100 : vector<1x128xf32>
    %102 = vector.extract_strided_slice %77 {offsets = [0, 0], sizes = [1, 128], strides = [1, 1]} : vector<1x384xf32> to vector<1x128xf32>
    %103 = vector.extract_strided_slice %79 {offsets = [0, 384], sizes = [1, 128], strides = [1, 1]} : vector<1x768xf32> to vector<1x128xf32>
    %104 = arith.addf %102, %103 : vector<1x128xf32>
    %105 = arith.negf %104 : vector<1x128xf32>
    %106 = math.exp %105 : vector<1x128xf32>
    %cst_32 = arith.constant 1.000000e+00 : f32
    %107 = vector.broadcast %cst_32 : f32 to vector<1x128xf32>
    %108 = arith.addf %107, %106 : vector<1x128xf32>
    %109 = arith.divf %107, %108 : vector<1x128xf32>
    %110 = vector.extract_strided_slice %77 {offsets = [0, 128], sizes = [1, 128], strides = [1, 1]} : vector<1x384xf32> to vector<1x128xf32>
    %111 = vector.extract_strided_slice %79 {offsets = [0, 512], sizes = [1, 128], strides = [1, 1]} : vector<1x768xf32> to vector<1x128xf32>
    %112 = arith.addf %110, %111 : vector<1x128xf32>
    %113 = arith.negf %112 : vector<1x128xf32>
    %114 = math.exp %113 : vector<1x128xf32>
    %cst_33 = arith.constant 1.000000e+00 : f32
    %115 = vector.broadcast %cst_33 : f32 to vector<1x128xf32>
    %116 = arith.addf %115, %114 : vector<1x128xf32>
    %117 = arith.divf %115, %116 : vector<1x128xf32>
    %118 = vector.extract_strided_slice %77 {offsets = [0, 256], sizes = [1, 128], strides = [1, 1]} : vector<1x384xf32> to vector<1x128xf32>
    %119 = vector.extract_strided_slice %79 {offsets = [0, 640], sizes = [1, 128], strides = [1, 1]} : vector<1x768xf32> to vector<1x128xf32>
    %120 = arith.addf %119, %11 : vector<1x128xf32>
    %121 = arith.mulf %109, %120 : vector<1x128xf32>
    %122 = arith.addf %118, %121 : vector<1x128xf32>
    %123 = math.tanh %122 : vector<1x128xf32>
    %cst_34 = arith.constant 1.000000e+00 : f32
    %124 = vector.broadcast %cst_34 : f32 to vector<1x128xf32>
    %125 = arith.subf %124, %95 : vector<1x128xf32>
    %126 = arith.mulf %125, %101 : vector<1x128xf32>
    %127 = vector.extract_strided_slice %73 {offsets = [0, 0], sizes = [1, 128], strides = [1, 1]} : vector<1x256xf32> to vector<1x128xf32>
    %128 = arith.mulf %95, %127 : vector<1x128xf32>
    %129 = arith.addf %126, %128 : vector<1x128xf32>
    %cst_35 = arith.constant 1.000000e+00 : f32
    %130 = vector.broadcast %cst_35 : f32 to vector<1x128xf32>
    %131 = arith.subf %130, %117 : vector<1x128xf32>
    %132 = arith.mulf %131, %123 : vector<1x128xf32>
    %133 = vector.extract_strided_slice %73 {offsets = [0, 128], sizes = [1, 128], strides = [1, 1]} : vector<1x256xf32> to vector<1x128xf32>
    %134 = arith.mulf %117, %133 : vector<1x128xf32>
    %135 = arith.addf %132, %134 : vector<1x128xf32>
    %136 = tpu.concatenate %129, %135 in 1 : vector<1x128xf32>, vector<1x128xf32> -> vector<1x256xf32>
    %c1_36 = arith.constant 1 : index
    %c0_37 = arith.constant 0 : index
    %137 = vector.load %arg22[%c1_36, %c0_37] : memref<8x256xf32, #tpu.memory_space<vmem>>, vector<1x128xf32>
    tpu.vector_store %arg22[%c1_36, %c0_37], %129 {strides = array<i32>} : memref<8x256xf32, #tpu.memory_space<vmem>>, vector<1x128xf32>,
    %c6_38 = arith.constant 6 : index
    %c128_39 = arith.constant 128 : index
    %138 = vector.load %arg22[%c6_38, %c128_39] : memref<8x256xf32, #tpu.memory_space<vmem>>, vector<1x128xf32>
    tpu.vector_store %arg22[%c6_38, %c128_39], %135 {strides = array<i32>} : memref<8x256xf32, #tpu.memory_space<vmem>>, vector<1x128xf32>,
    %c2 = arith.constant 2 : index
    %c0_40 = arith.constant 0 : index
    %139 = vector.load %arg21[%c2, %c0_40] : memref<8x768xf32, #tpu.memory_space<vmem>>, vector<1x384xf32>
    %c5 = arith.constant 5 : index
    %c384_41 = arith.constant 384 : index
    %140 = vector.load %arg21[%c5, %c384_41] : memref<8x768xf32, #tpu.memory_space<vmem>>, vector<1x384xf32>
    %141 = arith.truncf %136 : vector<1x256xf32> to vector<1x256xbf16>
    %cst_42 = arith.constant dense<0.000000e+00> : vector<1x768xf32>
    %142 = tpu.matmul %141, %9, %cst_42 {dimension_numbers = #tpu.dot_dimension_numbers<[1], [0], [0], [1], [0, 0, 1, 1], [], []>} : vector<1x256xbf16>, vector<256x768xbf16>, vector<1x768xf32> -> vector<1x768xf32>
    %143 = vector.extract_strided_slice %139 {offsets = [0, 0], sizes = [1, 128], strides = [1, 1]} : vector<1x384xf32> to vector<1x128xf32>
    %144 = vector.extract_strided_slice %142 {offsets = [0, 0], sizes = [1, 128], strides = [1, 1]} : vector<1x768xf32> to vector<1x128xf32>
    %145 = arith.addf %143, %144 : vector<1x128xf32>
    %146 = arith.negf %145 : vector<1x128xf32>
    %147 = math.exp %146 : vector<1x128xf32>
    %cst_43 = arith.constant 1.000000e+00 : f32
    %148 = vector.broadcast %cst_43 : f32 to vector<1x128xf32>
    %149 = arith.addf %148, %147 : vector<1x128xf32>
    %150 = arith.divf %148, %149 : vector<1x128xf32>
    %151 = vector.extract_strided_slice %139 {offsets = [0, 128], sizes = [1, 128], strides = [1, 1]} : vector<1x384xf32> to vector<1x128xf32>
    %152 = vector.extract_strided_slice %142 {offsets = [0, 128], sizes = [1, 128], strides = [1, 1]} : vector<1x768xf32> to vector<1x128xf32>
    %153 = arith.addf %151, %152 : vector<1x128xf32>
    %154 = arith.negf %153 : vector<1x128xf32>
    %155 = math.exp %154 : vector<1x128xf32>
    %cst_44 = arith.constant 1.000000e+00 : f32
    %156 = vector.broadcast %cst_44 : f32 to vector<1x128xf32>
    %157 = arith.addf %156, %155 : vector<1x128xf32>
    %158 = arith.divf %156, %157 : vector<1x128xf32>
    %159 = vector.extract_strided_slice %139 {offsets = [0, 256], sizes = [1, 128], strides = [1, 1]} : vector<1x384xf32> to vector<1x128xf32>
    %160 = vector.extract_strided_slice %142 {offsets = [0, 256], sizes = [1, 128], strides = [1, 1]} : vector<1x768xf32> to vector<1x128xf32>
    %161 = arith.addf %160, %10 : vector<1x128xf32>
    %162 = arith.mulf %150, %161 : vector<1x128xf32>
    %163 = arith.addf %159, %162 : vector<1x128xf32>
    %164 = math.tanh %163 : vector<1x128xf32>
    %165 = vector.extract_strided_slice %140 {offsets = [0, 0], sizes = [1, 128], strides = [1, 1]} : vector<1x384xf32> to vector<1x128xf32>
    %166 = vector.extract_strided_slice %142 {offsets = [0, 384], sizes = [1, 128], strides = [1, 1]} : vector<1x768xf32> to vector<1x128xf32>
    %167 = arith.addf %165, %166 : vector<1x128xf32>
    %168 = arith.negf %167 : vector<1x128xf32>
    %169 = math.exp %168 : vector<1x128xf32>
    %cst_45 = arith.constant 1.000000e+00 : f32
    %170 = vector.broadcast %cst_45 : f32 to vector<1x128xf32>
    %171 = arith.addf %170, %169 : vector<1x128xf32>
    %172 = arith.divf %170, %171 : vector<1x128xf32>
    %173 = vector.extract_strided_slice %140 {offsets = [0, 128], sizes = [1, 128], strides = [1, 1]} : vector<1x384xf32> to vector<1x128xf32>
    %174 = vector.extract_strided_slice %142 {offsets = [0, 512], sizes = [1, 128], strides = [1, 1]} : vector<1x768xf32> to vector<1x128xf32>
    %175 = arith.addf %173, %174 : vector<1x128xf32>
    %176 = arith.negf %175 : vector<1x128xf32>
    %177 = math.exp %176 : vector<1x128xf32>
    %cst_46 = arith.constant 1.000000e+00 : f32
    %178 = vector.broadcast %cst_46 : f32 to vector<1x128xf32>
    %179 = arith.addf %178, %177 : vector<1x128xf32>
    %180 = arith.divf %178, %179 : vector<1x128xf32>
    %181 = vector.extract_strided_slice %140 {offsets = [0, 256], sizes = [1, 128], strides = [1, 1]} : vector<1x384xf32> to vector<1x128xf32>
    %182 = vector.extract_strided_slice %142 {offsets = [0, 640], sizes = [1, 128], strides = [1, 1]} : vector<1x768xf32> to vector<1x128xf32>
    %183 = arith.addf %182, %11 : vector<1x128xf32>
    %184 = arith.mulf %172, %183 : vector<1x128xf32>
    %185 = arith.addf %181, %184 : vector<1x128xf32>
    %186 = math.tanh %185 : vector<1x128xf32>
    %cst_47 = arith.constant 1.000000e+00 : f32
    %187 = vector.broadcast %cst_47 : f32 to vector<1x128xf32>
    %188 = arith.subf %187, %158 : vector<1x128xf32>
    %189 = arith.mulf %188, %164 : vector<1x128xf32>
    %190 = vector.extract_strided_slice %136 {offsets = [0, 0], sizes = [1, 128], strides = [1, 1]} : vector<1x256xf32> to vector<1x128xf32>
    %191 = arith.mulf %158, %190 : vector<1x128xf32>
    %192 = arith.addf %189, %191 : vector<1x128xf32>
    %cst_48 = arith.constant 1.000000e+00 : f32
    %193 = vector.broadcast %cst_48 : f32 to vector<1x128xf32>
    %194 = arith.subf %193, %180 : vector<1x128xf32>
    %195 = arith.mulf %194, %186 : vector<1x128xf32>
    %196 = vector.extract_strided_slice %136 {offsets = [0, 128], sizes = [1, 128], strides = [1, 1]} : vector<1x256xf32> to vector<1x128xf32>
    %197 = arith.mulf %180, %196 : vector<1x128xf32>
    %198 = arith.addf %195, %197 : vector<1x128xf32>
    %199 = tpu.concatenate %192, %198 in 1 : vector<1x128xf32>, vector<1x128xf32> -> vector<1x256xf32>
    %c2_49 = arith.constant 2 : index
    %c0_50 = arith.constant 0 : index
    %200 = vector.load %arg22[%c2_49, %c0_50] : memref<8x256xf32, #tpu.memory_space<vmem>>, vector<1x128xf32>
    tpu.vector_store %arg22[%c2_49, %c0_50], %192 {strides = array<i32>} : memref<8x256xf32, #tpu.memory_space<vmem>>, vector<1x128xf32>,
    %c5_51 = arith.constant 5 : index
    %c128_52 = arith.constant 128 : index
    %201 = vector.load %arg22[%c5_51, %c128_52] : memref<8x256xf32, #tpu.memory_space<vmem>>, vector<1x128xf32>
    tpu.vector_store %arg22[%c5_51, %c128_52], %198 {strides = array<i32>} : memref<8x256xf32, #tpu.memory_space<vmem>>, vector<1x128xf32>,
    %c3 = arith.constant 3 : index
    %c0_53 = arith.constant 0 : index
    %202 = vector.load %arg21[%c3, %c0_53] : memref<8x768xf32, #tpu.memory_space<vmem>>, vector<1x384xf32>
    %c4 = arith.constant 4 : index
    %c384_54 = arith.constant 384 : index
    %203 = vector.load %arg21[%c4, %c384_54] : memref<8x768xf32, #tpu.memory_space<vmem>>, vector<1x384xf32>
    %204 = arith.truncf %199 : vector<1x256xf32> to vector<1x256xbf16>
    %cst_55 = arith.constant dense<0.000000e+00> : vector<1x768xf32>
    %205 = tpu.matmul %204, %9, %cst_55 {dimension_numbers = #tpu.dot_dimension_numbers<[1], [0], [0], [1], [0, 0, 1, 1], [], []>} : vector<1x256xbf16>, vector<256x768xbf16>, vector<1x768xf32> -> vector<1x768xf32>
    %206 = vector.extract_strided_slice %202 {offsets = [0, 0], sizes = [1, 128], strides = [1, 1]} : vector<1x384xf32> to vector<1x128xf32>
    %207 = vector.extract_strided_slice %205 {offsets = [0, 0], sizes = [1, 128], strides = [1, 1]} : vector<1x768xf32> to vector<1x128xf32>
    %208 = arith.addf %206, %207 : vector<1x128xf32>
    %209 = arith.negf %208 : vector<1x128xf32>
    %210 = math.exp %209 : vector<1x128xf32>
    %cst_56 = arith.constant 1.000000e+00 : f32
    %211 = vector.broadcast %cst_56 : f32 to vector<1x128xf32>
    %212 = arith.addf %211, %210 : vector<1x128xf32>
    %213 = arith.divf %211, %212 : vector<1x128xf32>
    %214 = vector.extract_strided_slice %202 {offsets = [0, 128], sizes = [1, 128], strides = [1, 1]} : vector<1x384xf32> to vector<1x128xf32>
    %215 = vector.extract_strided_slice %205 {offsets = [0, 128], sizes = [1, 128], strides = [1, 1]} : vector<1x768xf32> to vector<1x128xf32>
    %216 = arith.addf %214, %215 : vector<1x128xf32>
    %217 = arith.negf %216 : vector<1x128xf32>
    %218 = math.exp %217 : vector<1x128xf32>
    %cst_57 = arith.constant 1.000000e+00 : f32
    %219 = vector.broadcast %cst_57 : f32 to vector<1x128xf32>
    %220 = arith.addf %219, %218 : vector<1x128xf32>
    %221 = arith.divf %219, %220 : vector<1x128xf32>
    %222 = vector.extract_strided_slice %202 {offsets = [0, 256], sizes = [1, 128], strides = [1, 1]} : vector<1x384xf32> to vector<1x128xf32>
    %223 = vector.extract_strided_slice %205 {offsets = [0, 256], sizes = [1, 128], strides = [1, 1]} : vector<1x768xf32> to vector<1x128xf32>
    %224 = arith.addf %223, %10 : vector<1x128xf32>
    %225 = arith.mulf %213, %224 : vector<1x128xf32>
    %226 = arith.addf %222, %225 : vector<1x128xf32>
    %227 = math.tanh %226 : vector<1x128xf32>
    %228 = vector.extract_strided_slice %203 {offsets = [0, 0], sizes = [1, 128], strides = [1, 1]} : vector<1x384xf32> to vector<1x128xf32>
    %229 = vector.extract_strided_slice %205 {offsets = [0, 384], sizes = [1, 128], strides = [1, 1]} : vector<1x768xf32> to vector<1x128xf32>
    %230 = arith.addf %228, %229 : vector<1x128xf32>
    %231 = arith.negf %230 : vector<1x128xf32>
    %232 = math.exp %231 : vector<1x128xf32>
    %cst_58 = arith.constant 1.000000e+00 : f32
    %233 = vector.broadcast %cst_58 : f32 to vector<1x128xf32>
    %234 = arith.addf %233, %232 : vector<1x128xf32>
    %235 = arith.divf %233, %234 : vector<1x128xf32>
    %236 = vector.extract_strided_slice %203 {offsets = [0, 128], sizes = [1, 128], strides = [1, 1]} : vector<1x384xf32> to vector<1x128xf32>
    %237 = vector.extract_strided_slice %205 {offsets = [0, 512], sizes = [1, 128], strides = [1, 1]} : vector<1x768xf32> to vector<1x128xf32>
    %238 = arith.addf %236, %237 : vector<1x128xf32>
    %239 = arith.negf %238 : vector<1x128xf32>
    %240 = math.exp %239 : vector<1x128xf32>
    %cst_59 = arith.constant 1.000000e+00 : f32
    %241 = vector.broadcast %cst_59 : f32 to vector<1x128xf32>
    %242 = arith.addf %241, %240 : vector<1x128xf32>
    %243 = arith.divf %241, %242 : vector<1x128xf32>
    %244 = vector.extract_strided_slice %203 {offsets = [0, 256], sizes = [1, 128], strides = [1, 1]} : vector<1x384xf32> to vector<1x128xf32>
    %245 = vector.extract_strided_slice %205 {offsets = [0, 640], sizes = [1, 128], strides = [1, 1]} : vector<1x768xf32> to vector<1x128xf32>
    %246 = arith.addf %245, %11 : vector<1x128xf32>
    %247 = arith.mulf %235, %246 : vector<1x128xf32>
    %248 = arith.addf %244, %247 : vector<1x128xf32>
    %249 = math.tanh %248 : vector<1x128xf32>
    %cst_60 = arith.constant 1.000000e+00 : f32
    %250 = vector.broadcast %cst_60 : f32 to vector<1x128xf32>
    %251 = arith.subf %250, %221 : vector<1x128xf32>
    %252 = arith.mulf %251, %227 : vector<1x128xf32>
    %253 = vector.extract_strided_slice %199 {offsets = [0, 0], sizes = [1, 128], strides = [1, 1]} : vector<1x256xf32> to vector<1x128xf32>
    %254 = arith.mulf %221, %253 : vector<1x128xf32>
    %255 = arith.addf %252, %254 : vector<1x128xf32>
    %cst_61 = arith.constant 1.000000e+00 : f32
    %256 = vector.broadcast %cst_61 : f32 to vector<1x128xf32>
    %257 = arith.subf %256, %243 : vector<1x128xf32>
    %258 = arith.mulf %257, %249 : vector<1x128xf32>
    %259 = vector.extract_strided_slice %199 {offsets = [0, 128], sizes = [1, 128], strides = [1, 1]} : vector<1x256xf32> to vector<1x128xf32>
    %260 = arith.mulf %243, %259 : vector<1x128xf32>
    %261 = arith.addf %258, %260 : vector<1x128xf32>
    %262 = tpu.concatenate %255, %261 in 1 : vector<1x128xf32>, vector<1x128xf32> -> vector<1x256xf32>
    %c3_62 = arith.constant 3 : index
    %c0_63 = arith.constant 0 : index
    %263 = vector.load %arg22[%c3_62, %c0_63] : memref<8x256xf32, #tpu.memory_space<vmem>>, vector<1x128xf32>
    tpu.vector_store %arg22[%c3_62, %c0_63], %255 {strides = array<i32>} : memref<8x256xf32, #tpu.memory_space<vmem>>, vector<1x128xf32>,
    %c4_64 = arith.constant 4 : index
    %c128_65 = arith.constant 128 : index
    %264 = vector.load %arg22[%c4_64, %c128_65] : memref<8x256xf32, #tpu.memory_space<vmem>>, vector<1x128xf32>
    tpu.vector_store %arg22[%c4_64, %c128_65], %261 {strides = array<i32>} : memref<8x256xf32, #tpu.memory_space<vmem>>, vector<1x128xf32>,
    %c4_66 = arith.constant 4 : index
    %c0_67 = arith.constant 0 : index
    %265 = vector.load %arg21[%c4_66, %c0_67] : memref<8x768xf32, #tpu.memory_space<vmem>>, vector<1x384xf32>
    %c3_68 = arith.constant 3 : index
    %c384_69 = arith.constant 384 : index
    %266 = vector.load %arg21[%c3_68, %c384_69] : memref<8x768xf32, #tpu.memory_space<vmem>>, vector<1x384xf32>
    %267 = arith.truncf %262 : vector<1x256xf32> to vector<1x256xbf16>
    %cst_70 = arith.constant dense<0.000000e+00> : vector<1x768xf32>
    %268 = tpu.matmul %267, %9, %cst_70 {dimension_numbers = #tpu.dot_dimension_numbers<[1], [0], [0], [1], [0, 0, 1, 1], [], []>} : vector<1x256xbf16>, vector<256x768xbf16>, vector<1x768xf32> -> vector<1x768xf32>
    %269 = vector.extract_strided_slice %265 {offsets = [0, 0], sizes = [1, 128], strides = [1, 1]} : vector<1x384xf32> to vector<1x128xf32>
    %270 = vector.extract_strided_slice %268 {offsets = [0, 0], sizes = [1, 128], strides = [1, 1]} : vector<1x768xf32> to vector<1x128xf32>
    %271 = arith.addf %269, %270 : vector<1x128xf32>
    %272 = arith.negf %271 : vector<1x128xf32>
    %273 = math.exp %272 : vector<1x128xf32>
    %cst_71 = arith.constant 1.000000e+00 : f32
    %274 = vector.broadcast %cst_71 : f32 to vector<1x128xf32>
    %275 = arith.addf %274, %273 : vector<1x128xf32>
    %276 = arith.divf %274, %275 : vector<1x128xf32>
    %277 = vector.extract_strided_slice %265 {offsets = [0, 128], sizes = [1, 128], strides = [1, 1]} : vector<1x384xf32> to vector<1x128xf32>
    %278 = vector.extract_strided_slice %268 {offsets = [0, 128], sizes = [1, 128], strides = [1, 1]} : vector<1x768xf32> to vector<1x128xf32>
    %279 = arith.addf %277, %278 : vector<1x128xf32>
    %280 = arith.negf %279 : vector<1x128xf32>
    %281 = math.exp %280 : vector<1x128xf32>
    %cst_72 = arith.constant 1.000000e+00 : f32
    %282 = vector.broadcast %cst_72 : f32 to vector<1x128xf32>
    %283 = arith.addf %282, %281 : vector<1x128xf32>
    %284 = arith.divf %282, %283 : vector<1x128xf32>
    %285 = vector.extract_strided_slice %265 {offsets = [0, 256], sizes = [1, 128], strides = [1, 1]} : vector<1x384xf32> to vector<1x128xf32>
    %286 = vector.extract_strided_slice %268 {offsets = [0, 256], sizes = [1, 128], strides = [1, 1]} : vector<1x768xf32> to vector<1x128xf32>
    %287 = arith.addf %286, %10 : vector<1x128xf32>
    %288 = arith.mulf %276, %287 : vector<1x128xf32>
    %289 = arith.addf %285, %288 : vector<1x128xf32>
    %290 = math.tanh %289 : vector<1x128xf32>
    %291 = vector.extract_strided_slice %266 {offsets = [0, 0], sizes = [1, 128], strides = [1, 1]} : vector<1x384xf32> to vector<1x128xf32>
    %292 = vector.extract_strided_slice %268 {offsets = [0, 384], sizes = [1, 128], strides = [1, 1]} : vector<1x768xf32> to vector<1x128xf32>
    %293 = arith.addf %291, %292 : vector<1x128xf32>
    %294 = arith.negf %293 : vector<1x128xf32>
    %295 = math.exp %294 : vector<1x128xf32>
    %cst_73 = arith.constant 1.000000e+00 : f32
    %296 = vector.broadcast %cst_73 : f32 to vector<1x128xf32>
    %297 = arith.addf %296, %295 : vector<1x128xf32>
    %298 = arith.divf %296, %297 : vector<1x128xf32>
    %299 = vector.extract_strided_slice %266 {offsets = [0, 128], sizes = [1, 128], strides = [1, 1]} : vector<1x384xf32> to vector<1x128xf32>
    %300 = vector.extract_strided_slice %268 {offsets = [0, 512], sizes = [1, 128], strides = [1, 1]} : vector<1x768xf32> to vector<1x128xf32>
    %301 = arith.addf %299, %300 : vector<1x128xf32>
    %302 = arith.negf %301 : vector<1x128xf32>
    %303 = math.exp %302 : vector<1x128xf32>
    %cst_74 = arith.constant 1.000000e+00 : f32
    %304 = vector.broadcast %cst_74 : f32 to vector<1x128xf32>
    %305 = arith.addf %304, %303 : vector<1x128xf32>
    %306 = arith.divf %304, %305 : vector<1x128xf32>
    %307 = vector.extract_strided_slice %266 {offsets = [0, 256], sizes = [1, 128], strides = [1, 1]} : vector<1x384xf32> to vector<1x128xf32>
    %308 = vector.extract_strided_slice %268 {offsets = [0, 640], sizes = [1, 128], strides = [1, 1]} : vector<1x768xf32> to vector<1x128xf32>
    %309 = arith.addf %308, %11 : vector<1x128xf32>
    %310 = arith.mulf %298, %309 : vector<1x128xf32>
    %311 = arith.addf %307, %310 : vector<1x128xf32>
    %312 = math.tanh %311 : vector<1x128xf32>
    %cst_75 = arith.constant 1.000000e+00 : f32
    %313 = vector.broadcast %cst_75 : f32 to vector<1x128xf32>
    %314 = arith.subf %313, %284 : vector<1x128xf32>
    %315 = arith.mulf %314, %290 : vector<1x128xf32>
    %316 = vector.extract_strided_slice %262 {offsets = [0, 0], sizes = [1, 128], strides = [1, 1]} : vector<1x256xf32> to vector<1x128xf32>
    %317 = arith.mulf %284, %316 : vector<1x128xf32>
    %318 = arith.addf %315, %317 : vector<1x128xf32>
    %cst_76 = arith.constant 1.000000e+00 : f32
    %319 = vector.broadcast %cst_76 : f32 to vector<1x128xf32>
    %320 = arith.subf %319, %306 : vector<1x128xf32>
    %321 = arith.mulf %320, %312 : vector<1x128xf32>
    %322 = vector.extract_strided_slice %262 {offsets = [0, 128], sizes = [1, 128], strides = [1, 1]} : vector<1x256xf32> to vector<1x128xf32>
    %323 = arith.mulf %306, %322 : vector<1x128xf32>
    %324 = arith.addf %321, %323 : vector<1x128xf32>
    %325 = tpu.concatenate %318, %324 in 1 : vector<1x128xf32>, vector<1x128xf32> -> vector<1x256xf32>
    %c4_77 = arith.constant 4 : index
    %c0_78 = arith.constant 0 : index
    %326 = vector.load %arg22[%c4_77, %c0_78] : memref<8x256xf32, #tpu.memory_space<vmem>>, vector<1x128xf32>
    tpu.vector_store %arg22[%c4_77, %c0_78], %318 {strides = array<i32>} : memref<8x256xf32, #tpu.memory_space<vmem>>, vector<1x128xf32>,
    %c3_79 = arith.constant 3 : index
    %c128_80 = arith.constant 128 : index
    %327 = vector.load %arg22[%c3_79, %c128_80] : memref<8x256xf32, #tpu.memory_space<vmem>>, vector<1x128xf32>
    tpu.vector_store %arg22[%c3_79, %c128_80], %324 {strides = array<i32>} : memref<8x256xf32, #tpu.memory_space<vmem>>, vector<1x128xf32>,
    %c5_81 = arith.constant 5 : index
    %c0_82 = arith.constant 0 : index
    %328 = vector.load %arg21[%c5_81, %c0_82] : memref<8x768xf32, #tpu.memory_space<vmem>>, vector<1x384xf32>
    %c2_83 = arith.constant 2 : index
    %c384_84 = arith.constant 384 : index
    %329 = vector.load %arg21[%c2_83, %c384_84] : memref<8x768xf32, #tpu.memory_space<vmem>>, vector<1x384xf32>
    %330 = arith.truncf %325 : vector<1x256xf32> to vector<1x256xbf16>
    %cst_85 = arith.constant dense<0.000000e+00> : vector<1x768xf32>
    %331 = tpu.matmul %330, %9, %cst_85 {dimension_numbers = #tpu.dot_dimension_numbers<[1], [0], [0], [1], [0, 0, 1, 1], [], []>} : vector<1x256xbf16>, vector<256x768xbf16>, vector<1x768xf32> -> vector<1x768xf32>
    %332 = vector.extract_strided_slice %328 {offsets = [0, 0], sizes = [1, 128], strides = [1, 1]} : vector<1x384xf32> to vector<1x128xf32>
    %333 = vector.extract_strided_slice %331 {offsets = [0, 0], sizes = [1, 128], strides = [1, 1]} : vector<1x768xf32> to vector<1x128xf32>
    %334 = arith.addf %332, %333 : vector<1x128xf32>
    %335 = arith.negf %334 : vector<1x128xf32>
    %336 = math.exp %335 : vector<1x128xf32>
    %cst_86 = arith.constant 1.000000e+00 : f32
    %337 = vector.broadcast %cst_86 : f32 to vector<1x128xf32>
    %338 = arith.addf %337, %336 : vector<1x128xf32>
    %339 = arith.divf %337, %338 : vector<1x128xf32>
    %340 = vector.extract_strided_slice %328 {offsets = [0, 128], sizes = [1, 128], strides = [1, 1]} : vector<1x384xf32> to vector<1x128xf32>
    %341 = vector.extract_strided_slice %331 {offsets = [0, 128], sizes = [1, 128], strides = [1, 1]} : vector<1x768xf32> to vector<1x128xf32>
    %342 = arith.addf %340, %341 : vector<1x128xf32>
    %343 = arith.negf %342 : vector<1x128xf32>
    %344 = math.exp %343 : vector<1x128xf32>
    %cst_87 = arith.constant 1.000000e+00 : f32
    %345 = vector.broadcast %cst_87 : f32 to vector<1x128xf32>
    %346 = arith.addf %345, %344 : vector<1x128xf32>
    %347 = arith.divf %345, %346 : vector<1x128xf32>
    %348 = vector.extract_strided_slice %328 {offsets = [0, 256], sizes = [1, 128], strides = [1, 1]} : vector<1x384xf32> to vector<1x128xf32>
    %349 = vector.extract_strided_slice %331 {offsets = [0, 256], sizes = [1, 128], strides = [1, 1]} : vector<1x768xf32> to vector<1x128xf32>
    %350 = arith.addf %349, %10 : vector<1x128xf32>
    %351 = arith.mulf %339, %350 : vector<1x128xf32>
    %352 = arith.addf %348, %351 : vector<1x128xf32>
    %353 = math.tanh %352 : vector<1x128xf32>
    %354 = vector.extract_strided_slice %329 {offsets = [0, 0], sizes = [1, 128], strides = [1, 1]} : vector<1x384xf32> to vector<1x128xf32>
    %355 = vector.extract_strided_slice %331 {offsets = [0, 384], sizes = [1, 128], strides = [1, 1]} : vector<1x768xf32> to vector<1x128xf32>
    %356 = arith.addf %354, %355 : vector<1x128xf32>
    %357 = arith.negf %356 : vector<1x128xf32>
    %358 = math.exp %357 : vector<1x128xf32>
    %cst_88 = arith.constant 1.000000e+00 : f32
    %359 = vector.broadcast %cst_88 : f32 to vector<1x128xf32>
    %360 = arith.addf %359, %358 : vector<1x128xf32>
    %361 = arith.divf %359, %360 : vector<1x128xf32>
    %362 = vector.extract_strided_slice %329 {offsets = [0, 128], sizes = [1, 128], strides = [1, 1]} : vector<1x384xf32> to vector<1x128xf32>
    %363 = vector.extract_strided_slice %331 {offsets = [0, 512], sizes = [1, 128], strides = [1, 1]} : vector<1x768xf32> to vector<1x128xf32>
    %364 = arith.addf %362, %363 : vector<1x128xf32>
    %365 = arith.negf %364 : vector<1x128xf32>
    %366 = math.exp %365 : vector<1x128xf32>
    %cst_89 = arith.constant 1.000000e+00 : f32
    %367 = vector.broadcast %cst_89 : f32 to vector<1x128xf32>
    %368 = arith.addf %367, %366 : vector<1x128xf32>
    %369 = arith.divf %367, %368 : vector<1x128xf32>
    %370 = vector.extract_strided_slice %329 {offsets = [0, 256], sizes = [1, 128], strides = [1, 1]} : vector<1x384xf32> to vector<1x128xf32>
    %371 = vector.extract_strided_slice %331 {offsets = [0, 640], sizes = [1, 128], strides = [1, 1]} : vector<1x768xf32> to vector<1x128xf32>
    %372 = arith.addf %371, %11 : vector<1x128xf32>
    %373 = arith.mulf %361, %372 : vector<1x128xf32>
    %374 = arith.addf %370, %373 : vector<1x128xf32>
    %375 = math.tanh %374 : vector<1x128xf32>
    %cst_90 = arith.constant 1.000000e+00 : f32
    %376 = vector.broadcast %cst_90 : f32 to vector<1x128xf32>
    %377 = arith.subf %376, %347 : vector<1x128xf32>
    %378 = arith.mulf %377, %353 : vector<1x128xf32>
    %379 = vector.extract_strided_slice %325 {offsets = [0, 0], sizes = [1, 128], strides = [1, 1]} : vector<1x256xf32> to vector<1x128xf32>
    %380 = arith.mulf %347, %379 : vector<1x128xf32>
    %381 = arith.addf %378, %380 : vector<1x128xf32>
    %cst_91 = arith.constant 1.000000e+00 : f32
    %382 = vector.broadcast %cst_91 : f32 to vector<1x128xf32>
    %383 = arith.subf %382, %369 : vector<1x128xf32>
    %384 = arith.mulf %383, %375 : vector<1x128xf32>
    %385 = vector.extract_strided_slice %325 {offsets = [0, 128], sizes = [1, 128], strides = [1, 1]} : vector<1x256xf32> to vector<1x128xf32>
    %386 = arith.mulf %369, %385 : vector<1x128xf32>
    %387 = arith.addf %384, %386 : vector<1x128xf32>
    %388 = tpu.concatenate %381, %387 in 1 : vector<1x128xf32>, vector<1x128xf32> -> vector<1x256xf32>
    %c5_92 = arith.constant 5 : index
    %c0_93 = arith.constant 0 : index
    %389 = vector.load %arg22[%c5_92, %c0_93] : memref<8x256xf32, #tpu.memory_space<vmem>>, vector<1x128xf32>
    tpu.vector_store %arg22[%c5_92, %c0_93], %381 {strides = array<i32>} : memref<8x256xf32, #tpu.memory_space<vmem>>, vector<1x128xf32>,
    %c2_94 = arith.constant 2 : index
    %c128_95 = arith.constant 128 : index
    %390 = vector.load %arg22[%c2_94, %c128_95] : memref<8x256xf32, #tpu.memory_space<vmem>>, vector<1x128xf32>
    tpu.vector_store %arg22[%c2_94, %c128_95], %387 {strides = array<i32>} : memref<8x256xf32, #tpu.memory_space<vmem>>, vector<1x128xf32>,
    %c6_96 = arith.constant 6 : index
    %c0_97 = arith.constant 0 : index
    %391 = vector.load %arg21[%c6_96, %c0_97] : memref<8x768xf32, #tpu.memory_space<vmem>>, vector<1x384xf32>
    %c1_98 = arith.constant 1 : index
    %c384_99 = arith.constant 384 : index
    %392 = vector.load %arg21[%c1_98, %c384_99] : memref<8x768xf32, #tpu.memory_space<vmem>>, vector<1x384xf32>
    %393 = arith.truncf %388 : vector<1x256xf32> to vector<1x256xbf16>
    %cst_100 = arith.constant dense<0.000000e+00> : vector<1x768xf32>
    %394 = tpu.matmul %393, %9, %cst_100 {dimension_numbers = #tpu.dot_dimension_numbers<[1], [0], [0], [1], [0, 0, 1, 1], [], []>} : vector<1x256xbf16>, vector<256x768xbf16>, vector<1x768xf32> -> vector<1x768xf32>
    %395 = vector.extract_strided_slice %391 {offsets = [0, 0], sizes = [1, 128], strides = [1, 1]} : vector<1x384xf32> to vector<1x128xf32>
    %396 = vector.extract_strided_slice %394 {offsets = [0, 0], sizes = [1, 128], strides = [1, 1]} : vector<1x768xf32> to vector<1x128xf32>
    %397 = arith.addf %395, %396 : vector<1x128xf32>
    %398 = arith.negf %397 : vector<1x128xf32>
    %399 = math.exp %398 : vector<1x128xf32>
    %cst_101 = arith.constant 1.000000e+00 : f32
    %400 = vector.broadcast %cst_101 : f32 to vector<1x128xf32>
    %401 = arith.addf %400, %399 : vector<1x128xf32>
    %402 = arith.divf %400, %401 : vector<1x128xf32>
    %403 = vector.extract_strided_slice %391 {offsets = [0, 128], sizes = [1, 128], strides = [1, 1]} : vector<1x384xf32> to vector<1x128xf32>
    %404 = vector.extract_strided_slice %394 {offsets = [0, 128], sizes = [1, 128], strides = [1, 1]} : vector<1x768xf32> to vector<1x128xf32>
    %405 = arith.addf %403, %404 : vector<1x128xf32>
    %406 = arith.negf %405 : vector<1x128xf32>
    %407 = math.exp %406 : vector<1x128xf32>
    %cst_102 = arith.constant 1.000000e+00 : f32
    %408 = vector.broadcast %cst_102 : f32 to vector<1x128xf32>
    %409 = arith.addf %408, %407 : vector<1x128xf32>
    %410 = arith.divf %408, %409 : vector<1x128xf32>
    %411 = vector.extract_strided_slice %391 {offsets = [0, 256], sizes = [1, 128], strides = [1, 1]} : vector<1x384xf32> to vector<1x128xf32>
    %412 = vector.extract_strided_slice %394 {offsets = [0, 256], sizes = [1, 128], strides = [1, 1]} : vector<1x768xf32> to vector<1x128xf32>
    %413 = arith.addf %412, %10 : vector<1x128xf32>
    %414 = arith.mulf %402, %413 : vector<1x128xf32>
    %415 = arith.addf %411, %414 : vector<1x128xf32>
    %416 = math.tanh %415 : vector<1x128xf32>
    %417 = vector.extract_strided_slice %392 {offsets = [0, 0], sizes = [1, 128], strides = [1, 1]} : vector<1x384xf32> to vector<1x128xf32>
    %418 = vector.extract_strided_slice %394 {offsets = [0, 384], sizes = [1, 128], strides = [1, 1]} : vector<1x768xf32> to vector<1x128xf32>
    %419 = arith.addf %417, %418 : vector<1x128xf32>
    %420 = arith.negf %419 : vector<1x128xf32>
    %421 = math.exp %420 : vector<1x128xf32>
    %cst_103 = arith.constant 1.000000e+00 : f32
    %422 = vector.broadcast %cst_103 : f32 to vector<1x128xf32>
    %423 = arith.addf %422, %421 : vector<1x128xf32>
    %424 = arith.divf %422, %423 : vector<1x128xf32>
    %425 = vector.extract_strided_slice %392 {offsets = [0, 128], sizes = [1, 128], strides = [1, 1]} : vector<1x384xf32> to vector<1x128xf32>
    %426 = vector.extract_strided_slice %394 {offsets = [0, 512], sizes = [1, 128], strides = [1, 1]} : vector<1x768xf32> to vector<1x128xf32>
    %427 = arith.addf %425, %426 : vector<1x128xf32>
    %428 = arith.negf %427 : vector<1x128xf32>
    %429 = math.exp %428 : vector<1x128xf32>
    %cst_104 = arith.constant 1.000000e+00 : f32
    %430 = vector.broadcast %cst_104 : f32 to vector<1x128xf32>
    %431 = arith.addf %430, %429 : vector<1x128xf32>
    %432 = arith.divf %430, %431 : vector<1x128xf32>
    %433 = vector.extract_strided_slice %392 {offsets = [0, 256], sizes = [1, 128], strides = [1, 1]} : vector<1x384xf32> to vector<1x128xf32>
    %434 = vector.extract_strided_slice %394 {offsets = [0, 640], sizes = [1, 128], strides = [1, 1]} : vector<1x768xf32> to vector<1x128xf32>
    %435 = arith.addf %434, %11 : vector<1x128xf32>
    %436 = arith.mulf %424, %435 : vector<1x128xf32>
    %437 = arith.addf %433, %436 : vector<1x128xf32>
    %438 = math.tanh %437 : vector<1x128xf32>
    %cst_105 = arith.constant 1.000000e+00 : f32
    %439 = vector.broadcast %cst_105 : f32 to vector<1x128xf32>
    %440 = arith.subf %439, %410 : vector<1x128xf32>
    %441 = arith.mulf %440, %416 : vector<1x128xf32>
    %442 = vector.extract_strided_slice %388 {offsets = [0, 0], sizes = [1, 128], strides = [1, 1]} : vector<1x256xf32> to vector<1x128xf32>
    %443 = arith.mulf %410, %442 : vector<1x128xf32>
    %444 = arith.addf %441, %443 : vector<1x128xf32>
    %cst_106 = arith.constant 1.000000e+00 : f32
    %445 = vector.broadcast %cst_106 : f32 to vector<1x128xf32>
    %446 = arith.subf %445, %432 : vector<1x128xf32>
    %447 = arith.mulf %446, %438 : vector<1x128xf32>
    %448 = vector.extract_strided_slice %388 {offsets = [0, 128], sizes = [1, 128], strides = [1, 1]} : vector<1x256xf32> to vector<1x128xf32>
    %449 = arith.mulf %432, %448 : vector<1x128xf32>
    %450 = arith.addf %447, %449 : vector<1x128xf32>
    %451 = tpu.concatenate %444, %450 in 1 : vector<1x128xf32>, vector<1x128xf32> -> vector<1x256xf32>
    %c6_107 = arith.constant 6 : index
    %c0_108 = arith.constant 0 : index
    %452 = vector.load %arg22[%c6_107, %c0_108] : memref<8x256xf32, #tpu.memory_space<vmem>>, vector<1x128xf32>
    tpu.vector_store %arg22[%c6_107, %c0_108], %444 {strides = array<i32>} : memref<8x256xf32, #tpu.memory_space<vmem>>, vector<1x128xf32>,
    %c1_109 = arith.constant 1 : index
    %c128_110 = arith.constant 128 : index
    %453 = vector.load %arg22[%c1_109, %c128_110] : memref<8x256xf32, #tpu.memory_space<vmem>>, vector<1x128xf32>
    tpu.vector_store %arg22[%c1_109, %c128_110], %450 {strides = array<i32>} : memref<8x256xf32, #tpu.memory_space<vmem>>, vector<1x128xf32>,
    %c7_111 = arith.constant 7 : index
    %c0_112 = arith.constant 0 : index
    %454 = vector.load %arg21[%c7_111, %c0_112] : memref<8x768xf32, #tpu.memory_space<vmem>>, vector<1x384xf32>
    %c0_113 = arith.constant 0 : index
    %c384_114 = arith.constant 384 : index
    %455 = vector.load %arg21[%c0_113, %c384_114] : memref<8x768xf32, #tpu.memory_space<vmem>>, vector<1x384xf32>
    %456 = arith.truncf %451 : vector<1x256xf32> to vector<1x256xbf16>
    %cst_115 = arith.constant dense<0.000000e+00> : vector<1x768xf32>
    %457 = tpu.matmul %456, %9, %cst_115 {dimension_numbers = #tpu.dot_dimension_numbers<[1], [0], [0], [1], [0, 0, 1, 1], [], []>} : vector<1x256xbf16>, vector<256x768xbf16>, vector<1x768xf32> -> vector<1x768xf32>
    %458 = vector.extract_strided_slice %454 {offsets = [0, 0], sizes = [1, 128], strides = [1, 1]} : vector<1x384xf32> to vector<1x128xf32>
    %459 = vector.extract_strided_slice %457 {offsets = [0, 0], sizes = [1, 128], strides = [1, 1]} : vector<1x768xf32> to vector<1x128xf32>
    %460 = arith.addf %458, %459 : vector<1x128xf32>
    %461 = arith.negf %460 : vector<1x128xf32>
    %462 = math.exp %461 : vector<1x128xf32>
    %cst_116 = arith.constant 1.000000e+00 : f32
    %463 = vector.broadcast %cst_116 : f32 to vector<1x128xf32>
    %464 = arith.addf %463, %462 : vector<1x128xf32>
    %465 = arith.divf %463, %464 : vector<1x128xf32>
    %466 = vector.extract_strided_slice %454 {offsets = [0, 128], sizes = [1, 128], strides = [1, 1]} : vector<1x384xf32> to vector<1x128xf32>
    %467 = vector.extract_strided_slice %457 {offsets = [0, 128], sizes = [1, 128], strides = [1, 1]} : vector<1x768xf32> to vector<1x128xf32>
    %468 = arith.addf %466, %467 : vector<1x128xf32>
    %469 = arith.negf %468 : vector<1x128xf32>
    %470 = math.exp %469 : vector<1x128xf32>
    %cst_117 = arith.constant 1.000000e+00 : f32
    %471 = vector.broadcast %cst_117 : f32 to vector<1x128xf32>
    %472 = arith.addf %471, %470 : vector<1x128xf32>
    %473 = arith.divf %471, %472 : vector<1x128xf32>
    %474 = vector.extract_strided_slice %454 {offsets = [0, 256], sizes = [1, 128], strides = [1, 1]} : vector<1x384xf32> to vector<1x128xf32>
    %475 = vector.extract_strided_slice %457 {offsets = [0, 256], sizes = [1, 128], strides = [1, 1]} : vector<1x768xf32> to vector<1x128xf32>
    %476 = arith.addf %475, %10 : vector<1x128xf32>
    %477 = arith.mulf %465, %476 : vector<1x128xf32>
    %478 = arith.addf %474, %477 : vector<1x128xf32>
    %479 = math.tanh %478 : vector<1x128xf32>
    %480 = vector.extract_strided_slice %455 {offsets = [0, 0], sizes = [1, 128], strides = [1, 1]} : vector<1x384xf32> to vector<1x128xf32>
    %481 = vector.extract_strided_slice %457 {offsets = [0, 384], sizes = [1, 128], strides = [1, 1]} : vector<1x768xf32> to vector<1x128xf32>
    %482 = arith.addf %480, %481 : vector<1x128xf32>
    %483 = arith.negf %482 : vector<1x128xf32>
    %484 = math.exp %483 : vector<1x128xf32>
    %cst_118 = arith.constant 1.000000e+00 : f32
    %485 = vector.broadcast %cst_118 : f32 to vector<1x128xf32>
    %486 = arith.addf %485, %484 : vector<1x128xf32>
    %487 = arith.divf %485, %486 : vector<1x128xf32>
    %488 = vector.extract_strided_slice %455 {offsets = [0, 128], sizes = [1, 128], strides = [1, 1]} : vector<1x384xf32> to vector<1x128xf32>
    %489 = vector.extract_strided_slice %457 {offsets = [0, 512], sizes = [1, 128], strides = [1, 1]} : vector<1x768xf32> to vector<1x128xf32>
    %490 = arith.addf %488, %489 : vector<1x128xf32>
    %491 = arith.negf %490 : vector<1x128xf32>
    %492 = math.exp %491 : vector<1x128xf32>
    %cst_119 = arith.constant 1.000000e+00 : f32
    %493 = vector.broadcast %cst_119 : f32 to vector<1x128xf32>
    %494 = arith.addf %493, %492 : vector<1x128xf32>
    %495 = arith.divf %493, %494 : vector<1x128xf32>
    %496 = vector.extract_strided_slice %455 {offsets = [0, 256], sizes = [1, 128], strides = [1, 1]} : vector<1x384xf32> to vector<1x128xf32>
    %497 = vector.extract_strided_slice %457 {offsets = [0, 640], sizes = [1, 128], strides = [1, 1]} : vector<1x768xf32> to vector<1x128xf32>
    %498 = arith.addf %497, %11 : vector<1x128xf32>
    %499 = arith.mulf %487, %498 : vector<1x128xf32>
    %500 = arith.addf %496, %499 : vector<1x128xf32>
    %501 = math.tanh %500 : vector<1x128xf32>
    %cst_120 = arith.constant 1.000000e+00 : f32
    %502 = vector.broadcast %cst_120 : f32 to vector<1x128xf32>
    %503 = arith.subf %502, %473 : vector<1x128xf32>
    %504 = arith.mulf %503, %479 : vector<1x128xf32>
    %505 = vector.extract_strided_slice %451 {offsets = [0, 0], sizes = [1, 128], strides = [1, 1]} : vector<1x256xf32> to vector<1x128xf32>
    %506 = arith.mulf %473, %505 : vector<1x128xf32>
    %507 = arith.addf %504, %506 : vector<1x128xf32>
    %cst_121 = arith.constant 1.000000e+00 : f32
    %508 = vector.broadcast %cst_121 : f32 to vector<1x128xf32>
    %509 = arith.subf %508, %495 : vector<1x128xf32>
    %510 = arith.mulf %509, %501 : vector<1x128xf32>
    %511 = vector.extract_strided_slice %451 {offsets = [0, 128], sizes = [1, 128], strides = [1, 1]} : vector<1x256xf32> to vector<1x128xf32>
    %512 = arith.mulf %495, %511 : vector<1x128xf32>
    %513 = arith.addf %510, %512 : vector<1x128xf32>
    %c7_122 = arith.constant 7 : index
    %c0_123 = arith.constant 0 : index
    %514 = vector.load %arg22[%c7_122, %c0_123] : memref<8x256xf32, #tpu.memory_space<vmem>>, vector<1x128xf32>
    tpu.vector_store %arg22[%c7_122, %c0_123], %507 {strides = array<i32>} : memref<8x256xf32, #tpu.memory_space<vmem>>, vector<1x128xf32>,
    %c0_124 = arith.constant 0 : index
    %c128_125 = arith.constant 128 : index
    %515 = vector.load %arg22[%c0_124, %c128_125] : memref<8x256xf32, #tpu.memory_space<vmem>>, vector<1x128xf32>
    tpu.vector_store %arg22[%c0_124, %c128_125], %513 {strides = array<i32>} : memref<8x256xf32, #tpu.memory_space<vmem>>, vector<1x128xf32>,
    %c0_126 = arith.constant 0 : index
    %c0_127 = arith.constant 0 : index
    %516 = vector.load %arg22[%c0_126, %c0_127] : memref<8x256xf32, #tpu.memory_space<vmem>>, vector<8x256xf32>
    %517 = arith.truncf %516 : vector<8x256xf32> to vector<8x256xbf16>
    %c0_128 = arith.constant 0 : index
    %c0_129 = arith.constant 0 : index
    %518 = vector.load %arg6[%c0_128, %c0_129] : memref<256x768xbf16, #tpu.memory_space<vmem>>, vector<256x768xbf16>
    %cst_130 = arith.constant dense<0.000000e+00> : vector<8x768xf32>
    %519 = tpu.matmul %517, %518, %cst_130 {dimension_numbers = #tpu.dot_dimension_numbers<[1], [0], [0], [1], [0, 0, 1, 1], [], []>} : vector<8x256xbf16>, vector<256x768xbf16>, vector<8x768xf32> -> vector<8x768xf32>
    %c0_131 = arith.constant 0 : index
    %c0_132 = arith.constant 0 : index
    %520 = vector.load %arg8[%c0_131, %c0_132] : memref<1x768xf32, #tpu.memory_space<vmem>>, vector<1x768xf32>
    %521 = vector.broadcast %520 : vector<1x768xf32> to vector<8x768xf32>
    %522 = arith.addf %519, %521 : vector<8x768xf32>
    %c0_133 = arith.constant 0 : index
    %c0_134 = arith.constant 0 : index
    %523 = vector.load %arg21[%c0_133, %c0_134] : memref<8x768xf32, #tpu.memory_space<vmem>>, vector<8x768xf32>
    tpu.vector_store %arg21[%c0_133, %c0_134], %522 {strides = array<i32>} : memref<8x768xf32, #tpu.memory_space<vmem>>, vector<8x768xf32>,
    %c0_135 = arith.constant 0 : index
    %c0_136 = arith.constant 0 : index
    %524 = vector.load %arg7[%c0_135, %c0_136] : memref<256x768xbf16, #tpu.memory_space<vmem>>, vector<256x768xbf16>
    %c0_137 = arith.constant 0 : index
    %c0_138 = arith.constant 0 : index
    %525 = vector.load %arg9[%c0_137, %c0_138] : memref<1x256xf32, #tpu.memory_space<vmem>>, vector<1x128xf32>
    %c0_139 = arith.constant 0 : index
    %c128_140 = arith.constant 128 : index
    %526 = vector.load %arg9[%c0_139, %c128_140] : memref<1x256xf32, #tpu.memory_space<vmem>>, vector<1x128xf32>
    %cst_141 = arith.constant 0.000000e+00 : f32
    %527 = vector.broadcast %cst_141 : f32 to vector<1x256xf32>
    %c0_142 = arith.constant 0 : index
    %c0_143 = arith.constant 0 : index
    %528 = vector.load %arg21[%c0_142, %c0_143] : memref<8x768xf32, #tpu.memory_space<vmem>>, vector<1x384xf32>
    %c7_144 = arith.constant 7 : index
    %c384_145 = arith.constant 384 : index
    %529 = vector.load %arg21[%c7_144, %c384_145] : memref<8x768xf32, #tpu.memory_space<vmem>>, vector<1x384xf32>
    %530 = arith.truncf %527 : vector<1x256xf32> to vector<1x256xbf16>
    %cst_146 = arith.constant dense<0.000000e+00> : vector<1x768xf32>
    %531 = tpu.matmul %530, %524, %cst_146 {dimension_numbers = #tpu.dot_dimension_numbers<[1], [0], [0], [1], [0, 0, 1, 1], [], []>} : vector<1x256xbf16>, vector<256x768xbf16>, vector<1x768xf32> -> vector<1x768xf32>
    %532 = vector.extract_strided_slice %528 {offsets = [0, 0], sizes = [1, 128], strides = [1, 1]} : vector<1x384xf32> to vector<1x128xf32>
    %533 = vector.extract_strided_slice %531 {offsets = [0, 0], sizes = [1, 128], strides = [1, 1]} : vector<1x768xf32> to vector<1x128xf32>
    %534 = arith.addf %532, %533 : vector<1x128xf32>
    %535 = arith.negf %534 : vector<1x128xf32>
    %536 = math.exp %535 : vector<1x128xf32>
    %cst_147 = arith.constant 1.000000e+00 : f32
    %537 = vector.broadcast %cst_147 : f32 to vector<1x128xf32>
    %538 = arith.addf %537, %536 : vector<1x128xf32>
    %539 = arith.divf %537, %538 : vector<1x128xf32>
    %540 = vector.extract_strided_slice %528 {offsets = [0, 128], sizes = [1, 128], strides = [1, 1]} : vector<1x384xf32> to vector<1x128xf32>
    %541 = vector.extract_strided_slice %531 {offsets = [0, 128], sizes = [1, 128], strides = [1, 1]} : vector<1x768xf32> to vector<1x128xf32>
    %542 = arith.addf %540, %541 : vector<1x128xf32>
    %543 = arith.negf %542 : vector<1x128xf32>
    %544 = math.exp %543 : vector<1x128xf32>
    %cst_148 = arith.constant 1.000000e+00 : f32
    %545 = vector.broadcast %cst_148 : f32 to vector<1x128xf32>
    %546 = arith.addf %545, %544 : vector<1x128xf32>
    %547 = arith.divf %545, %546 : vector<1x128xf32>
    %548 = vector.extract_strided_slice %528 {offsets = [0, 256], sizes = [1, 128], strides = [1, 1]} : vector<1x384xf32> to vector<1x128xf32>
    %549 = vector.extract_strided_slice %531 {offsets = [0, 256], sizes = [1, 128], strides = [1, 1]} : vector<1x768xf32> to vector<1x128xf32>
    %550 = arith.addf %549, %525 : vector<1x128xf32>
    %551 = arith.mulf %539, %550 : vector<1x128xf32>
    %552 = arith.addf %548, %551 : vector<1x128xf32>
    %553 = math.tanh %552 : vector<1x128xf32>
    %554 = vector.extract_strided_slice %529 {offsets = [0, 0], sizes = [1, 128], strides = [1, 1]} : vector<1x384xf32> to vector<1x128xf32>
    %555 = vector.extract_strided_slice %531 {offsets = [0, 384], sizes = [1, 128], strides = [1, 1]} : vector<1x768xf32> to vector<1x128xf32>
    %556 = arith.addf %554, %555 : vector<1x128xf32>
    %557 = arith.negf %556 : vector<1x128xf32>
    %558 = math.exp %557 : vector<1x128xf32>
    %cst_149 = arith.constant 1.000000e+00 : f32
    %559 = vector.broadcast %cst_149 : f32 to vector<1x128xf32>
    %560 = arith.addf %559, %558 : vector<1x128xf32>
    %561 = arith.divf %559, %560 : vector<1x128xf32>
    %562 = vector.extract_strided_slice %529 {offsets = [0, 128], sizes = [1, 128], strides = [1, 1]} : vector<1x384xf32> to vector<1x128xf32>
    %563 = vector.extract_strided_slice %531 {offsets = [0, 512], sizes = [1, 128], strides = [1, 1]} : vector<1x768xf32> to vector<1x128xf32>
    %564 = arith.addf %562, %563 : vector<1x128xf32>
    %565 = arith.negf %564 : vector<1x128xf32>
    %566 = math.exp %565 : vector<1x128xf32>
    %cst_150 = arith.constant 1.000000e+00 : f32
    %567 = vector.broadcast %cst_150 : f32 to vector<1x128xf32>
    %568 = arith.addf %567, %566 : vector<1x128xf32>
    %569 = arith.divf %567, %568 : vector<1x128xf32>
    %570 = vector.extract_strided_slice %529 {offsets = [0, 256], sizes = [1, 128], strides = [1, 1]} : vector<1x384xf32> to vector<1x128xf32>
    %571 = vector.extract_strided_slice %531 {offsets = [0, 640], sizes = [1, 128], strides = [1, 1]} : vector<1x768xf32> to vector<1x128xf32>
    %572 = arith.addf %571, %526 : vector<1x128xf32>
    %573 = arith.mulf %561, %572 : vector<1x128xf32>
    %574 = arith.addf %570, %573 : vector<1x128xf32>
    %575 = math.tanh %574 : vector<1x128xf32>
    %cst_151 = arith.constant 1.000000e+00 : f32
    %576 = vector.broadcast %cst_151 : f32 to vector<1x128xf32>
    %577 = arith.subf %576, %547 : vector<1x128xf32>
    %578 = arith.mulf %577, %553 : vector<1x128xf32>
    %579 = vector.extract_strided_slice %527 {offsets = [0, 0], sizes = [1, 128], strides = [1, 1]} : vector<1x256xf32> to vector<1x128xf32>
    %580 = arith.mulf %547, %579 : vector<1x128xf32>
    %581 = arith.addf %578, %580 : vector<1x128xf32>
    %cst_152 = arith.constant 1.000000e+00 : f32
    %582 = vector.broadcast %cst_152 : f32 to vector<1x128xf32>
    %583 = arith.subf %582, %569 : vector<1x128xf32>
    %584 = arith.mulf %583, %575 : vector<1x128xf32>
    %585 = vector.extract_strided_slice %527 {offsets = [0, 128], sizes = [1, 128], strides = [1, 1]} : vector<1x256xf32> to vector<1x128xf32>
    %586 = arith.mulf %569, %585 : vector<1x128xf32>
    %587 = arith.addf %584, %586 : vector<1x128xf32>
    %588 = tpu.concatenate %581, %587 in 1 : vector<1x128xf32>, vector<1x128xf32> -> vector<1x256xf32>
    %c0_153 = arith.constant 0 : index
    %c0_154 = arith.constant 0 : index
    %589 = vector.load %arg23[%c0_153, %c0_154] : memref<8x256xf32, #tpu.memory_space<vmem>>, vector<1x128xf32>
    tpu.vector_store %arg23[%c0_153, %c0_154], %581 {strides = array<i32>} : memref<8x256xf32, #tpu.memory_space<vmem>>, vector<1x128xf32>,
    %c7_155 = arith.constant 7 : index
    %c128_156 = arith.constant 128 : index
    %590 = vector.load %arg23[%c7_155, %c128_156] : memref<8x256xf32, #tpu.memory_space<vmem>>, vector<1x128xf32>
    tpu.vector_store %arg23[%c7_155, %c128_156], %587 {strides = array<i32>} : memref<8x256xf32, #tpu.memory_space<vmem>>, vector<1x128xf32>,
    %c1_157 = arith.constant 1 : index
    %c0_158 = arith.constant 0 : index
    %591 = vector.load %arg21[%c1_157, %c0_158] : memref<8x768xf32, #tpu.memory_space<vmem>>, vector<1x384xf32>
    %c6_159 = arith.constant 6 : index
    %c384_160 = arith.constant 384 : index
    %592 = vector.load %arg21[%c6_159, %c384_160] : memref<8x768xf32, #tpu.memory_space<vmem>>, vector<1x384xf32>
    %593 = arith.truncf %588 : vector<1x256xf32> to vector<1x256xbf16>
    %cst_161 = arith.constant dense<0.000000e+00> : vector<1x768xf32>
    %594 = tpu.matmul %593, %524, %cst_161 {dimension_numbers = #tpu.dot_dimension_numbers<[1], [0], [0], [1], [0, 0, 1, 1], [], []>} : vector<1x256xbf16>, vector<256x768xbf16>, vector<1x768xf32> -> vector<1x768xf32>
    %595 = vector.extract_strided_slice %591 {offsets = [0, 0], sizes = [1, 128], strides = [1, 1]} : vector<1x384xf32> to vector<1x128xf32>
    %596 = vector.extract_strided_slice %594 {offsets = [0, 0], sizes = [1, 128], strides = [1, 1]} : vector<1x768xf32> to vector<1x128xf32>
    %597 = arith.addf %595, %596 : vector<1x128xf32>
    %598 = arith.negf %597 : vector<1x128xf32>
    %599 = math.exp %598 : vector<1x128xf32>
    %cst_162 = arith.constant 1.000000e+00 : f32
    %600 = vector.broadcast %cst_162 : f32 to vector<1x128xf32>
    %601 = arith.addf %600, %599 : vector<1x128xf32>
    %602 = arith.divf %600, %601 : vector<1x128xf32>
    %603 = vector.extract_strided_slice %591 {offsets = [0, 128], sizes = [1, 128], strides = [1, 1]} : vector<1x384xf32> to vector<1x128xf32>
    %604 = vector.extract_strided_slice %594 {offsets = [0, 128], sizes = [1, 128], strides = [1, 1]} : vector<1x768xf32> to vector<1x128xf32>
    %605 = arith.addf %603, %604 : vector<1x128xf32>
    %606 = arith.negf %605 : vector<1x128xf32>
    %607 = math.exp %606 : vector<1x128xf32>
    %cst_163 = arith.constant 1.000000e+00 : f32
    %608 = vector.broadcast %cst_163 : f32 to vector<1x128xf32>
    %609 = arith.addf %608, %607 : vector<1x128xf32>
    %610 = arith.divf %608, %609 : vector<1x128xf32>
    %611 = vector.extract_strided_slice %591 {offsets = [0, 256], sizes = [1, 128], strides = [1, 1]} : vector<1x384xf32> to vector<1x128xf32>
    %612 = vector.extract_strided_slice %594 {offsets = [0, 256], sizes = [1, 128], strides = [1, 1]} : vector<1x768xf32> to vector<1x128xf32>
    %613 = arith.addf %612, %525 : vector<1x128xf32>
    %614 = arith.mulf %602, %613 : vector<1x128xf32>
    %615 = arith.addf %611, %614 : vector<1x128xf32>
    %616 = math.tanh %615 : vector<1x128xf32>
    %617 = vector.extract_strided_slice %592 {offsets = [0, 0], sizes = [1, 128], strides = [1, 1]} : vector<1x384xf32> to vector<1x128xf32>
    %618 = vector.extract_strided_slice %594 {offsets = [0, 384], sizes = [1, 128], strides = [1, 1]} : vector<1x768xf32> to vector<1x128xf32>
    %619 = arith.addf %617, %618 : vector<1x128xf32>
    %620 = arith.negf %619 : vector<1x128xf32>
    %621 = math.exp %620 : vector<1x128xf32>
    %cst_164 = arith.constant 1.000000e+00 : f32
    %622 = vector.broadcast %cst_164 : f32 to vector<1x128xf32>
    %623 = arith.addf %622, %621 : vector<1x128xf32>
    %624 = arith.divf %622, %623 : vector<1x128xf32>
    %625 = vector.extract_strided_slice %592 {offsets = [0, 128], sizes = [1, 128], strides = [1, 1]} : vector<1x384xf32> to vector<1x128xf32>
    %626 = vector.extract_strided_slice %594 {offsets = [0, 512], sizes = [1, 128], strides = [1, 1]} : vector<1x768xf32> to vector<1x128xf32>
    %627 = arith.addf %625, %626 : vector<1x128xf32>
    %628 = arith.negf %627 : vector<1x128xf32>
    %629 = math.exp %628 : vector<1x128xf32>
    %cst_165 = arith.constant 1.000000e+00 : f32
    %630 = vector.broadcast %cst_165 : f32 to vector<1x128xf32>
    %631 = arith.addf %630, %629 : vector<1x128xf32>
    %632 = arith.divf %630, %631 : vector<1x128xf32>
    %633 = vector.extract_strided_slice %592 {offsets = [0, 256], sizes = [1, 128], strides = [1, 1]} : vector<1x384xf32> to vector<1x128xf32>
    %634 = vector.extract_strided_slice %594 {offsets = [0, 640], sizes = [1, 128], strides = [1, 1]} : vector<1x768xf32> to vector<1x128xf32>
    %635 = arith.addf %634, %526 : vector<1x128xf32>
    %636 = arith.mulf %624, %635 : vector<1x128xf32>
    %637 = arith.addf %633, %636 : vector<1x128xf32>
    %638 = math.tanh %637 : vector<1x128xf32>
    %cst_166 = arith.constant 1.000000e+00 : f32
    %639 = vector.broadcast %cst_166 : f32 to vector<1x128xf32>
    %640 = arith.subf %639, %610 : vector<1x128xf32>
    %641 = arith.mulf %640, %616 : vector<1x128xf32>
    %642 = vector.extract_strided_slice %588 {offsets = [0, 0], sizes = [1, 128], strides = [1, 1]} : vector<1x256xf32> to vector<1x128xf32>
    %643 = arith.mulf %610, %642 : vector<1x128xf32>
    %644 = arith.addf %641, %643 : vector<1x128xf32>
    %cst_167 = arith.constant 1.000000e+00 : f32
    %645 = vector.broadcast %cst_167 : f32 to vector<1x128xf32>
    %646 = arith.subf %645, %632 : vector<1x128xf32>
    %647 = arith.mulf %646, %638 : vector<1x128xf32>
    %648 = vector.extract_strided_slice %588 {offsets = [0, 128], sizes = [1, 128], strides = [1, 1]} : vector<1x256xf32> to vector<1x128xf32>
    %649 = arith.mulf %632, %648 : vector<1x128xf32>
    %650 = arith.addf %647, %649 : vector<1x128xf32>
    %651 = tpu.concatenate %644, %650 in 1 : vector<1x128xf32>, vector<1x128xf32> -> vector<1x256xf32>
    %c1_168 = arith.constant 1 : index
    %c0_169 = arith.constant 0 : index
    %652 = vector.load %arg23[%c1_168, %c0_169] : memref<8x256xf32, #tpu.memory_space<vmem>>, vector<1x128xf32>
    tpu.vector_store %arg23[%c1_168, %c0_169], %644 {strides = array<i32>} : memref<8x256xf32, #tpu.memory_space<vmem>>, vector<1x128xf32>,
    %c6_170 = arith.constant 6 : index
    %c128_171 = arith.constant 128 : index
    %653 = vector.load %arg23[%c6_170, %c128_171] : memref<8x256xf32, #tpu.memory_space<vmem>>, vector<1x128xf32>
    tpu.vector_store %arg23[%c6_170, %c128_171], %650 {strides = array<i32>} : memref<8x256xf32, #tpu.memory_space<vmem>>, vector<1x128xf32>,
    %c2_172 = arith.constant 2 : index
    %c0_173 = arith.constant 0 : index
    %654 = vector.load %arg21[%c2_172, %c0_173] : memref<8x768xf32, #tpu.memory_space<vmem>>, vector<1x384xf32>
    %c5_174 = arith.constant 5 : index
    %c384_175 = arith.constant 384 : index
    %655 = vector.load %arg21[%c5_174, %c384_175] : memref<8x768xf32, #tpu.memory_space<vmem>>, vector<1x384xf32>
    %656 = arith.truncf %651 : vector<1x256xf32> to vector<1x256xbf16>
    %cst_176 = arith.constant dense<0.000000e+00> : vector<1x768xf32>
    %657 = tpu.matmul %656, %524, %cst_176 {dimension_numbers = #tpu.dot_dimension_numbers<[1], [0], [0], [1], [0, 0, 1, 1], [], []>} : vector<1x256xbf16>, vector<256x768xbf16>, vector<1x768xf32> -> vector<1x768xf32>
    %658 = vector.extract_strided_slice %654 {offsets = [0, 0], sizes = [1, 128], strides = [1, 1]} : vector<1x384xf32> to vector<1x128xf32>
    %659 = vector.extract_strided_slice %657 {offsets = [0, 0], sizes = [1, 128], strides = [1, 1]} : vector<1x768xf32> to vector<1x128xf32>
    %660 = arith.addf %658, %659 : vector<1x128xf32>
    %661 = arith.negf %660 : vector<1x128xf32>
    %662 = math.exp %661 : vector<1x128xf32>
    %cst_177 = arith.constant 1.000000e+00 : f32
    %663 = vector.broadcast %cst_177 : f32 to vector<1x128xf32>
    %664 = arith.addf %663, %662 : vector<1x128xf32>
    %665 = arith.divf %663, %664 : vector<1x128xf32>
    %666 = vector.extract_strided_slice %654 {offsets = [0, 128], sizes = [1, 128], strides = [1, 1]} : vector<1x384xf32> to vector<1x128xf32>
    %667 = vector.extract_strided_slice %657 {offsets = [0, 128], sizes = [1, 128], strides = [1, 1]} : vector<1x768xf32> to vector<1x128xf32>
    %668 = arith.addf %666, %667 : vector<1x128xf32>
    %669 = arith.negf %668 : vector<1x128xf32>
    %670 = math.exp %669 : vector<1x128xf32>
    %cst_178 = arith.constant 1.000000e+00 : f32
    %671 = vector.broadcast %cst_178 : f32 to vector<1x128xf32>
    %672 = arith.addf %671, %670 : vector<1x128xf32>
    %673 = arith.divf %671, %672 : vector<1x128xf32>
    %674 = vector.extract_strided_slice %654 {offsets = [0, 256], sizes = [1, 128], strides = [1, 1]} : vector<1x384xf32> to vector<1x128xf32>
    %675 = vector.extract_strided_slice %657 {offsets = [0, 256], sizes = [1, 128], strides = [1, 1]} : vector<1x768xf32> to vector<1x128xf32>
    %676 = arith.addf %675, %525 : vector<1x128xf32>
    %677 = arith.mulf %665, %676 : vector<1x128xf32>
    %678 = arith.addf %674, %677 : vector<1x128xf32>
    %679 = math.tanh %678 : vector<1x128xf32>
    %680 = vector.extract_strided_slice %655 {offsets = [0, 0], sizes = [1, 128], strides = [1, 1]} : vector<1x384xf32> to vector<1x128xf32>
    %681 = vector.extract_strided_slice %657 {offsets = [0, 384], sizes = [1, 128], strides = [1, 1]} : vector<1x768xf32> to vector<1x128xf32>
    %682 = arith.addf %680, %681 : vector<1x128xf32>
    %683 = arith.negf %682 : vector<1x128xf32>
    %684 = math.exp %683 : vector<1x128xf32>
    %cst_179 = arith.constant 1.000000e+00 : f32
    %685 = vector.broadcast %cst_179 : f32 to vector<1x128xf32>
    %686 = arith.addf %685, %684 : vector<1x128xf32>
    %687 = arith.divf %685, %686 : vector<1x128xf32>
    %688 = vector.extract_strided_slice %655 {offsets = [0, 128], sizes = [1, 128], strides = [1, 1]} : vector<1x384xf32> to vector<1x128xf32>
    %689 = vector.extract_strided_slice %657 {offsets = [0, 512], sizes = [1, 128], strides = [1, 1]} : vector<1x768xf32> to vector<1x128xf32>
    %690 = arith.addf %688, %689 : vector<1x128xf32>
    %691 = arith.negf %690 : vector<1x128xf32>
    %692 = math.exp %691 : vector<1x128xf32>
    %cst_180 = arith.constant 1.000000e+00 : f32
    %693 = vector.broadcast %cst_180 : f32 to vector<1x128xf32>
    %694 = arith.addf %693, %692 : vector<1x128xf32>
    %695 = arith.divf %693, %694 : vector<1x128xf32>
    %696 = vector.extract_strided_slice %655 {offsets = [0, 256], sizes = [1, 128], strides = [1, 1]} : vector<1x384xf32> to vector<1x128xf32>
    %697 = vector.extract_strided_slice %657 {offsets = [0, 640], sizes = [1, 128], strides = [1, 1]} : vector<1x768xf32> to vector<1x128xf32>
    %698 = arith.addf %697, %526 : vector<1x128xf32>
    %699 = arith.mulf %687, %698 : vector<1x128xf32>
    %700 = arith.addf %696, %699 : vector<1x128xf32>
    %701 = math.tanh %700 : vector<1x128xf32>
    %cst_181 = arith.constant 1.000000e+00 : f32
    %702 = vector.broadcast %cst_181 : f32 to vector<1x128xf32>
    %703 = arith.subf %702, %673 : vector<1x128xf32>
    %704 = arith.mulf %703, %679 : vector<1x128xf32>
    %705 = vector.extract_strided_slice %651 {offsets = [0, 0], sizes = [1, 128], strides = [1, 1]} : vector<1x256xf32> to vector<1x128xf32>
    %706 = arith.mulf %673, %705 : vector<1x128xf32>
    %707 = arith.addf %704, %706 : vector<1x128xf32>
    %cst_182 = arith.constant 1.000000e+00 : f32
    %708 = vector.broadcast %cst_182 : f32 to vector<1x128xf32>
    %709 = arith.subf %708, %695 : vector<1x128xf32>
    %710 = arith.mulf %709, %701 : vector<1x128xf32>
    %711 = vector.extract_strided_slice %651 {offsets = [0, 128], sizes = [1, 128], strides = [1, 1]} : vector<1x256xf32> to vector<1x128xf32>
    %712 = arith.mulf %695, %711 : vector<1x128xf32>
    %713 = arith.addf %710, %712 : vector<1x128xf32>
    %714 = tpu.concatenate %707, %713 in 1 : vector<1x128xf32>, vector<1x128xf32> -> vector<1x256xf32>
    %c2_183 = arith.constant 2 : index
    %c0_184 = arith.constant 0 : index
    %715 = vector.load %arg23[%c2_183, %c0_184] : memref<8x256xf32, #tpu.memory_space<vmem>>, vector<1x128xf32>
    tpu.vector_store %arg23[%c2_183, %c0_184], %707 {strides = array<i32>} : memref<8x256xf32, #tpu.memory_space<vmem>>, vector<1x128xf32>,
    %c5_185 = arith.constant 5 : index
    %c128_186 = arith.constant 128 : index
    %716 = vector.load %arg23[%c5_185, %c128_186] : memref<8x256xf32, #tpu.memory_space<vmem>>, vector<1x128xf32>
    tpu.vector_store %arg23[%c5_185, %c128_186], %713 {strides = array<i32>} : memref<8x256xf32, #tpu.memory_space<vmem>>, vector<1x128xf32>,
    %c3_187 = arith.constant 3 : index
    %c0_188 = arith.constant 0 : index
    %717 = vector.load %arg21[%c3_187, %c0_188] : memref<8x768xf32, #tpu.memory_space<vmem>>, vector<1x384xf32>
    %c4_189 = arith.constant 4 : index
    %c384_190 = arith.constant 384 : index
    %718 = vector.load %arg21[%c4_189, %c384_190] : memref<8x768xf32, #tpu.memory_space<vmem>>, vector<1x384xf32>
    %719 = arith.truncf %714 : vector<1x256xf32> to vector<1x256xbf16>
    %cst_191 = arith.constant dense<0.000000e+00> : vector<1x768xf32>
    %720 = tpu.matmul %719, %524, %cst_191 {dimension_numbers = #tpu.dot_dimension_numbers<[1], [0], [0], [1], [0, 0, 1, 1], [], []>} : vector<1x256xbf16>, vector<256x768xbf16>, vector<1x768xf32> -> vector<1x768xf32>
    %721 = vector.extract_strided_slice %717 {offsets = [0, 0], sizes = [1, 128], strides = [1, 1]} : vector<1x384xf32> to vector<1x128xf32>
    %722 = vector.extract_strided_slice %720 {offsets = [0, 0], sizes = [1, 128], strides = [1, 1]} : vector<1x768xf32> to vector<1x128xf32>
    %723 = arith.addf %721, %722 : vector<1x128xf32>
    %724 = arith.negf %723 : vector<1x128xf32>
    %725 = math.exp %724 : vector<1x128xf32>
    %cst_192 = arith.constant 1.000000e+00 : f32
    %726 = vector.broadcast %cst_192 : f32 to vector<1x128xf32>
    %727 = arith.addf %726, %725 : vector<1x128xf32>
    %728 = arith.divf %726, %727 : vector<1x128xf32>
    %729 = vector.extract_strided_slice %717 {offsets = [0, 128], sizes = [1, 128], strides = [1, 1]} : vector<1x384xf32> to vector<1x128xf32>
    %730 = vector.extract_strided_slice %720 {offsets = [0, 128], sizes = [1, 128], strides = [1, 1]} : vector<1x768xf32> to vector<1x128xf32>
    %731 = arith.addf %729, %730 : vector<1x128xf32>
    %732 = arith.negf %731 : vector<1x128xf32>
    %733 = math.exp %732 : vector<1x128xf32>
    %cst_193 = arith.constant 1.000000e+00 : f32
    %734 = vector.broadcast %cst_193 : f32 to vector<1x128xf32>
    %735 = arith.addf %734, %733 : vector<1x128xf32>
    %736 = arith.divf %734, %735 : vector<1x128xf32>
    %737 = vector.extract_strided_slice %717 {offsets = [0, 256], sizes = [1, 128], strides = [1, 1]} : vector<1x384xf32> to vector<1x128xf32>
    %738 = vector.extract_strided_slice %720 {offsets = [0, 256], sizes = [1, 128], strides = [1, 1]} : vector<1x768xf32> to vector<1x128xf32>
    %739 = arith.addf %738, %525 : vector<1x128xf32>
    %740 = arith.mulf %728, %739 : vector<1x128xf32>
    %741 = arith.addf %737, %740 : vector<1x128xf32>
    %742 = math.tanh %741 : vector<1x128xf32>
    %743 = vector.extract_strided_slice %718 {offsets = [0, 0], sizes = [1, 128], strides = [1, 1]} : vector<1x384xf32> to vector<1x128xf32>
    %744 = vector.extract_strided_slice %720 {offsets = [0, 384], sizes = [1, 128], strides = [1, 1]} : vector<1x768xf32> to vector<1x128xf32>
    %745 = arith.addf %743, %744 : vector<1x128xf32>
    %746 = arith.negf %745 : vector<1x128xf32>
    %747 = math.exp %746 : vector<1x128xf32>
    %cst_194 = arith.constant 1.000000e+00 : f32
    %748 = vector.broadcast %cst_194 : f32 to vector<1x128xf32>
    %749 = arith.addf %748, %747 : vector<1x128xf32>
    %750 = arith.divf %748, %749 : vector<1x128xf32>
    %751 = vector.extract_strided_slice %718 {offsets = [0, 128], sizes = [1, 128], strides = [1, 1]} : vector<1x384xf32> to vector<1x128xf32>
    %752 = vector.extract_strided_slice %720 {offsets = [0, 512], sizes = [1, 128], strides = [1, 1]} : vector<1x768xf32> to vector<1x128xf32>
    %753 = arith.addf %751, %752 : vector<1x128xf32>
    %754 = arith.negf %753 : vector<1x128xf32>
    %755 = math.exp %754 : vector<1x128xf32>
    %cst_195 = arith.constant 1.000000e+00 : f32
    %756 = vector.broadcast %cst_195 : f32 to vector<1x128xf32>
    %757 = arith.addf %756, %755 : vector<1x128xf32>
    %758 = arith.divf %756, %757 : vector<1x128xf32>
    %759 = vector.extract_strided_slice %718 {offsets = [0, 256], sizes = [1, 128], strides = [1, 1]} : vector<1x384xf32> to vector<1x128xf32>
    %760 = vector.extract_strided_slice %720 {offsets = [0, 640], sizes = [1, 128], strides = [1, 1]} : vector<1x768xf32> to vector<1x128xf32>
    %761 = arith.addf %760, %526 : vector<1x128xf32>
    %762 = arith.mulf %750, %761 : vector<1x128xf32>
    %763 = arith.addf %759, %762 : vector<1x128xf32>
    %764 = math.tanh %763 : vector<1x128xf32>
    %cst_196 = arith.constant 1.000000e+00 : f32
    %765 = vector.broadcast %cst_196 : f32 to vector<1x128xf32>
    %766 = arith.subf %765, %736 : vector<1x128xf32>
    %767 = arith.mulf %766, %742 : vector<1x128xf32>
    %768 = vector.extract_strided_slice %714 {offsets = [0, 0], sizes = [1, 128], strides = [1, 1]} : vector<1x256xf32> to vector<1x128xf32>
    %769 = arith.mulf %736, %768 : vector<1x128xf32>
    %770 = arith.addf %767, %769 : vector<1x128xf32>
    %cst_197 = arith.constant 1.000000e+00 : f32
    %771 = vector.broadcast %cst_197 : f32 to vector<1x128xf32>
    %772 = arith.subf %771, %758 : vector<1x128xf32>
    %773 = arith.mulf %772, %764 : vector<1x128xf32>
    %774 = vector.extract_strided_slice %714 {offsets = [0, 128], sizes = [1, 128], strides = [1, 1]} : vector<1x256xf32> to vector<1x128xf32>
    %775 = arith.mulf %758, %774 : vector<1x128xf32>
    %776 = arith.addf %773, %775 : vector<1x128xf32>
    %777 = tpu.concatenate %770, %776 in 1 : vector<1x128xf32>, vector<1x128xf32> -> vector<1x256xf32>
    %c3_198 = arith.constant 3 : index
    %c0_199 = arith.constant 0 : index
    %778 = vector.load %arg23[%c3_198, %c0_199] : memref<8x256xf32, #tpu.memory_space<vmem>>, vector<1x128xf32>
    tpu.vector_store %arg23[%c3_198, %c0_199], %770 {strides = array<i32>} : memref<8x256xf32, #tpu.memory_space<vmem>>, vector<1x128xf32>,
    %c4_200 = arith.constant 4 : index
    %c128_201 = arith.constant 128 : index
    %779 = vector.load %arg23[%c4_200, %c128_201] : memref<8x256xf32, #tpu.memory_space<vmem>>, vector<1x128xf32>
    tpu.vector_store %arg23[%c4_200, %c128_201], %776 {strides = array<i32>} : memref<8x256xf32, #tpu.memory_space<vmem>>, vector<1x128xf32>,
    %c4_202 = arith.constant 4 : index
    %c0_203 = arith.constant 0 : index
    %780 = vector.load %arg21[%c4_202, %c0_203] : memref<8x768xf32, #tpu.memory_space<vmem>>, vector<1x384xf32>
    %c3_204 = arith.constant 3 : index
    %c384_205 = arith.constant 384 : index
    %781 = vector.load %arg21[%c3_204, %c384_205] : memref<8x768xf32, #tpu.memory_space<vmem>>, vector<1x384xf32>
    %782 = arith.truncf %777 : vector<1x256xf32> to vector<1x256xbf16>
    %cst_206 = arith.constant dense<0.000000e+00> : vector<1x768xf32>
    %783 = tpu.matmul %782, %524, %cst_206 {dimension_numbers = #tpu.dot_dimension_numbers<[1], [0], [0], [1], [0, 0, 1, 1], [], []>} : vector<1x256xbf16>, vector<256x768xbf16>, vector<1x768xf32> -> vector<1x768xf32>
    %784 = vector.extract_strided_slice %780 {offsets = [0, 0], sizes = [1, 128], strides = [1, 1]} : vector<1x384xf32> to vector<1x128xf32>
    %785 = vector.extract_strided_slice %783 {offsets = [0, 0], sizes = [1, 128], strides = [1, 1]} : vector<1x768xf32> to vector<1x128xf32>
    %786 = arith.addf %784, %785 : vector<1x128xf32>
    %787 = arith.negf %786 : vector<1x128xf32>
    %788 = math.exp %787 : vector<1x128xf32>
    %cst_207 = arith.constant 1.000000e+00 : f32
    %789 = vector.broadcast %cst_207 : f32 to vector<1x128xf32>
    %790 = arith.addf %789, %788 : vector<1x128xf32>
    %791 = arith.divf %789, %790 : vector<1x128xf32>
    %792 = vector.extract_strided_slice %780 {offsets = [0, 128], sizes = [1, 128], strides = [1, 1]} : vector<1x384xf32> to vector<1x128xf32>
    %793 = vector.extract_strided_slice %783 {offsets = [0, 128], sizes = [1, 128], strides = [1, 1]} : vector<1x768xf32> to vector<1x128xf32>
    %794 = arith.addf %792, %793 : vector<1x128xf32>
    %795 = arith.negf %794 : vector<1x128xf32>
    %796 = math.exp %795 : vector<1x128xf32>
    %cst_208 = arith.constant 1.000000e+00 : f32
    %797 = vector.broadcast %cst_208 : f32 to vector<1x128xf32>
    %798 = arith.addf %797, %796 : vector<1x128xf32>
    %799 = arith.divf %797, %798 : vector<1x128xf32>
    %800 = vector.extract_strided_slice %780 {offsets = [0, 256], sizes = [1, 128], strides = [1, 1]} : vector<1x384xf32> to vector<1x128xf32>
    %801 = vector.extract_strided_slice %783 {offsets = [0, 256], sizes = [1, 128], strides = [1, 1]} : vector<1x768xf32> to vector<1x128xf32>
    %802 = arith.addf %801, %525 : vector<1x128xf32>
    %803 = arith.mulf %791, %802 : vector<1x128xf32>
    %804 = arith.addf %800, %803 : vector<1x128xf32>
    %805 = math.tanh %804 : vector<1x128xf32>
    %806 = vector.extract_strided_slice %781 {offsets = [0, 0], sizes = [1, 128], strides = [1, 1]} : vector<1x384xf32> to vector<1x128xf32>
    %807 = vector.extract_strided_slice %783 {offsets = [0, 384], sizes = [1, 128], strides = [1, 1]} : vector<1x768xf32> to vector<1x128xf32>
    %808 = arith.addf %806, %807 : vector<1x128xf32>
    %809 = arith.negf %808 : vector<1x128xf32>
    %810 = math.exp %809 : vector<1x128xf32>
    %cst_209 = arith.constant 1.000000e+00 : f32
    %811 = vector.broadcast %cst_209 : f32 to vector<1x128xf32>
    %812 = arith.addf %811, %810 : vector<1x128xf32>
    %813 = arith.divf %811, %812 : vector<1x128xf32>
    %814 = vector.extract_strided_slice %781 {offsets = [0, 128], sizes = [1, 128], strides = [1, 1]} : vector<1x384xf32> to vector<1x128xf32>
    %815 = vector.extract_strided_slice %783 {offsets = [0, 512], sizes = [1, 128], strides = [1, 1]} : vector<1x768xf32> to vector<1x128xf32>
    %816 = arith.addf %814, %815 : vector<1x128xf32>
    %817 = arith.negf %816 : vector<1x128xf32>
    %818 = math.exp %817 : vector<1x128xf32>
    %cst_210 = arith.constant 1.000000e+00 : f32
    %819 = vector.broadcast %cst_210 : f32 to vector<1x128xf32>
    %820 = arith.addf %819, %818 : vector<1x128xf32>
    %821 = arith.divf %819, %820 : vector<1x128xf32>
    %822 = vector.extract_strided_slice %781 {offsets = [0, 256], sizes = [1, 128], strides = [1, 1]} : vector<1x384xf32> to vector<1x128xf32>
    %823 = vector.extract_strided_slice %783 {offsets = [0, 640], sizes = [1, 128], strides = [1, 1]} : vector<1x768xf32> to vector<1x128xf32>
    %824 = arith.addf %823, %526 : vector<1x128xf32>
    %825 = arith.mulf %813, %824 : vector<1x128xf32>
    %826 = arith.addf %822, %825 : vector<1x128xf32>
    %827 = math.tanh %826 : vector<1x128xf32>
    %cst_211 = arith.constant 1.000000e+00 : f32
    %828 = vector.broadcast %cst_211 : f32 to vector<1x128xf32>
    %829 = arith.subf %828, %799 : vector<1x128xf32>
    %830 = arith.mulf %829, %805 : vector<1x128xf32>
    %831 = vector.extract_strided_slice %777 {offsets = [0, 0], sizes = [1, 128], strides = [1, 1]} : vector<1x256xf32> to vector<1x128xf32>
    %832 = arith.mulf %799, %831 : vector<1x128xf32>
    %833 = arith.addf %830, %832 : vector<1x128xf32>
    %cst_212 = arith.constant 1.000000e+00 : f32
    %834 = vector.broadcast %cst_212 : f32 to vector<1x128xf32>
    %835 = arith.subf %834, %821 : vector<1x128xf32>
    %836 = arith.mulf %835, %827 : vector<1x128xf32>
    %837 = vector.extract_strided_slice %777 {offsets = [0, 128], sizes = [1, 128], strides = [1, 1]} : vector<1x256xf32> to vector<1x128xf32>
    %838 = arith.mulf %821, %837 : vector<1x128xf32>
    %839 = arith.addf %836, %838 : vector<1x128xf32>
    %840 = tpu.concatenate %833, %839 in 1 : vector<1x128xf32>, vector<1x128xf32> -> vector<1x256xf32>
    %c4_213 = arith.constant 4 : index
    %c0_214 = arith.constant 0 : index
    %841 = vector.load %arg23[%c4_213, %c0_214] : memref<8x256xf32, #tpu.memory_space<vmem>>, vector<1x128xf32>
    tpu.vector_store %arg23[%c4_213, %c0_214], %833 {strides = array<i32>} : memref<8x256xf32, #tpu.memory_space<vmem>>, vector<1x128xf32>,
    %c3_215 = arith.constant 3 : index
    %c128_216 = arith.constant 128 : index
    %842 = vector.load %arg23[%c3_215, %c128_216] : memref<8x256xf32, #tpu.memory_space<vmem>>, vector<1x128xf32>
    tpu.vector_store %arg23[%c3_215, %c128_216], %839 {strides = array<i32>} : memref<8x256xf32, #tpu.memory_space<vmem>>, vector<1x128xf32>,
    %c5_217 = arith.constant 5 : index
    %c0_218 = arith.constant 0 : index
    %843 = vector.load %arg21[%c5_217, %c0_218] : memref<8x768xf32, #tpu.memory_space<vmem>>, vector<1x384xf32>
    %c2_219 = arith.constant 2 : index
    %c384_220 = arith.constant 384 : index
    %844 = vector.load %arg21[%c2_219, %c384_220] : memref<8x768xf32, #tpu.memory_space<vmem>>, vector<1x384xf32>
    %845 = arith.truncf %840 : vector<1x256xf32> to vector<1x256xbf16>
    %cst_221 = arith.constant dense<0.000000e+00> : vector<1x768xf32>
    %846 = tpu.matmul %845, %524, %cst_221 {dimension_numbers = #tpu.dot_dimension_numbers<[1], [0], [0], [1], [0, 0, 1, 1], [], []>} : vector<1x256xbf16>, vector<256x768xbf16>, vector<1x768xf32> -> vector<1x768xf32>
    %847 = vector.extract_strided_slice %843 {offsets = [0, 0], sizes = [1, 128], strides = [1, 1]} : vector<1x384xf32> to vector<1x128xf32>
    %848 = vector.extract_strided_slice %846 {offsets = [0, 0], sizes = [1, 128], strides = [1, 1]} : vector<1x768xf32> to vector<1x128xf32>
    %849 = arith.addf %847, %848 : vector<1x128xf32>
    %850 = arith.negf %849 : vector<1x128xf32>
    %851 = math.exp %850 : vector<1x128xf32>
    %cst_222 = arith.constant 1.000000e+00 : f32
    %852 = vector.broadcast %cst_222 : f32 to vector<1x128xf32>
    %853 = arith.addf %852, %851 : vector<1x128xf32>
    %854 = arith.divf %852, %853 : vector<1x128xf32>
    %855 = vector.extract_strided_slice %843 {offsets = [0, 128], sizes = [1, 128], strides = [1, 1]} : vector<1x384xf32> to vector<1x128xf32>
    %856 = vector.extract_strided_slice %846 {offsets = [0, 128], sizes = [1, 128], strides = [1, 1]} : vector<1x768xf32> to vector<1x128xf32>
    %857 = arith.addf %855, %856 : vector<1x128xf32>
    %858 = arith.negf %857 : vector<1x128xf32>
    %859 = math.exp %858 : vector<1x128xf32>
    %cst_223 = arith.constant 1.000000e+00 : f32
    %860 = vector.broadcast %cst_223 : f32 to vector<1x128xf32>
    %861 = arith.addf %860, %859 : vector<1x128xf32>
    %862 = arith.divf %860, %861 : vector<1x128xf32>
    %863 = vector.extract_strided_slice %843 {offsets = [0, 256], sizes = [1, 128], strides = [1, 1]} : vector<1x384xf32> to vector<1x128xf32>
    %864 = vector.extract_strided_slice %846 {offsets = [0, 256], sizes = [1, 128], strides = [1, 1]} : vector<1x768xf32> to vector<1x128xf32>
    %865 = arith.addf %864, %525 : vector<1x128xf32>
    %866 = arith.mulf %854, %865 : vector<1x128xf32>
    %867 = arith.addf %863, %866 : vector<1x128xf32>
    %868 = math.tanh %867 : vector<1x128xf32>
    %869 = vector.extract_strided_slice %844 {offsets = [0, 0], sizes = [1, 128], strides = [1, 1]} : vector<1x384xf32> to vector<1x128xf32>
    %870 = vector.extract_strided_slice %846 {offsets = [0, 384], sizes = [1, 128], strides = [1, 1]} : vector<1x768xf32> to vector<1x128xf32>
    %871 = arith.addf %869, %870 : vector<1x128xf32>
    %872 = arith.negf %871 : vector<1x128xf32>
    %873 = math.exp %872 : vector<1x128xf32>
    %cst_224 = arith.constant 1.000000e+00 : f32
    %874 = vector.broadcast %cst_224 : f32 to vector<1x128xf32>
    %875 = arith.addf %874, %873 : vector<1x128xf32>
    %876 = arith.divf %874, %875 : vector<1x128xf32>
    %877 = vector.extract_strided_slice %844 {offsets = [0, 128], sizes = [1, 128], strides = [1, 1]} : vector<1x384xf32> to vector<1x128xf32>
    %878 = vector.extract_strided_slice %846 {offsets = [0, 512], sizes = [1, 128], strides = [1, 1]} : vector<1x768xf32> to vector<1x128xf32>
    %879 = arith.addf %877, %878 : vector<1x128xf32>
    %880 = arith.negf %879 : vector<1x128xf32>
    %881 = math.exp %880 : vector<1x128xf32>
    %cst_225 = arith.constant 1.000000e+00 : f32
    %882 = vector.broadcast %cst_225 : f32 to vector<1x128xf32>
    %883 = arith.addf %882, %881 : vector<1x128xf32>
    %884 = arith.divf %882, %883 : vector<1x128xf32>
    %885 = vector.extract_strided_slice %844 {offsets = [0, 256], sizes = [1, 128], strides = [1, 1]} : vector<1x384xf32> to vector<1x128xf32>
    %886 = vector.extract_strided_slice %846 {offsets = [0, 640], sizes = [1, 128], strides = [1, 1]} : vector<1x768xf32> to vector<1x128xf32>
    %887 = arith.addf %886, %526 : vector<1x128xf32>
    %888 = arith.mulf %876, %887 : vector<1x128xf32>
    %889 = arith.addf %885, %888 : vector<1x128xf32>
    %890 = math.tanh %889 : vector<1x128xf32>
    %cst_226 = arith.constant 1.000000e+00 : f32
    %891 = vector.broadcast %cst_226 : f32 to vector<1x128xf32>
    %892 = arith.subf %891, %862 : vector<1x128xf32>
    %893 = arith.mulf %892, %868 : vector<1x128xf32>
    %894 = vector.extract_strided_slice %840 {offsets = [0, 0], sizes = [1, 128], strides = [1, 1]} : vector<1x256xf32> to vector<1x128xf32>
    %895 = arith.mulf %862, %894 : vector<1x128xf32>
    %896 = arith.addf %893, %895 : vector<1x128xf32>
    %cst_227 = arith.constant 1.000000e+00 : f32
    %897 = vector.broadcast %cst_227 : f32 to vector<1x128xf32>
    %898 = arith.subf %897, %884 : vector<1x128xf32>
    %899 = arith.mulf %898, %890 : vector<1x128xf32>
    %900 = vector.extract_strided_slice %840 {offsets = [0, 128], sizes = [1, 128], strides = [1, 1]} : vector<1x256xf32> to vector<1x128xf32>
    %901 = arith.mulf %884, %900 : vector<1x128xf32>
    %902 = arith.addf %899, %901 : vector<1x128xf32>
    %903 = tpu.concatenate %896, %902 in 1 : vector<1x128xf32>, vector<1x128xf32> -> vector<1x256xf32>
    %c5_228 = arith.constant 5 : index
    %c0_229 = arith.constant 0 : index
    %904 = vector.load %arg23[%c5_228, %c0_229] : memref<8x256xf32, #tpu.memory_space<vmem>>, vector<1x128xf32>
    tpu.vector_store %arg23[%c5_228, %c0_229], %896 {strides = array<i32>} : memref<8x256xf32, #tpu.memory_space<vmem>>, vector<1x128xf32>,
    %c2_230 = arith.constant 2 : index
    %c128_231 = arith.constant 128 : index
    %905 = vector.load %arg23[%c2_230, %c128_231] : memref<8x256xf32, #tpu.memory_space<vmem>>, vector<1x128xf32>
    tpu.vector_store %arg23[%c2_230, %c128_231], %902 {strides = array<i32>} : memref<8x256xf32, #tpu.memory_space<vmem>>, vector<1x128xf32>,
    %c6_232 = arith.constant 6 : index
    %c0_233 = arith.constant 0 : index
    %906 = vector.load %arg21[%c6_232, %c0_233] : memref<8x768xf32, #tpu.memory_space<vmem>>, vector<1x384xf32>
    %c1_234 = arith.constant 1 : index
    %c384_235 = arith.constant 384 : index
    %907 = vector.load %arg21[%c1_234, %c384_235] : memref<8x768xf32, #tpu.memory_space<vmem>>, vector<1x384xf32>
    %908 = arith.truncf %903 : vector<1x256xf32> to vector<1x256xbf16>
    %cst_236 = arith.constant dense<0.000000e+00> : vector<1x768xf32>
    %909 = tpu.matmul %908, %524, %cst_236 {dimension_numbers = #tpu.dot_dimension_numbers<[1], [0], [0], [1], [0, 0, 1, 1], [], []>} : vector<1x256xbf16>, vector<256x768xbf16>, vector<1x768xf32> -> vector<1x768xf32>
    %910 = vector.extract_strided_slice %906 {offsets = [0, 0], sizes = [1, 128], strides = [1, 1]} : vector<1x384xf32> to vector<1x128xf32>
    %911 = vector.extract_strided_slice %909 {offsets = [0, 0], sizes = [1, 128], strides = [1, 1]} : vector<1x768xf32> to vector<1x128xf32>
    %912 = arith.addf %910, %911 : vector<1x128xf32>
    %913 = arith.negf %912 : vector<1x128xf32>
    %914 = math.exp %913 : vector<1x128xf32>
    %cst_237 = arith.constant 1.000000e+00 : f32
    %915 = vector.broadcast %cst_237 : f32 to vector<1x128xf32>
    %916 = arith.addf %915, %914 : vector<1x128xf32>
    %917 = arith.divf %915, %916 : vector<1x128xf32>
    %918 = vector.extract_strided_slice %906 {offsets = [0, 128], sizes = [1, 128], strides = [1, 1]} : vector<1x384xf32> to vector<1x128xf32>
    %919 = vector.extract_strided_slice %909 {offsets = [0, 128], sizes = [1, 128], strides = [1, 1]} : vector<1x768xf32> to vector<1x128xf32>
    %920 = arith.addf %918, %919 : vector<1x128xf32>
    %921 = arith.negf %920 : vector<1x128xf32>
    %922 = math.exp %921 : vector<1x128xf32>
    %cst_238 = arith.constant 1.000000e+00 : f32
    %923 = vector.broadcast %cst_238 : f32 to vector<1x128xf32>
    %924 = arith.addf %923, %922 : vector<1x128xf32>
    %925 = arith.divf %923, %924 : vector<1x128xf32>
    %926 = vector.extract_strided_slice %906 {offsets = [0, 256], sizes = [1, 128], strides = [1, 1]} : vector<1x384xf32> to vector<1x128xf32>
    %927 = vector.extract_strided_slice %909 {offsets = [0, 256], sizes = [1, 128], strides = [1, 1]} : vector<1x768xf32> to vector<1x128xf32>
    %928 = arith.addf %927, %525 : vector<1x128xf32>
    %929 = arith.mulf %917, %928 : vector<1x128xf32>
    %930 = arith.addf %926, %929 : vector<1x128xf32>
    %931 = math.tanh %930 : vector<1x128xf32>
    %932 = vector.extract_strided_slice %907 {offsets = [0, 0], sizes = [1, 128], strides = [1, 1]} : vector<1x384xf32> to vector<1x128xf32>
    %933 = vector.extract_strided_slice %909 {offsets = [0, 384], sizes = [1, 128], strides = [1, 1]} : vector<1x768xf32> to vector<1x128xf32>
    %934 = arith.addf %932, %933 : vector<1x128xf32>
    %935 = arith.negf %934 : vector<1x128xf32>
    %936 = math.exp %935 : vector<1x128xf32>
    %cst_239 = arith.constant 1.000000e+00 : f32
    %937 = vector.broadcast %cst_239 : f32 to vector<1x128xf32>
    %938 = arith.addf %937, %936 : vector<1x128xf32>
    %939 = arith.divf %937, %938 : vector<1x128xf32>
    %940 = vector.extract_strided_slice %907 {offsets = [0, 128], sizes = [1, 128], strides = [1, 1]} : vector<1x384xf32> to vector<1x128xf32>
    %941 = vector.extract_strided_slice %909 {offsets = [0, 512], sizes = [1, 128], strides = [1, 1]} : vector<1x768xf32> to vector<1x128xf32>
    %942 = arith.addf %940, %941 : vector<1x128xf32>
    %943 = arith.negf %942 : vector<1x128xf32>
    %944 = math.exp %943 : vector<1x128xf32>
    %cst_240 = arith.constant 1.000000e+00 : f32
    %945 = vector.broadcast %cst_240 : f32 to vector<1x128xf32>
    %946 = arith.addf %945, %944 : vector<1x128xf32>
    %947 = arith.divf %945, %946 : vector<1x128xf32>
    %948 = vector.extract_strided_slice %907 {offsets = [0, 256], sizes = [1, 128], strides = [1, 1]} : vector<1x384xf32> to vector<1x128xf32>
    %949 = vector.extract_strided_slice %909 {offsets = [0, 640], sizes = [1, 128], strides = [1, 1]} : vector<1x768xf32> to vector<1x128xf32>
    %950 = arith.addf %949, %526 : vector<1x128xf32>
    %951 = arith.mulf %939, %950 : vector<1x128xf32>
    %952 = arith.addf %948, %951 : vector<1x128xf32>
    %953 = math.tanh %952 : vector<1x128xf32>
    %cst_241 = arith.constant 1.000000e+00 : f32
    %954 = vector.broadcast %cst_241 : f32 to vector<1x128xf32>
    %955 = arith.subf %954, %925 : vector<1x128xf32>
    %956 = arith.mulf %955, %931 : vector<1x128xf32>
    %957 = vector.extract_strided_slice %903 {offsets = [0, 0], sizes = [1, 128], strides = [1, 1]} : vector<1x256xf32> to vector<1x128xf32>
    %958 = arith.mulf %925, %957 : vector<1x128xf32>
    %959 = arith.addf %956, %958 : vector<1x128xf32>
    %cst_242 = arith.constant 1.000000e+00 : f32
    %960 = vector.broadcast %cst_242 : f32 to vector<1x128xf32>
    %961 = arith.subf %960, %947 : vector<1x128xf32>
    %962 = arith.mulf %961, %953 : vector<1x128xf32>
    %963 = vector.extract_strided_slice %903 {offsets = [0, 128], sizes = [1, 128], strides = [1, 1]} : vector<1x256xf32> to vector<1x128xf32>
    %964 = arith.mulf %947, %963 : vector<1x128xf32>
    %965 = arith.addf %962, %964 : vector<1x128xf32>
    %966 = tpu.concatenate %959, %965 in 1 : vector<1x128xf32>, vector<1x128xf32> -> vector<1x256xf32>
    %c6_243 = arith.constant 6 : index
    %c0_244 = arith.constant 0 : index
    %967 = vector.load %arg23[%c6_243, %c0_244] : memref<8x256xf32, #tpu.memory_space<vmem>>, vector<1x128xf32>
    tpu.vector_store %arg23[%c6_243, %c0_244], %959 {strides = array<i32>} : memref<8x256xf32, #tpu.memory_space<vmem>>, vector<1x128xf32>,
    %c1_245 = arith.constant 1 : index
    %c128_246 = arith.constant 128 : index
    %968 = vector.load %arg23[%c1_245, %c128_246] : memref<8x256xf32, #tpu.memory_space<vmem>>, vector<1x128xf32>
    tpu.vector_store %arg23[%c1_245, %c128_246], %965 {strides = array<i32>} : memref<8x256xf32, #tpu.memory_space<vmem>>, vector<1x128xf32>,
    %c7_247 = arith.constant 7 : index
    %c0_248 = arith.constant 0 : index
    %969 = vector.load %arg21[%c7_247, %c0_248] : memref<8x768xf32, #tpu.memory_space<vmem>>, vector<1x384xf32>
    %c0_249 = arith.constant 0 : index
    %c384_250 = arith.constant 384 : index
    %970 = vector.load %arg21[%c0_249, %c384_250] : memref<8x768xf32, #tpu.memory_space<vmem>>, vector<1x384xf32>
    %971 = arith.truncf %966 : vector<1x256xf32> to vector<1x256xbf16>
    %cst_251 = arith.constant dense<0.000000e+00> : vector<1x768xf32>
    %972 = tpu.matmul %971, %524, %cst_251 {dimension_numbers = #tpu.dot_dimension_numbers<[1], [0], [0], [1], [0, 0, 1, 1], [], []>} : vector<1x256xbf16>, vector<256x768xbf16>, vector<1x768xf32> -> vector<1x768xf32>
    %973 = vector.extract_strided_slice %969 {offsets = [0, 0], sizes = [1, 128], strides = [1, 1]} : vector<1x384xf32> to vector<1x128xf32>
    %974 = vector.extract_strided_slice %972 {offsets = [0, 0], sizes = [1, 128], strides = [1, 1]} : vector<1x768xf32> to vector<1x128xf32>
    %975 = arith.addf %973, %974 : vector<1x128xf32>
    %976 = arith.negf %975 : vector<1x128xf32>
    %977 = math.exp %976 : vector<1x128xf32>
    %cst_252 = arith.constant 1.000000e+00 : f32
    %978 = vector.broadcast %cst_252 : f32 to vector<1x128xf32>
    %979 = arith.addf %978, %977 : vector<1x128xf32>
    %980 = arith.divf %978, %979 : vector<1x128xf32>
    %981 = vector.extract_strided_slice %969 {offsets = [0, 128], sizes = [1, 128], strides = [1, 1]} : vector<1x384xf32> to vector<1x128xf32>
    %982 = vector.extract_strided_slice %972 {offsets = [0, 128], sizes = [1, 128], strides = [1, 1]} : vector<1x768xf32> to vector<1x128xf32>
    %983 = arith.addf %981, %982 : vector<1x128xf32>
    %984 = arith.negf %983 : vector<1x128xf32>
    %985 = math.exp %984 : vector<1x128xf32>
    %cst_253 = arith.constant 1.000000e+00 : f32
    %986 = vector.broadcast %cst_253 : f32 to vector<1x128xf32>
    %987 = arith.addf %986, %985 : vector<1x128xf32>
    %988 = arith.divf %986, %987 : vector<1x128xf32>
    %989 = vector.extract_strided_slice %969 {offsets = [0, 256], sizes = [1, 128], strides = [1, 1]} : vector<1x384xf32> to vector<1x128xf32>
    %990 = vector.extract_strided_slice %972 {offsets = [0, 256], sizes = [1, 128], strides = [1, 1]} : vector<1x768xf32> to vector<1x128xf32>
    %991 = arith.addf %990, %525 : vector<1x128xf32>
    %992 = arith.mulf %980, %991 : vector<1x128xf32>
    %993 = arith.addf %989, %992 : vector<1x128xf32>
    %994 = math.tanh %993 : vector<1x128xf32>
    %995 = vector.extract_strided_slice %970 {offsets = [0, 0], sizes = [1, 128], strides = [1, 1]} : vector<1x384xf32> to vector<1x128xf32>
    %996 = vector.extract_strided_slice %972 {offsets = [0, 384], sizes = [1, 128], strides = [1, 1]} : vector<1x768xf32> to vector<1x128xf32>
    %997 = arith.addf %995, %996 : vector<1x128xf32>
    %998 = arith.negf %997 : vector<1x128xf32>
    %999 = math.exp %998 : vector<1x128xf32>
    %cst_254 = arith.constant 1.000000e+00 : f32
    %1000 = vector.broadcast %cst_254 : f32 to vector<1x128xf32>
    %1001 = arith.addf %1000, %999 : vector<1x128xf32>
    %1002 = arith.divf %1000, %1001 : vector<1x128xf32>
    %1003 = vector.extract_strided_slice %970 {offsets = [0, 128], sizes = [1, 128], strides = [1, 1]} : vector<1x384xf32> to vector<1x128xf32>
    %1004 = vector.extract_strided_slice %972 {offsets = [0, 512], sizes = [1, 128], strides = [1, 1]} : vector<1x768xf32> to vector<1x128xf32>
    %1005 = arith.addf %1003, %1004 : vector<1x128xf32>
    %1006 = arith.negf %1005 : vector<1x128xf32>
    %1007 = math.exp %1006 : vector<1x128xf32>
    %cst_255 = arith.constant 1.000000e+00 : f32
    %1008 = vector.broadcast %cst_255 : f32 to vector<1x128xf32>
    %1009 = arith.addf %1008, %1007 : vector<1x128xf32>
    %1010 = arith.divf %1008, %1009 : vector<1x128xf32>
    %1011 = vector.extract_strided_slice %970 {offsets = [0, 256], sizes = [1, 128], strides = [1, 1]} : vector<1x384xf32> to vector<1x128xf32>
    %1012 = vector.extract_strided_slice %972 {offsets = [0, 640], sizes = [1, 128], strides = [1, 1]} : vector<1x768xf32> to vector<1x128xf32>
    %1013 = arith.addf %1012, %526 : vector<1x128xf32>
    %1014 = arith.mulf %1002, %1013 : vector<1x128xf32>
    %1015 = arith.addf %1011, %1014 : vector<1x128xf32>
    %1016 = math.tanh %1015 : vector<1x128xf32>
    %cst_256 = arith.constant 1.000000e+00 : f32
    %1017 = vector.broadcast %cst_256 : f32 to vector<1x128xf32>
    %1018 = arith.subf %1017, %988 : vector<1x128xf32>
    %1019 = arith.mulf %1018, %994 : vector<1x128xf32>
    %1020 = vector.extract_strided_slice %966 {offsets = [0, 0], sizes = [1, 128], strides = [1, 1]} : vector<1x256xf32> to vector<1x128xf32>
    %1021 = arith.mulf %988, %1020 : vector<1x128xf32>
    %1022 = arith.addf %1019, %1021 : vector<1x128xf32>
    %cst_257 = arith.constant 1.000000e+00 : f32
    %1023 = vector.broadcast %cst_257 : f32 to vector<1x128xf32>
    %1024 = arith.subf %1023, %1010 : vector<1x128xf32>
    %1025 = arith.mulf %1024, %1016 : vector<1x128xf32>
    %1026 = vector.extract_strided_slice %966 {offsets = [0, 128], sizes = [1, 128], strides = [1, 1]} : vector<1x256xf32> to vector<1x128xf32>
    %1027 = arith.mulf %1010, %1026 : vector<1x128xf32>
    %1028 = arith.addf %1025, %1027 : vector<1x128xf32>
    %c7_258 = arith.constant 7 : index
    %c0_259 = arith.constant 0 : index
    %1029 = vector.load %arg23[%c7_258, %c0_259] : memref<8x256xf32, #tpu.memory_space<vmem>>, vector<1x128xf32>
    tpu.vector_store %arg23[%c7_258, %c0_259], %1022 {strides = array<i32>} : memref<8x256xf32, #tpu.memory_space<vmem>>, vector<1x128xf32>,
    %c0_260 = arith.constant 0 : index
    %c128_261 = arith.constant 128 : index
    %1030 = vector.load %arg23[%c0_260, %c128_261] : memref<8x256xf32, #tpu.memory_space<vmem>>, vector<1x128xf32>
    tpu.vector_store %arg23[%c0_260, %c128_261], %1028 {strides = array<i32>} : memref<8x256xf32, #tpu.memory_space<vmem>>, vector<1x128xf32>,
    %c0_262 = arith.constant 0 : index
    %c0_263 = arith.constant 0 : index
    %1031 = vector.load %arg23[%c0_262, %c0_263] : memref<8x256xf32, #tpu.memory_space<vmem>>, vector<8x256xf32>
    %c0_264 = arith.constant 0 : index
    %c0_265 = arith.constant 0 : index
    %1032 = vector.load %arg10[%c0_264, %c0_265] : memref<256x128xbf16, #tpu.memory_space<vmem>>, vector<256x128xbf16>
    %c0_266 = arith.constant 0 : index
    %c0_267 = arith.constant 0 : index
    %1033 = vector.load %arg11[%c0_266, %c0_267] : memref<1x128xf32, #tpu.memory_space<vmem>>, vector<1x128xf32>
    %1034 = arith.truncf %1031 : vector<8x256xf32> to vector<8x256xbf16>
    %cst_268 = arith.constant dense<0.000000e+00> : vector<8x128xf32>
    %1035 = tpu.matmul %1034, %1032, %cst_268 {dimension_numbers = #tpu.dot_dimension_numbers<[1], [0], [0], [1], [0, 0, 1, 1], [], []>} : vector<8x256xbf16>, vector<256x128xbf16>, vector<8x128xf32> -> vector<8x128xf32>
    %1036 = vector.broadcast %1033 : vector<1x128xf32> to vector<8x128xf32>
    %1037 = arith.addf %1035, %1036 : vector<8x128xf32>
    %cst_269 = arith.constant 0.000000e+00 : f32
    %1038 = vector.broadcast %cst_269 : f32 to vector<8x128xf32>
    %1039 = arith.maximumf %1037, %1038 : vector<8x128xf32>
    %c0_270 = arith.constant 0 : index
    %c0_271 = arith.constant 0 : index
    %1040 = vector.load %arg12[%c0_270, %c0_271] : memref<128x128xbf16, #tpu.memory_space<vmem>>, vector<128x128xbf16>
    %c0_272 = arith.constant 0 : index
    %c0_273 = arith.constant 0 : index
    %1041 = vector.load %arg13[%c0_272, %c0_273] : memref<1x128xf32, #tpu.memory_space<vmem>>, vector<1x128xf32>
    %1042 = arith.truncf %1039 : vector<8x128xf32> to vector<8x128xbf16>
    %cst_274 = arith.constant dense<0.000000e+00> : vector<8x128xf32>
    %1043 = tpu.matmul %1042, %1040, %cst_274 {dimension_numbers = #tpu.dot_dimension_numbers<[1], [0], [0], [1], [0, 0, 1, 1], [], []>} : vector<8x128xbf16>, vector<128x128xbf16>, vector<8x128xf32> -> vector<8x128xf32>
    %1044 = vector.broadcast %1041 : vector<1x128xf32> to vector<8x128xf32>
    %1045 = arith.addf %1043, %1044 : vector<8x128xf32>
    %cst_275 = arith.constant 0.000000e+00 : f32
    %1046 = vector.broadcast %cst_275 : f32 to vector<8x128xf32>
    %1047 = arith.maximumf %1045, %1046 : vector<8x128xf32>
    %c0_276 = arith.constant 0 : index
    %c0_277 = arith.constant 0 : index
    %1048 = vector.load %arg14[%c0_276, %c0_277] : memref<128x128xbf16, #tpu.memory_space<vmem>>, vector<128x128xbf16>
    %c0_278 = arith.constant 0 : index
    %c0_279 = arith.constant 0 : index
    %1049 = vector.load %arg15[%c0_278, %c0_279] : memref<1x128xf32, #tpu.memory_space<vmem>>, vector<1x128xf32>
    %1050 = arith.truncf %1047 : vector<8x128xf32> to vector<8x128xbf16>
    %cst_280 = arith.constant dense<0.000000e+00> : vector<8x128xf32>
    %1051 = tpu.matmul %1050, %1048, %cst_280 {dimension_numbers = #tpu.dot_dimension_numbers<[1], [0], [0], [1], [0, 0, 1, 1], [], []>} : vector<8x128xbf16>, vector<128x128xbf16>, vector<8x128xf32> -> vector<8x128xf32>
    %1052 = vector.broadcast %1049 : vector<1x128xf32> to vector<8x128xf32>
    %1053 = arith.addf %1051, %1052 : vector<8x128xf32>
    %cst_281 = arith.constant 0.000000e+00 : f32
    %1054 = vector.broadcast %cst_281 : f32 to vector<8x128xf32>
    %1055 = arith.maximumf %1053, %1054 : vector<8x128xf32>
    %c0_282 = arith.constant 0 : index
    %c0_283 = arith.constant 0 : index
    %1056 = vector.load %arg16[%c0_282, %c0_283] : memref<128x128xbf16, #tpu.memory_space<vmem>>, vector<128x128xbf16>
    %c0_284 = arith.constant 0 : index
    %c0_285 = arith.constant 0 : index
    %1057 = vector.load %arg17[%c0_284, %c0_285] : memref<1x128xf32, #tpu.memory_space<vmem>>, vector<1x128xf32>
    %1058 = arith.truncf %1055 : vector<8x128xf32> to vector<8x128xbf16>
    %cst_286 = arith.constant dense<0.000000e+00> : vector<8x128xf32>
    %1059 = tpu.matmul %1058, %1056, %cst_286 {dimension_numbers = #tpu.dot_dimension_numbers<[1], [0], [0], [1], [0, 0, 1, 1], [], []>} : vector<8x128xbf16>, vector<128x128xbf16>, vector<8x128xf32> -> vector<8x128xf32>
    %1060 = vector.broadcast %1057 : vector<1x128xf32> to vector<8x128xf32>
    %1061 = arith.addf %1059, %1060 : vector<8x128xf32>
    %cst_287 = arith.constant 0.000000e+00 : f32
    %1062 = vector.broadcast %cst_287 : f32 to vector<8x128xf32>
    %1063 = arith.maximumf %1061, %1062 : vector<8x128xf32>
    %c0_288 = arith.constant 0 : index
    %c0_289 = arith.constant 0 : index
    %1064 = vector.load %arg18[%c0_288, %c0_289] : memref<128x128xbf16, #tpu.memory_space<vmem>>, vector<128x128xbf16>
    %c0_290 = arith.constant 0 : index
    %c0_291 = arith.constant 0 : index
    %1065 = vector.load %arg19[%c0_290, %c0_291] : memref<1x128xf32, #tpu.memory_space<vmem>>, vector<1x128xf32>
    %1066 = arith.truncf %1063 : vector<8x128xf32> to vector<8x128xbf16>
    %cst_292 = arith.constant dense<0.000000e+00> : vector<8x128xf32>
    %1067 = tpu.matmul %1066, %1064, %cst_292 {dimension_numbers = #tpu.dot_dimension_numbers<[1], [0], [0], [1], [0, 0, 1, 1], [], []>} : vector<8x128xbf16>, vector<128x128xbf16>, vector<8x128xf32> -> vector<8x128xf32>
    %1068 = vector.broadcast %1065 : vector<1x128xf32> to vector<8x128xf32>
    %1069 = arith.addf %1067, %1068 : vector<8x128xf32>
    %c0_293 = arith.constant 0 : index
    %c0_294 = arith.constant 0 : index
    %1070 = vector.load %arg20[%c0_293, %c0_294] : memref<8x128xf32, #tpu.memory_space<vmem>>, vector<8x128xf32>
    tpu.vector_store %arg20[%c0_293, %c0_294], %1069 {strides = array<i32>} : memref<8x128xf32, #tpu.memory_space<vmem>>, vector<8x128xf32>,
    return
  }
  func.func @transform_0(%arg0: i32) -> (i32, i32, i32) {
    %c1_i32 = arith.constant 1 : i32
    %c0_i32 = arith.constant 0 : i32
    %c0_i32_0 = arith.constant 0 : i32
    %c0_i32_1 = arith.constant 0 : i32
    return %c1_i32, %c0_i32, %c0_i32_0 : i32, i32, i32
  }
  func.func @transform_1(%arg0: i32) -> (i32, i32) {
    %c0_i32 = arith.constant 0 : i32
    %c0_i32_0 = arith.constant 0 : i32
    %c0_i32_1 = arith.constant 0 : i32
    return %c0_i32, %c0_i32_0 : i32, i32
  }
  func.func @transform_2(%arg0: i32) -> (i32, i32) {
    %c0_i32 = arith.constant 0 : i32
    %c0_i32_0 = arith.constant 0 : i32
    %c0_i32_1 = arith.constant 0 : i32
    return %c0_i32, %c0_i32_0 : i32, i32
  }
  func.func @transform_3(%arg0: i32) -> (i32, i32) {
    %c0_i32 = arith.constant 0 : i32
    %c0_i32_0 = arith.constant 0 : i32
    %c0_i32_1 = arith.constant 0 : i32
    return %c0_i32, %c0_i32_0 : i32, i32
  }
  func.func @transform_4(%arg0: i32) -> (i32, i32) {
    %c0_i32 = arith.constant 0 : i32
    %c0_i32_0 = arith.constant 0 : i32
    %c0_i32_1 = arith.constant 0 : i32
    return %c0_i32, %c0_i32_0 : i32, i32
  }
  func.func @transform_5(%arg0: i32) -> (i32, i32) {
    %c0_i32 = arith.constant 0 : i32
    %c0_i32_0 = arith.constant 0 : i32
    %c0_i32_1 = arith.constant 0 : i32
    return %c0_i32, %c0_i32_0 : i32, i32
  }
  func.func @transform_6(%arg0: i32) -> (i32, i32) {
    %c0_i32 = arith.constant 0 : i32
    %c0_i32_0 = arith.constant 0 : i32
    %c0_i32_1 = arith.constant 0 : i32
    return %c0_i32, %c0_i32_0 : i32, i32
  }
  func.func @transform_7(%arg0: i32) -> (i32, i32) {
    %c0_i32 = arith.constant 0 : i32
    %c0_i32_0 = arith.constant 0 : i32
    %c0_i32_1 = arith.constant 0 : i32
    return %c0_i32, %c0_i32_0 : i32, i32
  }
  func.func @transform_8(%arg0: i32) -> (i32, i32) {
    %c0_i32 = arith.constant 0 : i32
    %c0_i32_0 = arith.constant 0 : i32
    %c0_i32_1 = arith.constant 0 : i32
    return %c0_i32, %c0_i32_0 : i32, i32
  }
  func.func @transform_9(%arg0: i32) -> (i32, i32) {
    %c0_i32 = arith.constant 0 : i32
    %c0_i32_0 = arith.constant 0 : i32
    %c0_i32_1 = arith.constant 0 : i32
    return %c0_i32, %c0_i32_0 : i32, i32
  }
  func.func @transform_10(%arg0: i32) -> (i32, i32) {
    %c0_i32 = arith.constant 0 : i32
    %c0_i32_0 = arith.constant 0 : i32
    %c0_i32_1 = arith.constant 0 : i32
    return %c0_i32, %c0_i32_0 : i32, i32
  }
  func.func @transform_11(%arg0: i32) -> (i32, i32) {
    %c0_i32 = arith.constant 0 : i32
    %c0_i32_0 = arith.constant 0 : i32
    %c0_i32_1 = arith.constant 0 : i32
    return %c0_i32, %c0_i32_0 : i32, i32
  }
  func.func @transform_12(%arg0: i32) -> (i32, i32) {
    %c0_i32 = arith.constant 0 : i32
    %c0_i32_0 = arith.constant 0 : i32
    %c0_i32_1 = arith.constant 0 : i32
    return %c0_i32, %c0_i32_0 : i32, i32
  }
  func.func @transform_13(%arg0: i32) -> (i32, i32) {
    %c0_i32 = arith.constant 0 : i32
    %c0_i32_0 = arith.constant 0 : i32
    %c0_i32_1 = arith.constant 0 : i32
    return %c0_i32, %c0_i32_0 : i32, i32
  }
  func.func @transform_14(%arg0: i32) -> (i32, i32) {
    %c0_i32 = arith.constant 0 : i32
    %c0_i32_0 = arith.constant 0 : i32
    %c0_i32_1 = arith.constant 0 : i32
    return %c0_i32, %c0_i32_0 : i32, i32
  }
  func.func @transform_15(%arg0: i32) -> (i32, i32) {
    %c0_i32 = arith.constant 0 : i32
    %c0_i32_0 = arith.constant 0 : i32
    %c0_i32_1 = arith.constant 0 : i32
    return %c0_i32, %c0_i32_0 : i32, i32
  }
  func.func @transform_16(%arg0: i32) -> (i32, i32) {
    %c0_i32 = arith.constant 0 : i32
    %c0_i32_0 = arith.constant 0 : i32
    %c0_i32_1 = arith.constant 0 : i32
    return %c0_i32, %c0_i32_0 : i32, i32
  }
  func.func @transform_17(%arg0: i32) -> (i32, i32) {
    %c0_i32 = arith.constant 0 : i32
    %c0_i32_0 = arith.constant 0 : i32
    %c0_i32_1 = arith.constant 0 : i32
    return %c0_i32, %c0_i32_0 : i32, i32
  }
  func.func @transform_18(%arg0: i32) -> (i32, i32) {
    %c0_i32 = arith.constant 0 : i32
    %c0_i32_0 = arith.constant 0 : i32
    %c0_i32_1 = arith.constant 0 : i32
    return %c0_i32, %c0_i32_0 : i32, i32
  }
  func.func @transform_19(%arg0: i32) -> (i32, i32) {
    %c0_i32 = arith.constant 0 : i32
    %c0_i32_0 = arith.constant 0 : i32
    %c0_i32_1 = arith.constant 0 : i32
    return %c0_i32, %c0_i32_0 : i32, i32
  }
}

</mosaic_0001>

<bundles_post_ra>
// kernel: sentiment_gru_forward.1
= control target key start
LH: loop header
LB: loop body
LE: loop exit
PB: predicated region body
PF: predicated region fallthrough
CT: control target
= control target key end

     0   :  { %s10983_s0 = inlined_call_operand.hbm [shape: f32[2,8,16], index: 0, kind: input, shape index: {}]   ;;  %s10984_s1 = inlined_call_operand.hbm [shape: bf16[16,768], index: 1, kind: input, shape index: {}]   ;;  %s10985_s2 = inlined_call_operand.hbm [shape: bf16[256,768], index: 2, kind: input, shape index: {}]   ;;  %s10986_s3 = inlined_call_operand.vmem [shape: f32[1,768], index: 3, kind: input, shape index: {}]   ;;  %s10987_s4 = inlined_call_operand.vmem [shape: f32[1,256], index: 4, kind: input, shape index: {}]   ;;  %s10988_s5 = inlined_call_operand.hbm [shape: bf16[256,768], index: 5, kind: input, shape index: {}]   ;;  %s10989_s6 = inlined_call_operand.hbm [shape: bf16[256,768], index: 6, kind: input, shape index: {}]   ;;  %s10990_s7 = inlined_call_operand.vmem [shape: f32[1,768], index: 7, kind: input, shape index: {}]   ;;  %s10991_s8 = inlined_call_operand.vmem [shape: f32[1,256], index: 8, kind: input, shape index: {}]   ;;  %s10992_s9 = inlined_call_operand.hbm [shape: bf16[256,128], index: 9, kind: input, shape index: {}]   ;;  %s10993_s10 = inlined_call_operand.hbm [shape: f32[1,128], index: 10, kind: input, shape index: {}]   ;;  %s10994_s11 = inlined_call_operand.hbm [shape: bf16[128,128], index: 11, kind: input, shape index: {}]   ;;  %s10995_s12 = inlined_call_operand.hbm [shape: f32[1,128], index: 12, kind: input, shape index: {}]   ;;  %s10996_s13 = inlined_call_operand.hbm [shape: bf16[128,128], index: 13, kind: input, shape index: {}]   ;;  %s10997_s14 = inlined_call_operand.hbm [shape: f32[1,128], index: 14, kind: input, shape index: {}]   ;;  %s10998_s15 = inlined_call_operand.hbm [shape: bf16[128,128], index: 15, kind: input, shape index: {}]   ;;  %s10999_s16 = inlined_call_operand.hbm [shape: f32[1,128], index: 16, kind: input, shape index: {}]   ;;  %s11000_s17 = inlined_call_operand.hbm [shape: bf16[128,128], index: 17, kind: input, shape index: {}]   ;;  %s11001_s18 = inlined_call_operand.vmem [shape: f32[1,128], index: 18, kind: input, shape index: {}]   ;;  %s11002_s19 = inlined_call_operand.vmem [shape: f32[8,128], index: 19, kind: output, shape index: {}]  }
   0x1   :  { %11408 = sst [smem:[#allocation97_spill]] %s10983_s0 }
   0x2   :  { %11409 = sst [smem:[#allocation98_spill]] %s10984_s1 }
   0x3   :  { %11410 = sst [smem:[#allocation99_spill]] %s10985_s2 }
   0x4   :  { %11411 = sst [smem:[#allocation100_spill]] %s10986_s3 }
   0x5   :  { %24 = vsyncpa [#allocation6], 0 }
   0x6   :  { %25 = vsyncpa [#allocation8], 0 }
   0x7   :  { %26 = vsyncpa [#allocation11], 0 }
   0x8   :  { %27 = vsyncpa [#allocation14], 0 }
   0x9   :  { %28 = vsyncpa [#allocation17], 0 }
   0xa   :  { %29 = vsyncpa [#allocation20], 0 }
   0xb   :  { %30 = vsyncpa [#allocation23], 0 }
   0xc   :  { %31 = vsyncpa [#allocation26], 0  ;;  %s7976_s0 = smov [#allocation7]  }
   0xd   :  { %s48_s30 = sshll.u32 %s7976_s0, 4  ;;  %s49_s30 = int_to_ptr.vmem [resolvable:$true] %s48_s30 }
   0xe   :  { %s7685_s20 = scalar_lea.vmem %s49_s30, 768  ;;  %p7690_p1 = scmp.lt.s32.totalorder %s49_s30, %s49_s30 }
   0xf   :  { %p7686_p0 = scmp.ne.s32.totalorder %s49_s30, %s7685_s20  ;;  %p7691_p2 = scmp.lt.s32.totalorder %s7685_s20, %s7685_s20 }
  0x11   :  { %p7692_p3 = por %p7691_p2, %p7690_p1 }
  0x13   :  { %p7693_p4 = pnand %p7692_p3, %p7686_p0 }
  0x15   :  { %7696 = shalt.err (!%p7693_p4)
}
  0x16   :  { %s7977_s21 = smov 384   ;;  %s7978_s1 = smov 24  }
  0x17   :  { %s11412_s23 = sld [smem:[#allocation98_spill]]  ;;  %s7979_s24 = smov [#allocation10]  }
  0x18   :  { %s76_s25 = sshll.u32 %s7979_s24, 4  ;;  %s7980_s3 = smov [#allocation13]   ;;  %s77_s25 = int_to_ptr.vmem [resolvable:$true] %s76_s25 }
  0x19   :  { %s104_s26 = sshll.u32 %s7980_s3, 4  ;;  %s7705_s27 = scalar_lea.vmem %s77_s25, 12288  ;;  %s105_s26 = int_to_ptr.vmem [resolvable:$true] %s104_s26 }
  0x1a   :  { %p7706_p5 = scmp.ne.s32.totalorder %s77_s25, %s7705_s27  ;;  %p7710_p6 = scmp.lt.s32.totalorder %s77_s25, %s77_s25 }
  0x1b   :  { %p7711_p7 = scmp.lt.s32.totalorder %s7705_s27, %s7705_s27 }
  0x1d   :  { %54 = dma.hbm_to_vmem [thread:$0]  %s11412_s23, 768, %s49_s30, [#allocation8], %s7977_s21, %s7977_s21, %s7978_s1  }
  0x1e   :  { %p7712_p8 = por %p7711_p7, %p7710_p6 }
  0x20   :  { %p7713_p9 = pnand %p7712_p8, %p7706_p5 }
  0x22   :  { %7716 = shalt.err (!%p7713_p9)
}
  0x23   :  { %82 = dma.hbm_to_vmem [thread:$0]  %s10988_s5, 12288, %s77_s25, [#allocation11], %s7977_s21, %s7977_s21, %s7978_s1  }
  0x24   :  { %s7725_s0 = scalar_lea.vmem %s105_s26, 2048  ;;  %p7730_p11 = scmp.lt.s32.totalorder %s105_s26, %s105_s26 }
  0x25   :  { %p7726_p10 = scmp.ne.s32.totalorder %s105_s26, %s7725_s0  ;;  %p7731_p12 = scmp.lt.s32.totalorder %s7725_s0, %s7725_s0 }
  0x27   :  { %p7732_p13 = por %p7731_p12, %p7730_p11 }
  0x29   :  { %p7733_p0 = pnand %p7732_p13, %p7726_p10 }
  0x2b   :  { %7736 = shalt.err (!%p7733_p0)
}
  0x2c   :  { %s7981_s30 = smov 64   ;;  %s7982_s20 = smov 4  }
  0x2d   :  { %110 = dma.hbm_to_vmem [thread:$0]  %s10992_s9, 2048, %s105_s26, [#allocation14], %s7981_s30, %s7981_s30, %s7982_s20  }
  0x2e   :  { %s7983_s23 = smov [#allocation16]   ;;  %s7984_s5 = smov [#allocation19]  }
  0x2f   :  { %s126_s24 = sshll.u32 %s7983_s23, 4  ;;  %s148_s25 = sshll.u32 %s7984_s5, 4  ;;  %s127_s24 = int_to_ptr.vmem [resolvable:$true] %s126_s24  ;;  %s149_s25 = int_to_ptr.vmem [resolvable:$true] %s148_s25 }
  0x30   :  { %s7745_s3 = scalar_lea.vmem %s127_s24, 1024  ;;  %p7750_p2 = scmp.lt.s32.totalorder %s127_s24, %s127_s24 }
  0x31   :  { %p7746_p1 = scmp.ne.s32.totalorder %s127_s24, %s7745_s3  ;;  %p7751_p3 = scmp.lt.s32.totalorder %s7745_s3, %s7745_s3 }
  0x33   :  { %p7752_p4 = por %p7751_p3, %p7750_p2 }
  0x35   :  { %p7753_p5 = pnand %p7752_p4, %p7746_p1 }
  0x37   :  { %7756 = shalt.err (!%p7753_p5)
}
  0x38   :  { %132 = dma.hbm_to_vmem [thread:$0]  %s10994_s11, 1024, %s127_s24, [#allocation17], %s7981_s30, %s7981_s30, %s7982_s20  }
  0x39   :  { %s7765_s9 = scalar_lea.vmem %s149_s25, 1024  ;;  %p7770_p7 = scmp.lt.s32.totalorder %s149_s25, %s149_s25 }
  0x3a   :  { %p7766_p6 = scmp.ne.s32.totalorder %s149_s25, %s7765_s9  ;;  %p7771_p8 = scmp.lt.s32.totalorder %s7765_s9, %s7765_s9 }
  0x3c   :  { %p7772_p9 = por %p7771_p8, %p7770_p7 }
  0x3e   :  { %p7773_p10 = pnand %p7772_p9, %p7766_p6 }
  0x40   :  { %7776 = shalt.err (!%p7773_p10)
}
  0x41   :  { %154 = dma.hbm_to_vmem [thread:$0]  %s10996_s13, 1024, %s149_s25, [#allocation20], %s7981_s30, %s7981_s30, %s7982_s20  }
  0x42   :  { %s7985_s0 = smov [#allocation22]   ;;  %s11413_s11 = sld [smem:[#allocation97_spill]] }
  0x43   :  { %s170_s22 = sshll.u32 %s7985_s0, 4  ;;  %s171_s22 = int_to_ptr.vmem [resolvable:$true] %s170_s22 }
  0x44   :  { %s7785_s5 = scalar_lea.vmem %s171_s22, 1024  ;;  %p7790_p12 = scmp.lt.s32.totalorder %s171_s22, %s171_s22 }
  0x45   :  { %p7786_p11 = scmp.ne.s32.totalorder %s171_s22, %s7785_s5  ;;  %p7791_p13 = scmp.lt.s32.totalorder %s7785_s5, %s7785_s5 }
  0x47   :  { %p7792_p0 = por %p7791_p13, %p7790_p12 }
  0x48   :  { %s37_s24 = scalar_lea.hbm %s11413_s11, 128 }
  0x49   :  { %p7793_p1 = pnand %p7792_p0, %p7786_p11 }
  0x4b   :  { %7796 = shalt.err (!%p7793_p1)
}
  0x4c   :  { %176 = dma.hbm_to_vmem [thread:$0]  %s10998_s15, 1024, %s171_s22, [#allocation23], %s7981_s30, %s7981_s30, %s7982_s20  }
  0x4d   :  { %s7986_s13 = smov [#allocation5]   ;;  %s7987_s28 = smov [#allocation9]  }
  0x4e   :  { %s39_s25 = sshll.u32 %s7986_s13, 4  ;;  %s60_s9 = sshll.u32 %s7987_s28, 4  ;;  %s40_s25 = int_to_ptr.vmem [resolvable:$true] %s39_s25  ;;  %s61_s9 = int_to_ptr.vmem [resolvable:$true] %s60_s9 }
  0x4f   :  { %s7807_s26 = scalar_lea.vmem %s40_s25, 128  ;;  %p7812_p3 = scmp.lt.s32.totalorder %s40_s25, %s40_s25 }
  0x50   :  { %p7808_p2 = scmp.ne.s32.totalorder %s40_s25, %s7807_s26  ;;  %p7813_p4 = scmp.lt.s32.totalorder %s7807_s26, %s7807_s26 }
  0x52   :  { %p7814_p5 = por %p7813_p4, %p7812_p3 }
  0x54   :  { %p7815_p6 = pnand %p7814_p5, %p7808_p2 }
  0x56   :  { %7818 = shalt.err (!%p7815_p6)
}
  0x57   :  { %42 = dma.hbm_to_vmem [thread:$0]  %s37_s24, 128, %s40_s25, [#allocation6]  }
  0x58   :  { %s7828_s29 = scalar_lea.vmem %s61_s9, 12288  ;;  %p7833_p8 = scmp.lt.s32.totalorder %s61_s9, %s61_s9 }
  0x59   :  { %p7829_p7 = scmp.ne.s32.totalorder %s61_s9, %s7828_s29  ;;  %p7834_p9 = scmp.lt.s32.totalorder %s7828_s29, %s7828_s29 }
  0x5b   :  { %p7835_p10 = por %p7834_p9, %p7833_p8 }
  0x5d   :  { %p7836_p11 = pnand %p7835_p10, %p7829_p7 }
  0x5f   :  { %7839 = shalt.err (!%p7836_p11)
}
  0x60   :  { %s11414_s22 = sld [smem:[#allocation99_spill]]  ;;  %s7988_s2 = smov [#allocation12]  }
  0x61   :  { %s88_s23 = sshll.u32 %s7988_s2, 4  ;;  %s7989_s11 = smov [#allocation15]   ;;  %s89_s23 = int_to_ptr.vmem [resolvable:$true] %s88_s23 }
  0x62   :  { %s117_s24 = sshll.u32 %s7989_s11, 4  ;;  %s7848_s5 = scalar_lea.vmem %s89_s23, 12288  ;;  %s118_s24 = int_to_ptr.vmem [resolvable:$true] %s117_s24 }
  0x63   :  { %p7849_p12 = scmp.ne.s32.totalorder %s89_s23, %s7848_s5  ;;  %p7853_p13 = scmp.lt.s32.totalorder %s89_s23, %s89_s23 }
  0x64   :  { %p7854_p0 = scmp.lt.s32.totalorder %s7848_s5, %s7848_s5 }
  0x66   :  { %66 = dma.hbm_to_vmem [thread:$0]  %s11414_s22, 12288, %s61_s9, [#allocation8], %s7977_s21, %s7977_s21, %s7978_s1  }
  0x67   :  { %p7855_p1 = por %p7854_p0, %p7853_p13 }
  0x69   :  { %p7856_p2 = pnand %p7855_p1, %p7849_p12 }
  0x6b   :  { %7859 = shalt.err (!%p7856_p2)
}
  0x6c   :  { %94 = dma.hbm_to_vmem [thread:$0]  %s10989_s6, 12288, %s89_s23, [#allocation11], %s7977_s21, %s7977_s21, %s7978_s1  }
  0x6d   :  { %s7868_s13 = scalar_lea.vmem %s118_s24, 16  ;;  %s7872_s25 = scalar_lea.vmem %s118_s24, 32 }
  0x6e   :  { %p7869_p3 = scmp.ne.s32.totalorder %s118_s24, %s7868_s13  ;;  %p7873_p4 = scmp.lt.s32.totalorder %s118_s24, %s118_s24 }
  0x6f   :  { %p7874_p5 = scmp.lt.s32.totalorder %s7872_s25, %s7868_s13 }
  0x71   :  { %p7875_p6 = por %p7874_p5, %p7873_p4 }
  0x73   :  { %p7876_p7 = pnand %p7875_p6, %p7869_p3 }
  0x75   :  { %7879 = shalt.err (!%p7876_p7)
}
  0x76   :  { %120 = dma.hbm_to_vmem [thread:$0]  %s10993_s10, 16, %s118_s24, [#allocation14]  }
  0x77   :  { %s7990_s26 = smov [#allocation18]   ;;  %s7991_s15 = smov [#allocation21]  }
  0x78   :  { %s139_s29 = sshll.u32 %s7990_s26, 4  ;;  %s161_s0 = sshll.u32 %s7991_s15, 4  ;;  %s140_s29 = int_to_ptr.vmem [resolvable:$true] %s139_s29  ;;  %s162_s0 = int_to_ptr.vmem [resolvable:$true] %s161_s0 }
  0x79   :  { %s7888_s22 = scalar_lea.vmem %s140_s29, 16  ;;  %s7892_s6 = scalar_lea.vmem %s140_s29, 32 }
  0x7a   :  { %p7889_p8 = scmp.ne.s32.totalorder %s140_s29, %s7888_s22  ;;  %p7893_p9 = scmp.lt.s32.totalorder %s140_s29, %s140_s29 }
  0x7b   :  { %p7894_p10 = scmp.lt.s32.totalorder %s7892_s6, %s7888_s22 }
  0x7d   :  { %p7895_p11 = por %p7894_p10, %p7893_p9 }
  0x7f   :  { %p7896_p12 = pnand %p7895_p11, %p7889_p8 }
  0x81   :  { %7899 = shalt.err (!%p7896_p12)
}
  0x82   :  { %142 = dma.hbm_to_vmem [thread:$0]  %s10995_s12, 16, %s140_s29, [#allocation17]  }
  0x83   :  { %s7908_s2 = scalar_lea.vmem %s162_s0, 16  ;;  %s7912_s10 = scalar_lea.vmem %s162_s0, 32 }
  0x84   :  { %p7909_p13 = scmp.ne.s32.totalorder %s162_s0, %s7908_s2  ;;  %p7913_p0 = scmp.lt.s32.totalorder %s162_s0, %s162_s0 }
  0x85   :  { %p7914_p1 = scmp.lt.s32.totalorder %s7912_s10, %s7908_s2 }
  0x87   :  { %p7915_p2 = por %p7914_p1, %p7913_p0 }
  0x89   :  { %p7916_p3 = pnand %p7915_p2, %p7909_p13 }
  0x8b   :  { %7919 = shalt.err (!%p7916_p3)
}
  0x8c   :  { %164 = dma.hbm_to_vmem [thread:$0]  %s10997_s14, 16, %s162_s0, [#allocation20]  }
  0x8d   :  { %s7992_s24 = smov [#allocation24]   ;;  %s7993_s3 = smov [#allocation25]  }
  0x8e   :  { %s183_s5 = sshll.u32 %s7992_s24, 4  ;;  %s192_s27 = sshll.u32 %s7993_s3, 4  ;;  %s184_s5 = int_to_ptr.vmem [resolvable:$true] %s183_s5  ;;  %s193_s27 = int_to_ptr.vmem [resolvable:$true] %s192_s27 }
  0x8f   :  { %s7928_s13 = scalar_lea.vmem %s184_s5, 16  ;;  %s7932_s12 = scalar_lea.vmem %s184_s5, 32 }
  0x90   :  { %p7929_p4 = scmp.ne.s32.totalorder %s184_s5, %s7928_s13  ;;  %p7933_p5 = scmp.lt.s32.totalorder %s184_s5, %s184_s5 }
  0x91   :  { %p7934_p6 = scmp.lt.s32.totalorder %s7932_s12, %s7928_s13 }
  0x93   :  { %p7935_p7 = por %p7934_p6, %p7933_p5 }
  0x95   :  { %p7936_p8 = pnand %p7935_p7, %p7929_p4 }
  0x97   :  { %7939 = shalt.err (!%p7936_p8)
}
  0x98   :  { %186 = dma.hbm_to_vmem [thread:$0]  %s10999_s16, 16, %s184_s5, [#allocation23]  }
  0x99   :  { %s7948_s9 = scalar_lea.vmem %s193_s27, 1024  ;;  %p7953_p10 = scmp.lt.s32.totalorder %s193_s27, %s193_s27 }
  0x9a   :  { %p7949_p9 = scmp.ne.s32.totalorder %s193_s27, %s7948_s9  ;;  %p7954_p11 = scmp.lt.s32.totalorder %s7948_s9, %s7948_s9 }
  0x9c   :  { %p7955_p12 = por %p7954_p11, %p7953_p10 }
  0x9e   :  { %p7956_p13 = pnand %p7955_p12, %p7949_p9 }
  0xa0   :  { %7959 = shalt.err (!%p7956_p13)
}
  0xa1   :  { %198 = dma.hbm_to_vmem [thread:$0]  %s11000_s17, 1024, %s193_s27, [#allocation26], %s7981_s30, %s7981_s30, %s7982_s20  }
  0xa2   :  { %7960 = dma.done.wait [#allocation6], 128  }
  0xa3   :  { %7961 = vsyncadd [#allocation6], 4294967168 }
  0xa4   :  { %7962 = dma.done.wait [#allocation8], 13056  }
  0xa5   :  { %7963 = vsyncadd [#allocation8], 4294954240 }
  0xa6   :  { %7964 = dma.done.wait [#allocation11], 24576  }
  0xa7   :  { %7965 = vsyncadd [#allocation11], 4294942720 }
  0xa8   :  { %7966 = dma.done.wait [#allocation14], 2064  }
  0xa9   :  { %7967 = vsyncadd [#allocation14], 4294965232 }
  0xaa   :  { %7968 = dma.done.wait [#allocation17], 1040  }
  0xab   :  { %7969 = vsyncadd [#allocation17], 4294966256 }
  0xac   :  { %7970 = dma.done.wait [#allocation20], 1040  }
  0xad   :  { %7971 = vsyncadd [#allocation20], 4294966256 }
  0xae   :  { %7972 = dma.done.wait [#allocation23], 1040  }
  0xaf   :  { %7973 = vsyncadd [#allocation23], 4294966256 }
  0xb0   :  { %7974 = dma.done.wait [#allocation26], 1024  }
  0xb1   :  { %7975 = vsyncadd [#allocation26], 4294966272  ;;  %v11010_v0 = vmov 0   ;;  %v6500_v1 = vld [vmem:[#allocation7 + $0x4] ss:$24 sps:$4 sm:$0xff]   ;;  %vm314_vm0 = vcmask 130048  }
  0xb2   :  { %350 = vmatprep.mubr.bf16.mxu0 %v11010_v0  ;;  %1060 = vmatprep.mubr.bf16.mxu1 %v11010_v0  ;;  %v8168_v2 = vld [vmem:[#allocation9 + $0x154] ss:$24 sps:$4 sm:$0xff]   ;;  %v6504_v3 = vld [vmem:[#allocation7] ss:$24 sps:$4 sm:$0xff]   ;;  %v8173_v7 = vld [vmem:[#allocation9 + $0x124] ss:$24 sps:$4 sm:$0xff]  }
  0xb3   :  { %332 = vmatprep.subr.bf16.mxu0 %v6500_v1  ;;  %v8170_v4 = vld [vmem:[#allocation9 + $0x150] ss:$24 sps:$4 sm:$0xff]   ;;  %1028 = vmatprep.subr.bf16.mxu1 %v8168_v2  ;;  %v8176_v8 = vld [vmem:[#allocation9 + $0x120] ss:$24 sps:$4 sm:$0xff]   ;;  %v6511_v10 = vld [vmem:[#allocation7 + $0xc] ss:$24 sps:$4 sm:$0xff]  }
  0xb4   :  { %v244_v5 = vld [vmem:[#allocation5] sm:$0xff]  ;;  %333 = vmatpush1.bf16.msra.mxu0 %v6504_v3  ;;  %1029 = vmatpush1.bf16.msra.mxu1 %v8170_v4  ;;  %v6509_v9 = vld [vmem:[#allocation7 + $0x8] ss:$24 sps:$4 sm:$0xff]   ;;  %v8187_v13 = vld [vmem:[#allocation9 + $0xc4] ss:$24 sps:$4 sm:$0xff]   ;;  %s11437_s30 = sld [smem:[#allocation100_spill]] }
  0xb5   :  { %v245_v6 = vpack.c.bf16 %v244_v5, %v244_v5  ;;  %1030 = vmatprep.subr.bf16.mxu1 %v8173_v7  ;;  %v8179_v11 = vld [vmem:[#allocation9 + $0xf4] ss:$24 sps:$4 sm:$0xff]   ;;  %373 = vmatprep.subr.bf16.mxu0 %v6511_v10  ;;  %v8183_v12 = vld [vmem:[#allocation9 + $0xf0] ss:$24 sps:$4 sm:$0xff]   ;;  %v6520_v14 = vld [vmem:[#allocation7 + $0x14] ss:$24 sps:$4 sm:$0xff]  }
  0xb6   :  { %v8189_v15 = vld [vmem:[#allocation9 + $0xc0] ss:$24 sps:$4 sm:$0xff]   ;;  %v8193_v17 = vld [vmem:[#allocation9 + $0x94] ss:$24 sps:$4 sm:$0xff]   ;;  %v8199_v19 = vld [vmem:[#allocation9 + $0x90] ss:$24 sps:$4 sm:$0xff]  }
  0xb7   :  { %5933 = vmatmul.mubr.msk.bf16.vlgmr.msra.gmra.mxu0 %vm314_vm0, %v245_v6  ;;  %v6518_v16 = vld [vmem:[#allocation7 + $0x10] ss:$24 sps:$4 sm:$0xff]   ;;  %v8195_v18 = vld [vmem:[#allocation9 + $0x15c] ss:$24 sps:$4 sm:$0xff]   ;;  %v8212_v23 = vld [vmem:[#allocation9 + $0x12c] ss:$24 sps:$4 sm:$0xff]  }
  0xb8   :  { %1031 = vmatpush1.bf16.msra.mxu1 %v8176_v8  ;;  %374 = vmatpush1.bf16.msra.mxu0 %v6509_v9  ;;  %v8203_v20 = vld [vmem:[#allocation9 + $0x64] ss:$24 sps:$4 sm:$0xff]   ;;  %v8206_v21 = vld [vmem:[#allocation9 + $0x158] ss:$24 sps:$4 sm:$0xff]   ;;  %v8214_v24 = vld [vmem:[#allocation9 + $0x34] ss:$24 sps:$4 sm:$0xff]  }
  0xb9   :  { %1032 = vmatprep.subr.bf16.mxu1 %v8179_v11  ;;  %391 = vmatprep.mubr.bf16.mxu0 %v11010_v0  ;;  %v8209_v22 = vld [vmem:[#allocation9 + $0x60] ss:$24 sps:$4 sm:$0xff]   ;;  %v8219_v26 = vld [vmem:[#allocation9 + $0x30] ss:$24 sps:$4 sm:$0xff]   ;;  %v8223_v27 = vld [vmem:[#allocation9 + $0xfc] ss:$24 sps:$4 sm:$0xff]  }
  0xba   :  { %414 = vmatprep.subr.bf16.mxu0 %v6520_v14  ;;  %v8217_v25 = vld [vmem:[#allocation9 + $0x128] ss:$24 sps:$4 sm:$0xff]   ;;  %v8227_v28 = vld [vmem:[#allocation9 + $0x4] ss:$24 sps:$4 sm:$0xff]   ;;  %v8230_v29 = vld [vmem:[#allocation9 + $0xf8] ss:$24 sps:$4 sm:$0xff]  }
  0xbb   :  { %v8234_v30 = vld [vmem:[#allocation9] ss:$24 sps:$4 sm:$0xff]   ;;  %v8238_v31 = vld [vmem:[#allocation9 + $0xcc] ss:$24 sps:$4 sm:$0xff]   ;;  %v8244_v34 = vld [vmem:[#allocation9 + $0x2d0] ss:$24 sps:$4 sm:$0xff]  }
  0xbc   :  { %1033 = vmatpush1.bf16.msra.mxu1 %v8183_v12  ;;  %v8240_v32 = vld [vmem:[#allocation9 + $0x2d4] ss:$24 sps:$4 sm:$0xff]   ;;  %v8242_v33 = vld [vmem:[#allocation9 + $0xc8] ss:$24 sps:$4 sm:$0xff]   ;;  %v8252_v36 = vld [vmem:[#allocation9 + $0x2a4] ss:$24 sps:$4 sm:$0xff]  }
  0xbd   :  { %1034 = vmatprep.subr.bf16.mxu1 %v8187_v13  ;;  %v8248_v35 = vld [vmem:[#allocation9 + $0x9c] ss:$24 sps:$4 sm:$0xff]   ;;  %v8254_v37 = vld [vmem:[#allocation9 + $0x98] ss:$24 sps:$4 sm:$0xff]   ;;  %v8262_v39 = vld [vmem:[#allocation9 + $0x6c] ss:$24 sps:$4 sm:$0xff]  }
  0xbe   :  { %v8258_v38 = vld [vmem:[#allocation9 + $0x2a0] ss:$24 sps:$4 sm:$0xff]   ;;  %v8264_v40 = vld [vmem:[#allocation9 + $0x274] ss:$24 sps:$4 sm:$0xff]   ;;  %v8270_v42 = vld [vmem:[#allocation9 + $0x270] ss:$24 sps:$4 sm:$0xff]  }
  0xbf   :  { %5934 = vmatmul.mubr.msk.bf16.vlgmr.msra.gmra.mxu0 %vm314_vm0, %v245_v6  ;;  %v8266_v41 = vld [vmem:[#allocation9 + $0x68] ss:$24 sps:$4 sm:$0xff]   ;;  %v8274_v43 = vld [vmem:[#allocation9 + $0x3c] ss:$24 sps:$4 sm:$0xff]   ;;  %v8278_v45 = vld [vmem:[#allocation9 + $0x38] ss:$24 sps:$4 sm:$0xff]  }
  0xc0   :  { %1035 = vmatpush1.bf16.msra.mxu1 %v8189_v15  ;;  %415 = vmatpush1.bf16.msra.mxu0 %v6518_v16  ;;  %v8276_v44 = vld [vmem:[#allocation9 + $0x244] ss:$24 sps:$4 sm:$0xff]   ;;  %v8282_v46 = vld [vmem:[#allocation9 + $0x240] ss:$24 sps:$4 sm:$0xff]   ;;  %v8288_v48 = vld [vmem:[#allocation9 + $0x214] ss:$24 sps:$4 sm:$0xff]  }
  0xc1   :  { %1036 = vmatprep.subr.bf16.mxu1 %v8193_v17  ;;  %432 = vmatprep.mubr.bf16.mxu0 %v11010_v0  ;;  %v8286_v47 = vld [vmem:[#allocation9 + $0xc] ss:$24 sps:$4 sm:$0xff]   ;;  %v8290_v49 = vld [vmem:[#allocation9 + $0x8] ss:$24 sps:$4 sm:$0xff]   ;;  %v8298_v51 = vld [vmem:[#allocation9 + $0x2dc] ss:$24 sps:$4 sm:$0xff]  }
  0xc2   :  { %1069 = vmatprep.subr.bf16.mxu0 %v8195_v18  ;;  %v8294_v50 = vld [vmem:[#allocation9 + $0x210] ss:$24 sps:$4 sm:$0xff]   ;;  %v8300_v52 = vld [vmem:[#allocation9 + $0x1e4] ss:$24 sps:$4 sm:$0xff]   ;;  %v8306_v54 = vld [vmem:[#allocation9 + $0x1e0] ss:$24 sps:$4 sm:$0xff]  }
  0xc3   :  { %v8302_v53 = vld [vmem:[#allocation9 + $0x2d8] ss:$24 sps:$4 sm:$0xff]   ;;  %v8310_v55 = vld [vmem:[#allocation9 + $0x2ac] ss:$24 sps:$4 sm:$0xff]   ;;  %v8314_v57 = vld [vmem:[#allocation9 + $0x2a8] ss:$24 sps:$4 sm:$0xff]  }
  0xc4   :  { %1037 = vmatpush1.bf16.msra.mxu1 %v8199_v19  ;;  %11415 = vst [vmem:[#allocation35_spill] sm:$0xff] %v8302_v53  ;;  %11416 = vst [vmem:[#allocation36_spill] sm:$0xff] %v8310_v55  ;;  %v8312_v56 = vld [vmem:[#allocation9 + $0x1b4] ss:$24 sps:$4 sm:$0xff]   ;;  %v8318_v58 = vld [vmem:[#allocation9 + $0x1b0] ss:$24 sps:$4 sm:$0xff]  }
  0xc5   :  { %1038 = vmatprep.subr.bf16.mxu1 %v8203_v20  ;;  %11417 = vst [vmem:[#allocation37_spill] sm:$0xff] %v8314_v57  ;;  %v8322_v59 = vld [vmem:[#allocation9 + $0x27c] ss:$24 sps:$4 sm:$0xff]   ;;  %v8326_v61 = vld [vmem:[#allocation9 + $0x278] ss:$24 sps:$4 sm:$0xff]   ;;  %vm7996_vm1 = vmmov 0  }
  0xc6   :  { %11418 = vst [vmem:[#allocation38_spill] sm:$0xff] %v8322_v59  ;;  %v8324_v60 = vld [vmem:[#allocation9 + $0x184] ss:$24 sps:$4 sm:$0xff]   ;;  %11419 = vst [vmem:[#allocation39_spill] sm:$0xff] %v8326_v61  ;;  %v8330_v62 = vld [vmem:[#allocation9 + $0x180] ss:$24 sps:$4 sm:$0xff]  }
  0xc7   :  { %5935 = vmatmul.mubr.msk.bf16.vlgmr.msra.gmra.mxu0 %vm314_vm0, %v245_v6  ;;  %v8334_v63 = vld [vmem:[#allocation9 + $0x24c] ss:$24 sps:$4 sm:$0xff]   ;;  %v8338_v3 = vld [vmem:[#allocation9 + $0x248] ss:$24 sps:$4 sm:$0xff]   ;;  %v8344_v6 = vld [vmem:[#allocation9 + $0x21c] ss:$24 sps:$4 sm:$0xff]  }
  0xc8   :  { %1070 = vmatpush1.bf16.msra.mxu0 %v8206_v21  ;;  %1039 = vmatpush1.bf16.msra.mxu1 %v8209_v22  ;;  %11420 = vst [vmem:[#allocation40_spill] sm:$0xff] %v8334_v63  ;;  %v8336_v1 = vld [vmem:[#allocation9 + $0x164] ss:$24 sps:$4 sm:$0xff]   ;;  %11421 = vst [vmem:[#allocation41_spill] sm:$0xff] %v8338_v3  ;;  %v6595_v5 = vld [vmem:[#allocation9 + $0x160] ss:$24 sps:$4 sm:$0xff]  }
  0xc9   :  { %1071 = vmatprep.subr.bf16.mxu0 %v8212_v23  ;;  %1040 = vmatprep.subr.bf16.mxu1 %v8214_v24  ;;  %11422 = vst [vmem:[#allocation42_spill] sm:$0xff] %v8344_v6  ;;  %v6599_v9 = vld [vmem:[#allocation9 + $0x134] ss:$24 sps:$4 sm:$0xff]   ;;  %v8346_v10 = vld [vmem:[#allocation9 + $0x218] ss:$24 sps:$4 sm:$0xff]  }
  0xca   :  { %1101 = vmatprep.mubr.bf16.mxu0 %v11010_v0  ;;  %v6601_v14 = vld [vmem:[#allocation9 + $0x130] ss:$24 sps:$4 sm:$0xff]   ;;  %v8350_v16 = vld [vmem:[#allocation9 + $0x1ec] ss:$24 sps:$4 sm:$0xff]  }
  0xcb   :  { %11423 = vst [vmem:[#allocation43_spill] sm:$0xff] %v8350_v16 }
  0xcc   :  { %1072 = vmatpush1.bf16.msra.mxu0 %v8217_v25  ;;  %1041 = vmatpush1.bf16.msra.mxu1 %v8219_v26 }
  0xcd   :  { %1073 = vmatprep.subr.bf16.mxu0 %v8223_v27  ;;  %1042 = vmatprep.subr.bf16.mxu1 %v8227_v28 }
  0xd0   :  { %1074 = vmatpush1.bf16.msra.mxu0 %v8230_v29  ;;  %1043 = vmatpush1.bf16.msra.mxu1 %v8234_v30 }
  0xd1   :  { %1075 = vmatprep.subr.bf16.mxu0 %v8238_v31  ;;  %1044 = vmatprep.subr.bf16.mxu1 %v8240_v32 }
  0xd4   :  { %1076 = vmatpush1.bf16.msra.mxu0 %v8242_v33  ;;  %1045 = vmatpush2.bf16.msra.mxu1 %v8244_v34 }
  0xd5   :  { %1077 = vmatprep.subr.bf16.mxu0 %v8248_v35  ;;  %1046 = vmatprep.subr.bf16.mxu1 %v8252_v36 }
  0xd8   :  { %1078 = vmatpush1.bf16.msra.mxu0 %v8254_v37  ;;  %1047 = vmatpush2.bf16.msra.mxu1 %v8258_v38 }
  0xd9   :  { %1079 = vmatprep.subr.bf16.mxu0 %v8262_v39  ;;  %1048 = vmatprep.subr.bf16.mxu1 %v8264_v40 }
  0xdc   :  { %1080 = vmatpush1.bf16.msra.mxu0 %v8266_v41  ;;  %1049 = vmatpush2.bf16.msra.mxu1 %v8270_v42 }
  0xdd   :  { %1081 = vmatprep.subr.bf16.mxu0 %v8274_v43  ;;  %1050 = vmatprep.subr.bf16.mxu1 %v8276_v44 }
  0xe0   :  { %1082 = vmatpush1.bf16.msra.mxu0 %v8278_v45  ;;  %1051 = vmatpush2.bf16.msra.mxu1 %v8282_v46 }
  0xe1   :  { %1083 = vmatprep.subr.bf16.mxu0 %v8286_v47  ;;  %1052 = vmatprep.subr.bf16.mxu1 %v8288_v48 }
  0xe4   :  { %1084 = vmatpush1.bf16.msra.mxu0 %v8290_v49  ;;  %1053 = vmatpush2.bf16.msra.mxu1 %v8294_v50 }
  0xe5   :  { %1085 = vmatprep.subr.bf16.mxu0 %v8298_v51  ;;  %1054 = vmatprep.subr.bf16.mxu1 %v8300_v52 }
  0xe8   :  { %1086 = vmatpush2.bf16.msra.mxu0 %v8302_v53  ;;  %1055 = vmatpush2.bf16.msra.mxu1 %v8306_v54  ;;  %v8362_v53 = vld [vmem:[#allocation9 + $0x18c] ss:$24 sps:$4 sm:$0xff]  }
  0xe9   :  { %1087 = vmatprep.subr.bf16.mxu0 %v8310_v55  ;;  %1056 = vmatprep.subr.bf16.mxu1 %v8312_v56  ;;  %v6611_v55 = vld [vmem:[#allocation9 + $0xd4] ss:$24 sps:$4 sm:$0xff]  }
  0xec   :  { %1088 = vmatpush2.bf16.msra.mxu0 %v8314_v57  ;;  %1057 = vmatpush2.bf16.msra.mxu1 %v8318_v58  ;;  %v8356_v57 = vld [vmem:[#allocation9 + $0x1bc] ss:$24 sps:$4 sm:$0xff]  }
  0xed   :  { %1089 = vmatprep.subr.bf16.mxu0 %v8322_v59  ;;  %1058 = vmatprep.subr.bf16.mxu1 %v8324_v60  ;;  %v6607_v59 = vld [vmem:[#allocation9 + $0x100] ss:$24 sps:$4 sm:$0xff]  }
  0xf0   :  { %1090 = vmatpush2.bf16.msra.mxu0 %v8326_v61  ;;  %1059 = vmatpush2.bf16.msra.mxu1 %v8330_v62  ;;  %v6605_v61 = vld [vmem:[#allocation9 + $0x104] ss:$24 sps:$4 sm:$0xff]  }
  0xf1   :  { %1091 = vmatprep.subr.bf16.mxu0 %v8334_v63  ;;  %1110 = vmatprep.subr.bf16.mxu1 %v8336_v1  ;;  %v8353_v63 = vld [vmem:[#allocation9 + $0x1e8] ss:$24 sps:$4 sm:$0xff]  }
  0xf3   :  { %1061 = vmatmul.mubr.bf16.vlgmr.msra.gmra.mxu1 %v11010_v0 }
  0xf4   :  { %1092 = vmatpush2.bf16.msra.mxu0 %v8338_v3  ;;  %1111 = vmatpush1.bf16.msra.mxu1 %v6595_v5  ;;  %v8360_v5 = vld [vmem:[#allocation9 + $0x1b8] ss:$24 sps:$4 sm:$0xff]  }
  0xf5   :  { %1093 = vmatprep.subr.bf16.mxu0 %v8344_v6  ;;  %1112 = vmatprep.subr.bf16.mxu1 %v6599_v9  ;;  %v6613_v3 = vld [vmem:[#allocation9 + $0xd0] ss:$24 sps:$4 sm:$0xff]   ;;  %v6617_v9 = vld [vmem:[#allocation9 + $0xa4] ss:$24 sps:$4 sm:$0xff]   ;;  %v8368_v6 = vld [vmem:[#allocation9 + $0xa0] ss:$24 sps:$4 sm:$0xff]  }
  0xf6   :  { %1142 = vmatprep.mubr.bf16.mxu1 %v11010_v0  ;;  %v8366_v0 = vld [vmem:[#allocation9 + $0x188] ss:$24 sps:$4 sm:$0xff]   ;;  %11424 = vst [vmem:[#allocation44_spill] sm:$0xff] %v8368_v6 }
  0xf8   :  { %1094 = vmatpush2.bf16.msra.mxu0 %v8346_v10  ;;  %1113 = vmatpush1.bf16.msra.mxu1 %v6601_v14  ;;  %v8370_v14 = vld [vmem:[#allocation9 + $0x74] ss:$24 sps:$4 sm:$0xff]  }
  0xf9   :  { %1095 = vmatprep.subr.bf16.mxu0 %v8350_v16  ;;  %1114 = vmatprep.subr.bf16.mxu1 %v6605_v61  ;;  %v8374_v61 = vld [vmem:[#allocation9 + $0x70] ss:$24 sps:$4 sm:$0xff]   ;;  %v8376_v16 = vld [vmem:[#allocation9 + $0x44] ss:$24 sps:$4 sm:$0xff]  }
  0xfa   :  { %11425 = vst [vmem:[#allocation45_spill] sm:$0xff] %v8374_v61 }
  0xfc   :  { %1096 = vmatpush2.bf16.msra.mxu0 %v8353_v63  ;;  %1115 = vmatpush1.bf16.msra.mxu1 %v6607_v59  ;;  %v11426_v59 = vmov 0  }
  0xfd   :  { %1097 = vmatprep.subr.bf16.mxu0 %v8356_v57  ;;  %1116 = vmatprep.subr.bf16.mxu1 %v6611_v55  ;;  %v8382_v55 = vld [vmem:[#allocation9 + $0x40] ss:$24 sps:$4 sm:$0xff]  }
 0x100   :  { %1098 = vmatpush2.bf16.msra.mxu0 %v8360_v5  ;;  %1117 = vmatpush1.bf16.msra.mxu1 %v6613_v3  ;;  %v8385_v3 = vld [vmem:[#allocation9 + $0x14] ss:$24 sps:$4 sm:$0xff]  }
 0x101   :  { %1099 = vmatprep.subr.bf16.mxu0 %v8362_v53  ;;  %1118 = vmatprep.subr.bf16.mxu1 %v6617_v9  ;;  %v8391_v9 = vld [vmem:[#allocation9 + $0x10] ss:$24 sps:$4 sm:$0xff]  }
 0x104   :  { %1100 = vmatpush2.bf16.msra.mxu0 %v8366_v0  ;;  %1119 = vmatpush1.bf16.msra.mxu1 %v8368_v6  ;;  %v8393_v6 = vld [vmem:[#allocation9 + $0x2e4] ss:$24 sps:$4 sm:$0xff]  }
 0x105   :  { %1120 = vmatprep.subr.bf16.mxu1 %v8370_v14  ;;  %1213 = vmatprep.subr.bf16.mxu0 %v8168_v2  ;;  %v8399_v2 = vld [vmem:[#allocation9 + $0x2e0] ss:$24 sps:$4 sm:$0xff]  }
 0x107   :  { %1102 = vmatmul.mubr.bf16.vlgmr.msra.gmra.mxu0 %v11426_v59 }
 0x108   :  { %1121 = vmatpush1.bf16.msra.mxu1 %v8374_v61  ;;  %1214 = vmatpush1.bf16.msra.mxu0 %v8170_v4  ;;  %v8401_v61 = vld [vmem:[#allocation9 + $0x2b4] ss:$24 sps:$4 sm:$0xff]   ;;  %v8407_v4 = vld [vmem:[#allocation9 + $0x2b0] ss:$24 sps:$4 sm:$0xff]  }
 0x109   :  { %1122 = vmatprep.subr.bf16.mxu1 %v8376_v16  ;;  %1215 = vmatprep.subr.bf16.mxu0 %v8173_v7  ;;  %v8409_v7 = vld [vmem:[#allocation9 + $0x284] ss:$24 sps:$4 sm:$0xff]  }
 0x10c   :  { %1123 = vmatpush1.bf16.msra.mxu1 %v8382_v55  ;;  %1216 = vmatpush1.bf16.msra.mxu0 %v8176_v8  ;;  %v8415_v8 = vld [vmem:[#allocation9 + $0x280] ss:$24 sps:$4 sm:$0xff]  }
 0x10d   :  { %1124 = vmatprep.subr.bf16.mxu1 %v8385_v3  ;;  %1217 = vmatprep.subr.bf16.mxu0 %v8179_v11  ;;  %v8417_v11 = vld [vmem:[#allocation9 + $0x254] ss:$24 sps:$4 sm:$0xff]  }
 0x110   :  { %1125 = vmatpush1.bf16.msra.mxu1 %v8391_v9  ;;  %1218 = vmatpush1.bf16.msra.mxu0 %v8183_v12  ;;  %v8423_v12 = vld [vmem:[#allocation9 + $0x250] ss:$24 sps:$4 sm:$0xff]  }
 0x111   :  { %1126 = vmatprep.subr.bf16.mxu1 %v8393_v6  ;;  %1219 = vmatprep.subr.bf16.mxu0 %v8187_v13  ;;  %v8425_v13 = vld [vmem:[#allocation9 + $0x224] ss:$24 sps:$4 sm:$0xff]  }
 0x114   :  { %1127 = vmatpush2.bf16.msra.mxu1 %v8399_v2  ;;  %1220 = vmatpush1.bf16.msra.mxu0 %v8189_v15  ;;  %v8431_v15 = vld [vmem:[#allocation9 + $0x220] ss:$24 sps:$4 sm:$0xff]  }
 0x115   :  { %1128 = vmatprep.subr.bf16.mxu1 %v8401_v61  ;;  %1221 = vmatprep.subr.bf16.mxu0 %v8193_v17  ;;  %v8433_v17 = vld [vmem:[#allocation9 + $0x1f4] ss:$24 sps:$4 sm:$0xff]  }
 0x118   :  { %1129 = vmatpush2.bf16.msra.mxu1 %v8407_v4  ;;  %1222 = vmatpush1.bf16.msra.mxu0 %v8199_v19  ;;  %v8439_v19 = vld [vmem:[#allocation9 + $0x1f0] ss:$24 sps:$4 sm:$0xff]  }
 0x119   :  { %1130 = vmatprep.subr.bf16.mxu1 %v8409_v7  ;;  %1223 = vmatprep.subr.bf16.mxu0 %v8203_v20  ;;  %v8441_v20 = vld [vmem:[#allocation9 + $0x1c4] ss:$24 sps:$4 sm:$0xff]  }
 0x11c   :  { %1131 = vmatpush2.bf16.msra.mxu1 %v8415_v8  ;;  %1224 = vmatpush1.bf16.msra.mxu0 %v8209_v22  ;;  %v8447_v22 = vld [vmem:[#allocation9 + $0x1c0] ss:$24 sps:$4 sm:$0xff]  }
 0x11d   :  { %1132 = vmatprep.subr.bf16.mxu1 %v8417_v11  ;;  %1225 = vmatprep.subr.bf16.mxu0 %v8214_v24  ;;  %v8449_v24 = vld [vmem:[#allocation9 + $0x194] ss:$24 sps:$4 sm:$0xff]  }
 0x120   :  { %1133 = vmatpush2.bf16.msra.mxu1 %v8423_v12  ;;  %1226 = vmatpush1.bf16.msra.mxu0 %v8219_v26  ;;  %v8455_v26 = vld [vmem:[#allocation9 + $0x190] ss:$24 sps:$4 sm:$0xff]  }
 0x121   :  { %1134 = vmatprep.subr.bf16.mxu1 %v8425_v13  ;;  %1227 = vmatprep.subr.bf16.mxu0 %v8227_v28  ;;  %v11432_v28 = vld [vmem:[#allocation40_spill] sm:$0xff] }
 0x124   :  { %1135 = vmatpush2.bf16.msra.mxu1 %v8431_v15  ;;  %1228 = vmatpush1.bf16.msra.mxu0 %v8234_v30  ;;  %v11434_v30 = vld [vmem:[#allocation42_spill] sm:$0xff] }
 0x125   :  { %1136 = vmatprep.subr.bf16.mxu1 %v8433_v17  ;;  %1229 = vmatprep.subr.bf16.mxu0 %v8240_v32  ;;  %v254_v32 = vlaneseq }
 0x128   :  { %1137 = vmatpush2.bf16.msra.mxu1 %v8439_v19  ;;  %1230 = vmatpush2.bf16.msra.mxu0 %v8244_v34 }
 0x129   :  { %1138 = vmatprep.subr.bf16.mxu1 %v8441_v20  ;;  %1231 = vmatprep.subr.bf16.mxu0 %v8252_v36  ;;  %v8513_v36 = vld [vmem:[#allocation9 + $0x154] ss:$24 sps:$4 sm:$0xff]  }
 0x12c   :  { %1139 = vmatpush2.bf16.msra.mxu1 %v8447_v22  ;;  %1232 = vmatpush2.bf16.msra.mxu0 %v8258_v38 }
 0x12d   :  { %1140 = vmatprep.subr.bf16.mxu1 %v8449_v24  ;;  %1233 = vmatprep.subr.bf16.mxu0 %v8264_v40 }
 0x130   :  { %1141 = vmatpush2.bf16.msra.mxu1 %v8455_v26  ;;  %1234 = vmatpush2.bf16.msra.mxu0 %v8270_v42 }
 0x131   :  { %1254 = vmatprep.subr.bf16.mxu1 %v8195_v18  ;;  %1235 = vmatprep.subr.bf16.mxu0 %v8276_v44  ;;  %v11427_v18 = vld [vmem:[#allocation35_spill] sm:$0xff] }
 0x133   :  { %1143 = vmatmul.mubr.bf16.vlgmr.msra.gmra.mxu1 %v11426_v59  ;;  %v8757_v59 = vld [vmem:[#allocation9 + $0x2ac] ss:$24 sps:$4 sm:$0xff]  }
 0x134   :  { %1255 = vmatpush1.bf16.msra.mxu1 %v8206_v21  ;;  %1236 = vmatpush2.bf16.msra.mxu0 %v8282_v46  ;;  %v11428_v21 = vld [vmem:[#allocation36_spill] sm:$0xff]  ;;  %11472 = vst [vmem:[#allocation68_spill] sm:$0xff] %v8757_v59 }
 0x135   :  { %1256 = vmatprep.subr.bf16.mxu1 %v8212_v23  ;;  %1237 = vmatprep.subr.bf16.mxu0 %v8288_v48  ;;  %v11429_v23 = vld [vmem:[#allocation37_spill] sm:$0xff]  ;;  %11438 = vst [vmem:[#allocation36_spill] sm:$0xff] %v8513_v36 }
 0x138   :  { %1257 = vmatpush1.bf16.msra.mxu1 %v8217_v25  ;;  %1238 = vmatpush2.bf16.msra.mxu0 %v8294_v50  ;;  %v11430_v25 = vld [vmem:[#allocation38_spill] sm:$0xff] }
 0x139   :  { %1258 = vmatprep.subr.bf16.mxu1 %v8223_v27  ;;  %1239 = vmatprep.subr.bf16.mxu0 %v8300_v52  ;;  %v11431_v27 = vld [vmem:[#allocation39_spill] sm:$0xff] }
 0x13c   :  { %1259 = vmatpush1.bf16.msra.mxu1 %v8230_v29  ;;  %1240 = vmatpush2.bf16.msra.mxu0 %v8306_v54  ;;  %v11433_v29 = vld [vmem:[#allocation41_spill] sm:$0xff] }
 0x13d   :  { %1260 = vmatprep.subr.bf16.mxu1 %v8238_v31  ;;  %1241 = vmatprep.subr.bf16.mxu0 %v8312_v56  ;;  %v11435_v31 = vld [vmem:[#allocation43_spill] sm:$0xff] }
 0x140   :  { %1261 = vmatpush1.bf16.msra.mxu1 %v8242_v33  ;;  %1242 = vmatpush2.bf16.msra.mxu0 %v8318_v58  ;;  %v8504_v33 = vshrl.u32 %v254_v32, 7 }
 0x141   :  { %1262 = vmatprep.subr.bf16.mxu1 %v8248_v35  ;;  %1243 = vmatprep.subr.bf16.mxu0 %v8324_v60  ;;  %v252_v35 = vld [vmem:[%s11437_s30] sm:$0x3f] }
 0x142   :  { %11436 = vst [vmem:[#allocation35_spill] sm:$0xff] %v8504_v33  ;;  %v11021_v34 = vsub.s32 0, %v8504_v33  ;;  %v11018_v44 = vsub.s32 3, %v8504_v33  ;;  %v11016_v54 = vsub.s32 5, %v8504_v33 }
 0x144   :  { %1263 = vmatpush1.bf16.msra.mxu1 %v8254_v37  ;;  %1244 = vmatpush2.bf16.msra.mxu0 %v8330_v62  ;;  %v11019_v37 = vsub.s32 1, %v8504_v33  ;;  %v257_v38 = vrot.slane %v252_v35, %v11021_v34  ;;  %v269_v48 = vrot.slane %v252_v35, %v11018_v44  ;;  %v277_v60 = vrot.slane %v252_v35, %v11016_v54  ;;  %v8736_v54 = vld [vmem:[#allocation9 + $0x68] ss:$24 sps:$4 sm:$0xff]   ;;  %v8742_v44 = vld [vmem:[#allocation9 + $0x38] ss:$24 sps:$4 sm:$0xff]  }
 0x145   :  { %1264 = vmatprep.subr.bf16.mxu1 %v8262_v39  ;;  %1295 = vmatprep.subr.bf16.mxu0 %v8336_v1  ;;  %11465 = vst [vmem:[#allocation61_spill] sm:$0xff] %v8736_v54  ;;  %11467 = vst [vmem:[#allocation63_spill] sm:$0xff] %v8742_v44  ;;  %v8751_v34 = vld [vmem:[#allocation9 + $0x2dc] ss:$24 sps:$4 sm:$0xff]  }
 0x146   :  { %v261_v39 = vrot.slane %v252_v35, %v11019_v37  ;;  %v8745_v37 = vld [vmem:[#allocation9 + $0xc] ss:$24 sps:$4 sm:$0xff]   ;;  %11470 = vst [vmem:[#allocation66_spill] sm:$0xff] %v8751_v34 }
 0x147   :  { %11468 = vst [vmem:[#allocation64_spill] sm:$0xff] %v8745_v37 }
 0x148   :  { %1265 = vmatpush1.bf16.msra.mxu1 %v8266_v41 }
 0x149   :  { %1266 = vmatprep.subr.bf16.mxu1 %v8274_v43 }
 0x14c   :  { %1267 = vmatpush1.bf16.msra.mxu1 %v8278_v45 }
 0x14d   :  { %1268 = vmatprep.subr.bf16.mxu1 %v8286_v47 }
 0x150   :  { %1269 = vmatpush1.bf16.msra.mxu1 %v8290_v49 }
 0x151   :  { %1270 = vmatprep.subr.bf16.mxu1 %v8298_v51  ;;  %v11017_v51 = vsub.s32 4, %v8504_v33 }
 0x154   :  { %1271 = vmatpush2.bf16.msra.mxu1 %v11427_v18 }
 0x155   :  { %1272 = vmatprep.subr.bf16.mxu1 %v11428_v21 }
 0x158   :  { %1273 = vmatpush2.bf16.msra.mxu1 %v11429_v23 }
 0x159   :  { %1274 = vmatprep.subr.bf16.mxu1 %v11430_v25 }
 0x15c   :  { %1275 = vmatpush2.bf16.msra.mxu1 %v11431_v27 }
 0x15d   :  { %1276 = vmatprep.subr.bf16.mxu1 %v11432_v28 }
 0x160   :  { %1277 = vmatpush2.bf16.msra.mxu1 %v11433_v29 }
 0x161   :  { %1278 = vmatprep.subr.bf16.mxu1 %v11434_v30 }
 0x164   :  { %1279 = vmatpush2.bf16.msra.mxu1 %v8346_v10 }
 0x165   :  { %1280 = vmatprep.subr.bf16.mxu1 %v11435_v31 }
 0x168   :  { %1281 = vmatpush2.bf16.msra.mxu1 %v8353_v63 }
 0x169   :  { %1282 = vmatprep.subr.bf16.mxu1 %v8356_v57  ;;  %v273_v57 = vrot.slane %v252_v35, %v11017_v51  ;;  %v8739_v51 = vld [vmem:[#allocation9 + $0x3c] ss:$24 sps:$4 sm:$0xff]  }
 0x16a   :  { %11466 = vst [vmem:[#allocation62_spill] sm:$0xff] %v8739_v51 }
 0x16c   :  { %1283 = vmatpush2.bf16.msra.mxu1 %v8360_v5 }
 0x16d   :  { %1284 = vmatprep.subr.bf16.mxu1 %v8362_v53 }
 0x170   :  { %1285 = vmatpush2.bf16.msra.mxu1 %v8366_v0  ;;  %v11020_v0 = vsub.s32 2, %v8504_v33  ;;  %v8754_v33 = vld [vmem:[#allocation9 + $0x2d8] ss:$24 sps:$4 sm:$0xff]  }
 0x171   :  { %1398 = vmatprep.subr.bf16.mxu1 %v8513_v36  ;;  %11471 = vst [vmem:[#allocation67_spill] sm:$0xff] %v8754_v33 }
 0x172   :  { %v265_v46 = vrot.slane %v252_v35, %v11020_v0  ;;  %v8748_v0 = vld [vmem:[#allocation9 + $0x8] ss:$24 sps:$4 sm:$0xff]  }
 0x173   :  { %11469 = vst [vmem:[#allocation65_spill] sm:$0xff] %v8748_v0 }
 0x177   :  { %v352_v40 = vpop.f32.mrf.mxu0 }
 0x178   :  { %v353_v41 = vadd.f32 %v352_v40, %v257_v38 }
 0x179   :  { %v354_v42 = vpop.f32.mrf.mxu0 }
 0x17a   :  { %441 = vst [vmem:[#allocation2] sm:$0xff] %v353_v41  ;;  %v355_v43 = vadd.f32 %v354_v42, %v261_v39 }
 0x17b   :  { %v356_v45 = vpop.f32.mrf.mxu0 }
 0x17c   :  { %442 = vst [vmem:[#allocation2 + $0x8] sm:$0xff] %v355_v43 }
 0x17d   :  { %v357_v47 = vpop.f32.mrf.mxu0 }
 0x17f   :  { %v393_v49 = vpop.f32.mrf.mxu0 }
 0x180   :  { %v394_v50 = vadd.f32 %v393_v49, %v265_v46  ;;  %v8536_v46 = vld [vmem:[%s10987_s4] sm:$0x1] }
 0x181   :  { %v395_v52 = vpop.f32.mrf.mxu0 }
 0x182   :  { %443 = vst [vmem:[#allocation2 + $0x10] sm:$0xff] %v394_v50  ;;  %v396_v53 = vadd.f32 %v395_v52, %v269_v48 }
 0x183   :  { %v397_v56 = vpop.f32.mrf.mxu0 }
 0x184   :  { %444 = vst [vmem:[#allocation2 + $0x18] sm:$0xff] %v396_v53 }
 0x185   :  { %v398_v58 = vpop.f32.mrf.mxu0 }
 0x187   :  { %v434_v62 = vpop.f32.mrf.mxu0 }
 0x188   :  { %v435_v63 = vadd.f32 %v434_v62, %v273_v57 }
 0x189   :  { %v436_v1 = vpop.f32.mrf.mxu0  ;;  %v545_v21 = vld [vmem:[#allocation2] ss:$8 sm:$0x7] }
 0x18a   :  { %445 = vst [vmem:[#allocation2 + $0x20] sm:$0xff] %v435_v63  ;;  %v437_v10 = vadd.f32 %v436_v1, %v277_v60  ;;  %v1159_v30 = vrot.slane %v545_v21, 1  ;;  %v1170_v52 = vrot.slane %v545_v21, 2 }
 0x18b   :  { %v438_v5 = vpop.f32.mrf.mxu0 }
 0x18c   :  { %446 = vst [vmem:[#allocation2 + $0x28] sm:$0xff] %v437_v10 }
 0x18d   :  { %v439_v18 = vpop.f32.mrf.mxu0 }
 0x193   :  { %v547_v53 = vld [vmem:[#allocation2 + $0x1f] ss:$8 sm:$0x7] }
 0x1b3   :  { %v1062_v23 = vpop.f32.mrf.mxu1 }
 0x1b4   :  { %v1151_v25 = vadd.f32 %v1062_v23, %v545_v21 }
 0x1b5   :  { %v1064_v27 = vpop.f32.mrf.mxu1 }
 0x1b6   :  { %v6032_v28 = vmul.f32 -1.442695, %v1151_v25  ;;  %v1161_v32 = vadd.f32 %v1159_v30, %v1064_v27  ;;  %v1182_v25 = vrot.slane %v547_v53, 1 }
 0x1b7   :  { %v1066_v29 = vpop.f32.mrf.mxu1 }
 0x1b8   :  { %6989 = vpow2.f32 %v6032_v28  ;;  %v6033_v38 = vmul.f32 -1.442695, %v1161_v32  ;;  %v8545_v32 = vld [vmem:[%s10987_s4 + $0x1] sm:$0x1] }
 0x1b9   :  { %v1067_v31 = vpop.f32.mrf.mxu1 }
 0x1ba   :  { %6991 = vpow2.f32 %v6033_v38 }
 0x1c5   :  { %v6990_v35 = vpop.eup %6989 }
 0x1c6   :  { %v1155_v39 = vadd.f32 1.0, %v6990_v35 }
 0x1c7   :  { %v1103_v40 = vpop.f32.mrf.mxu0  ;;  %v6992_v45 = vpop.eup %6991 }
 0x1c8   :  { %6993 = vrcp.f32 %v1155_v39  ;;  %v1165_v47 = vadd.f32 1.0, %v6992_v45  ;;  %v1168_v48 = vadd.f32 %v1103_v40, %v8536_v46  ;;  %v1193_v40 = vrot.slane %v547_v53, 2 }
 0x1c9   :  { %v1105_v41 = vpop.f32.mrf.mxu0 }
 0x1ca   :  { %6995 = vrcp.f32 %v1165_v47  ;;  %v1174_v57 = vadd.f32 %v1105_v41, %v547_v53 }
 0x1cb   :  { %v1107_v42 = vpop.f32.mrf.mxu0 }
 0x1cc   :  { %v6034_v58 = vmul.f32 -1.442695, %v1174_v57  ;;  %v8559_v57 = vld [vmem:[#allocation9 + $0x160] ss:$24 sps:$4 sm:$0xff]  }
 0x1cd   :  { %v1108_v43 = vpop.f32.mrf.mxu0 }
 0x1d5   :  { %v6994_v49 = vpop.eup %6993 }
 0x1d6   :  { %v1169_v50 = vmul.f32 %v6994_v49, %v1168_v48 }
 0x1d7   :  { %v6996_v60 = vpop.eup %6995 }
 0x1d8   :  { %v1172_v56 = vadd.f32 %v1170_v52, %v1169_v50  ;;  %v1197_v62 = vsub.f32 1.0, %v6996_v60  ;;  %v1199_v10 = vmul.f32 0.0, %v6996_v60  ;;  %v8565_v60 = vld [vmem:[#allocation9 + $0x150] ss:$24 sps:$4 sm:$0xff]  }
 0x1da   :  { %6997 = vtanh.f32 %v1172_v56 }
 0x1db   :  { %6999 = vpow2.f32 %v6034_v58  ;;  %v8562_v58 = vld [vmem:[#allocation9 + $0x134] ss:$24 sps:$4 sm:$0xff]  }
 0x1e7   :  { %v6998_v63 = vpop.eup %6997 }
 0x1e8   :  { %v1198_v1 = vmul.f32 %v6998_v63, %v1197_v62  ;;  %v7000_v18 = vpop.eup %6999  ;;  %v8568_v62 = vld [vmem:[#allocation9 + $0x124] ss:$24 sps:$4 sm:$0xff]   ;;  %v8571_v63 = vld [vmem:[#allocation9 + $0x130] ss:$24 sps:$4 sm:$0xff]  }
 0x1e9   :  { %v1178_v23 = vadd.f32 1.0, %v7000_v18  ;;  %v8580_v18 = vld [vmem:[#allocation9 + $0xf4] ss:$24 sps:$4 sm:$0xff]  }
 0x1ea   :  { %v8539_v5 = vadd.f32 %v1199_v10, %v1198_v1  ;;  %v8574_v1 = vld [vmem:[#allocation9 + $0x104] ss:$24 sps:$4 sm:$0xff]   ;;  %v8577_v10 = vld [vmem:[#allocation9 + $0x120] ss:$24 sps:$4 sm:$0xff]  }
 0x1eb   :  { %7001 = vrcp.f32 %v1178_v23  ;;  %v8583_v23 = vld [vmem:[#allocation9 + $0x100] ss:$24 sps:$4 sm:$0xff]  }
 0x1ec   :  { %1205 = vst [vmem:[#allocation3] sm:$0x1] %v8539_v5  ;;  %v8555_v53 = vpack.c.bf16 %v8539_v5, %v8539_v5 }
 0x1f3   :  { %v1144_v27 = vpop.f32.mrf.mxu1 }
 0x1f4   :  { %v1184_v21 = vadd.f32 %v1182_v25, %v1144_v27  ;;  %v8586_v25 = vld [vmem:[#allocation9 + $0xd4] ss:$24 sps:$4 sm:$0xff]   ;;  %v8589_v27 = vld [vmem:[#allocation9 + $0xf0] ss:$24 sps:$4 sm:$0xff]  }
 0x1f5   :  { %v1146_v28 = vpop.f32.mrf.mxu1 }
 0x1f6   :  { %v6035_v29 = vmul.f32 -1.442695, %v1184_v21  ;;  %v1191_v38 = vadd.f32 %v1146_v28, %v8545_v32  ;;  %v8592_v21 = vld [vmem:[#allocation9 + $0xc4] ss:$24 sps:$4 sm:$0xff]   ;;  %v8595_v28 = vld [vmem:[#allocation9 + $0xd0] ss:$24 sps:$4 sm:$0xff]  }
 0x1f7   :  { %v1148_v30 = vpop.f32.mrf.mxu1 }
 0x1f8   :  { %7003 = vpow2.f32 %v6035_v29  ;;  %v7002_v35 = vpop.eup %7001  ;;  %v8598_v29 = vld [vmem:[#allocation9 + $0xa4] ss:$24 sps:$4 sm:$0xff]   ;;  %v8601_v30 = vld [vmem:[#allocation9 + $0xc0] ss:$24 sps:$4 sm:$0xff]  }
 0x1f9   :  { %v1149_v31 = vpop.f32.mrf.mxu1  ;;  %v1192_v39 = vmul.f32 %v7002_v35, %v1191_v38  ;;  %v11439_v38 = vld [vmem:[#allocation44_spill] sm:$0xff] }
 0x1fa   :  { %v8604_v31 = vld [vmem:[#allocation9 + $0x94] ss:$24 sps:$4 sm:$0xff]   ;;  %v8609_v35 = vld [vmem:[#allocation9 + $0x90] ss:$24 sps:$4 sm:$0xff]  }
 0x1fb   :  { %v1195_v43 = vadd.f32 %v1193_v40, %v1192_v39  ;;  %v8612_v39 = vld [vmem:[#allocation9 + $0x64] ss:$24 sps:$4 sm:$0xff]  }
 0x1fc   :  { %v11440_v40 = vld [vmem:[#allocation45_spill] sm:$0xff] }
 0x205   :  { %v7004_v41 = vpop.eup %7003 }
 0x206   :  { %v1188_v42 = vadd.f32 1.0, %v7004_v41  ;;  %v8617_v41 = vld [vmem:[#allocation9 + $0x60] ss:$24 sps:$4 sm:$0xff]  }
 0x208   :  { %7005 = vrcp.f32 %v1188_v42  ;;  %v8620_v42 = vld [vmem:[#allocation9 + $0x34] ss:$24 sps:$4 sm:$0xff]  }
 0x209   :  { %7007 = vtanh.f32 %v1195_v43  ;;  %v8628_v43 = vld [vmem:[#allocation9 + $0x4] ss:$24 sps:$4 sm:$0xff]  }
 0x215   :  { %v7006_v45 = vpop.eup %7005 }
 0x216   :  { %v1201_v47 = vsub.f32 1.0, %v7006_v45  ;;  %v7008_v48 = vpop.eup %7007  ;;  %v1203_v50 = vmul.f32 0.0, %v7006_v45  ;;  %v8636_v45 = vld [vmem:[#allocation9 + $0x2d4] ss:$24 sps:$4 sm:$0xff]  }
 0x218   :  { %v1202_v49 = vmul.f32 %v7008_v48, %v1201_v47  ;;  %v8709_v47 = vld [vmem:[#allocation9 + $0x12c] ss:$24 sps:$4 sm:$0xff]   ;;  %v8715_v48 = vld [vmem:[#allocation9 + $0xfc] ss:$24 sps:$4 sm:$0xff]  }
 0x219   :  { %11456 = vst [vmem:[#allocation52_spill] sm:$0xff] %v8709_v47  ;;  %11458 = vst [vmem:[#allocation54_spill] sm:$0xff] %v8715_v48 }
 0x21a   :  { %v8548_v52 = vadd.f32 %v1203_v50, %v1202_v49  ;;  %v8718_v49 = vld [vmem:[#allocation9 + $0xf8] ss:$24 sps:$4 sm:$0xff]   ;;  %v8721_v50 = vld [vmem:[#allocation9 + $0xcc] ss:$24 sps:$4 sm:$0xff]  }
 0x21b   :  { %11459 = vst [vmem:[#allocation55_spill] sm:$0xff] %v8718_v49  ;;  %11460 = vst [vmem:[#allocation56_spill] sm:$0xff] %v8721_v50 }
 0x21c   :  { %1206 = vst [vmem:[#allocation3 + $0xf] sm:$0x1] %v8548_v52  ;;  %v1212_v56 = vpack.c.bf16 %v8548_v52, %v8548_v52 }
 0x21e   :  { %1245 = vmatprep.mubr.bf16.mxu0 %v1212_v56  ;;  %1286 = vmatprep.mubr.bf16.mxu1 %v1212_v56 }
 0x21f   :  { %1246 = vmatmul.mubr.bf16.vlgmr.msra.gmra.mxu0 %v8555_v53  ;;  %1287 = vmatmul.mubr.bf16.vlgmr.msra.gmra.mxu1 %v8555_v53 }
 0x220   :  { %1296 = vmatpush1.bf16.msra.mxu0 %v8559_v57  ;;  %1327 = vmatprep.mubr.bf16.mxu0 %v1212_v56  ;;  %v8724_v56 = vld [vmem:[#allocation9 + $0xc8] ss:$24 sps:$4 sm:$0xff]  }
 0x221   :  { %1297 = vmatprep.subr.bf16.mxu0 %v8562_v58  ;;  %1399 = vmatpush1.bf16.msra.mxu1 %v8565_v60  ;;  %11461 = vst [vmem:[#allocation57_spill] sm:$0xff] %v8724_v56 }
 0x222   :  { %1400 = vmatprep.subr.bf16.mxu1 %v8568_v62 }
 0x224   :  { %1298 = vmatpush1.bf16.msra.mxu0 %v8571_v63 }
 0x225   :  { %1299 = vmatprep.subr.bf16.mxu0 %v8574_v1  ;;  %1401 = vmatpush1.bf16.msra.mxu1 %v8577_v10 }
 0x226   :  { %1402 = vmatprep.subr.bf16.mxu1 %v8580_v18 }
 0x228   :  { %1300 = vmatpush1.bf16.msra.mxu0 %v8583_v23 }
 0x229   :  { %1301 = vmatprep.subr.bf16.mxu0 %v8586_v25  ;;  %1403 = vmatpush1.bf16.msra.mxu1 %v8589_v27 }
 0x22a   :  { %1404 = vmatprep.subr.bf16.mxu1 %v8592_v21 }
 0x22c   :  { %1302 = vmatpush1.bf16.msra.mxu0 %v8595_v28 }
 0x22d   :  { %1303 = vmatprep.subr.bf16.mxu0 %v8598_v29  ;;  %1405 = vmatpush1.bf16.msra.mxu1 %v8601_v30 }
 0x22e   :  { %1406 = vmatprep.subr.bf16.mxu1 %v8604_v31 }
 0x230   :  { %1304 = vmatpush1.bf16.msra.mxu0 %v11439_v38  ;;  %v8730_v38 = vld [vmem:[#allocation9 + $0x98] ss:$24 sps:$4 sm:$0xff]  }
 0x231   :  { %1305 = vmatprep.subr.bf16.mxu0 %v8370_v14  ;;  %1407 = vmatpush1.bf16.msra.mxu1 %v8609_v35  ;;  %v8625_v14 = vld [vmem:[#allocation9 + $0x30] ss:$24 sps:$4 sm:$0xff]   ;;  %11463 = vst [vmem:[#allocation59_spill] sm:$0xff] %v8730_v38 }
 0x232   :  { %1408 = vmatprep.subr.bf16.mxu1 %v8612_v39 }
 0x234   :  { %1306 = vmatpush1.bf16.msra.mxu0 %v11440_v40  ;;  %v8733_v40 = vld [vmem:[#allocation9 + $0x6c] ss:$24 sps:$4 sm:$0xff]  }
 0x235   :  { %1307 = vmatprep.subr.bf16.mxu0 %v8376_v16  ;;  %1409 = vmatpush1.bf16.msra.mxu1 %v8617_v41  ;;  %v8633_v16 = vld [vmem:[#allocation9] ss:$24 sps:$4 sm:$0xff]   ;;  %11464 = vst [vmem:[#allocation60_spill] sm:$0xff] %v8733_v40 }
 0x236   :  { %1410 = vmatprep.subr.bf16.mxu1 %v8620_v42 }
 0x238   :  { %1308 = vmatpush1.bf16.msra.mxu0 %v8382_v55  ;;  %v8641_v55 = vld [vmem:[#allocation9 + $0x2d0] ss:$24 sps:$4 sm:$0xff]  }
 0x239   :  { %1309 = vmatprep.subr.bf16.mxu0 %v8385_v3  ;;  %1411 = vmatpush1.bf16.msra.mxu1 %v8625_v14  ;;  %v8644_v3 = vld [vmem:[#allocation9 + $0x2a4] ss:$24 sps:$4 sm:$0xff]  }
 0x23a   :  { %1412 = vmatprep.subr.bf16.mxu1 %v8628_v43 }
 0x23c   :  { %1310 = vmatpush1.bf16.msra.mxu0 %v8391_v9  ;;  %v8652_v9 = vld [vmem:[#allocation9 + $0x274] ss:$24 sps:$4 sm:$0xff]  }
 0x23d   :  { %1311 = vmatprep.subr.bf16.mxu0 %v8393_v6  ;;  %1413 = vmatpush1.bf16.msra.mxu1 %v8633_v16  ;;  %v8649_v6 = vld [vmem:[#allocation9 + $0x2a0] ss:$24 sps:$4 sm:$0xff]   ;;  %11441 = vst [vmem:[#allocation37_spill] sm:$0xff] %v8652_v9 }
 0x23e   :  { %1414 = vmatprep.subr.bf16.mxu1 %v8636_v45 }
 0x240   :  { %1312 = vmatpush2.bf16.msra.mxu0 %v8399_v2  ;;  %v8660_v2 = vld [vmem:[#allocation9 + $0x244] ss:$24 sps:$4 sm:$0xff]  }
 0x241   :  { %1313 = vmatprep.subr.bf16.mxu0 %v8401_v61  ;;  %1415 = vmatpush2.bf16.msra.mxu1 %v8641_v55  ;;  %v8657_v61 = vld [vmem:[#allocation9 + $0x270] ss:$24 sps:$4 sm:$0xff]   ;;  %11443 = vst [vmem:[#allocation39_spill] sm:$0xff] %v8660_v2 }
 0x242   :  { %1416 = vmatprep.subr.bf16.mxu1 %v8644_v3  ;;  %11442 = vst [vmem:[#allocation38_spill] sm:$0xff] %v8657_v61 }
 0x244   :  { %1314 = vmatpush2.bf16.msra.mxu0 %v8407_v4  ;;  %v8665_v4 = vld [vmem:[#allocation9 + $0x240] ss:$24 sps:$4 sm:$0xff]  }
 0x245   :  { %1315 = vmatprep.subr.bf16.mxu0 %v8409_v7  ;;  %1417 = vmatpush2.bf16.msra.mxu1 %v8649_v6  ;;  %11444 = vst [vmem:[#allocation40_spill] sm:$0xff] %v8665_v4  ;;  %v8668_v7 = vld [vmem:[#allocation9 + $0x214] ss:$24 sps:$4 sm:$0xff]  }
 0x246   :  { %1418 = vmatprep.subr.bf16.mxu1 %v8652_v9  ;;  %11445 = vst [vmem:[#allocation41_spill] sm:$0xff] %v8668_v7 }
 0x248   :  { %1316 = vmatpush2.bf16.msra.mxu0 %v8415_v8  ;;  %v8673_v8 = vld [vmem:[#allocation9 + $0x210] ss:$24 sps:$4 sm:$0xff]  }
 0x249   :  { %1317 = vmatprep.subr.bf16.mxu0 %v8417_v11  ;;  %1419 = vmatpush2.bf16.msra.mxu1 %v8657_v61  ;;  %11446 = vst [vmem:[#allocation42_spill] sm:$0xff] %v8673_v8  ;;  %v8676_v11 = vld [vmem:[#allocation9 + $0x1e4] ss:$24 sps:$4 sm:$0xff]  }
 0x24a   :  { %1420 = vmatprep.subr.bf16.mxu1 %v8660_v2  ;;  %11447 = vst [vmem:[#allocation43_spill] sm:$0xff] %v8676_v11 }
 0x24c   :  { %1318 = vmatpush2.bf16.msra.mxu0 %v8423_v12  ;;  %v8681_v12 = vld [vmem:[#allocation9 + $0x1e0] ss:$24 sps:$4 sm:$0xff]  }
 0x24d   :  { %1319 = vmatprep.subr.bf16.mxu0 %v8425_v13  ;;  %1421 = vmatpush2.bf16.msra.mxu1 %v8665_v4  ;;  %11448 = vst [vmem:[#allocation44_spill] sm:$0xff] %v8681_v12  ;;  %v8684_v13 = vld [vmem:[#allocation9 + $0x1b4] ss:$24 sps:$4 sm:$0xff]  }
 0x24e   :  { %1422 = vmatprep.subr.bf16.mxu1 %v8668_v7  ;;  %11449 = vst [vmem:[#allocation45_spill] sm:$0xff] %v8684_v13 }
 0x250   :  { %1320 = vmatpush2.bf16.msra.mxu0 %v8431_v15  ;;  %v8689_v15 = vld [vmem:[#allocation9 + $0x1b0] ss:$24 sps:$4 sm:$0xff]  }
 0x251   :  { %1321 = vmatprep.subr.bf16.mxu0 %v8433_v17  ;;  %1423 = vmatpush2.bf16.msra.mxu1 %v8673_v8  ;;  %11450 = vst [vmem:[#allocation46_spill] sm:$0xff] %v8689_v15  ;;  %v8692_v17 = vld [vmem:[#allocation9 + $0x184] ss:$24 sps:$4 sm:$0xff]  }
 0x252   :  { %1424 = vmatprep.subr.bf16.mxu1 %v8676_v11  ;;  %11451 = vst [vmem:[#allocation47_spill] sm:$0xff] %v8692_v17 }
 0x254   :  { %1322 = vmatpush2.bf16.msra.mxu0 %v8439_v19  ;;  %v8696_v19 = vld [vmem:[#allocation9 + $0x15c] ss:$24 sps:$4 sm:$0xff]  }
 0x255   :  { %1323 = vmatprep.subr.bf16.mxu0 %v8441_v20  ;;  %1425 = vmatpush2.bf16.msra.mxu1 %v8681_v12  ;;  %11452 = vst [vmem:[#allocation48_spill] sm:$0xff] %v8696_v19  ;;  %v8699_v20 = vld [vmem:[#allocation9 + $0x180] ss:$24 sps:$4 sm:$0xff]  }
 0x256   :  { %1426 = vmatprep.subr.bf16.mxu1 %v8684_v13  ;;  %11453 = vst [vmem:[#allocation49_spill] sm:$0xff] %v8699_v20 }
 0x258   :  { %1324 = vmatpush2.bf16.msra.mxu0 %v8447_v22  ;;  %v8702_v22 = vld [vmem:[#allocation9 + $0x164] ss:$24 sps:$4 sm:$0xff]  }
 0x259   :  { %1325 = vmatprep.subr.bf16.mxu0 %v8449_v24  ;;  %1427 = vmatpush2.bf16.msra.mxu1 %v8689_v15  ;;  %11454 = vst [vmem:[#allocation50_spill] sm:$0xff] %v8702_v22  ;;  %v8706_v24 = vld [vmem:[#allocation9 + $0x158] ss:$24 sps:$4 sm:$0xff]  }
 0x25a   :  { %1428 = vmatprep.subr.bf16.mxu1 %v8692_v17  ;;  %11455 = vst [vmem:[#allocation51_spill] sm:$0xff] %v8706_v24 }
 0x25c   :  { %1326 = vmatpush2.bf16.msra.mxu0 %v8455_v26  ;;  %v8712_v26 = vld [vmem:[#allocation9 + $0x128] ss:$24 sps:$4 sm:$0xff]  }
 0x25d   :  { %1439 = vmatprep.subr.bf16.mxu0 %v8696_v19  ;;  %1429 = vmatpush2.bf16.msra.mxu1 %v8699_v20  ;;  %11457 = vst [vmem:[#allocation53_spill] sm:$0xff] %v8712_v26 }
 0x25e   :  { %1480 = vmatprep.subr.bf16.mxu1 %v8702_v22 }
 0x25f   :  { %1328 = vmatmul.mubr.bf16.vlgmr.msra.gmra.mxu0 %v8555_v53  ;;  %v8727_v53 = vld [vmem:[#allocation9 + $0x9c] ss:$24 sps:$4 sm:$0xff]  }
 0x260   :  { %1440 = vmatpush1.bf16.msra.mxu0 %v8706_v24  ;;  %11462 = vst [vmem:[#allocation58_spill] sm:$0xff] %v8727_v53 }
 0x261   :  { %1441 = vmatprep.subr.bf16.mxu0 %v8709_v47 }
 0x264   :  { %1442 = vmatpush1.bf16.msra.mxu0 %v8712_v26 }
 0x265   :  { %1443 = vmatprep.subr.bf16.mxu0 %v8715_v48 }
 0x268   :  { %1444 = vmatpush1.bf16.msra.mxu0 %v8718_v49 }
 0x269   :  { %1445 = vmatprep.subr.bf16.mxu0 %v8721_v50 }
 0x26c   :  { %1446 = vmatpush1.bf16.msra.mxu0 %v8724_v56 }
 0x26d   :  { %1447 = vmatprep.subr.bf16.mxu0 %v8727_v53 }
 0x270   :  { %1448 = vmatpush1.bf16.msra.mxu0 %v8730_v38 }
 0x271   :  { %1449 = vmatprep.subr.bf16.mxu0 %v8733_v40 }
 0x274   :  { %1450 = vmatpush1.bf16.msra.mxu0 %v8736_v54 }
 0x275   :  { %1451 = vmatprep.subr.bf16.mxu0 %v8739_v51 }
 0x278   :  { %1452 = vmatpush1.bf16.msra.mxu0 %v8742_v44  ;;  %v8760_v44 = vld [vmem:[#allocation9 + $0x2a8] ss:$24 sps:$4 sm:$0xff]  }
 0x279   :  { %1453 = vmatprep.subr.bf16.mxu0 %v8745_v37  ;;  %11473 = vst [vmem:[#allocation69_spill] sm:$0xff] %v8760_v44  ;;  %v8763_v37 = vld [vmem:[#allocation9 + $0x27c] ss:$24 sps:$4 sm:$0xff]  }
 0x27a   :  { %11474 = vst [vmem:[#allocation70_spill] sm:$0xff] %v8763_v37 }
 0x27c   :  { %1454 = vmatpush1.bf16.msra.mxu0 %v8748_v0  ;;  %v8766_v0 = vld [vmem:[#allocation9 + $0x278] ss:$24 sps:$4 sm:$0xff]  }
 0x27d   :  { %1455 = vmatprep.subr.bf16.mxu0 %v8751_v34  ;;  %11475 = vst [vmem:[#allocation71_spill] sm:$0xff] %v8766_v0  ;;  %v8769_v34 = vld [vmem:[#allocation9 + $0x24c] ss:$24 sps:$4 sm:$0xff]  }
 0x27e   :  { %11476 = vst [vmem:[#allocation72_spill] sm:$0xff] %v8769_v34 }
 0x280   :  { %1456 = vmatpush2.bf16.msra.mxu0 %v8754_v33  ;;  %v8772_v33 = vld [vmem:[#allocation9 + $0x248] ss:$24 sps:$4 sm:$0xff]  }
 0x281   :  { %1457 = vmatprep.subr.bf16.mxu0 %v8757_v59  ;;  %11477 = vst [vmem:[#allocation73_spill] sm:$0xff] %v8772_v33  ;;  %v8775_v59 = vld [vmem:[#allocation9 + $0x21c] ss:$24 sps:$4 sm:$0xff]  }
 0x282   :  { %11478 = vst [vmem:[#allocation74_spill] sm:$0xff] %v8775_v59 }
 0x284   :  { %1458 = vmatpush2.bf16.msra.mxu0 %v8760_v44  ;;  %v8778_v44 = vld [vmem:[#allocation9 + $0x218] ss:$24 sps:$4 sm:$0xff]  }
 0x285   :  { %1459 = vmatprep.subr.bf16.mxu0 %v8763_v37  ;;  %11479 = vst [vmem:[#allocation75_spill] sm:$0xff] %v8778_v44  ;;  %v8781_v37 = vld [vmem:[#allocation9 + $0x1ec] ss:$24 sps:$4 sm:$0xff]  }
 0x286   :  { %11480 = vst [vmem:[#allocation76_spill] sm:$0xff] %v8781_v37 }
 0x288   :  { %1460 = vmatpush2.bf16.msra.mxu0 %v8766_v0  ;;  %v8784_v0 = vld [vmem:[#allocation9 + $0x1e8] ss:$24 sps:$4 sm:$0xff]  }
 0x289   :  { %1461 = vmatprep.subr.bf16.mxu0 %v8769_v34  ;;  %11481 = vst [vmem:[#allocation77_spill] sm:$0xff] %v8784_v0  ;;  %v8787_v34 = vld [vmem:[#allocation9 + $0x1bc] ss:$24 sps:$4 sm:$0xff]  }
 0x28a   :  { %11482 = vst [vmem:[#allocation78_spill] sm:$0xff] %v8787_v34 }
 0x28c   :  { %1462 = vmatpush2.bf16.msra.mxu0 %v8772_v33  ;;  %v8790_v33 = vld [vmem:[#allocation9 + $0x1b8] ss:$24 sps:$4 sm:$0xff]  }
 0x28d   :  { %1463 = vmatprep.subr.bf16.mxu0 %v8775_v59  ;;  %11483 = vst [vmem:[#allocation79_spill] sm:$0xff] %v8790_v33  ;;  %v8793_v59 = vld [vmem:[#allocation9 + $0x18c] ss:$24 sps:$4 sm:$0xff]  }
 0x28e   :  { %11484 = vst [vmem:[#allocation80_spill] sm:$0xff] %v8793_v59 }
 0x290   :  { %1464 = vmatpush2.bf16.msra.mxu0 %v8778_v44  ;;  %v8796_v44 = vld [vmem:[#allocation9 + $0x188] ss:$24 sps:$4 sm:$0xff]  }
 0x291   :  { %1465 = vmatprep.subr.bf16.mxu0 %v8781_v37  ;;  %11485 = vst [vmem:[#allocation81_spill] sm:$0xff] %v8796_v44  ;;  %v1208_v37 = vld [vmem:[#allocation2 + $0x1] ss:$8 sm:$0x7] }
 0x292   :  { %v1355_v20 = vrot.slane %v1208_v37, 2 }
 0x294   :  { %1466 = vmatpush2.bf16.msra.mxu0 %v8784_v0 }
 0x295   :  { %1467 = vmatprep.subr.bf16.mxu0 %v8787_v34 }
 0x298   :  { %1468 = vmatpush2.bf16.msra.mxu0 %v8790_v33  ;;  %v1344_v33 = vrot.slane %v1208_v37, 1 }
 0x299   :  { %1469 = vmatprep.subr.bf16.mxu0 %v8793_v59 }
 0x29c   :  { %1470 = vmatpush2.bf16.msra.mxu0 %v8796_v44 }
 0x29d   :  { %1583 = vmatprep.subr.bf16.mxu0 %v8513_v36 }
 0x2df   :  { %v1247_v0 = vpop.f32.mrf.mxu0  ;;  %v1288_v51 = vpop.f32.mrf.mxu1 }
 0x2e0   :  { %v1336_v54 = vadd.f32 %v1247_v0, %v1208_v37  ;;  %v1353_v24 = vadd.f32 %v1288_v51, %v8536_v46 }
 0x2e1   :  { %v1249_v40 = vpop.f32.mrf.mxu0  ;;  %v1290_v34 = vpop.f32.mrf.mxu1 }
 0x2e2   :  { %v6036_v38 = vmul.f32 -1.442695, %v1336_v54  ;;  %v1346_v59 = vadd.f32 %v1344_v33, %v1249_v40  ;;  %v1210_v54 = vld [vmem:[#allocation2 + $0x1e] ss:$8 sm:$0x7] }
 0x2e3   :  { %v1251_v53 = vpop.f32.mrf.mxu0  ;;  %v1292_v56 = vpop.f32.mrf.mxu1  ;;  %v1367_v37 = vrot.slane %v1210_v54, 1 }
 0x2e4   :  { %7009 = vpow2.f32 %v6036_v38  ;;  %v6037_v48 = vmul.f32 -1.442695, %v1346_v59  ;;  %v1359_v53 = vadd.f32 %v1290_v34, %v1210_v54 }
 0x2e5   :  { %v1252_v50 = vpop.f32.mrf.mxu0  ;;  %v1293_v49 = vpop.f32.mrf.mxu1 }
 0x2e6   :  { %7011 = vpow2.f32 %v6037_v48  ;;  %v6038_v50 = vmul.f32 -1.442695, %v1359_v53 }
 0x2f1   :  { %v7010_v26 = vpop.eup %7009 }
 0x2f2   :  { %v1340_v44 = vadd.f32 1.0, %v7010_v26 }
 0x2f3   :  { %v7012_v36 = vpop.eup %7011 }
 0x2f4   :  { %7013 = vrcp.f32 %v1340_v44  ;;  %v1350_v47 = vadd.f32 1.0, %v7012_v36 }
 0x2f6   :  { %7015 = vrcp.f32 %v1350_v47 }
 0x301   :  { %v7014_v0 = vpop.eup %7013 }
 0x302   :  { %v1354_v22 = vmul.f32 %v7014_v0, %v1353_v24 }
 0x303   :  { %v7016_v33 = vpop.eup %7015 }
 0x304   :  { %v1357_v56 = vadd.f32 %v1355_v20, %v1354_v22  ;;  %v1382_v59 = vsub.f32 1.0, %v7016_v33  ;;  %v1384_v44 = vmul.f32 %v7016_v33, %v8539_v5  ;;  %v1378_v5 = vrot.slane %v1210_v54, 2 }
 0x306   :  { %7017 = vtanh.f32 %v1357_v56 }
 0x307   :  { %7019 = vpow2.f32 %v6038_v50 }
 0x313   :  { %v7018_v48 = vpop.eup %7017 }
 0x314   :  { %v1383_v49 = vmul.f32 %v7018_v48, %v1382_v59  ;;  %v7020_v36 = vpop.eup %7019 }
 0x315   :  { %v1363_v51 = vadd.f32 1.0, %v7020_v36 }
 0x316   :  { %v8802_v26 = vadd.f32 %v1384_v44, %v1383_v49 }
 0x317   :  { %7021 = vrcp.f32 %v1363_v51 }
 0x318   :  { %1390 = vst [vmem:[#allocation3 + $0x1] sm:$0x1] %v8802_v26  ;;  %v8814_v54 = vpack.c.bf16 %v8802_v26, %v8802_v26 }
 0x31f   :  { %v1329_v24 = vpop.f32.mrf.mxu0 }
 0x320   :  { %v1369_v20 = vadd.f32 %v1367_v37, %v1329_v24  ;;  %v8837_v24 = vld [vmem:[#allocation9 + $0x74] ss:$24 sps:$4 sm:$0xff]  }
 0x321   :  { %v1331_v34 = vpop.f32.mrf.mxu0 }
 0x322   :  { %v6039_v22 = vmul.f32 -1.442695, %v1369_v20  ;;  %v1376_v40 = vadd.f32 %v1331_v34, %v8545_v32  ;;  %v8842_v20 = vld [vmem:[#allocation9 + $0x70] ss:$24 sps:$4 sm:$0xff]   ;;  %v8845_v34 = vld [vmem:[#allocation9 + $0x44] ss:$24 sps:$4 sm:$0xff]  }
 0x323   :  { %v1333_v47 = vpop.f32.mrf.mxu0 }
 0x324   :  { %7023 = vpow2.f32 %v6039_v22  ;;  %v7022_v0 = vpop.eup %7021  ;;  %v8850_v22 = vld [vmem:[#allocation9 + $0x40] ss:$24 sps:$4 sm:$0xff]   ;;  %v8853_v47 = vld [vmem:[#allocation9 + $0x14] ss:$24 sps:$4 sm:$0xff]  }
 0x325   :  { %v1334_v38 = vpop.f32.mrf.mxu0  ;;  %v1377_v56 = vmul.f32 %v7022_v0, %v1376_v40  ;;  %v8861_v40 = vld [vmem:[#allocation9 + $0x2e4] ss:$24 sps:$4 sm:$0xff]   ;;  %v8866_v0 = vld [vmem:[#allocation9 + $0x2e0] ss:$24 sps:$4 sm:$0xff]  }
 0x326   :  { %v8858_v38 = vld [vmem:[#allocation9 + $0x10] ss:$24 sps:$4 sm:$0xff]  }
 0x327   :  { %v1380_v33 = vadd.f32 %v1378_v5, %v1377_v56  ;;  %v8869_v56 = vld [vmem:[#allocation9 + $0x2b4] ss:$24 sps:$4 sm:$0xff]   ;;  %v8874_v5 = vld [vmem:[#allocation9 + $0x2b0] ss:$24 sps:$4 sm:$0xff]  }
 0x331   :  { %v7024_v53 = vpop.eup %7023 }
 0x332   :  { %v1373_v50 = vadd.f32 1.0, %v7024_v53  ;;  %v8877_v53 = vld [vmem:[#allocation9 + $0x284] ss:$24 sps:$4 sm:$0xff]  }
 0x334   :  { %7025 = vrcp.f32 %v1373_v50  ;;  %v8882_v50 = vld [vmem:[#allocation9 + $0x280] ss:$24 sps:$4 sm:$0xff]  }
 0x335   :  { %7027 = vtanh.f32 %v1380_v33  ;;  %11486 = vst [vmem:[#allocation82_spill] sm:$0xff] %v8882_v50  ;;  %v8885_v33 = vld [vmem:[#allocation9 + $0x254] ss:$24 sps:$4 sm:$0xff]  }
 0x336   :  { %11487 = vst [vmem:[#allocation83_spill] sm:$0xff] %v8885_v33 }
 0x341   :  { %v7026_v59 = vpop.eup %7025 }
 0x342   :  { %v1386_v48 = vsub.f32 1.0, %v7026_v59  ;;  %v7028_v49 = vpop.eup %7027  ;;  %v1388_v36 = vmul.f32 %v7026_v59, %v8548_v52  ;;  %v8834_v52 = vld [vmem:[#allocation9 + $0xa0] ss:$24 sps:$4 sm:$0xff]   ;;  %v8890_v59 = vld [vmem:[#allocation9 + $0x250] ss:$24 sps:$4 sm:$0xff]  }
 0x343   :  { %11488 = vst [vmem:[#allocation84_spill] sm:$0xff] %v8890_v59 }
 0x344   :  { %v1387_v44 = vmul.f32 %v7028_v49, %v1386_v48  ;;  %v8893_v48 = vld [vmem:[#allocation9 + $0x224] ss:$24 sps:$4 sm:$0xff]   ;;  %v8898_v49 = vld [vmem:[#allocation9 + $0x220] ss:$24 sps:$4 sm:$0xff]  }
 0x345   :  { %11489 = vst [vmem:[#allocation85_spill] sm:$0xff] %v8893_v48  ;;  %11490 = vst [vmem:[#allocation86_spill] sm:$0xff] %v8898_v49 }
 0x346   :  { %v8807_v51 = vadd.f32 %v1388_v36, %v1387_v44  ;;  %v8901_v44 = vld [vmem:[#allocation9 + $0x1f4] ss:$24 sps:$4 sm:$0xff]   ;;  %v8906_v36 = vld [vmem:[#allocation9 + $0x1f0] ss:$24 sps:$4 sm:$0xff]  }
 0x347   :  { %11491 = vst [vmem:[#allocation87_spill] sm:$0xff] %v8901_v44  ;;  %11492 = vst [vmem:[#allocation88_spill] sm:$0xff] %v8906_v36 }
 0x348   :  { %1391 = vst [vmem:[#allocation3 + $0xe] sm:$0x1] %v8807_v51  ;;  %v1397_v37 = vpack.c.bf16 %v8807_v51, %v8807_v51 }
 0x34a   :  { %1430 = vmatprep.mubr.bf16.mxu1 %v1397_v37  ;;  %1471 = vmatprep.mubr.bf16.mxu0 %v1397_v37 }
 0x34b   :  { %1431 = vmatmul.mubr.bf16.vlgmr.msra.gmra.mxu1 %v8814_v54  ;;  %1472 = vmatmul.mubr.bf16.vlgmr.msra.gmra.mxu0 %v8814_v54 }
 0x34c   :  { %1481 = vmatpush1.bf16.msra.mxu1 %v8559_v57  ;;  %1512 = vmatprep.mubr.bf16.mxu1 %v1397_v37  ;;  %v8909_v37 = vld [vmem:[#allocation9 + $0x1c4] ss:$24 sps:$4 sm:$0xff]  }
 0x34d   :  { %1482 = vmatprep.subr.bf16.mxu1 %v8562_v58  ;;  %1584 = vmatpush1.bf16.msra.mxu0 %v8565_v60  ;;  %11493 = vst [vmem:[#allocation89_spill] sm:$0xff] %v8909_v37 }
 0x34e   :  { %1585 = vmatprep.subr.bf16.mxu0 %v8568_v62 }
 0x350   :  { %1483 = vmatpush1.bf16.msra.mxu1 %v8571_v63 }
 0x351   :  { %1484 = vmatprep.subr.bf16.mxu1 %v8574_v1  ;;  %1586 = vmatpush1.bf16.msra.mxu0 %v8577_v10 }
 0x352   :  { %1587 = vmatprep.subr.bf16.mxu0 %v8580_v18 }
 0x354   :  { %1485 = vmatpush1.bf16.msra.mxu1 %v8583_v23 }
 0x355   :  { %1486 = vmatprep.subr.bf16.mxu1 %v8586_v25  ;;  %1588 = vmatpush1.bf16.msra.mxu0 %v8589_v27 }
 0x356   :  { %1589 = vmatprep.subr.bf16.mxu0 %v8592_v21 }
 0x358   :  { %1487 = vmatpush1.bf16.msra.mxu1 %v8595_v28 }
 0x359   :  { %1488 = vmatprep.subr.bf16.mxu1 %v8598_v29  ;;  %1590 = vmatpush1.bf16.msra.mxu0 %v8601_v30 }
 0x35a   :  { %1591 = vmatprep.subr.bf16.mxu0 %v8604_v31 }
 0x35c   :  { %1489 = vmatpush1.bf16.msra.mxu1 %v8834_v52 }
 0x35d   :  { %1490 = vmatprep.subr.bf16.mxu1 %v8837_v24  ;;  %1592 = vmatpush1.bf16.msra.mxu0 %v8609_v35 }
 0x35e   :  { %1593 = vmatprep.subr.bf16.mxu0 %v8612_v39 }
 0x360   :  { %1491 = vmatpush1.bf16.msra.mxu1 %v8842_v20 }
 0x361   :  { %1492 = vmatprep.subr.bf16.mxu1 %v8845_v34  ;;  %1594 = vmatpush1.bf16.msra.mxu0 %v8617_v41 }
 0x362   :  { %1595 = vmatprep.subr.bf16.mxu0 %v8620_v42 }
 0x364   :  { %1493 = vmatpush1.bf16.msra.mxu1 %v8850_v22 }
 0x365   :  { %1494 = vmatprep.subr.bf16.mxu1 %v8853_v47  ;;  %1596 = vmatpush1.bf16.msra.mxu0 %v8625_v14 }
 0x366   :  { %1597 = vmatprep.subr.bf16.mxu0 %v8628_v43 }
 0x368   :  { %1495 = vmatpush1.bf16.msra.mxu1 %v8858_v38 }
 0x369   :  { %1496 = vmatprep.subr.bf16.mxu1 %v8861_v40  ;;  %1598 = vmatpush1.bf16.msra.mxu0 %v8633_v16 }
 0x36a   :  { %1599 = vmatprep.subr.bf16.mxu0 %v8636_v45 }
 0x36c   :  { %1497 = vmatpush2.bf16.msra.mxu1 %v8866_v0 }
 0x36d   :  { %1498 = vmatprep.subr.bf16.mxu1 %v8869_v56  ;;  %1600 = vmatpush2.bf16.msra.mxu0 %v8641_v55 }
 0x36e   :  { %1601 = vmatprep.subr.bf16.mxu0 %v8644_v3 }
 0x370   :  { %1499 = vmatpush2.bf16.msra.mxu1 %v8874_v5 }
 0x371   :  { %1500 = vmatprep.subr.bf16.mxu1 %v8877_v53  ;;  %1602 = vmatpush2.bf16.msra.mxu0 %v8649_v6 }
 0x372   :  { %1603 = vmatprep.subr.bf16.mxu0 %v8652_v9 }
 0x374   :  { %1501 = vmatpush2.bf16.msra.mxu1 %v8882_v50 }
 0x375   :  { %1502 = vmatprep.subr.bf16.mxu1 %v8885_v33  ;;  %1604 = vmatpush2.bf16.msra.mxu0 %v8657_v61 }
 0x376   :  { %1605 = vmatprep.subr.bf16.mxu0 %v8660_v2 }
 0x378   :  { %1503 = vmatpush2.bf16.msra.mxu1 %v8890_v59 }
 0x379   :  { %1504 = vmatprep.subr.bf16.mxu1 %v8893_v48  ;;  %1606 = vmatpush2.bf16.msra.mxu0 %v8665_v4 }
 0x37a   :  { %1607 = vmatprep.subr.bf16.mxu0 %v8668_v7 }
 0x37c   :  { %1505 = vmatpush2.bf16.msra.mxu1 %v8898_v49  ;;  %v8914_v49 = vld [vmem:[#allocation9 + $0x1c0] ss:$24 sps:$4 sm:$0xff]  }
 0x37d   :  { %1506 = vmatprep.subr.bf16.mxu1 %v8901_v44  ;;  %1608 = vmatpush2.bf16.msra.mxu0 %v8673_v8  ;;  %11494 = vst [vmem:[#allocation90_spill] sm:$0xff] %v8914_v49  ;;  %v8917_v44 = vld [vmem:[#allocation9 + $0x194] ss:$24 sps:$4 sm:$0xff]  }
 0x37e   :  { %1609 = vmatprep.subr.bf16.mxu0 %v8676_v11  ;;  %11495 = vst [vmem:[#allocation91_spill] sm:$0xff] %v8917_v44  ;;  %v11504_v11 = vld [vmem:[#allocation56_spill] sm:$0xff] }
 0x380   :  { %1507 = vmatpush2.bf16.msra.mxu1 %v8906_v36  ;;  %v8922_v36 = vld [vmem:[#allocation9 + $0x190] ss:$24 sps:$4 sm:$0xff]  }
 0x381   :  { %1508 = vmatprep.subr.bf16.mxu1 %v8909_v37  ;;  %1610 = vmatpush2.bf16.msra.mxu0 %v8681_v12  ;;  %11496 = vst [vmem:[#allocation92_spill] sm:$0xff] %v8922_v36  ;;  %v11497_v12 = vld [vmem:[#allocation49_spill] sm:$0xff]  ;;  %v11500_v37 = vld [vmem:[#allocation52_spill] sm:$0xff] }
 0x382   :  { %1611 = vmatprep.subr.bf16.mxu0 %v8684_v13  ;;  %v11498_v13 = vld [vmem:[#allocation50_spill] sm:$0xff] }
 0x384   :  { %1509 = vmatpush2.bf16.msra.mxu1 %v8914_v49  ;;  %v11499_v49 = vld [vmem:[#allocation51_spill] sm:$0xff] }
 0x385   :  { %1510 = vmatprep.subr.bf16.mxu1 %v8917_v44  ;;  %1612 = vmatpush2.bf16.msra.mxu0 %v8689_v15  ;;  %v11501_v44 = vld [vmem:[#allocation53_spill] sm:$0xff]  ;;  %v11502_v15 = vld [vmem:[#allocation54_spill] sm:$0xff] }
 0x386   :  { %1613 = vmatprep.subr.bf16.mxu0 %v8692_v17  ;;  %v11503_v17 = vld [vmem:[#allocation55_spill] sm:$0xff] }
 0x388   :  { %1511 = vmatpush2.bf16.msra.mxu1 %v8922_v36  ;;  %v11505_v36 = vld [vmem:[#allocation57_spill] sm:$0xff] }
 0x389   :  { %1624 = vmatprep.subr.bf16.mxu1 %v8696_v19  ;;  %1614 = vmatpush2.bf16.msra.mxu0 %v11497_v12  ;;  %v11506_v19 = vld [vmem:[#allocation58_spill] sm:$0xff]  ;;  %v11507_v12 = vld [vmem:[#allocation59_spill] sm:$0xff] }
 0x38a   :  { %1665 = vmatprep.subr.bf16.mxu0 %v11498_v13  ;;  %v11508_v13 = vld [vmem:[#allocation60_spill] sm:$0xff] }
 0x38b   :  { %1513 = vmatmul.mubr.bf16.vlgmr.msra.gmra.mxu1 %v8814_v54  ;;  %v11509_v54 = vld [vmem:[#allocation61_spill] sm:$0xff] }
 0x38c   :  { %1625 = vmatpush1.bf16.msra.mxu1 %v11499_v49  ;;  %v11510_v49 = vld [vmem:[#allocation62_spill] sm:$0xff] }
 0x38d   :  { %1626 = vmatprep.subr.bf16.mxu1 %v11500_v37  ;;  %v11511_v37 = vld [vmem:[#allocation63_spill] sm:$0xff] }
 0x390   :  { %1627 = vmatpush1.bf16.msra.mxu1 %v11501_v44  ;;  %v11512_v44 = vld [vmem:[#allocation64_spill] sm:$0xff] }
 0x391   :  { %1628 = vmatprep.subr.bf16.mxu1 %v11502_v15  ;;  %v11513_v15 = vld [vmem:[#allocation65_spill] sm:$0xff] }
 0x394   :  { %1629 = vmatpush1.bf16.msra.mxu1 %v11503_v17  ;;  %v11514_v17 = vld [vmem:[#allocation66_spill] sm:$0xff] }
 0x395   :  { %1630 = vmatprep.subr.bf16.mxu1 %v11504_v11  ;;  %v11515_v11 = vld [vmem:[#allocation67_spill] sm:$0xff] }
 0x398   :  { %1631 = vmatpush1.bf16.msra.mxu1 %v11505_v36  ;;  %v11516_v36 = vld [vmem:[#allocation68_spill] sm:$0xff] }
 0x399   :  { %1632 = vmatprep.subr.bf16.mxu1 %v11506_v19  ;;  %v11517_v19 = vld [vmem:[#allocation69_spill] sm:$0xff] }
 0x39c   :  { %1633 = vmatpush1.bf16.msra.mxu1 %v11507_v12  ;;  %v11518_v12 = vld [vmem:[#allocation70_spill] sm:$0xff] }
 0x39d   :  { %1634 = vmatprep.subr.bf16.mxu1 %v11508_v13  ;;  %v11519_v13 = vld [vmem:[#allocation71_spill] sm:$0xff] }
 0x3a0   :  { %1635 = vmatpush1.bf16.msra.mxu1 %v11509_v54  ;;  %v11520_v54 = vld [vmem:[#allocation72_spill] sm:$0xff] }
 0x3a1   :  { %1636 = vmatprep.subr.bf16.mxu1 %v11510_v49  ;;  %v11521_v49 = vld [vmem:[#allocation73_spill] sm:$0xff] }
 0x3a4   :  { %1637 = vmatpush1.bf16.msra.mxu1 %v11511_v37  ;;  %v11522_v37 = vld [vmem:[#allocation74_spill] sm:$0xff] }
 0x3a5   :  { %1638 = vmatprep.subr.bf16.mxu1 %v11512_v44  ;;  %v11523_v44 = vld [vmem:[#allocation75_spill] sm:$0xff] }
 0x3a8   :  { %1639 = vmatpush1.bf16.msra.mxu1 %v11513_v15  ;;  %v11524_v15 = vld [vmem:[#allocation76_spill] sm:$0xff] }
 0x3a9   :  { %1640 = vmatprep.subr.bf16.mxu1 %v11514_v17  ;;  %v11525_v17 = vld [vmem:[#allocation77_spill] sm:$0xff] }
 0x3ac   :  { %1641 = vmatpush2.bf16.msra.mxu1 %v11515_v11  ;;  %v11526_v11 = vld [vmem:[#allocation78_spill] sm:$0xff] }
 0x3ad   :  { %1642 = vmatprep.subr.bf16.mxu1 %v11516_v36  ;;  %v11527_v36 = vld [vmem:[#allocation79_spill] sm:$0xff] }
 0x3b0   :  { %1643 = vmatpush2.bf16.msra.mxu1 %v11517_v19  ;;  %v11528_v19 = vld [vmem:[#allocation80_spill] sm:$0xff] }
 0x3b1   :  { %1644 = vmatprep.subr.bf16.mxu1 %v11518_v12  ;;  %v11529_v12 = vld [vmem:[#allocation81_spill] sm:$0xff] }
 0x3b4   :  { %1645 = vmatpush2.bf16.msra.mxu1 %v11519_v13  ;;  %v11530_v13 = vld [vmem:[#allocation36_spill] sm:$0xff] }
 0x3b5   :  { %1646 = vmatprep.subr.bf16.mxu1 %v11520_v54  ;;  %v1393_v54 = vld [vmem:[#allocation2 + $0x2] ss:$8 sm:$0x7] }
 0x3b6   :  { %v1540_v9 = vrot.slane %v1393_v54, 2 }
 0x3b8   :  { %1647 = vmatpush2.bf16.msra.mxu1 %v11521_v49 }
 0x3b9   :  { %1648 = vmatprep.subr.bf16.mxu1 %v11522_v37 }
 0x3bc   :  { %1649 = vmatpush2.bf16.msra.mxu1 %v11523_v44 }
 0x3bd   :  { %1650 = vmatprep.subr.bf16.mxu1 %v11524_v15 }
 0x3c0   :  { %1651 = vmatpush2.bf16.msra.mxu1 %v11525_v17  ;;  %v1529_v17 = vrot.slane %v1393_v54, 1 }
 0x3c1   :  { %1652 = vmatprep.subr.bf16.mxu1 %v11526_v11 }
 0x3c4   :  { %1653 = vmatpush2.bf16.msra.mxu1 %v11527_v36 }
 0x3c5   :  { %1654 = vmatprep.subr.bf16.mxu1 %v11528_v19 }
 0x3c8   :  { %1655 = vmatpush2.bf16.msra.mxu1 %v11529_v12 }
 0x3c9   :  { %1768 = vmatprep.subr.bf16.mxu1 %v11530_v13 }
 0x40b   :  { %v1432_v49 = vpop.f32.mrf.mxu1  ;;  %v1473_v8 = vpop.f32.mrf.mxu0 }
 0x40c   :  { %v1521_v37 = vadd.f32 %v1432_v49, %v1393_v54  ;;  %v1538_v33 = vadd.f32 %v1473_v8, %v8536_v46 }
 0x40d   :  { %v1434_v7 = vpop.f32.mrf.mxu1  ;;  %v1475_v44 = vpop.f32.mrf.mxu0 }
 0x40e   :  { %v6040_v4 = vmul.f32 -1.442695, %v1521_v37  ;;  %v1531_v36 = vadd.f32 %v1529_v17, %v1434_v7 }
 0x40f   :  { %v1436_v15 = vpop.f32.mrf.mxu1  ;;  %v1477_v48 = vpop.f32.mrf.mxu0 }
 0x410   :  { %7029 = vpow2.f32 %v6040_v4  ;;  %v6041_v2 = vmul.f32 -1.442695, %v1531_v36  ;;  %v1395_v15 = vld [vmem:[#allocation2 + $0x1d] ss:$8 sm:$0x7] }
 0x411   :  { %v1437_v11 = vpop.f32.mrf.mxu1  ;;  %v1478_v59 = vpop.f32.mrf.mxu0  ;;  %v1544_v4 = vadd.f32 %v1475_v44, %v1395_v15 }
 0x412   :  { %7031 = vpow2.f32 %v6041_v2 }
 0x413   :  { %v6042_v11 = vmul.f32 -1.442695, %v1544_v4 }
 0x41d   :  { %v7030_v19 = vpop.eup %7029 }
 0x41e   :  { %v1525_v12 = vadd.f32 1.0, %v7030_v19 }
 0x41f   :  { %v7032_v13 = vpop.eup %7031 }
 0x420   :  { %7033 = vrcp.f32 %v1525_v12  ;;  %v1535_v61 = vadd.f32 1.0, %v7032_v13 }
 0x422   :  { %7035 = vrcp.f32 %v1535_v61 }
 0x42d   :  { %v7034_v49 = vpop.eup %7033 }
 0x42e   :  { %v1539_v50 = vmul.f32 %v7034_v49, %v1538_v33  ;;  %v1552_v33 = vrot.slane %v1395_v15, 1 }
 0x42f   :  { %v7036_v7 = vpop.eup %7035 }
 0x430   :  { %v1542_v48 = vadd.f32 %v1540_v9, %v1539_v50  ;;  %v1567_v17 = vsub.f32 1.0, %v7036_v7  ;;  %v1569_v12 = vmul.f32 %v7036_v7, %v8802_v26  ;;  %v1563_v26 = vrot.slane %v1395_v15, 2 }
 0x432   :  { %7037 = vtanh.f32 %v1542_v48 }
 0x433   :  { %7039 = vpow2.f32 %v6042_v11 }
 0x43f   :  { %v7038_v2 = vpop.eup %7037 }
 0x440   :  { %v1568_v59 = vmul.f32 %v7038_v2, %v1567_v17  ;;  %v7040_v46 = vpop.eup %7039 }
 0x441   :  { %v1548_v8 = vadd.f32 1.0, %v7040_v46 }
 0x442   :  { %v8963_v19 = vadd.f32 %v1569_v12, %v1568_v59 }
 0x443   :  { %7041 = vrcp.f32 %v1548_v8 }
 0x444   :  { %1575 = vst [vmem:[#allocation3 + $0x2] sm:$0x1] %v8963_v19  ;;  %v8975_v15 = vpack.c.bf16 %v8963_v19, %v8963_v19 }
 0x44b   :  { %v1514_v61 = vpop.f32.mrf.mxu1 }
 0x44c   :  { %v1554_v9 = vadd.f32 %v1552_v33, %v1514_v61  ;;  %v11532_v33 = vld [vmem:[#allocation82_spill] sm:$0xff]  ;;  %v11533_v61 = vld [vmem:[#allocation83_spill] sm:$0xff] }
 0x44d   :  { %v1516_v50 = vpop.f32.mrf.mxu1 }
 0x44e   :  { %v6043_v44 = vmul.f32 -1.442695, %v1554_v9  ;;  %v1561_v54 = vadd.f32 %v1516_v50, %v8545_v32  ;;  %v11534_v9 = vld [vmem:[#allocation38_spill] sm:$0xff]  ;;  %v11535_v50 = vld [vmem:[#allocation39_spill] sm:$0xff] }
 0x44f   :  { %v1518_v36 = vpop.f32.mrf.mxu1 }
 0x450   :  { %7043 = vpow2.f32 %v6043_v44  ;;  %v7042_v13 = vpop.eup %7041  ;;  %v11536_v44 = vld [vmem:[#allocation84_spill] sm:$0xff]  ;;  %v11537_v36 = vld [vmem:[#allocation85_spill] sm:$0xff] }
 0x451   :  { %v1519_v37 = vpop.f32.mrf.mxu1  ;;  %v1562_v49 = vmul.f32 %v7042_v13, %v1561_v54  ;;  %v11539_v54 = vld [vmem:[#allocation41_spill] sm:$0xff]  ;;  %v11540_v13 = vld [vmem:[#allocation86_spill] sm:$0xff] }
 0x452   :  { %v11538_v37 = vld [vmem:[#allocation40_spill] sm:$0xff] }
 0x453   :  { %v1565_v11 = vadd.f32 %v1563_v26, %v1562_v49  ;;  %v11541_v49 = vld [vmem:[#allocation87_spill] sm:$0xff]  ;;  %v11542_v26 = vld [vmem:[#allocation42_spill] sm:$0xff] }
 0x45d   :  { %v7044_v48 = vpop.eup %7043 }
 0x45e   :  { %v1558_v4 = vadd.f32 1.0, %v7044_v48  ;;  %v11543_v48 = vld [vmem:[#allocation43_spill] sm:$0xff] }
 0x460   :  { %7045 = vrcp.f32 %v1558_v4  ;;  %v11544_v4 = vld [vmem:[#allocation88_spill] sm:$0xff] }
 0x461   :  { %7047 = vtanh.f32 %v1565_v11  ;;  %v11545_v11 = vld [vmem:[#allocation89_spill] sm:$0xff] }
 0x46d   :  { %v7046_v7 = vpop.eup %7045 }
 0x46e   :  { %v1571_v17 = vsub.f32 1.0, %v7046_v7  ;;  %v7048_v2 = vpop.eup %7047  ;;  %v1573_v12 = vmul.f32 %v7046_v7, %v8807_v51  ;;  %v11531_v51 = vld [vmem:[#allocation37_spill] sm:$0xff]  ;;  %v11546_v7 = vld [vmem:[#allocation44_spill] sm:$0xff] }
 0x470   :  { %v1572_v59 = vmul.f32 %v7048_v2, %v1571_v17  ;;  %v11547_v17 = vld [vmem:[#allocation45_spill] sm:$0xff]  ;;  %v11548_v2 = vld [vmem:[#allocation90_spill] sm:$0xff] }
 0x472   :  { %v8968_v46 = vadd.f32 %v1573_v12, %v1572_v59  ;;  %v11549_v59 = vld [vmem:[#allocation91_spill] sm:$0xff]  ;;  %v11550_v12 = vld [vmem:[#allocation46_spill] sm:$0xff] }
 0x474   :  { %1576 = vst [vmem:[#allocation3 + $0xd] sm:$0x1] %v8968_v46  ;;  %v1582_v8 = vpack.c.bf16 %v8968_v46, %v8968_v46 }
 0x476   :  { %1615 = vmatprep.mubr.bf16.mxu0 %v1582_v8  ;;  %1656 = vmatprep.mubr.bf16.mxu1 %v1582_v8 }
 0x477   :  { %1616 = vmatmul.mubr.bf16.vlgmr.msra.gmra.mxu0 %v8975_v15  ;;  %1657 = vmatmul.mubr.bf16.vlgmr.msra.gmra.mxu1 %v8975_v15 }
 0x478   :  { %1666 = vmatpush1.bf16.msra.mxu0 %v8559_v57  ;;  %1697 = vmatprep.mubr.bf16.mxu0 %v1582_v8  ;;  %v11551_v8 = vld [vmem:[#allocation47_spill] sm:$0xff] }
 0x479   :  { %1667 = vmatprep.subr.bf16.mxu0 %v8562_v58  ;;  %1769 = vmatpush1.bf16.msra.mxu1 %v8565_v60 }
 0x47a   :  { %1770 = vmatprep.subr.bf16.mxu1 %v8568_v62 }
 0x47c   :  { %1668 = vmatpush1.bf16.msra.mxu0 %v8571_v63 }
 0x47d   :  { %1669 = vmatprep.subr.bf16.mxu0 %v8574_v1  ;;  %1771 = vmatpush1.bf16.msra.mxu1 %v8577_v10 }
 0x47e   :  { %1772 = vmatprep.subr.bf16.mxu1 %v8580_v18 }
 0x480   :  { %1670 = vmatpush1.bf16.msra.mxu0 %v8583_v23 }
 0x481   :  { %1671 = vmatprep.subr.bf16.mxu0 %v8586_v25  ;;  %1773 = vmatpush1.bf16.msra.mxu1 %v8589_v27 }
 0x482   :  { %1774 = vmatprep.subr.bf16.mxu1 %v8592_v21 }
 0x484   :  { %1672 = vmatpush1.bf16.msra.mxu0 %v8595_v28 }
 0x485   :  { %1673 = vmatprep.subr.bf16.mxu0 %v8598_v29  ;;  %1775 = vmatpush1.bf16.msra.mxu1 %v8601_v30 }
 0x486   :  { %1776 = vmatprep.subr.bf16.mxu1 %v8604_v31 }
 0x488   :  { %1674 = vmatpush1.bf16.msra.mxu0 %v8834_v52 }
 0x489   :  { %1675 = vmatprep.subr.bf16.mxu0 %v8837_v24  ;;  %1777 = vmatpush1.bf16.msra.mxu1 %v8609_v35 }
 0x48a   :  { %1778 = vmatprep.subr.bf16.mxu1 %v8612_v39 }
 0x48c   :  { %1676 = vmatpush1.bf16.msra.mxu0 %v8842_v20 }
 0x48d   :  { %1677 = vmatprep.subr.bf16.mxu0 %v8845_v34  ;;  %1779 = vmatpush1.bf16.msra.mxu1 %v8617_v41 }
 0x48e   :  { %1780 = vmatprep.subr.bf16.mxu1 %v8620_v42 }
 0x490   :  { %1678 = vmatpush1.bf16.msra.mxu0 %v8850_v22 }
 0x491   :  { %1679 = vmatprep.subr.bf16.mxu0 %v8853_v47  ;;  %1781 = vmatpush1.bf16.msra.mxu1 %v8625_v14 }
 0x492   :  { %1782 = vmatprep.subr.bf16.mxu1 %v8628_v43 }
 0x494   :  { %1680 = vmatpush1.bf16.msra.mxu0 %v8858_v38 }
 0x495   :  { %1681 = vmatprep.subr.bf16.mxu0 %v8861_v40  ;;  %1783 = vmatpush1.bf16.msra.mxu1 %v8633_v16 }
 0x496   :  { %1784 = vmatprep.subr.bf16.mxu1 %v8636_v45 }
 0x498   :  { %1682 = vmatpush2.bf16.msra.mxu0 %v8866_v0 }
 0x499   :  { %1683 = vmatprep.subr.bf16.mxu0 %v8869_v56  ;;  %1785 = vmatpush2.bf16.msra.mxu1 %v8641_v55 }
 0x49a   :  { %1786 = vmatprep.subr.bf16.mxu1 %v8644_v3 }
 0x49c   :  { %1684 = vmatpush2.bf16.msra.mxu0 %v8874_v5 }
 0x49d   :  { %1685 = vmatprep.subr.bf16.mxu0 %v8877_v53  ;;  %1787 = vmatpush2.bf16.msra.mxu1 %v8649_v6 }
 0x49e   :  { %1788 = vmatprep.subr.bf16.mxu1 %v11531_v51 }
 0x4a0   :  { %1686 = vmatpush2.bf16.msra.mxu0 %v11532_v33 }
 0x4a1   :  { %1687 = vmatprep.subr.bf16.mxu0 %v11533_v61  ;;  %1789 = vmatpush2.bf16.msra.mxu1 %v11534_v9 }
 0x4a2   :  { %1790 = vmatprep.subr.bf16.mxu1 %v11535_v50 }
 0x4a4   :  { %1688 = vmatpush2.bf16.msra.mxu0 %v11536_v44 }
 0x4a5   :  { %1689 = vmatprep.subr.bf16.mxu0 %v11537_v36  ;;  %1791 = vmatpush2.bf16.msra.mxu1 %v11538_v37 }
 0x4a6   :  { %1792 = vmatprep.subr.bf16.mxu1 %v11539_v54 }
 0x4a8   :  { %1690 = vmatpush2.bf16.msra.mxu0 %v11540_v13 }
 0x4a9   :  { %1691 = vmatprep.subr.bf16.mxu0 %v11541_v49  ;;  %1793 = vmatpush2.bf16.msra.mxu1 %v11542_v26  ;;  %v11552_v49 = vld [vmem:[#allocation92_spill] sm:$0xff] }
 0x4aa   :  { %1794 = vmatprep.subr.bf16.mxu1 %v11543_v48  ;;  %v11553_v26 = vld [vmem:[#allocation48_spill] sm:$0xff]  ;;  %v11554_v48 = vld [vmem:[#allocation49_spill] sm:$0xff] }
 0x4ac   :  { %1692 = vmatpush2.bf16.msra.mxu0 %v11544_v4  ;;  %v11555_v4 = vld [vmem:[#allocation50_spill] sm:$0xff] }
 0x4ad   :  { %1693 = vmatprep.subr.bf16.mxu0 %v11545_v11  ;;  %1795 = vmatpush2.bf16.msra.mxu1 %v11546_v7  ;;  %v11556_v7 = vld [vmem:[#allocation51_spill] sm:$0xff] }
 0x4ae   :  { %1796 = vmatprep.subr.bf16.mxu1 %v11547_v17  ;;  %v11557_v17 = vld [vmem:[#allocation52_spill] sm:$0xff] }
 0x4b0   :  { %1694 = vmatpush2.bf16.msra.mxu0 %v11548_v2  ;;  %v11558_v2 = vld [vmem:[#allocation53_spill] sm:$0xff] }
 0x4b1   :  { %1695 = vmatprep.subr.bf16.mxu0 %v11549_v59  ;;  %1797 = vmatpush2.bf16.msra.mxu1 %v11550_v12  ;;  %v11559_v59 = vld [vmem:[#allocation54_spill] sm:$0xff]  ;;  %v11560_v12 = vld [vmem:[#allocation55_spill] sm:$0xff] }
 0x4b2   :  { %1798 = vmatprep.subr.bf16.mxu1 %v11551_v8  ;;  %v11561_v8 = vld [vmem:[#allocation56_spill] sm:$0xff] }
 0x4b4   :  { %1696 = vmatpush2.bf16.msra.mxu0 %v11552_v49  ;;  %v11562_v49 = vld [vmem:[#allocation57_spill] sm:$0xff] }
 0x4b5   :  { %1809 = vmatprep.subr.bf16.mxu0 %v11553_v26  ;;  %1799 = vmatpush2.bf16.msra.mxu1 %v11554_v48  ;;  %v11563_v26 = vld [vmem:[#allocation58_spill] sm:$0xff]  ;;  %v11564_v48 = vld [vmem:[#allocation59_spill] sm:$0xff] }
 0x4b6   :  { %1850 = vmatprep.subr.bf16.mxu1 %v11555_v4  ;;  %v11565_v4 = vld [vmem:[#allocation60_spill] sm:$0xff] }
 0x4b7   :  { %1698 = vmatmul.mubr.bf16.vlgmr.msra.gmra.mxu0 %v8975_v15  ;;  %v11566_v15 = vld [vmem:[#allocation61_spill] sm:$0xff] }
 0x4b8   :  { %1810 = vmatpush1.bf16.msra.mxu0 %v11556_v7  ;;  %v11567_v7 = vld [vmem:[#allocation62_spill] sm:$0xff] }
 0x4b9   :  { %1811 = vmatprep.subr.bf16.mxu0 %v11557_v17  ;;  %v11568_v17 = vld [vmem:[#allocation63_spill] sm:$0xff] }
 0x4bc   :  { %1812 = vmatpush1.bf16.msra.mxu0 %v11558_v2  ;;  %v11569_v2 = vld [vmem:[#allocation64_spill] sm:$0xff] }
 0x4bd   :  { %1813 = vmatprep.subr.bf16.mxu0 %v11559_v59  ;;  %v11570_v59 = vld [vmem:[#allocation65_spill] sm:$0xff] }
 0x4c0   :  { %1814 = vmatpush1.bf16.msra.mxu0 %v11560_v12  ;;  %v11571_v12 = vld [vmem:[#allocation66_spill] sm:$0xff] }
 0x4c1   :  { %1815 = vmatprep.subr.bf16.mxu0 %v11561_v8  ;;  %v11572_v8 = vld [vmem:[#allocation67_spill] sm:$0xff] }
 0x4c4   :  { %1816 = vmatpush1.bf16.msra.mxu0 %v11562_v49  ;;  %v11573_v49 = vld [vmem:[#allocation68_spill] sm:$0xff] }
 0x4c5   :  { %1817 = vmatprep.subr.bf16.mxu0 %v11563_v26  ;;  %v11574_v26 = vld [vmem:[#allocation69_spill] sm:$0xff] }
 0x4c8   :  { %1818 = vmatpush1.bf16.msra.mxu0 %v11564_v48  ;;  %v11575_v48 = vld [vmem:[#allocation70_spill] sm:$0xff] }
 0x4c9   :  { %1819 = vmatprep.subr.bf16.mxu0 %v11565_v4  ;;  %v11576_v4 = vld [vmem:[#allocation71_spill] sm:$0xff] }
 0x4cc   :  { %1820 = vmatpush1.bf16.msra.mxu0 %v11566_v15  ;;  %v11577_v15 = vld [vmem:[#allocation72_spill] sm:$0xff] }
 0x4cd   :  { %1821 = vmatprep.subr.bf16.mxu0 %v11567_v7  ;;  %v11578_v7 = vld [vmem:[#allocation73_spill] sm:$0xff] }
 0x4d0   :  { %1822 = vmatpush1.bf16.msra.mxu0 %v11568_v17  ;;  %v11579_v17 = vld [vmem:[#allocation74_spill] sm:$0xff] }
 0x4d1   :  { %1823 = vmatprep.subr.bf16.mxu0 %v11569_v2  ;;  %v11580_v2 = vld [vmem:[#allocation75_spill] sm:$0xff] }
 0x4d4   :  { %1824 = vmatpush1.bf16.msra.mxu0 %v11570_v59  ;;  %v11581_v59 = vld [vmem:[#allocation76_spill] sm:$0xff] }
 0x4d5   :  { %1825 = vmatprep.subr.bf16.mxu0 %v11571_v12  ;;  %v11582_v12 = vld [vmem:[#allocation77_spill] sm:$0xff] }
 0x4d8   :  { %1826 = vmatpush2.bf16.msra.mxu0 %v11572_v8  ;;  %v11583_v8 = vld [vmem:[#allocation78_spill] sm:$0xff] }
 0x4d9   :  { %1827 = vmatprep.subr.bf16.mxu0 %v11573_v49  ;;  %v11584_v49 = vld [vmem:[#allocation79_spill] sm:$0xff] }
 0x4dc   :  { %1828 = vmatpush2.bf16.msra.mxu0 %v11574_v26  ;;  %v11585_v26 = vld [vmem:[#allocation80_spill] sm:$0xff] }
 0x4dd   :  { %1829 = vmatprep.subr.bf16.mxu0 %v11575_v48  ;;  %v11586_v48 = vld [vmem:[#allocation81_spill] sm:$0xff] }
 0x4e0   :  { %1830 = vmatpush2.bf16.msra.mxu0 %v11576_v4  ;;  %v9075_v4 = vld [vmem:[#allocation9 + $0x154] ss:$24 sps:$4 sm:$0xff]  }
 0x4e1   :  { %1831 = vmatprep.subr.bf16.mxu0 %v11577_v15  ;;  %11587 = vst [vmem:[#allocation36_spill] sm:$0xff] %v9075_v4 }
 0x4e4   :  { %1832 = vmatpush2.bf16.msra.mxu0 %v11578_v7  ;;  %v1578_v7 = vld [vmem:[#allocation2 + $0x3] ss:$8 sm:$0x7] }
 0x4e5   :  { %1833 = vmatprep.subr.bf16.mxu0 %v11579_v17 }
 0x4e8   :  { %1834 = vmatpush2.bf16.msra.mxu0 %v11580_v2 }
 0x4e9   :  { %1835 = vmatprep.subr.bf16.mxu0 %v11581_v59 }
 0x4ec   :  { %1836 = vmatpush2.bf16.msra.mxu0 %v11582_v12 }
 0x4ed   :  { %1837 = vmatprep.subr.bf16.mxu0 %v11583_v8  ;;  %v1714_v8 = vrot.slane %v1578_v7, 1 }
 0x4f0   :  { %1838 = vmatpush2.bf16.msra.mxu0 %v11584_v49 }
 0x4f1   :  { %1839 = vmatprep.subr.bf16.mxu0 %v11585_v26 }
 0x4f4   :  { %1840 = vmatpush2.bf16.msra.mxu0 %v11586_v48 }
 0x4f5   :  { %1953 = vmatprep.subr.bf16.mxu0 %v9075_v4 }
 0x537   :  { %v1617_v17 = vpop.f32.mrf.mxu0  ;;  %v1658_v15 = vpop.f32.mrf.mxu1 }
 0x538   :  { %v1706_v2 = vadd.f32 %v1617_v17, %v1578_v7  ;;  %v9081_v17 = vld [vmem:[%s10987_s4] sm:$0x1] }
 0x539   :  { %v1619_v11 = vpop.f32.mrf.mxu0  ;;  %v1660_v59 = vpop.f32.mrf.mxu1  ;;  %11588 = vst [vmem:[#allocation37_spill] sm:$0xff] %v9081_v17 }
 0x53a   :  { %v6044_v13 = vmul.f32 -1.442695, %v1706_v2  ;;  %v1716_v26 = vadd.f32 %v1714_v8, %v1619_v11  ;;  %v1723_v2 = vadd.f32 %v9081_v17, %v1658_v15 }
 0x53b   :  { %v1621_v12 = vpop.f32.mrf.mxu0  ;;  %v1662_v54 = vpop.f32.mrf.mxu1 }
 0x53c   :  { %7049 = vpow2.f32 %v6044_v13  ;;  %v6045_v36 = vmul.f32 -1.442695, %v1716_v26  ;;  %v1725_v12 = vrot.slane %v1578_v7, 2 }
 0x53d   :  { %v1622_v49 = vpop.f32.mrf.mxu0  ;;  %v1663_v37 = vpop.f32.mrf.mxu1 }
 0x53e   :  { %7051 = vpow2.f32 %v6045_v36  ;;  %v1580_v37 = vld [vmem:[#allocation2 + $0x1c] ss:$8 sm:$0x7] }
 0x53f   :  { %v1729_v26 = vadd.f32 %v1660_v59, %v1580_v37  ;;  %v1737_v7 = vrot.slane %v1580_v37, 1 }
 0x541   :  { %v6046_v36 = vmul.f32 -1.442695, %v1729_v26 }
 0x549   :  { %v7050_v48 = vpop.eup %7049 }
 0x54a   :  { %v1710_v44 = vadd.f32 1.0, %v7050_v48 }
 0x54b   :  { %v7052_v4 = vpop.eup %7051 }
 0x54c   :  { %7053 = vrcp.f32 %v1710_v44  ;;  %v1720_v50 = vadd.f32 1.0, %v7052_v4 }
 0x54e   :  { %7055 = vrcp.f32 %v1720_v50 }
 0x559   :  { %v7054_v54 = vpop.eup %7053 }
 0x55a   :  { %v1724_v13 = vmul.f32 %v7054_v54, %v1723_v2 }
 0x55b   :  { %v7056_v44 = vpop.eup %7055 }
 0x55c   :  { %v1727_v49 = vadd.f32 %v1725_v12, %v1724_v13  ;;  %v1752_v48 = vsub.f32 1.0, %v7056_v44  ;;  %v1754_v8 = vmul.f32 %v7056_v44, %v8963_v19  ;;  %v1748_v19 = vrot.slane %v1580_v37, 2 }
 0x55e   :  { %7057 = vtanh.f32 %v1727_v49 }
 0x55f   :  { %7059 = vpow2.f32 %v6046_v36 }
 0x56b   :  { %v7058_v4 = vpop.eup %7057 }
 0x56c   :  { %v1753_v11 = vmul.f32 %v7058_v4, %v1752_v48  ;;  %v7060_v15 = vpop.eup %7059 }
 0x56d   :  { %v1733_v2 = vadd.f32 1.0, %v7060_v15 }
 0x56e   :  { %v9085_v9 = vadd.f32 %v1754_v8, %v1753_v11 }
 0x56f   :  { %7061 = vrcp.f32 %v1733_v2 }
 0x570   :  { %1760 = vst [vmem:[#allocation3 + $0x3] sm:$0x1] %v9085_v9  ;;  %v9097_v37 = vpack.c.bf16 %v9085_v9, %v9085_v9 }
 0x577   :  { %v1699_v50 = vpop.f32.mrf.mxu0 }
 0x578   :  { %v1739_v54 = vadd.f32 %v1737_v7, %v1699_v50 }
 0x579   :  { %v1701_v59 = vpop.f32.mrf.mxu0 }
 0x57a   :  { %v6047_v13 = vmul.f32 -1.442695, %v1739_v54  ;;  %v1746_v26 = vadd.f32 %v1701_v59, %v8545_v32  ;;  %v11619_v54 = vld [vmem:[#allocation59_spill] sm:$0xff]  ;;  %v11620_v59 = vld [vmem:[#allocation60_spill] sm:$0xff] }
 0x57b   :  { %v1703_v12 = vpop.f32.mrf.mxu0 }
 0x57c   :  { %7063 = vpow2.f32 %v6047_v13  ;;  %v7062_v36 = vpop.eup %7061  ;;  %v11621_v13 = vld [vmem:[#allocation61_spill] sm:$0xff]  ;;  %v11622_v12 = vld [vmem:[#allocation62_spill] sm:$0xff] }
 0x57d   :  { %v1704_v49 = vpop.f32.mrf.mxu0  ;;  %v1747_v48 = vmul.f32 %v7062_v36, %v1746_v26  ;;  %v11624_v26 = vld [vmem:[#allocation64_spill] sm:$0xff]  ;;  %v11625_v36 = vld [vmem:[#allocation65_spill] sm:$0xff] }
 0x57e   :  { %v11623_v49 = vld [vmem:[#allocation63_spill] sm:$0xff] }
 0x57f   :  { %v1750_v11 = vadd.f32 %v1748_v19, %v1747_v48  ;;  %v11626_v48 = vld [vmem:[#allocation66_spill] sm:$0xff]  ;;  %v11627_v19 = vld [vmem:[#allocation67_spill] sm:$0xff] }
 0x589   :  { %v7064_v44 = vpop.eup %7063 }
 0x58a   :  { %v1743_v4 = vadd.f32 1.0, %v7064_v44  ;;  %v11628_v44 = vld [vmem:[#allocation68_spill] sm:$0xff] }
 0x58c   :  { %7065 = vrcp.f32 %v1743_v4  ;;  %v11629_v4 = vld [vmem:[#allocation69_spill] sm:$0xff] }
 0x58d   :  { %7067 = vtanh.f32 %v1750_v11  ;;  %v11630_v11 = vld [vmem:[#allocation70_spill] sm:$0xff] }
 0x599   :  { %v7066_v8 = vpop.eup %7065 }
 0x59a   :  { %v1756_v15 = vsub.f32 1.0, %v7066_v8  ;;  %v7068_v17 = vpop.eup %7067  ;;  %v1758_v7 = vmul.f32 %v7066_v8, %v8968_v46  ;;  %v11616_v46 = vld [vmem:[#allocation56_spill] sm:$0xff]  ;;  %v11631_v8 = vld [vmem:[#allocation71_spill] sm:$0xff] }
 0x59c   :  { %v1757_v2 = vmul.f32 %v7068_v17, %v1756_v15  ;;  %v11618_v17 = vld [vmem:[#allocation58_spill] sm:$0xff]  ;;  %v11632_v15 = vld [vmem:[#allocation72_spill] sm:$0xff] }
 0x59e   :  { %v9090_v50 = vadd.f32 %v1758_v7, %v1757_v2  ;;  %v11633_v2 = vld [vmem:[#allocation73_spill] sm:$0xff]  ;;  %v11634_v7 = vld [vmem:[#allocation74_spill] sm:$0xff] }
 0x5a0   :  { %1761 = vst [vmem:[#allocation3 + $0xc] sm:$0x1] %v9090_v50  ;;  %v1767_v32 = vpack.c.bf16 %v9090_v50, %v9090_v50 }
 0x5a2   :  { %1800 = vmatprep.mubr.bf16.mxu1 %v1767_v32  ;;  %1841 = vmatprep.mubr.bf16.mxu0 %v1767_v32 }
 0x5a3   :  { %1801 = vmatmul.mubr.bf16.vlgmr.msra.gmra.mxu1 %v9097_v37  ;;  %1842 = vmatmul.mubr.bf16.vlgmr.msra.gmra.mxu0 %v9097_v37 }
 0x5a4   :  { %1851 = vmatpush1.bf16.msra.mxu1 %v8559_v57  ;;  %1882 = vmatprep.mubr.bf16.mxu1 %v1767_v32  ;;  %v11589_v57 = vld [vmem:[#allocation38_spill] sm:$0xff]  ;;  %v11635_v32 = vld [vmem:[#allocation75_spill] sm:$0xff] }
 0x5a5   :  { %1852 = vmatprep.subr.bf16.mxu1 %v8562_v58  ;;  %1954 = vmatpush1.bf16.msra.mxu0 %v8565_v60  ;;  %v11590_v58 = vld [vmem:[#allocation39_spill] sm:$0xff]  ;;  %v11591_v60 = vld [vmem:[#allocation84_spill] sm:$0xff] }
 0x5a6   :  { %1955 = vmatprep.subr.bf16.mxu0 %v8568_v62  ;;  %v11592_v62 = vld [vmem:[#allocation85_spill] sm:$0xff] }
 0x5a8   :  { %1853 = vmatpush1.bf16.msra.mxu1 %v8571_v63  ;;  %v11593_v63 = vld [vmem:[#allocation40_spill] sm:$0xff] }
 0x5a9   :  { %1854 = vmatprep.subr.bf16.mxu1 %v8574_v1  ;;  %1956 = vmatpush1.bf16.msra.mxu0 %v8577_v10  ;;  %v11594_v1 = vld [vmem:[#allocation41_spill] sm:$0xff]  ;;  %v11595_v10 = vld [vmem:[#allocation86_spill] sm:$0xff] }
 0x5aa   :  { %1957 = vmatprep.subr.bf16.mxu0 %v8580_v18  ;;  %v11596_v18 = vld [vmem:[#allocation87_spill] sm:$0xff] }
 0x5ac   :  { %1855 = vmatpush1.bf16.msra.mxu1 %v8583_v23  ;;  %v11597_v23 = vld [vmem:[#allocation42_spill] sm:$0xff] }
 0x5ad   :  { %1856 = vmatprep.subr.bf16.mxu1 %v8586_v25  ;;  %1958 = vmatpush1.bf16.msra.mxu0 %v8589_v27  ;;  %v11598_v25 = vld [vmem:[#allocation43_spill] sm:$0xff]  ;;  %v11599_v27 = vld [vmem:[#allocation88_spill] sm:$0xff] }
 0x5ae   :  { %1959 = vmatprep.subr.bf16.mxu0 %v8592_v21  ;;  %v11600_v21 = vld [vmem:[#allocation89_spill] sm:$0xff] }
 0x5b0   :  { %1857 = vmatpush1.bf16.msra.mxu1 %v8595_v28  ;;  %v11601_v28 = vld [vmem:[#allocation44_spill] sm:$0xff] }
 0x5b1   :  { %1858 = vmatprep.subr.bf16.mxu1 %v8598_v29  ;;  %1960 = vmatpush1.bf16.msra.mxu0 %v8601_v30  ;;  %v11602_v29 = vld [vmem:[#allocation45_spill] sm:$0xff]  ;;  %v11603_v30 = vld [vmem:[#allocation90_spill] sm:$0xff] }
 0x5b2   :  { %1961 = vmatprep.subr.bf16.mxu0 %v8604_v31  ;;  %v11604_v31 = vld [vmem:[#allocation91_spill] sm:$0xff] }
 0x5b4   :  { %1859 = vmatpush1.bf16.msra.mxu1 %v8834_v52 }
 0x5b5   :  { %1860 = vmatprep.subr.bf16.mxu1 %v8837_v24  ;;  %1962 = vmatpush1.bf16.msra.mxu0 %v8609_v35  ;;  %v11605_v35 = vld [vmem:[#allocation46_spill] sm:$0xff] }
 0x5b6   :  { %1963 = vmatprep.subr.bf16.mxu0 %v8612_v39  ;;  %v11606_v39 = vld [vmem:[#allocation47_spill] sm:$0xff] }
 0x5b8   :  { %1861 = vmatpush1.bf16.msra.mxu1 %v8842_v20 }
 0x5b9   :  { %1862 = vmatprep.subr.bf16.mxu1 %v8845_v34  ;;  %1964 = vmatpush1.bf16.msra.mxu0 %v8617_v41  ;;  %v11607_v41 = vld [vmem:[#allocation92_spill] sm:$0xff] }
 0x5ba   :  { %1965 = vmatprep.subr.bf16.mxu0 %v8620_v42  ;;  %v11608_v42 = vld [vmem:[#allocation48_spill] sm:$0xff] }
 0x5bc   :  { %1863 = vmatpush1.bf16.msra.mxu1 %v8850_v22 }
 0x5bd   :  { %1864 = vmatprep.subr.bf16.mxu1 %v8853_v47  ;;  %1966 = vmatpush1.bf16.msra.mxu0 %v8625_v14  ;;  %v11609_v14 = vld [vmem:[#allocation49_spill] sm:$0xff] }
 0x5be   :  { %1967 = vmatprep.subr.bf16.mxu0 %v8628_v43  ;;  %v11610_v43 = vld [vmem:[#allocation50_spill] sm:$0xff] }
 0x5c0   :  { %1865 = vmatpush1.bf16.msra.mxu1 %v8858_v38 }
 0x5c1   :  { %1866 = vmatprep.subr.bf16.mxu1 %v8861_v40  ;;  %1968 = vmatpush1.bf16.msra.mxu0 %v8633_v16  ;;  %v11611_v16 = vld [vmem:[#allocation51_spill] sm:$0xff] }
 0x5c2   :  { %1969 = vmatprep.subr.bf16.mxu0 %v8636_v45  ;;  %v11612_v45 = vld [vmem:[#allocation52_spill] sm:$0xff] }
 0x5c4   :  { %1867 = vmatpush2.bf16.msra.mxu1 %v8866_v0 }
 0x5c5   :  { %1868 = vmatprep.subr.bf16.mxu1 %v8869_v56  ;;  %1970 = vmatpush2.bf16.msra.mxu0 %v8641_v55  ;;  %v11613_v55 = vld [vmem:[#allocation53_spill] sm:$0xff] }
 0x5c6   :  { %1971 = vmatprep.subr.bf16.mxu0 %v8644_v3  ;;  %v11614_v3 = vld [vmem:[#allocation54_spill] sm:$0xff] }
 0x5c8   :  { %1869 = vmatpush2.bf16.msra.mxu1 %v8874_v5 }
 0x5c9   :  { %1870 = vmatprep.subr.bf16.mxu1 %v8877_v53  ;;  %1972 = vmatpush2.bf16.msra.mxu0 %v8649_v6  ;;  %v11615_v6 = vld [vmem:[#allocation55_spill] sm:$0xff] }
 0x5ca   :  { %1973 = vmatprep.subr.bf16.mxu0 %v11531_v51  ;;  %v11617_v51 = vld [vmem:[#allocation57_spill] sm:$0xff] }
 0x5cc   :  { %1871 = vmatpush2.bf16.msra.mxu1 %v11532_v33 }
 0x5cd   :  { %1872 = vmatprep.subr.bf16.mxu1 %v11533_v61  ;;  %1974 = vmatpush2.bf16.msra.mxu0 %v11589_v57  ;;  %v11637_v57 = vld [vmem:[#allocation77_spill] sm:$0xff] }
 0x5ce   :  { %1975 = vmatprep.subr.bf16.mxu0 %v11590_v58  ;;  %v11638_v58 = vld [vmem:[#allocation78_spill] sm:$0xff] }
 0x5d0   :  { %1873 = vmatpush2.bf16.msra.mxu1 %v11591_v60 }
 0x5d1   :  { %1874 = vmatprep.subr.bf16.mxu1 %v11592_v62  ;;  %1976 = vmatpush2.bf16.msra.mxu0 %v11593_v63  ;;  %v11639_v63 = vld [vmem:[#allocation79_spill] sm:$0xff] }
 0x5d2   :  { %1977 = vmatprep.subr.bf16.mxu0 %v11594_v1  ;;  %v11640_v1 = vld [vmem:[#allocation80_spill] sm:$0xff] }
 0x5d4   :  { %1875 = vmatpush2.bf16.msra.mxu1 %v11595_v10 }
 0x5d5   :  { %1876 = vmatprep.subr.bf16.mxu1 %v11596_v18  ;;  %1978 = vmatpush2.bf16.msra.mxu0 %v11597_v23  ;;  %v11641_v23 = vld [vmem:[#allocation81_spill] sm:$0xff] }
 0x5d6   :  { %1979 = vmatprep.subr.bf16.mxu0 %v11598_v25  ;;  %v11642_v25 = vld [vmem:[#allocation36_spill] sm:$0xff] }
 0x5d8   :  { %1877 = vmatpush2.bf16.msra.mxu1 %v11599_v27 }
 0x5d9   :  { %1878 = vmatprep.subr.bf16.mxu1 %v11600_v21  ;;  %1980 = vmatpush2.bf16.msra.mxu0 %v11601_v28  ;;  %v1763_v28 = vld [vmem:[#allocation2 + $0x4] ss:$8 sm:$0x7] }
 0x5da   :  { %1981 = vmatprep.subr.bf16.mxu0 %v11602_v29 }
 0x5dc   :  { %1879 = vmatpush2.bf16.msra.mxu1 %v11603_v30 }
 0x5dd   :  { %1880 = vmatprep.subr.bf16.mxu1 %v11604_v31  ;;  %1982 = vmatpush2.bf16.msra.mxu0 %v11605_v35 }
 0x5de   :  { %1983 = vmatprep.subr.bf16.mxu0 %v11606_v39 }
 0x5e0   :  { %1881 = vmatpush2.bf16.msra.mxu1 %v11607_v41 }
 0x5e1   :  { %1994 = vmatprep.subr.bf16.mxu1 %v11608_v42  ;;  %1984 = vmatpush2.bf16.msra.mxu0 %v11609_v14 }
 0x5e2   :  { %2035 = vmatprep.subr.bf16.mxu0 %v11610_v43 }
 0x5e3   :  { %1883 = vmatmul.mubr.bf16.vlgmr.msra.gmra.mxu1 %v9097_v37  ;;  %v11636_v37 = vld [vmem:[#allocation76_spill] sm:$0xff] }
 0x5e4   :  { %1995 = vmatpush1.bf16.msra.mxu1 %v11611_v16 }
 0x5e5   :  { %1996 = vmatprep.subr.bf16.mxu1 %v11612_v45 }
 0x5e8   :  { %1997 = vmatpush1.bf16.msra.mxu1 %v11613_v55  ;;  %v1899_v55 = vrot.slane %v1763_v28, 1 }
 0x5e9   :  { %1998 = vmatprep.subr.bf16.mxu1 %v11614_v3 }
 0x5ec   :  { %1999 = vmatpush1.bf16.msra.mxu1 %v11615_v6 }
 0x5ed   :  { %2000 = vmatprep.subr.bf16.mxu1 %v11616_v46 }
 0x5f0   :  { %2001 = vmatpush1.bf16.msra.mxu1 %v11617_v51 }
 0x5f1   :  { %2002 = vmatprep.subr.bf16.mxu1 %v11618_v17 }
 0x5f4   :  { %2003 = vmatpush1.bf16.msra.mxu1 %v11619_v54 }
 0x5f5   :  { %2004 = vmatprep.subr.bf16.mxu1 %v11620_v59 }
 0x5f8   :  { %2005 = vmatpush1.bf16.msra.mxu1 %v11621_v13 }
 0x5f9   :  { %2006 = vmatprep.subr.bf16.mxu1 %v11622_v12  ;;  %v11643_v12 = vld [vmem:[#allocation37_spill] sm:$0xff] }
 0x5fc   :  { %2007 = vmatpush1.bf16.msra.mxu1 %v11623_v49 }
 0x5fd   :  { %2008 = vmatprep.subr.bf16.mxu1 %v11624_v26 }
 0x600   :  { %2009 = vmatpush1.bf16.msra.mxu1 %v11625_v36 }
 0x601   :  { %2010 = vmatprep.subr.bf16.mxu1 %v11626_v48  ;;  %v1910_v48 = vrot.slane %v1763_v28, 2 }
 0x604   :  { %2011 = vmatpush2.bf16.msra.mxu1 %v11627_v19  ;;  %v1765_v19 = vld [vmem:[#allocation2 + $0x1b] ss:$8 sm:$0x7] }
 0x605   :  { %2012 = vmatprep.subr.bf16.mxu1 %v11628_v44 }
 0x608   :  { %2013 = vmatpush2.bf16.msra.mxu1 %v11629_v4 }
 0x609   :  { %2014 = vmatprep.subr.bf16.mxu1 %v11630_v11 }
 0x60c   :  { %2015 = vmatpush2.bf16.msra.mxu1 %v11631_v8 }
 0x60d   :  { %2016 = vmatprep.subr.bf16.mxu1 %v11632_v15 }
 0x610   :  { %2017 = vmatpush2.bf16.msra.mxu1 %v11633_v2 }
 0x611   :  { %2018 = vmatprep.subr.bf16.mxu1 %v11634_v7 }
 0x614   :  { %2019 = vmatpush2.bf16.msra.mxu1 %v11635_v32 }
 0x615   :  { %2020 = vmatprep.subr.bf16.mxu1 %v11636_v37 }
 0x618   :  { %2021 = vmatpush2.bf16.msra.mxu1 %v11637_v57 }
 0x619   :  { %2022 = vmatprep.subr.bf16.mxu1 %v11638_v58 }
 0x61c   :  { %2023 = vmatpush2.bf16.msra.mxu1 %v11639_v63  ;;  %v1922_v63 = vrot.slane %v1765_v19, 1 }
 0x61d   :  { %2024 = vmatprep.subr.bf16.mxu1 %v11640_v1 }
 0x620   :  { %2025 = vmatpush2.bf16.msra.mxu1 %v11641_v23 }
 0x621   :  { %2138 = vmatprep.subr.bf16.mxu1 %v11642_v25 }
 0x663   :  { %v1802_v29 = vpop.f32.mrf.mxu1  ;;  %v1843_v35 = vpop.f32.mrf.mxu0 }
 0x664   :  { %v1891_v39 = vadd.f32 %v1802_v29, %v1763_v28  ;;  %v1908_v49 = vadd.f32 %v11643_v12, %v1843_v35 }
 0x665   :  { %v1804_v42 = vpop.f32.mrf.mxu1  ;;  %v1845_v14 = vpop.f32.mrf.mxu0 }
 0x666   :  { %v6048_v43 = vmul.f32 -1.442695, %v1891_v39  ;;  %v1901_v46 = vadd.f32 %v1899_v55, %v1804_v42  ;;  %v1914_v4 = vadd.f32 %v1845_v14, %v1765_v19  ;;  %v9206_v42 = vld [vmem:[%s10987_s4 + $0x1] sm:$0x1] }
 0x667   :  { %v1806_v16 = vpop.f32.mrf.mxu1  ;;  %v1847_v45 = vpop.f32.mrf.mxu0 }
 0x668   :  { %7069 = vpow2.f32 %v6048_v43  ;;  %v6049_v51 = vmul.f32 -1.442695, %v1901_v46  ;;  %v6050_v11 = vmul.f32 -1.442695, %v1914_v4  ;;  %v1933_v16 = vrot.slane %v1765_v19, 2 }
 0x669   :  { %v1807_v3 = vpop.f32.mrf.mxu1  ;;  %v1848_v6 = vpop.f32.mrf.mxu0  ;;  %v9233_v19 = vld [vmem:[#allocation9 + $0x130] ss:$24 sps:$4 sm:$0xff]   ;;  %v9239_v4 = vld [vmem:[#allocation9 + $0x120] ss:$24 sps:$4 sm:$0xff]  }
 0x66a   :  { %7071 = vpow2.f32 %v6049_v51 }
 0x675   :  { %v7070_v17 = vpop.eup %7069 }
 0x676   :  { %v1895_v54 = vadd.f32 1.0, %v7070_v17 }
 0x677   :  { %v7072_v59 = vpop.eup %7071 }
 0x678   :  { %7073 = vrcp.f32 %v1895_v54  ;;  %v1905_v13 = vadd.f32 1.0, %v7072_v59 }
 0x67a   :  { %7075 = vrcp.f32 %v1905_v13 }
 0x685   :  { %v7074_v26 = vpop.eup %7073 }
 0x686   :  { %v1909_v36 = vmul.f32 %v7074_v26, %v1908_v49  ;;  %v9221_v26 = vld [vmem:[#allocation9 + $0x160] ss:$24 sps:$4 sm:$0xff]  }
 0x687   :  { %v7076_v8 = vpop.eup %7075 }
 0x688   :  { %v1912_v44 = vadd.f32 %v1910_v48, %v1909_v36  ;;  %v1937_v15 = vsub.f32 1.0, %v7076_v8  ;;  %v1939_v32 = vmul.f32 %v7076_v8, %v9085_v9  ;;  %v9227_v36 = vld [vmem:[#allocation9 + $0x150] ss:$24 sps:$4 sm:$0xff]   ;;  %v9230_v48 = vld [vmem:[#allocation9 + $0x124] ss:$24 sps:$4 sm:$0xff]  }
 0x689   :  { %v9245_v8 = vld [vmem:[#allocation9 + $0x100] ss:$24 sps:$4 sm:$0xff]  }
 0x68a   :  { %7077 = vtanh.f32 %v1912_v44  ;;  %v9236_v44 = vld [vmem:[#allocation9 + $0x104] ss:$24 sps:$4 sm:$0xff]  }
 0x68b   :  { %7079 = vpow2.f32 %v6050_v11  ;;  %v9242_v11 = vld [vmem:[#allocation9 + $0xf4] ss:$24 sps:$4 sm:$0xff]  }
 0x697   :  { %v7078_v2 = vpop.eup %7077 }
 0x698   :  { %v1938_v7 = vmul.f32 %v7078_v2, %v1937_v15  ;;  %v7080_v57 = vpop.eup %7079  ;;  %v9248_v15 = vld [vmem:[#allocation9 + $0xd4] ss:$24 sps:$4 sm:$0xff]   ;;  %v9251_v2 = vld [vmem:[#allocation9 + $0xf0] ss:$24 sps:$4 sm:$0xff]  }
 0x699   :  { %v1918_v58 = vadd.f32 1.0, %v7080_v57  ;;  %v9260_v57 = vld [vmem:[#allocation9 + $0xa4] ss:$24 sps:$4 sm:$0xff]  }
 0x69a   :  { %v9200_v37 = vadd.f32 %v1939_v32, %v1938_v7  ;;  %v9254_v7 = vld [vmem:[#allocation9 + $0xc4] ss:$24 sps:$4 sm:$0xff]   ;;  %v9257_v32 = vld [vmem:[#allocation9 + $0xd0] ss:$24 sps:$4 sm:$0xff]  }
 0x69b   :  { %7081 = vrcp.f32 %v1918_v58  ;;  %v9263_v58 = vld [vmem:[#allocation9 + $0xc0] ss:$24 sps:$4 sm:$0xff]  }
 0x69c   :  { %1945 = vst [vmem:[#allocation3 + $0x4] sm:$0x1] %v9200_v37  ;;  %v9217_v49 = vpack.c.bf16 %v9200_v37, %v9200_v37 }
 0x6a3   :  { %v1884_v1 = vpop.f32.mrf.mxu1 }
 0x6a4   :  { %v1924_v23 = vadd.f32 %v1922_v63, %v1884_v1  ;;  %v9266_v63 = vld [vmem:[#allocation9 + $0x94] ss:$24 sps:$4 sm:$0xff]   ;;  %v9271_v1 = vld [vmem:[#allocation9 + $0x90] ss:$24 sps:$4 sm:$0xff]  }
 0x6a5   :  { %v1886_v28 = vpop.f32.mrf.mxu1 }
 0x6a6   :  { %v6051_v29 = vmul.f32 -1.442695, %v1924_v23  ;;  %v1931_v9 = vadd.f32 %v9206_v42, %v1886_v28  ;;  %v9274_v23 = vld [vmem:[#allocation9 + $0x64] ss:$24 sps:$4 sm:$0xff]   ;;  %v9279_v28 = vld [vmem:[#allocation9 + $0x60] ss:$24 sps:$4 sm:$0xff]  }
 0x6a7   :  { %v1888_v35 = vpop.f32.mrf.mxu1 }
 0x6a8   :  { %7083 = vpow2.f32 %v6051_v29  ;;  %v7082_v14 = vpop.eup %7081  ;;  %v9282_v29 = vld [vmem:[#allocation9 + $0x34] ss:$24 sps:$4 sm:$0xff]  }
 0x6a9   :  { %v1889_v39 = vpop.f32.mrf.mxu1  ;;  %v1932_v43 = vmul.f32 %v7082_v14, %v1931_v9  ;;  %v9371_v35 = vld [vmem:[#allocation9 + $0x12c] ss:$24 sps:$4 sm:$0xff]   ;;  %v9380_v9 = vld [vmem:[#allocation9 + $0xf8] ss:$24 sps:$4 sm:$0xff]  }
 0x6aa   :  { %11647 = vst [vmem:[#allocation39_spill] sm:$0xff] %v9371_v35  ;;  %v9377_v39 = vld [vmem:[#allocation9 + $0xfc] ss:$24 sps:$4 sm:$0xff]   ;;  %11650 = vst [vmem:[#allocation40_spill] sm:$0xff] %v9380_v9  ;;  %v9383_v14 = vld [vmem:[#allocation9 + $0xcc] ss:$24 sps:$4 sm:$0xff]  }
 0x6ab   :  { %v1935_v3 = vadd.f32 %v1933_v16, %v1932_v43  ;;  %11649 = vst [vmem:[#allocation85_spill] sm:$0xff] %v9377_v39  ;;  %11651 = vst [vmem:[#allocation41_spill] sm:$0xff] %v9383_v14  ;;  %v9386_v43 = vld [vmem:[#allocation9 + $0xc8] ss:$24 sps:$4 sm:$0xff]   ;;  %v9389_v16 = vld [vmem:[#allocation9 + $0x9c] ss:$24 sps:$4 sm:$0xff]  }
 0x6ac   :  { %11652 = vst [vmem:[#allocation86_spill] sm:$0xff] %v9386_v43  ;;  %11653 = vst [vmem:[#allocation87_spill] sm:$0xff] %v9389_v16 }
 0x6b5   :  { %v7084_v45 = vpop.eup %7083 }
 0x6b6   :  { %v1928_v55 = vadd.f32 1.0, %v7084_v45  ;;  %v9392_v45 = vld [vmem:[#allocation9 + $0x98] ss:$24 sps:$4 sm:$0xff]  }
 0x6b7   :  { %11654 = vst [vmem:[#allocation42_spill] sm:$0xff] %v9392_v45 }
 0x6b8   :  { %7085 = vrcp.f32 %v1928_v55  ;;  %v9395_v55 = vld [vmem:[#allocation9 + $0x6c] ss:$24 sps:$4 sm:$0xff]  }
 0x6b9   :  { %7087 = vtanh.f32 %v1935_v3  ;;  %11655 = vst [vmem:[#allocation43_spill] sm:$0xff] %v9395_v55  ;;  %v9398_v3 = vld [vmem:[#allocation9 + $0x68] ss:$24 sps:$4 sm:$0xff]  }
 0x6ba   :  { %11656 = vst [vmem:[#allocation88_spill] sm:$0xff] %v9398_v3 }
 0x6c5   :  { %v7086_v6 = vpop.eup %7085 }
 0x6c6   :  { %v1941_v46 = vsub.f32 1.0, %v7086_v6  ;;  %v7088_v51 = vpop.eup %7087  ;;  %v1943_v54 = vmul.f32 %v7086_v6, %v9090_v50  ;;  %v9224_v50 = vld [vmem:[#allocation9 + $0x134] ss:$24 sps:$4 sm:$0xff]  }
 0x6c7   :  { %v9401_v6 = vld [vmem:[#allocation9 + $0x3c] ss:$24 sps:$4 sm:$0xff]  }
 0x6c8   :  { %v1942_v17 = vmul.f32 %v7088_v51, %v1941_v46  ;;  %11657 = vst [vmem:[#allocation89_spill] sm:$0xff] %v9401_v6  ;;  %v9404_v46 = vld [vmem:[#allocation9 + $0x38] ss:$24 sps:$4 sm:$0xff]   ;;  %v9407_v51 = vld [vmem:[#allocation9 + $0xc] ss:$24 sps:$4 sm:$0xff]  }
 0x6c9   :  { %11658 = vst [vmem:[#allocation44_spill] sm:$0xff] %v9404_v46  ;;  %11659 = vst [vmem:[#allocation45_spill] sm:$0xff] %v9407_v51 }
 0x6ca   :  { %v9210_v59 = vadd.f32 %v1943_v54, %v1942_v17  ;;  %v9410_v17 = vld [vmem:[#allocation9 + $0x8] ss:$24 sps:$4 sm:$0xff]   ;;  %v9413_v54 = vld [vmem:[#allocation9 + $0x2dc] ss:$24 sps:$4 sm:$0xff]  }
 0x6cb   :  { %11660 = vst [vmem:[#allocation90_spill] sm:$0xff] %v9410_v17  ;;  %11661 = vst [vmem:[#allocation91_spill] sm:$0xff] %v9413_v54 }
 0x6cc   :  { %1946 = vst [vmem:[#allocation3 + $0xb] sm:$0x1] %v9210_v59  ;;  %v1952_v13 = vpack.c.bf16 %v9210_v59, %v9210_v59 }
 0x6ce   :  { %1985 = vmatprep.mubr.bf16.mxu0 %v1952_v13  ;;  %2026 = vmatprep.mubr.bf16.mxu1 %v1952_v13 }
 0x6cf   :  { %1986 = vmatmul.mubr.bf16.vlgmr.msra.gmra.mxu0 %v9217_v49  ;;  %2027 = vmatmul.mubr.bf16.vlgmr.msra.gmra.mxu1 %v9217_v49 }
 0x6d0   :  { %2036 = vmatpush1.bf16.msra.mxu0 %v9221_v26  ;;  %2067 = vmatprep.mubr.bf16.mxu0 %v1952_v13  ;;  %v9416_v13 = vld [vmem:[#allocation9 + $0x2d8] ss:$24 sps:$4 sm:$0xff]  }
 0x6d1   :  { %2037 = vmatprep.subr.bf16.mxu0 %v9224_v50  ;;  %2139 = vmatpush1.bf16.msra.mxu1 %v9227_v36  ;;  %11662 = vst [vmem:[#allocation46_spill] sm:$0xff] %v9416_v13 }
 0x6d2   :  { %2140 = vmatprep.subr.bf16.mxu1 %v9230_v48 }
 0x6d4   :  { %2038 = vmatpush1.bf16.msra.mxu0 %v9233_v19 }
 0x6d5   :  { %2039 = vmatprep.subr.bf16.mxu0 %v9236_v44  ;;  %2141 = vmatpush1.bf16.msra.mxu1 %v9239_v4 }
 0x6d6   :  { %2142 = vmatprep.subr.bf16.mxu1 %v9242_v11 }
 0x6d8   :  { %2040 = vmatpush1.bf16.msra.mxu0 %v9245_v8 }
 0x6d9   :  { %2041 = vmatprep.subr.bf16.mxu0 %v9248_v15  ;;  %2143 = vmatpush1.bf16.msra.mxu1 %v9251_v2 }
 0x6da   :  { %2144 = vmatprep.subr.bf16.mxu1 %v9254_v7 }
 0x6dc   :  { %2042 = vmatpush1.bf16.msra.mxu0 %v9257_v32 }
 0x6dd   :  { %2043 = vmatprep.subr.bf16.mxu0 %v9260_v57  ;;  %2145 = vmatpush1.bf16.msra.mxu1 %v9263_v58 }
 0x6de   :  { %2146 = vmatprep.subr.bf16.mxu1 %v9266_v63 }
 0x6e0   :  { %2044 = vmatpush1.bf16.msra.mxu0 %v8834_v52  ;;  %v9287_v52 = vld [vmem:[#allocation9 + $0x30] ss:$24 sps:$4 sm:$0xff]  }
 0x6e1   :  { %2045 = vmatprep.subr.bf16.mxu0 %v8837_v24  ;;  %2147 = vmatpush1.bf16.msra.mxu1 %v9271_v1  ;;  %v9290_v24 = vld [vmem:[#allocation9 + $0x4] ss:$24 sps:$4 sm:$0xff]  }
 0x6e2   :  { %2148 = vmatprep.subr.bf16.mxu1 %v9274_v23 }
 0x6e4   :  { %2046 = vmatpush1.bf16.msra.mxu0 %v8842_v20  ;;  %v9295_v20 = vld [vmem:[#allocation9] ss:$24 sps:$4 sm:$0xff]  }
 0x6e5   :  { %2047 = vmatprep.subr.bf16.mxu0 %v8845_v34  ;;  %2149 = vmatpush1.bf16.msra.mxu1 %v9279_v28  ;;  %v9298_v34 = vld [vmem:[#allocation9 + $0x2d4] ss:$24 sps:$4 sm:$0xff]  }
 0x6e6   :  { %2150 = vmatprep.subr.bf16.mxu1 %v9282_v29 }
 0x6e8   :  { %2048 = vmatpush1.bf16.msra.mxu0 %v8850_v22  ;;  %v9303_v22 = vld [vmem:[#allocation9 + $0x2d0] ss:$24 sps:$4 sm:$0xff]  }
 0x6e9   :  { %2049 = vmatprep.subr.bf16.mxu0 %v8853_v47  ;;  %2151 = vmatpush1.bf16.msra.mxu1 %v9287_v52  ;;  %v9306_v47 = vld [vmem:[#allocation9 + $0x2a4] ss:$24 sps:$4 sm:$0xff]  }
 0x6ea   :  { %2152 = vmatprep.subr.bf16.mxu1 %v9290_v24 }
 0x6ec   :  { %2050 = vmatpush1.bf16.msra.mxu0 %v8858_v38  ;;  %v9311_v38 = vld [vmem:[#allocation9 + $0x2a0] ss:$24 sps:$4 sm:$0xff]  }
 0x6ed   :  { %2051 = vmatprep.subr.bf16.mxu0 %v8861_v40  ;;  %2153 = vmatpush1.bf16.msra.mxu1 %v9295_v20  ;;  %v9314_v40 = vld [vmem:[#allocation9 + $0x274] ss:$24 sps:$4 sm:$0xff]  }
 0x6ee   :  { %2154 = vmatprep.subr.bf16.mxu1 %v9298_v34 }
 0x6f0   :  { %2052 = vmatpush2.bf16.msra.mxu0 %v8866_v0  ;;  %v9319_v0 = vld [vmem:[#allocation9 + $0x270] ss:$24 sps:$4 sm:$0xff]  }
 0x6f1   :  { %2053 = vmatprep.subr.bf16.mxu0 %v8869_v56  ;;  %2155 = vmatpush2.bf16.msra.mxu1 %v9303_v22  ;;  %v9322_v56 = vld [vmem:[#allocation9 + $0x244] ss:$24 sps:$4 sm:$0xff]  }
 0x6f2   :  { %2156 = vmatprep.subr.bf16.mxu1 %v9306_v47 }
 0x6f4   :  { %2054 = vmatpush2.bf16.msra.mxu0 %v8874_v5  ;;  %v9327_v5 = vld [vmem:[#allocation9 + $0x240] ss:$24 sps:$4 sm:$0xff]  }
 0x6f5   :  { %2055 = vmatprep.subr.bf16.mxu0 %v8877_v53  ;;  %2157 = vmatpush2.bf16.msra.mxu1 %v9311_v38  ;;  %v9330_v53 = vld [vmem:[#allocation9 + $0x214] ss:$24 sps:$4 sm:$0xff]  }
 0x6f6   :  { %2158 = vmatprep.subr.bf16.mxu1 %v9314_v40 }
 0x6f8   :  { %2056 = vmatpush2.bf16.msra.mxu0 %v11532_v33  ;;  %v9335_v33 = vld [vmem:[#allocation9 + $0x210] ss:$24 sps:$4 sm:$0xff]  }
 0x6f9   :  { %2057 = vmatprep.subr.bf16.mxu0 %v11533_v61  ;;  %2159 = vmatpush2.bf16.msra.mxu1 %v9319_v0  ;;  %v9338_v61 = vld [vmem:[#allocation9 + $0x1e4] ss:$24 sps:$4 sm:$0xff]  }
 0x6fa   :  { %2160 = vmatprep.subr.bf16.mxu1 %v9322_v56 }
 0x6fc   :  { %2058 = vmatpush2.bf16.msra.mxu0 %v11591_v60  ;;  %v9343_v60 = vld [vmem:[#allocation9 + $0x1e0] ss:$24 sps:$4 sm:$0xff]  }
 0x6fd   :  { %2059 = vmatprep.subr.bf16.mxu0 %v11592_v62  ;;  %2161 = vmatpush2.bf16.msra.mxu1 %v9327_v5  ;;  %v9346_v62 = vld [vmem:[#allocation9 + $0x1b4] ss:$24 sps:$4 sm:$0xff]  }
 0x6fe   :  { %2162 = vmatprep.subr.bf16.mxu1 %v9330_v53 }
 0x700   :  { %2060 = vmatpush2.bf16.msra.mxu0 %v11595_v10  ;;  %v9351_v10 = vld [vmem:[#allocation9 + $0x1b0] ss:$24 sps:$4 sm:$0xff]  }
 0x701   :  { %2061 = vmatprep.subr.bf16.mxu0 %v11596_v18  ;;  %2163 = vmatpush2.bf16.msra.mxu1 %v9335_v33  ;;  %v9354_v18 = vld [vmem:[#allocation9 + $0x184] ss:$24 sps:$4 sm:$0xff]  }
 0x702   :  { %2164 = vmatprep.subr.bf16.mxu1 %v9338_v61 }
 0x704   :  { %2062 = vmatpush2.bf16.msra.mxu0 %v11599_v27  ;;  %v9358_v27 = vld [vmem:[#allocation9 + $0x15c] ss:$24 sps:$4 sm:$0xff]  }
 0x705   :  { %2063 = vmatprep.subr.bf16.mxu0 %v11600_v21  ;;  %2165 = vmatpush2.bf16.msra.mxu1 %v9343_v60  ;;  %v9361_v21 = vld [vmem:[#allocation9 + $0x180] ss:$24 sps:$4 sm:$0xff]  }
 0x706   :  { %2166 = vmatprep.subr.bf16.mxu1 %v9346_v62  ;;  %11644 = vst [vmem:[#allocation82_spill] sm:$0xff] %v9361_v21 }
 0x708   :  { %2064 = vmatpush2.bf16.msra.mxu0 %v11603_v30  ;;  %v9364_v30 = vld [vmem:[#allocation9 + $0x164] ss:$24 sps:$4 sm:$0xff]  }
 0x709   :  { %2065 = vmatprep.subr.bf16.mxu0 %v11604_v31  ;;  %2167 = vmatpush2.bf16.msra.mxu1 %v9351_v10  ;;  %11645 = vst [vmem:[#allocation83_spill] sm:$0xff] %v9364_v30  ;;  %v9368_v31 = vld [vmem:[#allocation9 + $0x158] ss:$24 sps:$4 sm:$0xff]  }
 0x70a   :  { %2168 = vmatprep.subr.bf16.mxu1 %v9354_v18  ;;  %11646 = vst [vmem:[#allocation38_spill] sm:$0xff] %v9368_v31 }
 0x70c   :  { %2066 = vmatpush2.bf16.msra.mxu0 %v11607_v41  ;;  %v9374_v41 = vld [vmem:[#allocation9 + $0x128] ss:$24 sps:$4 sm:$0xff]  }
 0x70d   :  { %2179 = vmatprep.subr.bf16.mxu0 %v9358_v27  ;;  %2169 = vmatpush2.bf16.msra.mxu1 %v9361_v21  ;;  %11648 = vst [vmem:[#allocation84_spill] sm:$0xff] %v9374_v41 }
 0x70e   :  { %2220 = vmatprep.subr.bf16.mxu1 %v9364_v30 }
 0x70f   :  { %2068 = vmatmul.mubr.bf16.vlgmr.msra.gmra.mxu0 %v9217_v49  ;;  %v9419_v49 = vld [vmem:[#allocation9 + $0x2ac] ss:$24 sps:$4 sm:$0xff]  }
 0x710   :  { %2180 = vmatpush1.bf16.msra.mxu0 %v9368_v31  ;;  %11663 = vst [vmem:[#allocation47_spill] sm:$0xff] %v9419_v49 }
 0x711   :  { %2181 = vmatprep.subr.bf16.mxu0 %v9371_v35 }
 0x714   :  { %2182 = vmatpush1.bf16.msra.mxu0 %v9374_v41 }
 0x715   :  { %2183 = vmatprep.subr.bf16.mxu0 %v9377_v39 }
 0x718   :  { %2184 = vmatpush1.bf16.msra.mxu0 %v9380_v9 }
 0x719   :  { %2185 = vmatprep.subr.bf16.mxu0 %v9383_v14 }
 0x71c   :  { %2186 = vmatpush1.bf16.msra.mxu0 %v9386_v43 }
 0x71d   :  { %2187 = vmatprep.subr.bf16.mxu0 %v9389_v16 }
 0x720   :  { %2188 = vmatpush1.bf16.msra.mxu0 %v9392_v45 }
 0x721   :  { %2189 = vmatprep.subr.bf16.mxu0 %v9395_v55 }
 0x724   :  { %2190 = vmatpush1.bf16.msra.mxu0 %v9398_v3 }
 0x725   :  { %2191 = vmatprep.subr.bf16.mxu0 %v9401_v6 }
 0x728   :  { %2192 = vmatpush1.bf16.msra.mxu0 %v9404_v46  ;;  %v9422_v46 = vld [vmem:[#allocation9 + $0x2a8] ss:$24 sps:$4 sm:$0xff]  }
 0x729   :  { %2193 = vmatprep.subr.bf16.mxu0 %v9407_v51  ;;  %11664 = vst [vmem:[#allocation92_spill] sm:$0xff] %v9422_v46  ;;  %v9425_v51 = vld [vmem:[#allocation9 + $0x27c] ss:$24 sps:$4 sm:$0xff]  }
 0x72a   :  { %11665 = vst [vmem:[#allocation48_spill] sm:$0xff] %v9425_v51 }
 0x72c   :  { %2194 = vmatpush1.bf16.msra.mxu0 %v9410_v17  ;;  %v9428_v17 = vld [vmem:[#allocation9 + $0x278] ss:$24 sps:$4 sm:$0xff]  }
 0x72d   :  { %2195 = vmatprep.subr.bf16.mxu0 %v9413_v54  ;;  %11666 = vst [vmem:[#allocation49_spill] sm:$0xff] %v9428_v17  ;;  %v9431_v54 = vld [vmem:[#allocation9 + $0x24c] ss:$24 sps:$4 sm:$0xff]  }
 0x72e   :  { %11667 = vst [vmem:[#allocation50_spill] sm:$0xff] %v9431_v54 }
 0x730   :  { %2196 = vmatpush2.bf16.msra.mxu0 %v9416_v13  ;;  %v9434_v13 = vld [vmem:[#allocation9 + $0x248] ss:$24 sps:$4 sm:$0xff]  }
 0x731   :  { %2197 = vmatprep.subr.bf16.mxu0 %v9419_v49  ;;  %11668 = vst [vmem:[#allocation51_spill] sm:$0xff] %v9434_v13  ;;  %v9437_v49 = vld [vmem:[#allocation9 + $0x21c] ss:$24 sps:$4 sm:$0xff]  }
 0x732   :  { %11669 = vst [vmem:[#allocation52_spill] sm:$0xff] %v9437_v49 }
 0x734   :  { %2198 = vmatpush2.bf16.msra.mxu0 %v9422_v46  ;;  %v9440_v46 = vld [vmem:[#allocation9 + $0x218] ss:$24 sps:$4 sm:$0xff]  }
 0x735   :  { %2199 = vmatprep.subr.bf16.mxu0 %v9425_v51  ;;  %11670 = vst [vmem:[#allocation53_spill] sm:$0xff] %v9440_v46  ;;  %v9443_v51 = vld [vmem:[#allocation9 + $0x1ec] ss:$24 sps:$4 sm:$0xff]  }
 0x736   :  { %11671 = vst [vmem:[#allocation54_spill] sm:$0xff] %v9443_v51 }
 0x738   :  { %2200 = vmatpush2.bf16.msra.mxu0 %v9428_v17  ;;  %v9446_v17 = vld [vmem:[#allocation9 + $0x1e8] ss:$24 sps:$4 sm:$0xff]  }
 0x739   :  { %2201 = vmatprep.subr.bf16.mxu0 %v9431_v54  ;;  %11672 = vst [vmem:[#allocation55_spill] sm:$0xff] %v9446_v17  ;;  %v9449_v54 = vld [vmem:[#allocation9 + $0x1bc] ss:$24 sps:$4 sm:$0xff]  }
 0x73a   :  { %11673 = vst [vmem:[#allocation56_spill] sm:$0xff] %v9449_v54 }
 0x73c   :  { %2202 = vmatpush2.bf16.msra.mxu0 %v9434_v13  ;;  %v9452_v13 = vld [vmem:[#allocation9 + $0x1b8] ss:$24 sps:$4 sm:$0xff]  }
 0x73d   :  { %2203 = vmatprep.subr.bf16.mxu0 %v9437_v49  ;;  %11674 = vst [vmem:[#allocation57_spill] sm:$0xff] %v9452_v13  ;;  %v9455_v49 = vld [vmem:[#allocation9 + $0x18c] ss:$24 sps:$4 sm:$0xff]  }
 0x73e   :  { %11675 = vst [vmem:[#allocation58_spill] sm:$0xff] %v9455_v49 }
 0x740   :  { %2204 = vmatpush2.bf16.msra.mxu0 %v9440_v46  ;;  %v9458_v46 = vld [vmem:[#allocation9 + $0x188] ss:$24 sps:$4 sm:$0xff]  }
 0x741   :  { %2205 = vmatprep.subr.bf16.mxu0 %v9443_v51  ;;  %11676 = vst [vmem:[#allocation59_spill] sm:$0xff] %v9458_v46  ;;  %v1948_v51 = vld [vmem:[#allocation2 + $0x5] ss:$8 sm:$0x7] }
 0x742   :  { %v2095_v21 = vrot.slane %v1948_v51, 2 }
 0x744   :  { %2206 = vmatpush2.bf16.msra.mxu0 %v9446_v17 }
 0x745   :  { %2207 = vmatprep.subr.bf16.mxu0 %v9449_v54 }
 0x748   :  { %2208 = vmatpush2.bf16.msra.mxu0 %v9452_v13  ;;  %v2084_v13 = vrot.slane %v1948_v51, 1 }
 0x749   :  { %2209 = vmatprep.subr.bf16.mxu0 %v9455_v49 }
 0x74c   :  { %2210 = vmatpush2.bf16.msra.mxu0 %v9458_v46 }
 0x74d   :  { %2323 = vmatprep.subr.bf16.mxu0 %v11642_v25 }
 0x78f   :  { %v1987_v17 = vpop.f32.mrf.mxu0  ;;  %v2028_v6 = vpop.f32.mrf.mxu1 }
 0x790   :  { %v2076_v3 = vadd.f32 %v1987_v17, %v1948_v51  ;;  %v2093_v31 = vadd.f32 %v11643_v12, %v2028_v6 }
 0x791   :  { %v1989_v55 = vpop.f32.mrf.mxu0  ;;  %v2030_v54 = vpop.f32.mrf.mxu1 }
 0x792   :  { %v6052_v45 = vmul.f32 -1.442695, %v2076_v3  ;;  %v2086_v49 = vadd.f32 %v2084_v13, %v1989_v55 }
 0x793   :  { %v1991_v16 = vpop.f32.mrf.mxu0  ;;  %v2032_v43 = vpop.f32.mrf.mxu1 }
 0x794   :  { %7089 = vpow2.f32 %v6052_v45  ;;  %v6053_v39 = vmul.f32 -1.442695, %v2086_v49  ;;  %v1950_v16 = vld [vmem:[#allocation2 + $0x1a] ss:$8 sm:$0x7] }
 0x795   :  { %v1992_v14 = vpop.f32.mrf.mxu0  ;;  %v2033_v9 = vpop.f32.mrf.mxu1  ;;  %v2099_v45 = vadd.f32 %v2030_v54, %v1950_v16  ;;  %v2107_v51 = vrot.slane %v1950_v16, 1 }
 0x796   :  { %7091 = vpow2.f32 %v6053_v39 }
 0x797   :  { %v6054_v14 = vmul.f32 -1.442695, %v2099_v45 }
 0x7a1   :  { %v7090_v41 = vpop.eup %7089 }
 0x7a2   :  { %v2080_v46 = vadd.f32 1.0, %v7090_v41 }
 0x7a3   :  { %v7092_v25 = vpop.eup %7091 }
 0x7a4   :  { %7093 = vrcp.f32 %v2080_v46  ;;  %v2090_v35 = vadd.f32 1.0, %v7092_v25 }
 0x7a6   :  { %7095 = vrcp.f32 %v2090_v35 }
 0x7b1   :  { %v7094_v17 = vpop.eup %7093 }
 0x7b2   :  { %v2094_v30 = vmul.f32 %v7094_v17, %v2093_v31 }
 0x7b3   :  { %v7096_v9 = vpop.eup %7095 }
 0x7b4   :  { %v2097_v43 = vadd.f32 %v2095_v21, %v2094_v30  ;;  %v2122_v55 = vsub.f32 1.0, %v7096_v9  ;;  %v2124_v41 = vmul.f32 %v7096_v9, %v9200_v37  ;;  %v2118_v37 = vrot.slane %v1950_v16, 2 }
 0x7b6   :  { %7097 = vtanh.f32 %v2097_v43 }
 0x7b7   :  { %7099 = vpow2.f32 %v6054_v14 }
 0x7c3   :  { %v7098_v39 = vpop.eup %7097 }
 0x7c4   :  { %v2123_v3 = vmul.f32 %v7098_v39, %v2122_v55  ;;  %v7100_v6 = vpop.eup %7099 }
 0x7c5   :  { %v2103_v31 = vadd.f32 1.0, %v7100_v6 }
 0x7c6   :  { %v9464_v46 = vadd.f32 %v2124_v41, %v2123_v3 }
 0x7c7   :  { %7101 = vrcp.f32 %v2103_v31 }
 0x7c8   :  { %2130 = vst [vmem:[#allocation3 + $0x5] sm:$0x1] %v9464_v46  ;;  %v9476_v16 = vpack.c.bf16 %v9464_v46, %v9464_v46 }
 0x7cf   :  { %v2069_v35 = vpop.f32.mrf.mxu0 }
 0x7d0   :  { %v2109_v21 = vadd.f32 %v2107_v51, %v2069_v35  ;;  %v11685_v35 = vld [vmem:[#allocation86_spill] sm:$0xff] }
 0x7d1   :  { %v2071_v30 = vpop.f32.mrf.mxu0 }
 0x7d2   :  { %v6055_v54 = vmul.f32 -1.442695, %v2109_v21  ;;  %v2116_v25 = vadd.f32 %v9206_v42, %v2071_v30  ;;  %v11687_v21 = vld [vmem:[#allocation42_spill] sm:$0xff]  ;;  %v11688_v30 = vld [vmem:[#allocation43_spill] sm:$0xff] }
 0x7d3   :  { %v2073_v13 = vpop.f32.mrf.mxu0 }
 0x7d4   :  { %7103 = vpow2.f32 %v6055_v54  ;;  %v7102_v17 = vpop.eup %7101  ;;  %v11689_v54 = vld [vmem:[#allocation88_spill] sm:$0xff]  ;;  %v11690_v13 = vld [vmem:[#allocation89_spill] sm:$0xff] }
 0x7d5   :  { %v2074_v49 = vpop.f32.mrf.mxu0  ;;  %v2117_v43 = vmul.f32 %v7102_v17, %v2116_v25  ;;  %v11692_v25 = vld [vmem:[#allocation45_spill] sm:$0xff]  ;;  %v11693_v17 = vld [vmem:[#allocation90_spill] sm:$0xff] }
 0x7d6   :  { %v11691_v49 = vld [vmem:[#allocation44_spill] sm:$0xff] }
 0x7d7   :  { %v2120_v9 = vadd.f32 %v2118_v37, %v2117_v43  ;;  %v11694_v43 = vld [vmem:[#allocation91_spill] sm:$0xff]  ;;  %v11695_v37 = vld [vmem:[#allocation46_spill] sm:$0xff] }
 0x7e1   :  { %v7104_v45 = vpop.eup %7103 }
 0x7e2   :  { %v2113_v14 = vadd.f32 1.0, %v7104_v45  ;;  %v11696_v45 = vld [vmem:[#allocation47_spill] sm:$0xff] }
 0x7e4   :  { %7105 = vrcp.f32 %v2113_v14  ;;  %v11697_v14 = vld [vmem:[#allocation92_spill] sm:$0xff] }
 0x7e5   :  { %7107 = vtanh.f32 %v2120_v9  ;;  %v11698_v9 = vld [vmem:[#allocation48_spill] sm:$0xff] }
 0x7f1   :  { %v7106_v55 = vpop.eup %7105 }
 0x7f2   :  { %v2126_v39 = vsub.f32 1.0, %v7106_v55  ;;  %v7108_v3 = vpop.eup %7107  ;;  %v2128_v6 = vmul.f32 %v7106_v55, %v9210_v59  ;;  %v9496_v59 = vld [vmem:[#allocation9 + $0xa0] ss:$24 sps:$4 sm:$0xff]  }
 0x7f3   :  { %v11699_v55 = vld [vmem:[#allocation49_spill] sm:$0xff] }
 0x7f4   :  { %v2127_v41 = vmul.f32 %v7108_v3, %v2126_v39  ;;  %v11700_v39 = vld [vmem:[#allocation50_spill] sm:$0xff]  ;;  %v11701_v3 = vld [vmem:[#allocation51_spill] sm:$0xff] }
 0x7f6   :  { %v9469_v31 = vadd.f32 %v2128_v6, %v2127_v41  ;;  %v11702_v41 = vld [vmem:[#allocation52_spill] sm:$0xff]  ;;  %v11703_v6 = vld [vmem:[#allocation53_spill] sm:$0xff] }
 0x7f8   :  { %2131 = vst [vmem:[#allocation3 + $0xa] sm:$0x1] %v9469_v31  ;;  %v2137_v51 = vpack.c.bf16 %v9469_v31, %v9469_v31 }
 0x7fa   :  { %2170 = vmatprep.mubr.bf16.mxu1 %v2137_v51  ;;  %2211 = vmatprep.mubr.bf16.mxu0 %v2137_v51 }
 0x7fb   :  { %2171 = vmatmul.mubr.bf16.vlgmr.msra.gmra.mxu1 %v9476_v16  ;;  %2212 = vmatmul.mubr.bf16.vlgmr.msra.gmra.mxu0 %v9476_v16 }
 0x7fc   :  { %2221 = vmatpush1.bf16.msra.mxu1 %v9221_v26  ;;  %2252 = vmatprep.mubr.bf16.mxu1 %v2137_v51  ;;  %v11704_v51 = vld [vmem:[#allocation54_spill] sm:$0xff] }
 0x7fd   :  { %2222 = vmatprep.subr.bf16.mxu1 %v9224_v50  ;;  %2324 = vmatpush1.bf16.msra.mxu0 %v9227_v36  ;;  %v9499_v36 = vld [vmem:[#allocation9 + $0x74] ss:$24 sps:$4 sm:$0xff]  }
 0x7fe   :  { %2325 = vmatprep.subr.bf16.mxu0 %v9230_v48  ;;  %v9504_v48 = vld [vmem:[#allocation9 + $0x70] ss:$24 sps:$4 sm:$0xff]  }
 0x800   :  { %2223 = vmatpush1.bf16.msra.mxu1 %v9233_v19 }
 0x801   :  { %2224 = vmatprep.subr.bf16.mxu1 %v9236_v44  ;;  %2326 = vmatpush1.bf16.msra.mxu0 %v9239_v4  ;;  %v9507_v4 = vld [vmem:[#allocation9 + $0x44] ss:$24 sps:$4 sm:$0xff]  }
 0x802   :  { %2327 = vmatprep.subr.bf16.mxu0 %v9242_v11  ;;  %v9512_v11 = vld [vmem:[#allocation9 + $0x40] ss:$24 sps:$4 sm:$0xff]  }
 0x804   :  { %2225 = vmatpush1.bf16.msra.mxu1 %v9245_v8 }
 0x805   :  { %2226 = vmatprep.subr.bf16.mxu1 %v9248_v15  ;;  %2328 = vmatpush1.bf16.msra.mxu0 %v9251_v2  ;;  %v9515_v2 = vld [vmem:[#allocation9 + $0x14] ss:$24 sps:$4 sm:$0xff]  }
 0x806   :  { %2329 = vmatprep.subr.bf16.mxu0 %v9254_v7  ;;  %v9520_v7 = vld [vmem:[#allocation9 + $0x10] ss:$24 sps:$4 sm:$0xff]  }
 0x808   :  { %2227 = vmatpush1.bf16.msra.mxu1 %v9257_v32 }
 0x809   :  { %2228 = vmatprep.subr.bf16.mxu1 %v9260_v57  ;;  %2330 = vmatpush1.bf16.msra.mxu0 %v9263_v58  ;;  %v9523_v58 = vld [vmem:[#allocation9 + $0x2e4] ss:$24 sps:$4 sm:$0xff]  }
 0x80a   :  { %2331 = vmatprep.subr.bf16.mxu0 %v9266_v63  ;;  %v9528_v63 = vld [vmem:[#allocation9 + $0x2e0] ss:$24 sps:$4 sm:$0xff]  }
 0x80c   :  { %2229 = vmatpush1.bf16.msra.mxu1 %v9496_v59 }
 0x80d   :  { %2230 = vmatprep.subr.bf16.mxu1 %v9499_v36  ;;  %2332 = vmatpush1.bf16.msra.mxu0 %v9271_v1  ;;  %v9531_v1 = vld [vmem:[#allocation9 + $0x2b4] ss:$24 sps:$4 sm:$0xff]  }
 0x80e   :  { %2333 = vmatprep.subr.bf16.mxu0 %v9274_v23  ;;  %v9536_v23 = vld [vmem:[#allocation9 + $0x2b0] ss:$24 sps:$4 sm:$0xff]  }
 0x810   :  { %2231 = vmatpush1.bf16.msra.mxu1 %v9504_v48 }
 0x811   :  { %2232 = vmatprep.subr.bf16.mxu1 %v9507_v4  ;;  %2334 = vmatpush1.bf16.msra.mxu0 %v9279_v28  ;;  %v9539_v28 = vld [vmem:[#allocation9 + $0x284] ss:$24 sps:$4 sm:$0xff]  }
 0x812   :  { %2335 = vmatprep.subr.bf16.mxu0 %v9282_v29  ;;  %v9544_v29 = vld [vmem:[#allocation9 + $0x280] ss:$24 sps:$4 sm:$0xff]  }
 0x814   :  { %2233 = vmatpush1.bf16.msra.mxu1 %v9512_v11 }
 0x815   :  { %2234 = vmatprep.subr.bf16.mxu1 %v9515_v2  ;;  %2336 = vmatpush1.bf16.msra.mxu0 %v9287_v52  ;;  %v9547_v52 = vld [vmem:[#allocation9 + $0x254] ss:$24 sps:$4 sm:$0xff]  }
 0x816   :  { %2337 = vmatprep.subr.bf16.mxu0 %v9290_v24  ;;  %v9552_v24 = vld [vmem:[#allocation9 + $0x250] ss:$24 sps:$4 sm:$0xff]  }
 0x818   :  { %2235 = vmatpush1.bf16.msra.mxu1 %v9520_v7 }
 0x819   :  { %2236 = vmatprep.subr.bf16.mxu1 %v9523_v58  ;;  %2338 = vmatpush1.bf16.msra.mxu0 %v9295_v20  ;;  %v9555_v20 = vld [vmem:[#allocation9 + $0x224] ss:$24 sps:$4 sm:$0xff]  }
 0x81a   :  { %2339 = vmatprep.subr.bf16.mxu0 %v9298_v34  ;;  %v9560_v34 = vld [vmem:[#allocation9 + $0x220] ss:$24 sps:$4 sm:$0xff]  }
 0x81c   :  { %2237 = vmatpush2.bf16.msra.mxu1 %v9528_v63 }
 0x81d   :  { %2238 = vmatprep.subr.bf16.mxu1 %v9531_v1  ;;  %2340 = vmatpush2.bf16.msra.mxu0 %v9303_v22  ;;  %v9563_v22 = vld [vmem:[#allocation9 + $0x1f4] ss:$24 sps:$4 sm:$0xff]  }
 0x81e   :  { %2341 = vmatprep.subr.bf16.mxu0 %v9306_v47  ;;  %v9568_v47 = vld [vmem:[#allocation9 + $0x1f0] ss:$24 sps:$4 sm:$0xff]  }
 0x820   :  { %2239 = vmatpush2.bf16.msra.mxu1 %v9536_v23 }
 0x821   :  { %2240 = vmatprep.subr.bf16.mxu1 %v9539_v28  ;;  %2342 = vmatpush2.bf16.msra.mxu0 %v9311_v38  ;;  %v9571_v38 = vld [vmem:[#allocation9 + $0x1c4] ss:$24 sps:$4 sm:$0xff]  }
 0x822   :  { %2343 = vmatprep.subr.bf16.mxu0 %v9314_v40  ;;  %v9576_v40 = vld [vmem:[#allocation9 + $0x1c0] ss:$24 sps:$4 sm:$0xff]  }
 0x824   :  { %2241 = vmatpush2.bf16.msra.mxu1 %v9544_v29 }
 0x825   :  { %2242 = vmatprep.subr.bf16.mxu1 %v9547_v52  ;;  %2344 = vmatpush2.bf16.msra.mxu0 %v9319_v0  ;;  %v9579_v0 = vld [vmem:[#allocation9 + $0x194] ss:$24 sps:$4 sm:$0xff]  }
 0x826   :  { %2345 = vmatprep.subr.bf16.mxu0 %v9322_v56  ;;  %v9584_v56 = vld [vmem:[#allocation9 + $0x190] ss:$24 sps:$4 sm:$0xff]  }
 0x828   :  { %2243 = vmatpush2.bf16.msra.mxu1 %v9552_v24 }
 0x829   :  { %2244 = vmatprep.subr.bf16.mxu1 %v9555_v20  ;;  %2346 = vmatpush2.bf16.msra.mxu0 %v9327_v5  ;;  %v11677_v5 = vld [vmem:[#allocation82_spill] sm:$0xff] }
 0x82a   :  { %2347 = vmatprep.subr.bf16.mxu0 %v9330_v53  ;;  %v11678_v53 = vld [vmem:[#allocation83_spill] sm:$0xff] }
 0x82c   :  { %2245 = vmatpush2.bf16.msra.mxu1 %v9560_v34 }
 0x82d   :  { %2246 = vmatprep.subr.bf16.mxu1 %v9563_v22  ;;  %2348 = vmatpush2.bf16.msra.mxu0 %v9335_v33  ;;  %v11679_v33 = vld [vmem:[#allocation38_spill] sm:$0xff] }
 0x82e   :  { %2349 = vmatprep.subr.bf16.mxu0 %v9338_v61  ;;  %v11680_v61 = vld [vmem:[#allocation39_spill] sm:$0xff] }
 0x830   :  { %2247 = vmatpush2.bf16.msra.mxu1 %v9568_v47 }
 0x831   :  { %2248 = vmatprep.subr.bf16.mxu1 %v9571_v38  ;;  %2350 = vmatpush2.bf16.msra.mxu0 %v9343_v60  ;;  %v11681_v60 = vld [vmem:[#allocation84_spill] sm:$0xff] }
 0x832   :  { %2351 = vmatprep.subr.bf16.mxu0 %v9346_v62  ;;  %v11682_v62 = vld [vmem:[#allocation85_spill] sm:$0xff] }
 0x834   :  { %2249 = vmatpush2.bf16.msra.mxu1 %v9576_v40 }
 0x835   :  { %2250 = vmatprep.subr.bf16.mxu1 %v9579_v0  ;;  %2352 = vmatpush2.bf16.msra.mxu0 %v9351_v10  ;;  %v11683_v10 = vld [vmem:[#allocation40_spill] sm:$0xff] }
 0x836   :  { %2353 = vmatprep.subr.bf16.mxu0 %v9354_v18  ;;  %v11684_v18 = vld [vmem:[#allocation41_spill] sm:$0xff] }
 0x838   :  { %2251 = vmatpush2.bf16.msra.mxu1 %v9584_v56 }
 0x839   :  { %2364 = vmatprep.subr.bf16.mxu1 %v9358_v27  ;;  %2354 = vmatpush2.bf16.msra.mxu0 %v11677_v5  ;;  %v11686_v27 = vld [vmem:[#allocation87_spill] sm:$0xff]  ;;  %v11706_v5 = vld [vmem:[#allocation56_spill] sm:$0xff] }
 0x83a   :  { %2405 = vmatprep.subr.bf16.mxu0 %v11678_v53  ;;  %v11707_v53 = vld [vmem:[#allocation57_spill] sm:$0xff] }
 0x83b   :  { %2253 = vmatmul.mubr.bf16.vlgmr.msra.gmra.mxu1 %v9476_v16  ;;  %v11705_v16 = vld [vmem:[#allocation55_spill] sm:$0xff] }
 0x83c   :  { %2365 = vmatpush1.bf16.msra.mxu1 %v11679_v33  ;;  %v11708_v33 = vld [vmem:[#allocation58_spill] sm:$0xff] }
 0x83d   :  { %2366 = vmatprep.subr.bf16.mxu1 %v11680_v61  ;;  %v11709_v61 = vld [vmem:[#allocation59_spill] sm:$0xff] }
 0x840   :  { %2367 = vmatpush1.bf16.msra.mxu1 %v11681_v60  ;;  %v2133_v60 = vld [vmem:[#allocation2 + $0x6] ss:$8 sm:$0x7] }
 0x841   :  { %2368 = vmatprep.subr.bf16.mxu1 %v11682_v62 }
 0x844   :  { %2369 = vmatpush1.bf16.msra.mxu1 %v11683_v10 }
 0x845   :  { %2370 = vmatprep.subr.bf16.mxu1 %v11684_v18 }
 0x848   :  { %2371 = vmatpush1.bf16.msra.mxu1 %v11685_v35 }
 0x849   :  { %2372 = vmatprep.subr.bf16.mxu1 %v11686_v27 }
 0x84c   :  { %2373 = vmatpush1.bf16.msra.mxu1 %v11687_v21 }
 0x84d   :  { %2374 = vmatprep.subr.bf16.mxu1 %v11688_v30 }
 0x850   :  { %2375 = vmatpush1.bf16.msra.mxu1 %v11689_v54 }
 0x851   :  { %2376 = vmatprep.subr.bf16.mxu1 %v11690_v13  ;;  %v2269_v13 = vrot.slane %v2133_v60, 1 }
 0x854   :  { %2377 = vmatpush1.bf16.msra.mxu1 %v11691_v49 }
 0x855   :  { %2378 = vmatprep.subr.bf16.mxu1 %v11692_v25 }
 0x858   :  { %2379 = vmatpush1.bf16.msra.mxu1 %v11693_v17 }
 0x859   :  { %2380 = vmatprep.subr.bf16.mxu1 %v11694_v43 }
 0x85c   :  { %2381 = vmatpush2.bf16.msra.mxu1 %v11695_v37 }
 0x85d   :  { %2382 = vmatprep.subr.bf16.mxu1 %v11696_v45 }
 0x860   :  { %2383 = vmatpush2.bf16.msra.mxu1 %v11697_v14 }
 0x861   :  { %2384 = vmatprep.subr.bf16.mxu1 %v11698_v9 }
 0x864   :  { %2385 = vmatpush2.bf16.msra.mxu1 %v11699_v55 }
 0x865   :  { %2386 = vmatprep.subr.bf16.mxu1 %v11700_v39 }
 0x868   :  { %2387 = vmatpush2.bf16.msra.mxu1 %v11701_v3 }
 0x869   :  { %2388 = vmatprep.subr.bf16.mxu1 %v11702_v41  ;;  %v2280_v41 = vrot.slane %v2133_v60, 2 }
 0x86c   :  { %2389 = vmatpush2.bf16.msra.mxu1 %v11703_v6  ;;  %v2135_v6 = vld [vmem:[#allocation2 + $0x19] ss:$8 sm:$0x7] }
 0x86d   :  { %2390 = vmatprep.subr.bf16.mxu1 %v11704_v51 }
 0x870   :  { %2391 = vmatpush2.bf16.msra.mxu1 %v11705_v16 }
 0x871   :  { %2392 = vmatprep.subr.bf16.mxu1 %v11706_v5 }
 0x874   :  { %2393 = vmatpush2.bf16.msra.mxu1 %v11707_v53 }
 0x875   :  { %2394 = vmatprep.subr.bf16.mxu1 %v11708_v33 }
 0x878   :  { %2395 = vmatpush2.bf16.msra.mxu1 %v11709_v61 }
 0x8bb   :  { %v2172_v62 = vpop.f32.mrf.mxu1  ;;  %v2213_v10 = vpop.f32.mrf.mxu0 }
 0x8bc   :  { %v2261_v18 = vadd.f32 %v2172_v62, %v2133_v60  ;;  %v2278_v55 = vadd.f32 %v11643_v12, %v2213_v10  ;;  %v2292_v60 = vrot.slane %v2135_v6, 1 }
 0x8bd   :  { %v2174_v35 = vpop.f32.mrf.mxu1  ;;  %v2215_v27 = vpop.f32.mrf.mxu0 }
 0x8be   :  { %v6056_v21 = vmul.f32 -1.442695, %v2261_v18  ;;  %v2271_v17 = vadd.f32 %v2269_v13, %v2174_v35  ;;  %v2284_v16 = vadd.f32 %v2215_v27, %v2135_v6 }
 0x8bf   :  { %v2176_v30 = vpop.f32.mrf.mxu1  ;;  %v2217_v54 = vpop.f32.mrf.mxu0 }
 0x8c0   :  { %7109 = vpow2.f32 %v6056_v21  ;;  %v6057_v43 = vmul.f32 -1.442695, %v2271_v17  ;;  %v6058_v5 = vmul.f32 -1.442695, %v2284_v16  ;;  %v6703_v16 = vld [vmem:[#allocation10 + $0x2d4] ss:$24 sps:$4 sm:$0xff]  }
 0x8c1   :  { %v2177_v49 = vpop.f32.mrf.mxu1  ;;  %v2218_v25 = vpop.f32.mrf.mxu0 }
 0x8c2   :  { %7111 = vpow2.f32 %v6057_v43 }
 0x8cd   :  { %v7110_v37 = vpop.eup %7109 }
 0x8ce   :  { %v2265_v45 = vadd.f32 1.0, %v7110_v37 }
 0x8cf   :  { %v7112_v14 = vpop.eup %7111 }
 0x8d0   :  { %7113 = vrcp.f32 %v2265_v45  ;;  %v2275_v9 = vadd.f32 1.0, %v7112_v14 }
 0x8d2   :  { %7115 = vrcp.f32 %v2275_v9 }
 0x8dd   :  { %v7114_v39 = vpop.eup %7113 }
 0x8de   :  { %v2279_v3 = vmul.f32 %v7114_v39, %v2278_v55 }
 0x8df   :  { %v7116_v53 = vpop.eup %7115 }
 0x8e0   :  { %v2282_v51 = vadd.f32 %v2280_v41, %v2279_v3  ;;  %v2307_v33 = vsub.f32 1.0, %v7116_v53  ;;  %v2309_v18 = vmul.f32 %v7116_v53, %v9464_v46  ;;  %v2303_v46 = vrot.slane %v2135_v6, 2  ;;  %v6701_v53 = vld [vmem:[#allocation10 + $0x2d0] ss:$24 sps:$4 sm:$0xff]  }
 0x8e2   :  { %7117 = vtanh.f32 %v2282_v51 }
 0x8e3   :  { %7119 = vpow2.f32 %v6058_v5  ;;  %v6706_v5 = vld [vmem:[#allocation10 + $0x2dc] ss:$24 sps:$4 sm:$0xff]  }
 0x8ef   :  { %v7118_v61 = vpop.eup %7117 }
 0x8f0   :  { %v2308_v62 = vmul.f32 %v7118_v61, %v2307_v33  ;;  %v7120_v12 = vpop.eup %7119  ;;  %v6704_v33 = vld [vmem:[#allocation10 + $0x2d8] ss:$24 sps:$4 sm:$0xff]   ;;  %v6709_v61 = vld [vmem:[#allocation10 + $0x2a4] ss:$24 sps:$4 sm:$0xff]  }
 0x8f1   :  { %v2288_v10 = vadd.f32 1.0, %v7120_v12  ;;  %v6710_v12 = vld [vmem:[#allocation10 + $0x2a8] ss:$24 sps:$4 sm:$0xff]  }
 0x8f2   :  { %v9624_v35 = vadd.f32 %v2309_v18, %v2308_v62  ;;  %v6712_v62 = vld [vmem:[#allocation10 + $0x2ac] ss:$24 sps:$4 sm:$0xff]   ;;  %v6707_v18 = vld [vmem:[#allocation10 + $0x2a0] ss:$24 sps:$4 sm:$0xff]  }
 0x8f3   :  { %7121 = vrcp.f32 %v2288_v10  ;;  %v6715_v10 = vld [vmem:[#allocation10 + $0x274] ss:$24 sps:$4 sm:$0xff]  }
 0x8f4   :  { %2315 = vst [vmem:[#allocation3 + $0x6] sm:$0x1] %v9624_v35  ;;  %v2321_v6 = vpack.c.bf16 %v9624_v35, %v9624_v35 }
 0x8fb   :  { %v2254_v21 = vpop.f32.mrf.mxu1 }
 0x8fc   :  { %v2294_v30 = vadd.f32 %v2292_v60, %v2254_v21  ;;  %v6718_v60 = vld [vmem:[#allocation10 + $0x27c] ss:$24 sps:$4 sm:$0xff]   ;;  %v6713_v21 = vld [vmem:[#allocation10 + $0x270] ss:$24 sps:$4 sm:$0xff]  }
 0x8fd   :  { %v2256_v27 = vpop.f32.mrf.mxu1 }
 0x8fe   :  { %v6059_v54 = vmul.f32 -1.442695, %v2294_v30  ;;  %v2301_v25 = vadd.f32 %v9206_v42, %v2256_v27  ;;  %v6716_v30 = vld [vmem:[#allocation10 + $0x278] ss:$24 sps:$4 sm:$0xff]   ;;  %v6721_v27 = vld [vmem:[#allocation10 + $0x244] ss:$24 sps:$4 sm:$0xff]  }
 0x8ff   :  { %v2258_v13 = vpop.f32.mrf.mxu1 }
 0x900   :  { %7123 = vpow2.f32 %v6059_v54  ;;  %v7122_v17 = vpop.eup %7121  ;;  %v6724_v54 = vld [vmem:[#allocation10 + $0x24c] ss:$24 sps:$4 sm:$0xff]   ;;  %v6719_v13 = vld [vmem:[#allocation10 + $0x240] ss:$24 sps:$4 sm:$0xff]  }
 0x901   :  { %v2259_v49 = vpop.f32.mrf.mxu1  ;;  %v2302_v43 = vmul.f32 %v7122_v17, %v2301_v25  ;;  %v6727_v25 = vld [vmem:[#allocation10 + $0x214] ss:$24 sps:$4 sm:$0xff]  }
 0x902   :  { %v6722_v49 = vld [vmem:[#allocation10 + $0x248] ss:$24 sps:$4 sm:$0xff]   ;;  %v6730_v17 = vld [vmem:[#allocation10 + $0x21c] ss:$24 sps:$4 sm:$0xff]  }
 0x903   :  { %v2305_v14 = vadd.f32 %v2303_v46, %v2302_v43  ;;  %v6725_v43 = vld [vmem:[#allocation10 + $0x210] ss:$24 sps:$4 sm:$0xff]  }
 0x904   :  { %v6728_v46 = vld [vmem:[#allocation10 + $0x218] ss:$24 sps:$4 sm:$0xff]  }
 0x90d   :  { %v7124_v37 = vpop.eup %7123 }
 0x90e   :  { %v2298_v45 = vadd.f32 1.0, %v7124_v37  ;;  %v6733_v37 = vld [vmem:[#allocation10 + $0x1e4] ss:$24 sps:$4 sm:$0xff]  }
 0x910   :  { %7125 = vrcp.f32 %v2298_v45  ;;  %v6736_v45 = vld [vmem:[#allocation10 + $0x1ec] ss:$24 sps:$4 sm:$0xff]  }
 0x911   :  { %7127 = vtanh.f32 %v2305_v14  ;;  %v6731_v14 = vld [vmem:[#allocation10 + $0x1e0] ss:$24 sps:$4 sm:$0xff]  }
 0x91d   :  { %v7126_v9 = vpop.eup %7125 }
 0x91e   :  { %v2311_v55 = vsub.f32 1.0, %v7126_v9  ;;  %v7128_v39 = vpop.eup %7127  ;;  %v2313_v41 = vmul.f32 %v7126_v9, %v9469_v31  ;;  %v6665_v31 = vld [vmem:[#allocation10 + $0xf0] ss:$24 sps:$4 sm:$0xff]  }
 0x91f   :  { %v6734_v9 = vld [vmem:[#allocation10 + $0x1e8] ss:$24 sps:$4 sm:$0xff]  }
 0x920   :  { %v2312_v3 = vmul.f32 %v7128_v39, %v2311_v55  ;;  %v6737_v55 = vld [vmem:[#allocation10 + $0x1b0] ss:$24 sps:$4 sm:$0xff]   ;;  %v6739_v39 = vld [vmem:[#allocation10 + $0x1b4] ss:$24 sps:$4 sm:$0xff]  }
 0x922   :  { %v9629_v51 = vadd.f32 %v2313_v41, %v2312_v3  ;;  %v6740_v3 = vld [vmem:[#allocation10 + $0x1b8] ss:$24 sps:$4 sm:$0xff]   ;;  %v6742_v41 = vld [vmem:[#allocation10 + $0x1bc] ss:$24 sps:$4 sm:$0xff]  }
 0x924   :  { %2316 = vst [vmem:[#allocation3 + $0x9] sm:$0x1] %v9629_v51  ;;  %v2322_v42 = vpack.c.bf16 %v9629_v51, %v9629_v51 }
 0x926   :  { %2355 = vmatprep.mubr.bf16.mxu0 %v2322_v42  ;;  %2396 = vmatprep.mubr.bf16.mxu1 %v2322_v42 }
 0x927   :  { %2356 = vmatmul.mubr.bf16.vlgmr.msra.gmra.mxu0 %v2321_v6  ;;  %2397 = vmatmul.mubr.bf16.vlgmr.msra.gmra.mxu1 %v2321_v6 }
 0x928   :  { %2406 = vmatpush1.bf16.msra.mxu0 %v9221_v26  ;;  %2437 = vmatprep.mubr.bf16.mxu0 %v2322_v42  ;;  %v6655_v26 = vld [vmem:[#allocation10 + $0x154] ss:$24 sps:$4 sm:$0xff]   ;;  %v6745_v42 = vld [vmem:[#allocation10 + $0x184] ss:$24 sps:$4 sm:$0xff]  }
 0x929   :  { %2407 = vmatprep.subr.bf16.mxu0 %v9224_v50  ;;  %v6658_v50 = vld [vmem:[#allocation10 + $0x15c] ss:$24 sps:$4 sm:$0xff]   ;;  %3114 = vmatprep.subr.bf16.mxu1 %v6655_v26  ;;  %v6743_v26 = vld [vmem:[#allocation10 + $0x180] ss:$24 sps:$4 sm:$0xff]  }
 0x92c   :  { %2408 = vmatpush1.bf16.msra.mxu0 %v9233_v19  ;;  %v6653_v19 = vld [vmem:[#allocation10 + $0x150] ss:$24 sps:$4 sm:$0xff]  }
 0x92d   :  { %2409 = vmatprep.subr.bf16.mxu0 %v9236_v44  ;;  %v6656_v44 = vld [vmem:[#allocation10 + $0x158] ss:$24 sps:$4 sm:$0xff]   ;;  %3115 = vmatpush1.bf16.msra.mxu1 %v6653_v19  ;;  %v6751_v19 = vld [vmem:[#allocation10 + $0x164] ss:$24 sps:$4 sm:$0xff]  }
 0x930   :  { %2410 = vmatpush1.bf16.msra.mxu0 %v9245_v8  ;;  %v6661_v8 = vld [vmem:[#allocation10 + $0x124] ss:$24 sps:$4 sm:$0xff]  }
 0x931   :  { %2411 = vmatprep.subr.bf16.mxu0 %v9248_v15  ;;  %v6664_v15 = vld [vmem:[#allocation10 + $0x12c] ss:$24 sps:$4 sm:$0xff]   ;;  %3116 = vmatprep.subr.bf16.mxu1 %v6661_v8 }
 0x932   :  { %v2318_v8 = vld [vmem:[#allocation2 + $0x7] ss:$8 sm:$0x7] }
 0x934   :  { %2412 = vmatpush1.bf16.msra.mxu0 %v9257_v32  ;;  %v6659_v32 = vld [vmem:[#allocation10 + $0x120] ss:$24 sps:$4 sm:$0xff]  }
 0x935   :  { %2413 = vmatprep.subr.bf16.mxu0 %v9260_v57  ;;  %v6662_v57 = vld [vmem:[#allocation10 + $0x128] ss:$24 sps:$4 sm:$0xff]   ;;  %3117 = vmatpush1.bf16.msra.mxu1 %v6659_v32 }
 0x938   :  { %2414 = vmatpush1.bf16.msra.mxu0 %v9496_v59  ;;  %v6667_v59 = vld [vmem:[#allocation10 + $0xf4] ss:$24 sps:$4 sm:$0xff]  }
 0x939   :  { %2415 = vmatprep.subr.bf16.mxu0 %v9499_v36  ;;  %v6668_v36 = vld [vmem:[#allocation10 + $0xf8] ss:$24 sps:$4 sm:$0xff]   ;;  %3118 = vmatprep.subr.bf16.mxu1 %v6667_v59 }
 0x93a   :  { %3119 = vmatpush1.bf16.msra.mxu1 %v6665_v31 }
 0x93c   :  { %2416 = vmatpush1.bf16.msra.mxu0 %v9504_v48  ;;  %v6670_v48 = vld [vmem:[#allocation10 + $0xfc] ss:$24 sps:$4 sm:$0xff]  }
 0x93d   :  { %2417 = vmatprep.subr.bf16.mxu0 %v9507_v4  ;;  %v6673_v4 = vld [vmem:[#allocation10 + $0xc4] ss:$24 sps:$4 sm:$0xff]  }
 0x93e   :  { %3120 = vmatprep.subr.bf16.mxu1 %v6673_v4 }
 0x940   :  { %2418 = vmatpush1.bf16.msra.mxu0 %v9512_v11  ;;  %v6676_v11 = vld [vmem:[#allocation10 + $0xcc] ss:$24 sps:$4 sm:$0xff]  }
 0x941   :  { %2419 = vmatprep.subr.bf16.mxu0 %v9515_v2  ;;  %v6671_v2 = vld [vmem:[#allocation10 + $0xc0] ss:$24 sps:$4 sm:$0xff]  }
 0x942   :  { %3121 = vmatpush1.bf16.msra.mxu1 %v6671_v2 }
 0x944   :  { %2420 = vmatpush1.bf16.msra.mxu0 %v9520_v7  ;;  %v6674_v7 = vld [vmem:[#allocation10 + $0xc8] ss:$24 sps:$4 sm:$0xff]  }
 0x945   :  { %2421 = vmatprep.subr.bf16.mxu0 %v9523_v58  ;;  %v6679_v58 = vld [vmem:[#allocation10 + $0x94] ss:$24 sps:$4 sm:$0xff]  }
 0x946   :  { %3122 = vmatprep.subr.bf16.mxu1 %v6679_v58 }
 0x948   :  { %2422 = vmatpush2.bf16.msra.mxu0 %v9528_v63  ;;  %v6682_v63 = vld [vmem:[#allocation10 + $0x9c] ss:$24 sps:$4 sm:$0xff]  }
 0x949   :  { %2423 = vmatprep.subr.bf16.mxu0 %v9531_v1  ;;  %v6677_v1 = vld [vmem:[#allocation10 + $0x90] ss:$24 sps:$4 sm:$0xff]  }
 0x94a   :  { %3123 = vmatpush1.bf16.msra.mxu1 %v6677_v1 }
 0x94c   :  { %2424 = vmatpush2.bf16.msra.mxu0 %v9536_v23  ;;  %v6680_v23 = vld [vmem:[#allocation10 + $0x98] ss:$24 sps:$4 sm:$0xff]  }
 0x94d   :  { %2425 = vmatprep.subr.bf16.mxu0 %v9539_v28  ;;  %v6685_v28 = vld [vmem:[#allocation10 + $0x64] ss:$24 sps:$4 sm:$0xff]  }
 0x94e   :  { %3124 = vmatprep.subr.bf16.mxu1 %v6685_v28 }
 0x950   :  { %2426 = vmatpush2.bf16.msra.mxu0 %v9544_v29  ;;  %v6688_v29 = vld [vmem:[#allocation10 + $0x6c] ss:$24 sps:$4 sm:$0xff]  }
 0x951   :  { %2427 = vmatprep.subr.bf16.mxu0 %v9547_v52  ;;  %v6683_v52 = vld [vmem:[#allocation10 + $0x60] ss:$24 sps:$4 sm:$0xff]  }
 0x952   :  { %3125 = vmatpush1.bf16.msra.mxu1 %v6683_v52  ;;  %v7503_v52 = vld [vmem:[%s10987_s4] sm:$0x1] }
 0x954   :  { %2428 = vmatpush2.bf16.msra.mxu0 %v9552_v24  ;;  %v6686_v24 = vld [vmem:[#allocation10 + $0x68] ss:$24 sps:$4 sm:$0xff]  }
 0x955   :  { %2429 = vmatprep.subr.bf16.mxu0 %v9555_v20  ;;  %v6691_v20 = vld [vmem:[#allocation10 + $0x34] ss:$24 sps:$4 sm:$0xff]  }
 0x956   :  { %3126 = vmatprep.subr.bf16.mxu1 %v6691_v20 }
 0x958   :  { %2430 = vmatpush2.bf16.msra.mxu0 %v9560_v34  ;;  %v6694_v34 = vld [vmem:[#allocation10 + $0x3c] ss:$24 sps:$4 sm:$0xff]  }
 0x959   :  { %2431 = vmatprep.subr.bf16.mxu0 %v9563_v22  ;;  %v6689_v22 = vld [vmem:[#allocation10 + $0x30] ss:$24 sps:$4 sm:$0xff]  }
 0x95a   :  { %3127 = vmatpush1.bf16.msra.mxu1 %v6689_v22  ;;  %v2465_v22 = vrot.slane %v2318_v8, 2 }
 0x95c   :  { %2432 = vmatpush2.bf16.msra.mxu0 %v9568_v47  ;;  %v6692_v47 = vld [vmem:[#allocation10 + $0x38] ss:$24 sps:$4 sm:$0xff]  }
 0x95d   :  { %2433 = vmatprep.subr.bf16.mxu0 %v9571_v38  ;;  %v6697_v38 = vld [vmem:[#allocation10 + $0x4] ss:$24 sps:$4 sm:$0xff]  }
 0x95e   :  { %3128 = vmatprep.subr.bf16.mxu1 %v6697_v38 }
 0x960   :  { %2434 = vmatpush2.bf16.msra.mxu0 %v9576_v40  ;;  %v6700_v40 = vld [vmem:[#allocation10 + $0xc] ss:$24 sps:$4 sm:$0xff]  }
 0x961   :  { %2435 = vmatprep.subr.bf16.mxu0 %v9579_v0  ;;  %v6695_v0 = vld [vmem:[#allocation10] ss:$24 sps:$4 sm:$0xff]  }
 0x962   :  { %3129 = vmatpush1.bf16.msra.mxu1 %v6695_v0 }
 0x963   :  { %3130 = vmatprep.subr.bf16.mxu1 %v6703_v16 }
 0x964   :  { %2436 = vmatpush2.bf16.msra.mxu0 %v9584_v56  ;;  %v6698_v56 = vld [vmem:[#allocation10 + $0x8] ss:$24 sps:$4 sm:$0xff]  }
 0x965   :  { %3155 = vmatprep.subr.bf16.mxu0 %v6658_v50  ;;  %v6746_v50 = vld [vmem:[#allocation10 + $0x188] ss:$24 sps:$4 sm:$0xff]  }
 0x966   :  { %3131 = vmatpush2.bf16.msra.mxu1 %v6701_v53 }
 0x967   :  { %2438 = vmatmul.mubr.bf16.vlgmr.msra.gmra.mxu0 %v2321_v6  ;;  %3132 = vmatprep.subr.bf16.mxu1 %v6709_v61  ;;  %v6748_v6 = vld [vmem:[#allocation10 + $0x18c] ss:$24 sps:$4 sm:$0xff]  }
 0x968   :  { %3156 = vmatpush1.bf16.msra.mxu0 %v6656_v44  ;;  %v9667_v44 = vld [vmem:[#allocation12 + $0x154] ss:$24 sps:$4 sm:$0xff]  }
 0x969   :  { %3157 = vmatprep.subr.bf16.mxu0 %v6664_v15 }
 0x96a   :  { %3133 = vmatpush2.bf16.msra.mxu1 %v6707_v18 }
 0x96b   :  { %3134 = vmatprep.subr.bf16.mxu1 %v6715_v10 }
 0x96c   :  { %3158 = vmatpush1.bf16.msra.mxu0 %v6662_v57 }
 0x96d   :  { %3159 = vmatprep.subr.bf16.mxu0 %v6670_v48 }
 0x96e   :  { %3135 = vmatpush2.bf16.msra.mxu1 %v6713_v21 }
 0x96f   :  { %3136 = vmatprep.subr.bf16.mxu1 %v6721_v27 }
 0x970   :  { %3160 = vmatpush1.bf16.msra.mxu0 %v6668_v36 }
 0x971   :  { %3161 = vmatprep.subr.bf16.mxu0 %v6676_v11  ;;  %v2454_v11 = vrot.slane %v2318_v8, 1 }
 0x972   :  { %3137 = vmatpush2.bf16.msra.mxu1 %v6719_v13  ;;  %v7504_v13 = vld [vmem:[%s10987_s4 + $0x1] sm:$0x1] }
 0x973   :  { %3138 = vmatprep.subr.bf16.mxu1 %v6727_v25 }
 0x974   :  { %3162 = vmatpush1.bf16.msra.mxu0 %v6674_v7 }
 0x975   :  { %3163 = vmatprep.subr.bf16.mxu0 %v6682_v63 }
 0x976   :  { %3139 = vmatpush2.bf16.msra.mxu1 %v6725_v43 }
 0x977   :  { %3140 = vmatprep.subr.bf16.mxu1 %v6733_v37 }
 0x978   :  { %3164 = vmatpush1.bf16.msra.mxu0 %v6680_v23 }
 0x979   :  { %3165 = vmatprep.subr.bf16.mxu0 %v6688_v29 }
 0x97a   :  { %3141 = vmatpush2.bf16.msra.mxu1 %v6731_v14 }
 0x97b   :  { %3142 = vmatprep.subr.bf16.mxu1 %v6739_v39 }
 0x97c   :  { %3166 = vmatpush1.bf16.msra.mxu0 %v6686_v24 }
 0x97d   :  { %3167 = vmatprep.subr.bf16.mxu0 %v6694_v34 }
 0x97e   :  { %3143 = vmatpush2.bf16.msra.mxu1 %v6737_v55 }
 0x97f   :  { %3144 = vmatprep.subr.bf16.mxu1 %v6745_v42 }
 0x980   :  { %3168 = vmatpush1.bf16.msra.mxu0 %v6692_v47  ;;  %v2320_v47 = vld [vmem:[#allocation2 + $0x18] ss:$8 sm:$0x7] }
 0x981   :  { %3169 = vmatprep.subr.bf16.mxu0 %v6700_v40 }
 0x982   :  { %3145 = vmatpush2.bf16.msra.mxu1 %v6743_v26  ;;  %v6749_v26 = vld [vmem:[#allocation10 + $0x160] ss:$24 sps:$4 sm:$0xff]  }
 0x983   :  { %3196 = vmatprep.subr.bf16.mxu1 %v6751_v19 }
 0x984   :  { %3170 = vmatpush1.bf16.msra.mxu0 %v6698_v56 }
 0x985   :  { %3171 = vmatprep.subr.bf16.mxu0 %v6706_v5 }
 0x988   :  { %3172 = vmatpush2.bf16.msra.mxu0 %v6704_v33 }
 0x989   :  { %3173 = vmatprep.subr.bf16.mxu0 %v6712_v62 }
 0x98c   :  { %3174 = vmatpush2.bf16.msra.mxu0 %v6710_v12  ;;  %v2477_v12 = vrot.slane %v2320_v47, 1 }
 0x98d   :  { %3175 = vmatprep.subr.bf16.mxu0 %v6718_v60 }
 0x990   :  { %3176 = vmatpush2.bf16.msra.mxu0 %v6716_v30 }
 0x991   :  { %3177 = vmatprep.subr.bf16.mxu0 %v6724_v54 }
 0x994   :  { %3178 = vmatpush2.bf16.msra.mxu0 %v6722_v49 }
 0x995   :  { %3179 = vmatprep.subr.bf16.mxu0 %v6730_v17  ;;  %v2488_v17 = vrot.slane %v2320_v47, 2 }
 0x998   :  { %3180 = vmatpush2.bf16.msra.mxu0 %v6728_v46 }
 0x999   :  { %3181 = vmatprep.subr.bf16.mxu0 %v6736_v45 }
 0x99c   :  { %3182 = vmatpush2.bf16.msra.mxu0 %v6734_v9 }
 0x99d   :  { %3183 = vmatprep.subr.bf16.mxu0 %v6742_v41 }
 0x9a0   :  { %3184 = vmatpush2.bf16.msra.mxu0 %v6740_v3 }
 0x9a1   :  { %3185 = vmatprep.subr.bf16.mxu0 %v6748_v6 }
 0x9a4   :  { %3186 = vmatpush2.bf16.msra.mxu0 %v6746_v50  ;;  %v9678_v50 = vld [vmem:[#allocation12 + $0x150] ss:$24 sps:$4 sm:$0xff]  }
 0x9a5   :  { %3823 = vmatprep.subr.bf16.mxu0 %v9667_v44 }
 0x9e7   :  { %v2357_v15 = vpop.f32.mrf.mxu0  ;;  %v2398_v32 = vpop.f32.mrf.mxu1 }
 0x9e8   :  { %v2446_v57 = vadd.f32 %v2357_v15, %v2318_v8  ;;  %v2463_v24 = vadd.f32 %v7503_v52, %v2398_v32  ;;  %v6757_v8 = vld [vmem:[#allocation10 + $0x134] ss:$24 sps:$4 sm:$0xff]   ;;  %v9682_v15 = vld [vmem:[#allocation12 + $0x124] ss:$24 sps:$4 sm:$0xff]   ;;  %v9687_v32 = vld [vmem:[#allocation12 + $0x120] ss:$24 sps:$4 sm:$0xff]  }
 0x9e9   :  { %v2359_v31 = vpop.f32.mrf.mxu0  ;;  %v2400_v59 = vpop.f32.mrf.mxu1  ;;  %v6779_v52 = vld [vmem:[#allocation10 + $0x70] ss:$24 sps:$4 sm:$0xff]  }
 0x9ea   :  { %v6060_v36 = vmul.f32 -1.442695, %v2446_v57  ;;  %v2456_v58 = vadd.f32 %v2454_v11, %v2359_v31  ;;  %v2469_v40 = vadd.f32 %v2400_v59, %v2320_v47  ;;  %v6763_v57 = vld [vmem:[#allocation10 + $0x104] ss:$24 sps:$4 sm:$0xff]   ;;  %v9689_v31 = vld [vmem:[#allocation12 + $0xf4] ss:$24 sps:$4 sm:$0xff]  }
 0x9eb   :  { %v2361_v48 = vpop.f32.mrf.mxu0  ;;  %v2402_v4 = vpop.f32.mrf.mxu1  ;;  %v11710_v59 = vmov 0   ;;  %v9697_v11 = vld [vmem:[#allocation12 + $0xc4] ss:$24 sps:$4 sm:$0xff]   ;;  %v9718_v47 = vld [vmem:[#allocation12 + $0x30] ss:$24 sps:$4 sm:$0xff]  }
 0x9ec   :  { %7129 = vpow2.f32 %v6060_v36  ;;  %v6061_v63 = vmul.f32 -1.442695, %v2456_v58  ;;  %v6062_v0 = vmul.f32 -1.442695, %v2469_v40  ;;  %v6761_v36 = vld [vmem:[#allocation10 + $0x100] ss:$24 sps:$4 sm:$0xff]  }
 0x9ed   :  { %v2362_v2 = vpop.f32.mrf.mxu0  ;;  %v2403_v7 = vpop.f32.mrf.mxu1  ;;  %v9694_v48 = vld [vmem:[#allocation12 + $0xf0] ss:$24 sps:$4 sm:$0xff]   ;;  %v6769_v4 = vld [vmem:[#allocation10 + $0xd4] ss:$24 sps:$4 sm:$0xff]   ;;  %v6775_v58 = vld [vmem:[#allocation10 + $0xa4] ss:$24 sps:$4 sm:$0xff]  }
 0x9ee   :  { %7131 = vpow2.f32 %v6061_v63  ;;  %v6767_v2 = vld [vmem:[#allocation10 + $0xd0] ss:$24 sps:$4 sm:$0xff]   ;;  %v9700_v7 = vld [vmem:[#allocation12 + $0xc0] ss:$24 sps:$4 sm:$0xff]   ;;  %v9703_v63 = vld [vmem:[#allocation12 + $0x94] ss:$24 sps:$4 sm:$0xff]  }
 0x9ef   :  { %v9721_v40 = vld [vmem:[#allocation12 + $0x4] ss:$24 sps:$4 sm:$0xff]  }
 0x9f9   :  { %v7130_v1 = vpop.eup %7129 }
 0x9fa   :  { %v2450_v23 = vadd.f32 1.0, %v7130_v1  ;;  %v6773_v1 = vld [vmem:[#allocation10 + $0xa0] ss:$24 sps:$4 sm:$0xff]  }
 0x9fb   :  { %v7132_v28 = vpop.eup %7131 }
 0x9fc   :  { %7133 = vrcp.f32 %v2450_v23  ;;  %v2460_v29 = vadd.f32 1.0, %v7132_v28  ;;  %v9706_v23 = vld [vmem:[#allocation12 + $0x90] ss:$24 sps:$4 sm:$0xff]   ;;  %v6781_v28 = vld [vmem:[#allocation10 + $0x74] ss:$24 sps:$4 sm:$0xff]  }
 0x9fe   :  { %7135 = vrcp.f32 %v2460_v29  ;;  %v9709_v29 = vld [vmem:[#allocation12 + $0x64] ss:$24 sps:$4 sm:$0xff]  }
 0xa09   :  { %v7134_v20 = vpop.eup %7133 }
 0xa0a   :  { %v2464_v34 = vmul.f32 %v7134_v20, %v2463_v24  ;;  %v9712_v24 = vld [vmem:[#allocation12 + $0x60] ss:$24 sps:$4 sm:$0xff]   ;;  %v6787_v20 = vld [vmem:[#allocation10 + $0x44] ss:$24 sps:$4 sm:$0xff]  }
 0xa0b   :  { %v7136_v56 = vpop.eup %7135 }
 0xa0c   :  { %v2467_v38 = vadd.f32 %v2465_v22, %v2464_v34  ;;  %v2492_v16 = vsub.f32 1.0, %v7136_v56  ;;  %v2494_v33 = vmul.f32 %v7136_v56, %v9624_v35  ;;  %v9715_v34 = vld [vmem:[#allocation12 + $0x34] ss:$24 sps:$4 sm:$0xff]   ;;  %v6785_v22 = vld [vmem:[#allocation10 + $0x40] ss:$24 sps:$4 sm:$0xff]  }
 0xa0d   :  { %v9724_v56 = vld [vmem:[#allocation12] ss:$24 sps:$4 sm:$0xff]  }
 0xa0e   :  { %7137 = vtanh.f32 %v2467_v38  ;;  %v6793_v38 = vld [vmem:[#allocation10 + $0x14] ss:$24 sps:$4 sm:$0xff]  }
 0xa0f   :  { %7139 = vpow2.f32 %v6062_v0  ;;  %v6791_v0 = vld [vmem:[#allocation10 + $0x10] ss:$24 sps:$4 sm:$0xff]  }
 0xa1b   :  { %v7138_v5 = vpop.eup %7137 }
 0xa1c   :  { %v2493_v53 = vmul.f32 %v7138_v5, %v2492_v16  ;;  %v7140_v62 = vpop.eup %7139  ;;  %v6799_v16 = vld [vmem:[#allocation10 + $0x2e4] ss:$24 sps:$4 sm:$0xff]   ;;  %v9727_v5 = vld [vmem:[#allocation12 + $0x2d4] ss:$24 sps:$4 sm:$0xff]  }
 0xa1d   :  { %v2473_v18 = vadd.f32 1.0, %v7140_v62  ;;  %v9733_v62 = vld [vmem:[#allocation12 + $0x2a4] ss:$24 sps:$4 sm:$0xff]  }
 0xa1e   :  { %v2495_v61 = vadd.f32 %v2494_v33, %v2493_v53  ;;  %v6797_v53 = vld [vmem:[#allocation10 + $0x2e0] ss:$24 sps:$4 sm:$0xff]   ;;  %v9730_v33 = vld [vmem:[#allocation12 + $0x2d0] ss:$24 sps:$4 sm:$0xff]  }
 0xa1f   :  { %7141 = vrcp.f32 %v2473_v18  ;;  %v6803_v18 = vld [vmem:[#allocation10 + $0x2b0] ss:$24 sps:$4 sm:$0xff]  }
 0xa20   :  { %2500 = vst [vmem:[#allocation3 + $0x7] sm:$0x1] %v2495_v61  ;;  %v6805_v61 = vld [vmem:[#allocation10 + $0x2b4] ss:$24 sps:$4 sm:$0xff]  }
 0xa27   :  { %v2439_v10 = vpop.f32.mrf.mxu0  ;;  %v2502_v41 = vld [vmem:[#allocation3] sm:$0xff] }
 0xa28   :  { %v2479_v60 = vadd.f32 %v2477_v12, %v2439_v10  ;;  %v9680_v19 = vpack.c.bf16 %v2502_v41, %v2502_v41  ;;  %v9736_v12 = vld [vmem:[#allocation12 + $0x2a0] ss:$24 sps:$4 sm:$0xff]   ;;  %v6811_v10 = vld [vmem:[#allocation10 + $0x284] ss:$24 sps:$4 sm:$0xff]   ;;  %v6841_v41 = vld [vmem:[#allocation10 + $0x194] ss:$24 sps:$4 sm:$0xff]  }
 0xa29   :  { %v2441_v21 = vpop.f32.mrf.mxu0 }
 0xa2a   :  { %v6063_v30 = vmul.f32 -1.442695, %v2479_v60  ;;  %v2486_v49 = vadd.f32 %v7504_v13, %v2441_v21  ;;  %v9739_v60 = vld [vmem:[#allocation12 + $0x274] ss:$24 sps:$4 sm:$0xff]   ;;  %v6809_v21 = vld [vmem:[#allocation10 + $0x280] ss:$24 sps:$4 sm:$0xff]  }
 0xa2b   :  { %v2443_v27 = vpop.f32.mrf.mxu0  ;;  %v6815_v13 = vld [vmem:[#allocation10 + $0x250] ss:$24 sps:$4 sm:$0xff]  }
 0xa2c   :  { %7143 = vpow2.f32 %v6063_v30  ;;  %v7142_v25 = vpop.eup %7141  ;;  %v9742_v30 = vld [vmem:[#allocation12 + $0x270] ss:$24 sps:$4 sm:$0xff]   ;;  %v6817_v27 = vld [vmem:[#allocation10 + $0x254] ss:$24 sps:$4 sm:$0xff]  }
 0xa2d   :  { %v2444_v54 = vpop.f32.mrf.mxu0  ;;  %v2487_v35 = vmul.f32 %v7142_v25, %v2486_v49  ;;  %v9748_v49 = vld [vmem:[#allocation12 + $0x240] ss:$24 sps:$4 sm:$0xff]   ;;  %v6823_v25 = vld [vmem:[#allocation10 + $0x224] ss:$24 sps:$4 sm:$0xff]  }
 0xa2e   :  { %v9745_v54 = vld [vmem:[#allocation12 + $0x244] ss:$24 sps:$4 sm:$0xff]  }
 0xa2f   :  { %v2490_v37 = vadd.f32 %v2488_v17, %v2487_v35  ;;  %v9751_v35 = vld [vmem:[#allocation12 + $0x214] ss:$24 sps:$4 sm:$0xff]   ;;  %v6821_v17 = vld [vmem:[#allocation10 + $0x220] ss:$24 sps:$4 sm:$0xff]  }
 0xa39   :  { %v7144_v43 = vpop.eup %7143 }
 0xa3a   :  { %v2483_v46 = vadd.f32 1.0, %v7144_v43  ;;  %v9754_v43 = vld [vmem:[#allocation12 + $0x210] ss:$24 sps:$4 sm:$0xff]  }
 0xa3c   :  { %7145 = vrcp.f32 %v2483_v46  ;;  %v6829_v46 = vld [vmem:[#allocation10 + $0x1f4] ss:$24 sps:$4 sm:$0xff]  }
 0xa3d   :  { %7147 = vtanh.f32 %v2490_v37  ;;  %v9757_v37 = vld [vmem:[#allocation12 + $0x1e4] ss:$24 sps:$4 sm:$0xff]  }
 0xa49   :  { %v7146_v45 = vpop.eup %7145 }
 0xa4a   :  { %v2496_v14 = vsub.f32 1.0, %v7146_v45  ;;  %v7148_v9 = vpop.eup %7147  ;;  %v2498_v55 = vmul.f32 %v7146_v45, %v9629_v51  ;;  %v6755_v51 = vld [vmem:[#allocation10 + $0x130] ss:$24 sps:$4 sm:$0xff]  }
 0xa4b   :  { %v6827_v45 = vld [vmem:[#allocation10 + $0x1f0] ss:$24 sps:$4 sm:$0xff]  }
 0xa4c   :  { %v2497_v39 = vmul.f32 %v7148_v9, %v2496_v14  ;;  %v9760_v14 = vld [vmem:[#allocation12 + $0x1e0] ss:$24 sps:$4 sm:$0xff]   ;;  %v6835_v9 = vld [vmem:[#allocation10 + $0x1c4] ss:$24 sps:$4 sm:$0xff]  }
 0xa4d   :  { %11711 = vst [vmem:[#allocation60_spill] sm:$0xff] %v9760_v14 }
 0xa4e   :  { %v2499_v3 = vadd.f32 %v2498_v55, %v2497_v39  ;;  %v9763_v55 = vld [vmem:[#allocation12 + $0x1b4] ss:$24 sps:$4 sm:$0xff]   ;;  %v6833_v39 = vld [vmem:[#allocation10 + $0x1c0] ss:$24 sps:$4 sm:$0xff]  }
 0xa4f   :  { %11712 = vst [vmem:[#allocation61_spill] sm:$0xff] %v9763_v55 }
 0xa50   :  { %2501 = vst [vmem:[#allocation3 + $0x8] sm:$0x1] %v2499_v3  ;;  %v9766_v3 = vld [vmem:[#allocation12 + $0x1b0] ss:$24 sps:$4 sm:$0xff]  }
 0xa51   :  { %11713 = vst [vmem:[#allocation62_spill] sm:$0xff] %v9766_v3 }
 0xa57   :  { %v2503_v42 = vld [vmem:[#allocation3 + $0x8] sm:$0xff] }
 0xa58   :  { %v2505_v6 = vpack.c.bf16 %v2503_v42, %v2503_v42  ;;  %v9769_v42 = vld [vmem:[#allocation12 + $0x184] ss:$24 sps:$4 sm:$0xff]  }
 0xa59   :  { %11714 = vst [vmem:[#allocation63_spill] sm:$0xff] %v9769_v42 }
 0xa5a   :  { %3146 = vmatprep.mubr.bf16.mxu1 %v2505_v6  ;;  %3187 = vmatprep.mubr.bf16.mxu0 %v2505_v6 }
 0xa5b   :  { %3147 = vmatmul.mubr.bf16.vlgmr.msra.gmra.mxu1 %v9680_v19  ;;  %3188 = vmatmul.mubr.bf16.vlgmr.msra.gmra.mxu0 %v9680_v19 }
 0xa5c   :  { %3197 = vmatpush1.bf16.msra.mxu1 %v6749_v26  ;;  %3824 = vmatpush1.bf16.msra.mxu0 %v9678_v50  ;;  %v9772_v26 = vld [vmem:[#allocation12 + $0x180] ss:$24 sps:$4 sm:$0xff]  }
 0xa5d   :  { %3228 = vmatprep.mubr.bf16.mxu1 %v2505_v6  ;;  %3198 = vmatprep.subr.bf16.mxu1 %v6757_v8  ;;  %v6839_v6 = vld [vmem:[#allocation10 + $0x190] ss:$24 sps:$4 sm:$0xff]   ;;  %11715 = vst [vmem:[#allocation64_spill] sm:$0xff] %v9772_v26  ;;  %v9775_v8 = vld [vmem:[#allocation12 + $0x15c] ss:$24 sps:$4 sm:$0xff]  }
 0xa5e   :  { %3825 = vmatprep.subr.bf16.mxu0 %v9682_v15  ;;  %3855 = vmatprep.mubr.bf16.mxu0 %v11710_v59 }
 0xa60   :  { %3199 = vmatpush1.bf16.msra.mxu1 %v6755_v51  ;;  %3826 = vmatpush1.bf16.msra.mxu0 %v9687_v32  ;;  %v9777_v51 = vld [vmem:[#allocation12 + $0x164] ss:$24 sps:$4 sm:$0xff]  }
 0xa61   :  { %3200 = vmatprep.subr.bf16.mxu1 %v6763_v57  ;;  %3827 = vmatprep.subr.bf16.mxu0 %v9689_v31  ;;  %11716 = vst [vmem:[#allocation65_spill] sm:$0xff] %v9777_v51  ;;  %v9780_v57 = vld [vmem:[#allocation12 + $0x158] ss:$24 sps:$4 sm:$0xff]  }
 0xa64   :  { %3201 = vmatpush1.bf16.msra.mxu1 %v6761_v36  ;;  %3828 = vmatpush1.bf16.msra.mxu0 %v9694_v48  ;;  %v9782_v36 = vld [vmem:[#allocation12 + $0x160] ss:$24 sps:$4 sm:$0xff]  }
 0xa65   :  { %3202 = vmatprep.subr.bf16.mxu1 %v6769_v4  ;;  %3829 = vmatprep.subr.bf16.mxu0 %v9697_v11  ;;  %11717 = vst [vmem:[#allocation66_spill] sm:$0xff] %v9782_v36  ;;  %v9786_v4 = vld [vmem:[#allocation12 + $0x12c] ss:$24 sps:$4 sm:$0xff]  }
 0xa68   :  { %3203 = vmatpush1.bf16.msra.mxu1 %v6767_v2  ;;  %3830 = vmatpush1.bf16.msra.mxu0 %v9700_v7  ;;  %v9788_v2 = vld [vmem:[#allocation12 + $0x134] ss:$24 sps:$4 sm:$0xff]  }
 0xa69   :  { %3204 = vmatprep.subr.bf16.mxu1 %v6775_v58  ;;  %3831 = vmatprep.subr.bf16.mxu0 %v9703_v63  ;;  %11718 = vst [vmem:[#allocation67_spill] sm:$0xff] %v9788_v2  ;;  %v9794_v58 = vld [vmem:[#allocation12 + $0x128] ss:$24 sps:$4 sm:$0xff]  }
 0xa6a   :  { %11719 = vst [vmem:[#allocation68_spill] sm:$0xff] %v9794_v58 }
 0xa6c   :  { %3205 = vmatpush1.bf16.msra.mxu1 %v6773_v1  ;;  %3832 = vmatpush1.bf16.msra.mxu0 %v9706_v23  ;;  %v9796_v1 = vld [vmem:[#allocation12 + $0x130] ss:$24 sps:$4 sm:$0xff]  }
 0xa6d   :  { %3206 = vmatprep.subr.bf16.mxu1 %v6781_v28  ;;  %3833 = vmatprep.subr.bf16.mxu0 %v9709_v29  ;;  %11720 = vst [vmem:[#allocation69_spill] sm:$0xff] %v9796_v1  ;;  %v9800_v28 = vld [vmem:[#allocation12 + $0xfc] ss:$24 sps:$4 sm:$0xff]  }
 0xa6e   :  { %11721 = vst [vmem:[#allocation70_spill] sm:$0xff] %v9800_v28 }
 0xa70   :  { %3207 = vmatpush1.bf16.msra.mxu1 %v6779_v52  ;;  %3834 = vmatpush1.bf16.msra.mxu0 %v9712_v24  ;;  %v9802_v52 = vld [vmem:[#allocation12 + $0x104] ss:$24 sps:$4 sm:$0xff]  }
 0xa71   :  { %3208 = vmatprep.subr.bf16.mxu1 %v6787_v20  ;;  %3835 = vmatprep.subr.bf16.mxu0 %v9715_v34  ;;  %11722 = vst [vmem:[#allocation71_spill] sm:$0xff] %v9802_v52  ;;  %v9810_v20 = vld [vmem:[#allocation12 + $0x100] ss:$24 sps:$4 sm:$0xff]  }
 0xa72   :  { %11724 = vst [vmem:[#allocation73_spill] sm:$0xff] %v9810_v20 }
 0xa74   :  { %3209 = vmatpush1.bf16.msra.mxu1 %v6785_v22  ;;  %3836 = vmatpush1.bf16.msra.mxu0 %v9718_v47  ;;  %v9814_v22 = vld [vmem:[#allocation12 + $0xcc] ss:$24 sps:$4 sm:$0xff]  }
 0xa75   :  { %3210 = vmatprep.subr.bf16.mxu1 %v6793_v38  ;;  %3837 = vmatprep.subr.bf16.mxu0 %v9721_v40  ;;  %11725 = vst [vmem:[#allocation74_spill] sm:$0xff] %v9814_v22  ;;  %v9816_v38 = vld [vmem:[#allocation12 + $0xd4] ss:$24 sps:$4 sm:$0xff]  }
 0xa76   :  { %11726 = vst [vmem:[#allocation75_spill] sm:$0xff] %v9816_v38 }
 0xa78   :  { %3211 = vmatpush1.bf16.msra.mxu1 %v6791_v0  ;;  %3838 = vmatpush1.bf16.msra.mxu0 %v9724_v56  ;;  %v9820_v0 = vld [vmem:[#allocation12 + $0xc8] ss:$24 sps:$4 sm:$0xff]  }
 0xa79   :  { %3212 = vmatprep.subr.bf16.mxu1 %v6799_v16  ;;  %3839 = vmatprep.subr.bf16.mxu0 %v9727_v5  ;;  %11727 = vst [vmem:[#allocation76_spill] sm:$0xff] %v9820_v0  ;;  %v9822_v16 = vld [vmem:[#allocation12 + $0xd0] ss:$24 sps:$4 sm:$0xff]  }
 0xa7a   :  { %11728 = vst [vmem:[#allocation77_spill] sm:$0xff] %v9822_v16 }
 0xa7c   :  { %3213 = vmatpush2.bf16.msra.mxu1 %v6797_v53  ;;  %3840 = vmatpush2.bf16.msra.mxu0 %v9730_v33  ;;  %v9826_v53 = vld [vmem:[#allocation12 + $0x9c] ss:$24 sps:$4 sm:$0xff]  }
 0xa7d   :  { %3214 = vmatprep.subr.bf16.mxu1 %v6805_v61  ;;  %3841 = vmatprep.subr.bf16.mxu0 %v9733_v62  ;;  %11729 = vst [vmem:[#allocation78_spill] sm:$0xff] %v9826_v53  ;;  %v9828_v61 = vld [vmem:[#allocation12 + $0xa4] ss:$24 sps:$4 sm:$0xff]  }
 0xa7e   :  { %11730 = vst [vmem:[#allocation79_spill] sm:$0xff] %v9828_v61 }
 0xa80   :  { %3215 = vmatpush2.bf16.msra.mxu1 %v6803_v18  ;;  %3842 = vmatpush2.bf16.msra.mxu0 %v9736_v12  ;;  %v9832_v18 = vld [vmem:[#allocation12 + $0x98] ss:$24 sps:$4 sm:$0xff]  }
 0xa81   :  { %3216 = vmatprep.subr.bf16.mxu1 %v6811_v10  ;;  %3843 = vmatprep.subr.bf16.mxu0 %v9739_v60  ;;  %11731 = vst [vmem:[#allocation80_spill] sm:$0xff] %v9832_v18  ;;  %v9834_v10 = vld [vmem:[#allocation12 + $0xa0] ss:$24 sps:$4 sm:$0xff]  }
 0xa82   :  { %11732 = vst [vmem:[#allocation81_spill] sm:$0xff] %v9834_v10 }
 0xa84   :  { %3217 = vmatpush2.bf16.msra.mxu1 %v6809_v21  ;;  %3844 = vmatpush2.bf16.msra.mxu0 %v9742_v30  ;;  %v9838_v21 = vld [vmem:[#allocation12 + $0x6c] ss:$24 sps:$4 sm:$0xff]  }
 0xa85   :  { %3218 = vmatprep.subr.bf16.mxu1 %v6817_v27  ;;  %3845 = vmatprep.subr.bf16.mxu0 %v9745_v54  ;;  %11733 = vst [vmem:[#allocation36_spill] sm:$0xff] %v9838_v21  ;;  %v9840_v27 = vld [vmem:[#allocation12 + $0x74] ss:$24 sps:$4 sm:$0xff]  }
 0xa86   :  { %11734 = vst [vmem:[#allocation37_spill] sm:$0xff] %v9840_v27 }
 0xa88   :  { %3219 = vmatpush2.bf16.msra.mxu1 %v6815_v13  ;;  %3846 = vmatpush2.bf16.msra.mxu0 %v9748_v49  ;;  %v9844_v13 = vld [vmem:[#allocation12 + $0x68] ss:$24 sps:$4 sm:$0xff]  }
 0xa89   :  { %3220 = vmatprep.subr.bf16.mxu1 %v6823_v25  ;;  %3847 = vmatprep.subr.bf16.mxu0 %v9751_v35  ;;  %11735 = vst [vmem:[#allocation82_spill] sm:$0xff] %v9844_v13  ;;  %v9846_v25 = vld [vmem:[#allocation12 + $0x70] ss:$24 sps:$4 sm:$0xff]  }
 0xa8a   :  { %11736 = vst [vmem:[#allocation83_spill] sm:$0xff] %v9846_v25 }
 0xa8c   :  { %3221 = vmatpush2.bf16.msra.mxu1 %v6821_v17  ;;  %3848 = vmatpush2.bf16.msra.mxu0 %v9754_v43  ;;  %v9850_v17 = vld [vmem:[#allocation12 + $0x3c] ss:$24 sps:$4 sm:$0xff]  }
 0xa8d   :  { %3222 = vmatprep.subr.bf16.mxu1 %v6829_v46  ;;  %3849 = vmatprep.subr.bf16.mxu0 %v9757_v37  ;;  %11737 = vst [vmem:[#allocation38_spill] sm:$0xff] %v9850_v17  ;;  %v9852_v46 = vld [vmem:[#allocation12 + $0x44] ss:$24 sps:$4 sm:$0xff]  }
 0xa8e   :  { %11738 = vst [vmem:[#allocation39_spill] sm:$0xff] %v9852_v46 }
 0xa90   :  { %3223 = vmatpush2.bf16.msra.mxu1 %v6827_v45  ;;  %3850 = vmatpush2.bf16.msra.mxu0 %v9760_v14  ;;  %v9856_v45 = vld [vmem:[#allocation12 + $0x38] ss:$24 sps:$4 sm:$0xff]   ;;  %v9960_v14 = vld [vmem:[#allocation12 + $0x194] ss:$24 sps:$4 sm:$0xff]  }
 0xa91   :  { %3224 = vmatprep.subr.bf16.mxu1 %v6835_v9  ;;  %3851 = vmatprep.subr.bf16.mxu0 %v9763_v55  ;;  %11739 = vst [vmem:[#allocation84_spill] sm:$0xff] %v9856_v45  ;;  %v9858_v9 = vld [vmem:[#allocation12 + $0x40] ss:$24 sps:$4 sm:$0xff]  }
 0xa92   :  { %11740 = vst [vmem:[#allocation85_spill] sm:$0xff] %v9858_v9  ;;  %v9954_v55 = vld [vmem:[#allocation12 + $0x1c0] ss:$24 sps:$4 sm:$0xff]  }
 0xa94   :  { %3225 = vmatpush2.bf16.msra.mxu1 %v6833_v39  ;;  %3852 = vmatpush2.bf16.msra.mxu0 %v9766_v3  ;;  %v9862_v39 = vld [vmem:[#allocation12 + $0xc] ss:$24 sps:$4 sm:$0xff]  }
 0xa95   :  { %3226 = vmatprep.subr.bf16.mxu1 %v6841_v41  ;;  %3853 = vmatprep.subr.bf16.mxu0 %v9769_v42  ;;  %11741 = vst [vmem:[#allocation40_spill] sm:$0xff] %v9862_v39  ;;  %v9864_v41 = vld [vmem:[#allocation12 + $0x14] ss:$24 sps:$4 sm:$0xff]   ;;  %v9942_v42 = vld [vmem:[#allocation12 + $0x1f0] ss:$24 sps:$4 sm:$0xff]  }
 0xa96   :  { %11742 = vst [vmem:[#allocation41_spill] sm:$0xff] %v9864_v41  ;;  %v9948_v3 = vld [vmem:[#allocation12 + $0x1c4] ss:$24 sps:$4 sm:$0xff]  }
 0xa98   :  { %3227 = vmatpush2.bf16.msra.mxu1 %v6839_v6  ;;  %3854 = vmatpush2.bf16.msra.mxu0 %v9772_v26  ;;  %v9868_v6 = vld [vmem:[#allocation12 + $0x8] ss:$24 sps:$4 sm:$0xff]   ;;  %v9936_v26 = vld [vmem:[#allocation12 + $0x1f4] ss:$24 sps:$4 sm:$0xff]  }
 0xa99   :  { %3864 = vmatprep.subr.bf16.mxu1 %v9775_v8  ;;  %3905 = vmatprep.subr.bf16.mxu0 %v9777_v51  ;;  %11743 = vst [vmem:[#allocation86_spill] sm:$0xff] %v9868_v6  ;;  %v9930_v51 = vld [vmem:[#allocation12 + $0x220] ss:$24 sps:$4 sm:$0xff]   ;;  %11766 = vst [vmem:[#allocation58_spill] sm:$0xff] %v9936_v26 }
 0xa9a   :  { %11764 = vst [vmem:[#allocation56_spill] sm:$0xff] %v9930_v51 }
 0xa9b   :  { %3229 = vmatmul.mubr.bf16.vlgmr.msra.gmra.mxu1 %v9680_v19  ;;  %3856 = vmatmul.mubr.bf16.vlgmr.msra.gmra.mxu0 %v11710_v59  ;;  %v9808_v19 = vld [vmem:[#allocation12 + $0xf8] ss:$24 sps:$4 sm:$0xff]  }
 0xa9c   :  { %3865 = vmatpush1.bf16.msra.mxu1 %v9780_v57  ;;  %3906 = vmatpush1.bf16.msra.mxu0 %v9782_v36  ;;  %11723 = vst [vmem:[#allocation72_spill] sm:$0xff] %v9808_v19  ;;  %v9924_v36 = vld [vmem:[#allocation12 + $0x224] ss:$24 sps:$4 sm:$0xff]  }
 0xa9d   :  { %3866 = vmatprep.subr.bf16.mxu1 %v9786_v4  ;;  %3907 = vmatprep.subr.bf16.mxu0 %v9788_v2  ;;  %v9918_v2 = vld [vmem:[#allocation12 + $0x250] ss:$24 sps:$4 sm:$0xff]   ;;  %11762 = vst [vmem:[#allocation54_spill] sm:$0xff] %v9924_v36 }
 0xa9e   :  { %3896 = vmatprep.mubr.bf16.mxu1 %v11710_v59  ;;  %3937 = vmatprep.mubr.bf16.mxu0 %v11710_v59  ;;  %11760 = vst [vmem:[#allocation52_spill] sm:$0xff] %v9918_v2 }
 0xaa0   :  { %3867 = vmatpush1.bf16.msra.mxu1 %v9794_v58  ;;  %3908 = vmatpush1.bf16.msra.mxu0 %v9796_v1  ;;  %v9912_v1 = vld [vmem:[#allocation12 + $0x254] ss:$24 sps:$4 sm:$0xff]  }
 0xaa1   :  { %3868 = vmatprep.subr.bf16.mxu1 %v9800_v28  ;;  %3909 = vmatprep.subr.bf16.mxu0 %v9802_v52  ;;  %v9906_v52 = vld [vmem:[#allocation12 + $0x280] ss:$24 sps:$4 sm:$0xff]   ;;  %11758 = vst [vmem:[#allocation50_spill] sm:$0xff] %v9912_v1 }
 0xaa2   :  { %11756 = vst [vmem:[#allocation48_spill] sm:$0xff] %v9906_v52 }
 0xaa4   :  { %3869 = vmatpush1.bf16.msra.mxu1 %v9808_v19  ;;  %3910 = vmatpush1.bf16.msra.mxu0 %v9810_v20  ;;  %v9900_v20 = vld [vmem:[#allocation12 + $0x284] ss:$24 sps:$4 sm:$0xff]  }
 0xaa5   :  { %3870 = vmatprep.subr.bf16.mxu1 %v9814_v22  ;;  %3911 = vmatprep.subr.bf16.mxu0 %v9816_v38  ;;  %v9894_v38 = vld [vmem:[#allocation12 + $0x2b0] ss:$24 sps:$4 sm:$0xff]   ;;  %11754 = vst [vmem:[#allocation47_spill] sm:$0xff] %v9900_v20 }
 0xaa6   :  { %11752 = vst [vmem:[#allocation91_spill] sm:$0xff] %v9894_v38 }
 0xaa8   :  { %3871 = vmatpush1.bf16.msra.mxu1 %v9820_v0  ;;  %3912 = vmatpush1.bf16.msra.mxu0 %v9822_v16  ;;  %v9888_v16 = vld [vmem:[#allocation12 + $0x2b4] ss:$24 sps:$4 sm:$0xff]  }
 0xaa9   :  { %3872 = vmatprep.subr.bf16.mxu1 %v9826_v53  ;;  %3913 = vmatprep.subr.bf16.mxu0 %v9828_v61  ;;  %v9882_v61 = vld [vmem:[#allocation12 + $0x2e0] ss:$24 sps:$4 sm:$0xff]   ;;  %11750 = vst [vmem:[#allocation45_spill] sm:$0xff] %v9888_v16 }
 0xaaa   :  { %11748 = vst [vmem:[#allocation89_spill] sm:$0xff] %v9882_v61 }
 0xaac   :  { %3873 = vmatpush1.bf16.msra.mxu1 %v9832_v18  ;;  %3914 = vmatpush1.bf16.msra.mxu0 %v9834_v10  ;;  %v9876_v10 = vld [vmem:[#allocation12 + $0x2e4] ss:$24 sps:$4 sm:$0xff]  }
 0xaad   :  { %3874 = vmatprep.subr.bf16.mxu1 %v9838_v21  ;;  %3915 = vmatprep.subr.bf16.mxu0 %v9840_v27  ;;  %v9870_v27 = vld [vmem:[#allocation12 + $0x10] ss:$24 sps:$4 sm:$0xff]   ;;  %11746 = vst [vmem:[#allocation43_spill] sm:$0xff] %v9876_v10 }
 0xaae   :  { %11744 = vst [vmem:[#allocation87_spill] sm:$0xff] %v9870_v27 }
 0xab0   :  { %3875 = vmatpush1.bf16.msra.mxu1 %v9844_v13  ;;  %3916 = vmatpush1.bf16.msra.mxu0 %v9846_v25  ;;  %v9874_v25 = vld [vmem:[#allocation12 + $0x2dc] ss:$24 sps:$4 sm:$0xff]  }
 0xab1   :  { %3876 = vmatprep.subr.bf16.mxu1 %v9850_v17  ;;  %3917 = vmatprep.subr.bf16.mxu0 %v9852_v46  ;;  %11745 = vst [vmem:[#allocation42_spill] sm:$0xff] %v9874_v25  ;;  %v9880_v46 = vld [vmem:[#allocation12 + $0x2d8] ss:$24 sps:$4 sm:$0xff]  }
 0xab2   :  { %11747 = vst [vmem:[#allocation88_spill] sm:$0xff] %v9880_v46 }
 0xab4   :  { %3877 = vmatpush1.bf16.msra.mxu1 %v9856_v45  ;;  %3918 = vmatpush1.bf16.msra.mxu0 %v9858_v9  ;;  %v9886_v9 = vld [vmem:[#allocation12 + $0x2ac] ss:$24 sps:$4 sm:$0xff]  }
 0xab5   :  { %3878 = vmatprep.subr.bf16.mxu1 %v9862_v39  ;;  %3919 = vmatprep.subr.bf16.mxu0 %v9864_v41  ;;  %11749 = vst [vmem:[#allocation44_spill] sm:$0xff] %v9886_v9  ;;  %v9892_v41 = vld [vmem:[#allocation12 + $0x2a8] ss:$24 sps:$4 sm:$0xff]  }
 0xab6   :  { %11751 = vst [vmem:[#allocation90_spill] sm:$0xff] %v9892_v41 }
 0xab8   :  { %3879 = vmatpush1.bf16.msra.mxu1 %v9868_v6  ;;  %3920 = vmatpush1.bf16.msra.mxu0 %v9870_v27  ;;  %v9898_v27 = vld [vmem:[#allocation12 + $0x27c] ss:$24 sps:$4 sm:$0xff]  }
 0xab9   :  { %3880 = vmatprep.subr.bf16.mxu1 %v9874_v25  ;;  %3921 = vmatprep.subr.bf16.mxu0 %v9876_v10  ;;  %11753 = vst [vmem:[#allocation46_spill] sm:$0xff] %v9898_v27  ;;  %v9904_v10 = vld [vmem:[#allocation12 + $0x278] ss:$24 sps:$4 sm:$0xff]  }
 0xaba   :  { %11755 = vst [vmem:[#allocation92_spill] sm:$0xff] %v9904_v10 }
 0xabc   :  { %3881 = vmatpush2.bf16.msra.mxu1 %v9880_v46  ;;  %3922 = vmatpush2.bf16.msra.mxu0 %v9882_v61  ;;  %v9910_v61 = vld [vmem:[#allocation12 + $0x24c] ss:$24 sps:$4 sm:$0xff]  }
 0xabd   :  { %3882 = vmatprep.subr.bf16.mxu1 %v9886_v9  ;;  %3923 = vmatprep.subr.bf16.mxu0 %v9888_v16  ;;  %11757 = vst [vmem:[#allocation49_spill] sm:$0xff] %v9910_v61  ;;  %v9916_v16 = vld [vmem:[#allocation12 + $0x248] ss:$24 sps:$4 sm:$0xff]  }
 0xabe   :  { %11759 = vst [vmem:[#allocation51_spill] sm:$0xff] %v9916_v16 }
 0xac0   :  { %3883 = vmatpush2.bf16.msra.mxu1 %v9892_v41  ;;  %3924 = vmatpush2.bf16.msra.mxu0 %v9894_v38  ;;  %v9922_v38 = vld [vmem:[#allocation12 + $0x21c] ss:$24 sps:$4 sm:$0xff]  }
 0xac1   :  { %3884 = vmatprep.subr.bf16.mxu1 %v9898_v27  ;;  %3925 = vmatprep.subr.bf16.mxu0 %v9900_v20  ;;  %11761 = vst [vmem:[#allocation53_spill] sm:$0xff] %v9922_v38  ;;  %v9928_v20 = vld [vmem:[#allocation12 + $0x218] ss:$24 sps:$4 sm:$0xff]  }
 0xac2   :  { %11763 = vst [vmem:[#allocation55_spill] sm:$0xff] %v9928_v20 }
 0xac4   :  { %3885 = vmatpush2.bf16.msra.mxu1 %v9904_v10  ;;  %3926 = vmatpush2.bf16.msra.mxu0 %v9906_v52  ;;  %v9934_v52 = vld [vmem:[#allocation12 + $0x1ec] ss:$24 sps:$4 sm:$0xff]  }
 0xac5   :  { %3886 = vmatprep.subr.bf16.mxu1 %v9910_v61  ;;  %3927 = vmatprep.subr.bf16.mxu0 %v9912_v1  ;;  %11765 = vst [vmem:[#allocation57_spill] sm:$0xff] %v9934_v52  ;;  %v9940_v1 = vld [vmem:[#allocation12 + $0x1e8] ss:$24 sps:$4 sm:$0xff]  }
 0xac6   :  { %11767 = vst [vmem:[#allocation59_spill] sm:$0xff] %v9940_v1 }
 0xac8   :  { %3887 = vmatpush2.bf16.msra.mxu1 %v9916_v16  ;;  %3928 = vmatpush2.bf16.msra.mxu0 %v9918_v2  ;;  %v9946_v2 = vld [vmem:[#allocation12 + $0x1bc] ss:$24 sps:$4 sm:$0xff]  }
 0xac9   :  { %3888 = vmatprep.subr.bf16.mxu1 %v9922_v38  ;;  %3929 = vmatprep.subr.bf16.mxu0 %v9924_v36  ;;  %11768 = vst [vmem:[#allocation93_spill] sm:$0xff] %v9946_v2  ;;  %v9952_v36 = vld [vmem:[#allocation12 + $0x1b8] ss:$24 sps:$4 sm:$0xff]  }
 0xaca   :  { %11769 = vst [vmem:[#allocation94_spill] sm:$0xff] %v9952_v36 }
 0xacc   :  { %3889 = vmatpush2.bf16.msra.mxu1 %v9928_v20  ;;  %3930 = vmatpush2.bf16.msra.mxu0 %v9930_v51  ;;  %v9958_v51 = vld [vmem:[#allocation12 + $0x18c] ss:$24 sps:$4 sm:$0xff]  }
 0xacd   :  { %3890 = vmatprep.subr.bf16.mxu1 %v9934_v52  ;;  %3931 = vmatprep.subr.bf16.mxu0 %v9936_v26  ;;  %11770 = vst [vmem:[#allocation95_spill] sm:$0xff] %v9958_v51  ;;  %v9964_v26 = vld [vmem:[#allocation12 + $0x188] ss:$24 sps:$4 sm:$0xff]  }
 0xace   :  { %11771 = vst [vmem:[#allocation96_spill] sm:$0xff] %v9964_v26 }
 0xad0   :  { %3891 = vmatpush2.bf16.msra.mxu1 %v9940_v1  ;;  %3932 = vmatpush2.bf16.msra.mxu0 %v9942_v42  ;;  %v9966_v1 = vld [vmem:[#allocation12 + $0x190] ss:$24 sps:$4 sm:$0xff]  }
 0xad1   :  { %3892 = vmatprep.subr.bf16.mxu1 %v9946_v2  ;;  %3933 = vmatprep.subr.bf16.mxu0 %v9948_v3 }
 0xad4   :  { %3893 = vmatpush2.bf16.msra.mxu1 %v9952_v36  ;;  %3934 = vmatpush2.bf16.msra.mxu0 %v9954_v55 }
 0xad5   :  { %3894 = vmatprep.subr.bf16.mxu1 %v9958_v51  ;;  %3935 = vmatprep.subr.bf16.mxu0 %v9960_v14 }
 0xad8   :  { %3895 = vmatpush2.bf16.msra.mxu1 %v9964_v26  ;;  %3936 = vmatpush2.bf16.msra.mxu0 %v9966_v1 }
 0xad9   :  { %4006 = vmatprep.subr.bf16.mxu1 %v9667_v44  ;;  %4047 = vmatprep.subr.bf16.mxu0 %v9775_v8 }
 0xadb   :  { %3897 = vmatmul.mubr.bf16.vlgmr.msra.gmra.mxu1 %v11710_v59  ;;  %3938 = vmatmul.mubr.bf16.vlgmr.msra.gmra.mxu0 %v11710_v59  ;;  %v11772_v59 = vld [vmem:[#allocation60_spill] sm:$0xff] }
 0xadc   :  { %4007 = vmatpush1.bf16.msra.mxu1 %v9678_v50  ;;  %4048 = vmatpush1.bf16.msra.mxu0 %v9780_v57 }
 0xadd   :  { %4008 = vmatprep.subr.bf16.mxu1 %v9682_v15  ;;  %4049 = vmatprep.subr.bf16.mxu0 %v9786_v4 }
 0xae0   :  { %4009 = vmatpush1.bf16.msra.mxu1 %v9687_v32  ;;  %4050 = vmatpush1.bf16.msra.mxu0 %v9794_v58 }
 0xae1   :  { %4010 = vmatprep.subr.bf16.mxu1 %v9689_v31  ;;  %4051 = vmatprep.subr.bf16.mxu0 %v9800_v28 }
 0xae4   :  { %4011 = vmatpush1.bf16.msra.mxu1 %v9694_v48  ;;  %4052 = vmatpush1.bf16.msra.mxu0 %v9808_v19 }
 0xae5   :  { %4012 = vmatprep.subr.bf16.mxu1 %v9697_v11  ;;  %4053 = vmatprep.subr.bf16.mxu0 %v9814_v22 }
 0xae8   :  { %4013 = vmatpush1.bf16.msra.mxu1 %v9700_v7  ;;  %4054 = vmatpush1.bf16.msra.mxu0 %v9820_v0 }
 0xae9   :  { %4014 = vmatprep.subr.bf16.mxu1 %v9703_v63  ;;  %4055 = vmatprep.subr.bf16.mxu0 %v9826_v53 }
 0xaec   :  { %4015 = vmatpush1.bf16.msra.mxu1 %v9706_v23  ;;  %4056 = vmatpush1.bf16.msra.mxu0 %v9832_v18 }
 0xaed   :  { %4016 = vmatprep.subr.bf16.mxu1 %v9709_v29  ;;  %4057 = vmatprep.subr.bf16.mxu0 %v9838_v21 }
 0xaf0   :  { %4017 = vmatpush1.bf16.msra.mxu1 %v9712_v24  ;;  %4058 = vmatpush1.bf16.msra.mxu0 %v9844_v13 }
 0xaf1   :  { %4018 = vmatprep.subr.bf16.mxu1 %v9715_v34  ;;  %4059 = vmatprep.subr.bf16.mxu0 %v9850_v17 }
 0xaf4   :  { %4019 = vmatpush1.bf16.msra.mxu1 %v9718_v47  ;;  %4060 = vmatpush1.bf16.msra.mxu0 %v9856_v45 }
 0xaf5   :  { %4020 = vmatprep.subr.bf16.mxu1 %v9721_v40  ;;  %4061 = vmatprep.subr.bf16.mxu0 %v9862_v39 }
 0xaf8   :  { %4021 = vmatpush1.bf16.msra.mxu1 %v9724_v56  ;;  %4062 = vmatpush1.bf16.msra.mxu0 %v9868_v6 }
 0xaf9   :  { %4022 = vmatprep.subr.bf16.mxu1 %v9727_v5  ;;  %4063 = vmatprep.subr.bf16.mxu0 %v9874_v25 }
 0xafc   :  { %4023 = vmatpush2.bf16.msra.mxu1 %v9730_v33  ;;  %4064 = vmatpush2.bf16.msra.mxu0 %v9880_v46  ;;  %v11780_v46 = vld [vmem:[#allocation64_spill] sm:$0xff] }
 0xafd   :  { %4024 = vmatprep.subr.bf16.mxu1 %v9733_v62  ;;  %4065 = vmatprep.subr.bf16.mxu0 %v9886_v9 }
 0xb00   :  { %4025 = vmatpush2.bf16.msra.mxu1 %v9736_v12  ;;  %4066 = vmatpush2.bf16.msra.mxu0 %v9892_v41 }
 0xb01   :  { %4026 = vmatprep.subr.bf16.mxu1 %v9739_v60  ;;  %4067 = vmatprep.subr.bf16.mxu0 %v9898_v27 }
 0xb04   :  { %4027 = vmatpush2.bf16.msra.mxu1 %v9742_v30  ;;  %4068 = vmatpush2.bf16.msra.mxu0 %v9904_v10  ;;  %v11773_v10 = vld [vmem:[#allocation59_spill] sm:$0xff] }
 0xb05   :  { %4028 = vmatprep.subr.bf16.mxu1 %v9745_v54  ;;  %4069 = vmatprep.subr.bf16.mxu0 %v9910_v61  ;;  %v11774_v61 = vld [vmem:[#allocation61_spill] sm:$0xff] }
 0xb08   :  { %4029 = vmatpush2.bf16.msra.mxu1 %v9748_v49  ;;  %4070 = vmatpush2.bf16.msra.mxu0 %v9916_v16  ;;  %v11775_v16 = vld [vmem:[#allocation62_spill] sm:$0xff] }
 0xb09   :  { %4030 = vmatprep.subr.bf16.mxu1 %v9751_v35  ;;  %4071 = vmatprep.subr.bf16.mxu0 %v9922_v38  ;;  %v11776_v38 = vld [vmem:[#allocation63_spill] sm:$0xff] }
 0xb0c   :  { %4031 = vmatpush2.bf16.msra.mxu1 %v9754_v43  ;;  %4072 = vmatpush2.bf16.msra.mxu0 %v9928_v20  ;;  %v2602_v20 = vld [vmem:[%s10990_s7] sm:$0x3f] }
 0xb0d   :  { %4032 = vmatprep.subr.bf16.mxu1 %v9757_v37  ;;  %4073 = vmatprep.subr.bf16.mxu0 %v9934_v52  ;;  %v11777_v52 = vld [vmem:[#allocation35_spill] sm:$0xff] }
 0xb0e   :  { %v11778_v27 = vsub.s32 0, %v11777_v52  ;;  %v11783_v6 = vsub.s32 3, %v11777_v52 }
 0xb10   :  { %4033 = vmatpush2.bf16.msra.mxu1 %v11772_v59  ;;  %4074 = vmatpush2.bf16.msra.mxu0 %v11773_v10  ;;  %v2607_v41 = vrot.slane %v2602_v20, %v11778_v27  ;;  %v11779_v10 = vsub.s32 2, %v11777_v52 }
 0xb11   :  { %4034 = vmatprep.subr.bf16.mxu1 %v11774_v61  ;;  %4075 = vmatprep.subr.bf16.mxu0 %v9946_v2  ;;  %v11781_v2 = vld [vmem:[#allocation65_spill] sm:$0xff] }
 0xb12   :  { %v2615_v9 = vrot.slane %v2602_v20, %v11779_v10 }
 0xb14   :  { %4035 = vmatpush2.bf16.msra.mxu1 %v11775_v16  ;;  %4076 = vmatpush2.bf16.msra.mxu0 %v9952_v36  ;;  %v11782_v36 = vsub.s32 1, %v11777_v52 }
 0xb15   :  { %4036 = vmatprep.subr.bf16.mxu1 %v11776_v38  ;;  %4077 = vmatprep.subr.bf16.mxu0 %v9958_v51  ;;  %v2619_v51 = vrot.slane %v2602_v20, %v11783_v6  ;;  %v11785_v6 = vsub.s32 5, %v11777_v52 }
 0xb16   :  { %v2611_v25 = vrot.slane %v2602_v20, %v11782_v36  ;;  %v11784_v36 = vsub.s32 4, %v11777_v52 }
 0xb17   :  { %v2627_v19 = vrot.slane %v2602_v20, %v11785_v6 }
 0xb18   :  { %4037 = vmatpush2.bf16.msra.mxu1 %v11780_v46  ;;  %4078 = vmatpush2.bf16.msra.mxu0 %v9964_v26  ;;  %v2623_v22 = vrot.slane %v2602_v20, %v11784_v36 }
 0xb19   :  { %4088 = vmatprep.subr.bf16.mxu1 %v11781_v2  ;;  %4189 = vmatprep.subr.bf16.mxu0 %v9667_v44 }
 0xb1b   :  { %v3148_v39 = vpop.f32.mrf.mxu1  ;;  %v3189_v45 = vpop.f32.mrf.mxu0 }
 0xb1c   :  { %v3149_v27 = vadd.f32 %v3148_v39, %v2607_v41  ;;  %v3190_v17 = vadd.f32 %v3189_v45, %v2615_v9 }
 0xb1d   :  { %v3150_v13 = vpop.f32.mrf.mxu1  ;;  %v3191_v10 = vpop.f32.mrf.mxu0 }
 0xb1e   :  { %3237 = vst [vmem:[#allocation2] sm:$0xff] %v3149_v27  ;;  %3239 = vst [vmem:[#allocation2 + $0x10] sm:$0xff] %v3190_v17  ;;  %v3151_v21 = vadd.f32 %v3150_v13, %v2611_v25  ;;  %v3192_v26 = vadd.f32 %v3191_v10, %v2619_v51 }
 0xb1f   :  { %v3152_v18 = vpop.f32.mrf.mxu1  ;;  %v3193_v53 = vpop.f32.mrf.mxu0 }
 0xb20   :  { %3238 = vst [vmem:[#allocation2 + $0x8] sm:$0xff] %v3151_v21  ;;  %3240 = vst [vmem:[#allocation2 + $0x18] sm:$0xff] %v3192_v26 }
 0xb21   :  { %v3153_v44 = vpop.f32.mrf.mxu1  ;;  %v3194_v0 = vpop.f32.mrf.mxu0 }
 0xb27   :  { %v3341_v21 = vld [vmem:[#allocation2] ss:$8 sm:$0x7] }
 0xb28   :  { %v3954_v17 = vrot.slane %v3341_v21, 1 }
 0xb5b   :  { %v3230_v39 = vpop.f32.mrf.mxu1  ;;  %v3857_v45 = vpop.f32.mrf.mxu0 }
 0xb5c   :  { %v3231_v9 = vadd.f32 %v3230_v39, %v2623_v22  ;;  %v3946_v0 = vadd.f32 %v3857_v45, %v3341_v21 }
 0xb5d   :  { %v3232_v41 = vpop.f32.mrf.mxu1  ;;  %v3859_v27 = vpop.f32.mrf.mxu0 }
 0xb5e   :  { %3241 = vst [vmem:[#allocation2 + $0x20] sm:$0xff] %v3231_v9  ;;  %v3233_v13 = vadd.f32 %v3232_v41, %v2627_v19  ;;  %v6256_v25 = vmul.f32 -1.442695, %v3946_v0  ;;  %v3956_v10 = vadd.f32 %v3954_v17, %v3859_v27  ;;  %v10058_v19 = vld [vmem:[%s10991_s8] sm:$0x1] }
 0xb5f   :  { %v3234_v51 = vpop.f32.mrf.mxu1  ;;  %v3861_v18 = vpop.f32.mrf.mxu0  ;;  %11786 = vst [vmem:[#allocation60_spill] sm:$0xff] %v10058_v19 }
 0xb60   :  { %3242 = vst [vmem:[#allocation2 + $0x28] sm:$0xff] %v3233_v13  ;;  %7149 = vpow2.f32 %v6256_v25  ;;  %v6257_v52 = vmul.f32 -1.442695, %v3956_v10  ;;  %v3965_v51 = vrot.slane %v3341_v21, 2 }
 0xb61   :  { %v3235_v53 = vpop.f32.mrf.mxu1  ;;  %v3862_v26 = vpop.f32.mrf.mxu0 }
 0xb62   :  { %7151 = vpow2.f32 %v6257_v52 }
 0xb67   :  { %v3342_v41 = vld [vmem:[#allocation2 + $0x1f] ss:$8 sm:$0x7] }
 0xb6d   :  { %v7150_v20 = vpop.eup %7149 }
 0xb6e   :  { %v3950_v44 = vadd.f32 1.0, %v7150_v20  ;;  %v3977_v20 = vrot.slane %v3342_v41, 1 }
 0xb6f   :  { %v7152_v22 = vpop.eup %7151 }
 0xb70   :  { %7153 = vrcp.f32 %v3950_v44  ;;  %v3960_v36 = vadd.f32 1.0, %v7152_v22 }
 0xb72   :  { %7155 = vrcp.f32 %v3960_v36 }
 0xb7d   :  { %v7154_v9 = vpop.eup %7153 }
 0xb9b   :  { %v3898_v6 = vpop.f32.mrf.mxu1  ;;  %v3939_v39 = vpop.f32.mrf.mxu0 }
 0xb9c   :  { %v3963_v45 = vadd.f32 %v3898_v6, %v10058_v19  ;;  %v3979_v44 = vadd.f32 %v3977_v20, %v3939_v39  ;;  %v7156_v6 = vpop.eup %7155 }
 0xb9d   :  { %v3900_v13 = vpop.f32.mrf.mxu1  ;;  %v3941_v27 = vpop.f32.mrf.mxu0  ;;  %v3992_v19 = vsub.f32 1.0, %v7156_v6  ;;  %v3994_v36 = vmul.f32 0.0, %v7156_v6  ;;  %v11790_v6 = vld [vmem:[#allocation71_spill] sm:$0xff] }
 0xb9e   :  { %v3964_v18 = vmul.f32 %v7154_v9, %v3963_v45  ;;  %v3969_v53 = vadd.f32 %v3900_v13, %v3342_v41  ;;  %v6259_v22 = vmul.f32 -1.442695, %v3979_v44  ;;  %v11788_v44 = vld [vmem:[#allocation67_spill] sm:$0xff] }
 0xb9f   :  { %v3902_v26 = vpop.f32.mrf.mxu1  ;;  %v3943_v0 = vpop.f32.mrf.mxu0 }
 0xba0   :  { %v3967_v25 = vadd.f32 %v3965_v51, %v3964_v18  ;;  %v6258_v17 = vmul.f32 -1.442695, %v3969_v53  ;;  %v10067_v51 = vld [vmem:[%s10991_s8 + $0x1] sm:$0x1] }
 0xba1   :  { %v3903_v10 = vpop.f32.mrf.mxu1  ;;  %v3944_v52 = vpop.f32.mrf.mxu0  ;;  %v3986_v18 = vadd.f32 %v3941_v27, %v10067_v51 }
 0xba2   :  { %7157 = vtanh.f32 %v3967_v25 }
 0xba3   :  { %7159 = vpow2.f32 %v6258_v17 }
 0xba4   :  { %7161 = vpow2.f32 %v6259_v22  ;;  %v11789_v22 = vld [vmem:[#allocation69_spill] sm:$0xff] }
 0xbaf   :  { %v7158_v28 = vpop.eup %7157 }
 0xbb0   :  { %v7160_v58 = vpop.eup %7159  ;;  %v3993_v21 = vmul.f32 %v7158_v28, %v3992_v19  ;;  %v3988_v28 = vrot.slane %v3342_v41, 2  ;;  %v11787_v41 = vld [vmem:[#allocation66_spill] sm:$0xff] }
 0xbb1   :  { %v3973_v45 = vadd.f32 1.0, %v7160_v58  ;;  %v7162_v13 = vpop.eup %7161 }
 0xbb2   :  { %v10061_v9 = vadd.f32 %v3994_v36, %v3993_v21  ;;  %v3983_v39 = vadd.f32 1.0, %v7162_v13  ;;  %v11791_v21 = vld [vmem:[#allocation73_spill] sm:$0xff]  ;;  %v11792_v36 = vld [vmem:[#allocation75_spill] sm:$0xff]  ;;  %v11829_v13 = vld [vmem:[#allocation90_spill] sm:$0xff] }
 0xbb3   :  { %7163 = vrcp.f32 %v3973_v45  ;;  %v11793_v45 = vld [vmem:[#allocation77_spill] sm:$0xff] }
 0xbb4   :  { %4000 = vst [vmem:[#allocation4] sm:$0x1] %v10061_v9  ;;  %7165 = vrcp.f32 %v3983_v39  ;;  %v10077_v27 = vpack.c.bf16 %v10061_v9, %v10061_v9  ;;  %v11830_v39 = vld [vmem:[#allocation46_spill] sm:$0xff] }
 0xbc0   :  { %v7164_v53 = vpop.eup %7163 }
 0xbc1   :  { %v3987_v26 = vmul.f32 %v7164_v53, %v3986_v18  ;;  %v7166_v58 = vpop.eup %7165  ;;  %v11831_v18 = vld [vmem:[#allocation92_spill] sm:$0xff]  ;;  %v11832_v53 = vld [vmem:[#allocation49_spill] sm:$0xff] }
 0xbc2   :  { %v3996_v0 = vsub.f32 1.0, %v7166_v58  ;;  %v3998_v10 = vmul.f32 0.0, %v7166_v58  ;;  %v11836_v58 = vld [vmem:[#allocation57_spill] sm:$0xff] }
 0xbc3   :  { %v3990_v19 = vadd.f32 %v3988_v28, %v3987_v26  ;;  %v11833_v26 = vld [vmem:[#allocation51_spill] sm:$0xff]  ;;  %v11834_v28 = vld [vmem:[#allocation53_spill] sm:$0xff] }
 0xbc5   :  { %7167 = vtanh.f32 %v3990_v19  ;;  %v11835_v19 = vld [vmem:[#allocation55_spill] sm:$0xff] }
 0xbd2   :  { %v7168_v25 = vpop.eup %7167 }
 0xbd3   :  { %v3997_v17 = vmul.f32 %v7168_v25, %v3996_v0  ;;  %v11837_v0 = vld [vmem:[#allocation59_spill] sm:$0xff]  ;;  %v11838_v25 = vld [vmem:[#allocation93_spill] sm:$0xff] }
 0xbd5   :  { %v10070_v52 = vadd.f32 %v3998_v10, %v3997_v17  ;;  %v11839_v17 = vld [vmem:[#allocation94_spill] sm:$0xff]  ;;  %v11840_v10 = vld [vmem:[#allocation95_spill] sm:$0xff] }
 0xbd7   :  { %4001 = vst [vmem:[#allocation4 + $0xf] sm:$0x1] %v10070_v52  ;;  %v4005_v20 = vpack.c.bf16 %v10070_v52, %v10070_v52 }
 0xbd9   :  { %4038 = vmatprep.mubr.bf16.mxu1 %v4005_v20  ;;  %4079 = vmatprep.mubr.bf16.mxu0 %v4005_v20 }
 0xbda   :  { %4039 = vmatmul.mubr.bf16.vlgmr.msra.gmra.mxu1 %v10077_v27  ;;  %4080 = vmatmul.mubr.bf16.vlgmr.msra.gmra.mxu0 %v10077_v27 }
 0xbdb   :  { %4089 = vmatpush1.bf16.msra.mxu1 %v11787_v41  ;;  %4120 = vmatprep.mubr.bf16.mxu1 %v4005_v20  ;;  %v11841_v20 = vld [vmem:[#allocation96_spill] sm:$0xff] }
 0xbdc   :  { %4090 = vmatprep.subr.bf16.mxu1 %v11788_v44  ;;  %4190 = vmatpush1.bf16.msra.mxu0 %v9678_v50  ;;  %v11794_v50 = vld [vmem:[#allocation79_spill] sm:$0xff] }
 0xbdd   :  { %4191 = vmatprep.subr.bf16.mxu0 %v9682_v15  ;;  %v11795_v15 = vld [vmem:[#allocation81_spill] sm:$0xff] }
 0xbdf   :  { %4091 = vmatpush1.bf16.msra.mxu1 %v11789_v22 }
 0xbe0   :  { %4092 = vmatprep.subr.bf16.mxu1 %v11790_v6  ;;  %4192 = vmatpush1.bf16.msra.mxu0 %v9687_v32  ;;  %v11796_v32 = vld [vmem:[#allocation37_spill] sm:$0xff] }
 0xbe1   :  { %4193 = vmatprep.subr.bf16.mxu0 %v9689_v31  ;;  %v11797_v31 = vld [vmem:[#allocation83_spill] sm:$0xff] }
 0xbe3   :  { %4093 = vmatpush1.bf16.msra.mxu1 %v11791_v21 }
 0xbe4   :  { %4094 = vmatprep.subr.bf16.mxu1 %v11792_v36  ;;  %4194 = vmatpush1.bf16.msra.mxu0 %v9694_v48  ;;  %v11798_v48 = vld [vmem:[#allocation39_spill] sm:$0xff] }
 0xbe5   :  { %4195 = vmatprep.subr.bf16.mxu0 %v9697_v11  ;;  %v11799_v11 = vld [vmem:[#allocation85_spill] sm:$0xff] }
 0xbe7   :  { %4095 = vmatpush1.bf16.msra.mxu1 %v11793_v45 }
 0xbe8   :  { %4096 = vmatprep.subr.bf16.mxu1 %v11794_v50  ;;  %4196 = vmatpush1.bf16.msra.mxu0 %v9700_v7  ;;  %v11800_v7 = vld [vmem:[#allocation41_spill] sm:$0xff] }
 0xbe9   :  { %4197 = vmatprep.subr.bf16.mxu0 %v9703_v63  ;;  %v11801_v63 = vld [vmem:[#allocation87_spill] sm:$0xff] }
 0xbeb   :  { %4097 = vmatpush1.bf16.msra.mxu1 %v11795_v15 }
 0xbec   :  { %4098 = vmatprep.subr.bf16.mxu1 %v11796_v32  ;;  %4198 = vmatpush1.bf16.msra.mxu0 %v9706_v23  ;;  %v11802_v23 = vld [vmem:[#allocation43_spill] sm:$0xff] }
 0xbed   :  { %4199 = vmatprep.subr.bf16.mxu0 %v9709_v29  ;;  %v11803_v29 = vld [vmem:[#allocation89_spill] sm:$0xff] }
 0xbef   :  { %4099 = vmatpush1.bf16.msra.mxu1 %v11797_v31 }
 0xbf0   :  { %4100 = vmatprep.subr.bf16.mxu1 %v11798_v48  ;;  %4200 = vmatpush1.bf16.msra.mxu0 %v9712_v24  ;;  %v11804_v24 = vld [vmem:[#allocation45_spill] sm:$0xff] }
 0xbf1   :  { %4201 = vmatprep.subr.bf16.mxu0 %v9715_v34  ;;  %v11805_v34 = vld [vmem:[#allocation91_spill] sm:$0xff] }
 0xbf3   :  { %4101 = vmatpush1.bf16.msra.mxu1 %v11799_v11 }
 0xbf4   :  { %4102 = vmatprep.subr.bf16.mxu1 %v11800_v7  ;;  %4202 = vmatpush1.bf16.msra.mxu0 %v9718_v47  ;;  %v11806_v47 = vld [vmem:[#allocation47_spill] sm:$0xff] }
 0xbf5   :  { %4203 = vmatprep.subr.bf16.mxu0 %v9721_v40  ;;  %v11807_v40 = vld [vmem:[#allocation48_spill] sm:$0xff] }
 0xbf7   :  { %4103 = vmatpush1.bf16.msra.mxu1 %v11801_v63 }
 0xbf8   :  { %4104 = vmatprep.subr.bf16.mxu1 %v11802_v23  ;;  %4204 = vmatpush1.bf16.msra.mxu0 %v9724_v56  ;;  %v11808_v56 = vld [vmem:[#allocation50_spill] sm:$0xff] }
 0xbf9   :  { %4205 = vmatprep.subr.bf16.mxu0 %v9727_v5  ;;  %v11809_v5 = vld [vmem:[#allocation52_spill] sm:$0xff] }
 0xbfb   :  { %4105 = vmatpush2.bf16.msra.mxu1 %v11803_v29 }
 0xbfc   :  { %4106 = vmatprep.subr.bf16.mxu1 %v11804_v24  ;;  %4206 = vmatpush2.bf16.msra.mxu0 %v9730_v33  ;;  %v11810_v33 = vld [vmem:[#allocation54_spill] sm:$0xff] }
 0xbfd   :  { %4207 = vmatprep.subr.bf16.mxu0 %v9733_v62  ;;  %v11811_v62 = vld [vmem:[#allocation56_spill] sm:$0xff] }
 0xbff   :  { %4107 = vmatpush2.bf16.msra.mxu1 %v11805_v34 }
 0xc00   :  { %4108 = vmatprep.subr.bf16.mxu1 %v11806_v47  ;;  %4208 = vmatpush2.bf16.msra.mxu0 %v9736_v12  ;;  %v11812_v12 = vld [vmem:[#allocation58_spill] sm:$0xff] }
 0xc01   :  { %4209 = vmatprep.subr.bf16.mxu0 %v9739_v60  ;;  %v11813_v60 = vld [vmem:[#allocation68_spill] sm:$0xff] }
 0xc03   :  { %4109 = vmatpush2.bf16.msra.mxu1 %v11807_v40 }
 0xc04   :  { %4110 = vmatprep.subr.bf16.mxu1 %v11808_v56  ;;  %4210 = vmatpush2.bf16.msra.mxu0 %v9742_v30  ;;  %v11814_v30 = vld [vmem:[#allocation70_spill] sm:$0xff] }
 0xc05   :  { %4211 = vmatprep.subr.bf16.mxu0 %v9745_v54  ;;  %v11815_v54 = vld [vmem:[#allocation72_spill] sm:$0xff] }
 0xc07   :  { %4111 = vmatpush2.bf16.msra.mxu1 %v11809_v5 }
 0xc08   :  { %4112 = vmatprep.subr.bf16.mxu1 %v11810_v33  ;;  %4212 = vmatpush2.bf16.msra.mxu0 %v9748_v49  ;;  %v11816_v49 = vld [vmem:[#allocation74_spill] sm:$0xff] }
 0xc09   :  { %4213 = vmatprep.subr.bf16.mxu0 %v9751_v35  ;;  %v11817_v35 = vld [vmem:[#allocation76_spill] sm:$0xff] }
 0xc0b   :  { %4113 = vmatpush2.bf16.msra.mxu1 %v11811_v62 }
 0xc0c   :  { %4114 = vmatprep.subr.bf16.mxu1 %v11812_v12  ;;  %4214 = vmatpush2.bf16.msra.mxu0 %v9754_v43  ;;  %v11818_v43 = vld [vmem:[#allocation78_spill] sm:$0xff] }
 0xc0d   :  { %4215 = vmatprep.subr.bf16.mxu0 %v9757_v37  ;;  %v11819_v37 = vld [vmem:[#allocation80_spill] sm:$0xff] }
 0xc0f   :  { %4115 = vmatpush2.bf16.msra.mxu1 %v9942_v42 }
 0xc10   :  { %4116 = vmatprep.subr.bf16.mxu1 %v9948_v3  ;;  %4216 = vmatpush2.bf16.msra.mxu0 %v11772_v59  ;;  %v11828_v59 = vld [vmem:[#allocation44_spill] sm:$0xff] }
 0xc11   :  { %4217 = vmatprep.subr.bf16.mxu0 %v11774_v61  ;;  %v11826_v61 = vld [vmem:[#allocation42_spill] sm:$0xff] }
 0xc13   :  { %4117 = vmatpush2.bf16.msra.mxu1 %v9954_v55 }
 0xc14   :  { %4118 = vmatprep.subr.bf16.mxu1 %v9960_v14  ;;  %4218 = vmatpush2.bf16.msra.mxu0 %v11775_v16  ;;  %v11825_v16 = vld [vmem:[#allocation86_spill] sm:$0xff] }
 0xc15   :  { %4219 = vmatprep.subr.bf16.mxu0 %v11776_v38  ;;  %v11824_v38 = vld [vmem:[#allocation40_spill] sm:$0xff] }
 0xc17   :  { %4119 = vmatpush2.bf16.msra.mxu1 %v9966_v1 }
 0xc18   :  { %4230 = vmatprep.subr.bf16.mxu1 %v9775_v8  ;;  %4220 = vmatpush2.bf16.msra.mxu0 %v11780_v46  ;;  %v11820_v8 = vld [vmem:[#allocation36_spill] sm:$0xff] }
 0xc19   :  { %4271 = vmatprep.subr.bf16.mxu0 %v11781_v2  ;;  %v11821_v2 = vld [vmem:[#allocation82_spill] sm:$0xff]  ;;  %v11827_v46 = vld [vmem:[#allocation88_spill] sm:$0xff] }
 0xc1a   :  { %4121 = vmatmul.mubr.bf16.vlgmr.msra.gmra.mxu1 %v10077_v27  ;;  %v10177_v27 = vld [vmem:[#allocation12 + $0x154] ss:$24 sps:$4 sm:$0xff]  }
 0xc1b   :  { %4231 = vmatpush1.bf16.msra.mxu1 %v9780_v57  ;;  %v11822_v57 = vld [vmem:[#allocation38_spill] sm:$0xff]  ;;  %11842 = vst [vmem:[#allocation61_spill] sm:$0xff] %v10177_v27 }
 0xc1c   :  { %4232 = vmatprep.subr.bf16.mxu1 %v9786_v4  ;;  %v11823_v4 = vld [vmem:[#allocation84_spill] sm:$0xff] }
 0xc1f   :  { %4233 = vmatpush1.bf16.msra.mxu1 %v11813_v60  ;;  %v4002_v60 = vld [vmem:[#allocation2 + $0x1] ss:$8 sm:$0x7] }
 0xc20   :  { %4234 = vmatprep.subr.bf16.mxu1 %v11814_v30 }
 0xc23   :  { %4235 = vmatpush1.bf16.msra.mxu1 %v11815_v54 }
 0xc24   :  { %4236 = vmatprep.subr.bf16.mxu1 %v11816_v49 }
 0xc27   :  { %4237 = vmatpush1.bf16.msra.mxu1 %v11817_v35 }
 0xc28   :  { %4238 = vmatprep.subr.bf16.mxu1 %v11818_v43 }
 0xc2b   :  { %4239 = vmatpush1.bf16.msra.mxu1 %v11819_v37 }
 0xc2c   :  { %4240 = vmatprep.subr.bf16.mxu1 %v11820_v8 }
 0xc2f   :  { %4241 = vmatpush1.bf16.msra.mxu1 %v11821_v2 }
 0xc30   :  { %4242 = vmatprep.subr.bf16.mxu1 %v11822_v57 }
 0xc33   :  { %4243 = vmatpush1.bf16.msra.mxu1 %v11823_v4 }
 0xc34   :  { %4244 = vmatprep.subr.bf16.mxu1 %v11824_v38 }
 0xc37   :  { %4245 = vmatpush1.bf16.msra.mxu1 %v11825_v16 }
 0xc38   :  { %4246 = vmatprep.subr.bf16.mxu1 %v11826_v61 }
 0xc3b   :  { %4247 = vmatpush2.bf16.msra.mxu1 %v11827_v46 }
 0xc3c   :  { %4248 = vmatprep.subr.bf16.mxu1 %v11828_v59  ;;  %v4148_v59 = vrot.slane %v4002_v60, 2 }
 0xc3f   :  { %4249 = vmatpush2.bf16.msra.mxu1 %v11829_v13 }
 0xc40   :  { %4250 = vmatprep.subr.bf16.mxu1 %v11830_v39  ;;  %v11843_v39 = vld [vmem:[#allocation60_spill] sm:$0xff] }
 0xc43   :  { %4251 = vmatpush2.bf16.msra.mxu1 %v11831_v18 }
 0xc44   :  { %4252 = vmatprep.subr.bf16.mxu1 %v11832_v53 }
 0xc47   :  { %4253 = vmatpush2.bf16.msra.mxu1 %v11833_v26 }
 0xc48   :  { %4254 = vmatprep.subr.bf16.mxu1 %v11834_v28 }
 0xc4b   :  { %4255 = vmatpush2.bf16.msra.mxu1 %v11835_v19 }
 0xc4c   :  { %4256 = vmatprep.subr.bf16.mxu1 %v11836_v58 }
 0xc4f   :  { %4257 = vmatpush2.bf16.msra.mxu1 %v11837_v0 }
 0xc50   :  { %4258 = vmatprep.subr.bf16.mxu1 %v11838_v25  ;;  %v4137_v25 = vrot.slane %v4002_v60, 1 }
 0xc53   :  { %4259 = vmatpush2.bf16.msra.mxu1 %v11839_v17 }
 0xc54   :  { %4260 = vmatprep.subr.bf16.mxu1 %v11840_v10 }
 0xc57   :  { %4261 = vmatpush2.bf16.msra.mxu1 %v11841_v20 }
 0xc58   :  { %4372 = vmatprep.subr.bf16.mxu1 %v10177_v27 }
 0xc9a   :  { %v4040_v30 = vpop.f32.mrf.mxu1  ;;  %v4081_v54 = vpop.f32.mrf.mxu0 }
 0xc9b   :  { %v4129_v49 = vadd.f32 %v4040_v30, %v4002_v60  ;;  %v4146_v13 = vadd.f32 %v4081_v54, %v11843_v39 }
 0xc9c   :  { %v4042_v35 = vpop.f32.mrf.mxu1  ;;  %v4083_v43 = vpop.f32.mrf.mxu0 }
 0xc9d   :  { %v6260_v58 = vmul.f32 -1.442695, %v4129_v49  ;;  %v4139_v10 = vadd.f32 %v4137_v25, %v4042_v35 }
 0xc9e   :  { %v4044_v0 = vpop.f32.mrf.mxu1  ;;  %v4085_v19 = vpop.f32.mrf.mxu0 }
 0xc9f   :  { %7169 = vpow2.f32 %v6260_v58  ;;  %v6261_v26 = vmul.f32 -1.442695, %v4139_v10  ;;  %v4003_v0 = vld [vmem:[#allocation2 + $0x1e] ss:$8 sm:$0x7] }
 0xca0   :  { %v4045_v17 = vpop.f32.mrf.mxu1  ;;  %v4086_v28 = vpop.f32.mrf.mxu0  ;;  %v4152_v58 = vadd.f32 %v4083_v43, %v4003_v0 }
 0xca1   :  { %7171 = vpow2.f32 %v6261_v26 }
 0xca2   :  { %v6262_v17 = vmul.f32 -1.442695, %v4152_v58 }
 0xcac   :  { %v7170_v20 = vpop.eup %7169 }
 0xcad   :  { %v4133_v53 = vadd.f32 1.0, %v7170_v20 }
 0xcae   :  { %v7172_v27 = vpop.eup %7171 }
 0xcaf   :  { %7173 = vrcp.f32 %v4133_v53  ;;  %v4143_v18 = vadd.f32 1.0, %v7172_v27 }
 0xcb1   :  { %7175 = vrcp.f32 %v4143_v18 }
 0xcbc   :  { %v7174_v30 = vpop.eup %7173 }
 0xcbd   :  { %v4147_v46 = vmul.f32 %v7174_v30, %v4146_v13  ;;  %v4160_v13 = vrot.slane %v4003_v0, 1 }
 0xcbe   :  { %v7176_v28 = vpop.eup %7175 }
 0xcbf   :  { %v4150_v19 = vadd.f32 %v4148_v59, %v4147_v46  ;;  %v4175_v25 = vsub.f32 1.0, %v7176_v28  ;;  %v4177_v53 = vmul.f32 %v7176_v28, %v10061_v9  ;;  %v4171_v9 = vrot.slane %v4003_v0, 2 }
 0xcc1   :  { %7177 = vtanh.f32 %v4150_v19 }
 0xcc2   :  { %7179 = vpow2.f32 %v6262_v17 }
 0xcce   :  { %v7178_v26 = vpop.eup %7177 }
 0xccf   :  { %v4176_v10 = vmul.f32 %v7178_v26, %v4175_v25  ;;  %v7180_v27 = vpop.eup %7179 }
 0xcd0   :  { %v4156_v60 = vadd.f32 1.0, %v7180_v27 }
 0xcd1   :  { %v10182_v20 = vadd.f32 %v4177_v53, %v4176_v10 }
 0xcd2   :  { %7181 = vrcp.f32 %v4156_v60 }
 0xcd3   :  { %4183 = vst [vmem:[#allocation4 + $0x1] sm:$0x1] %v10182_v20  ;;  %v10194_v0 = vpack.c.bf16 %v10182_v20, %v10182_v20 }
 0xcda   :  { %v4122_v18 = vpop.f32.mrf.mxu1 }
 0xcdb   :  { %v4162_v46 = vadd.f32 %v4160_v13, %v4122_v18  ;;  %v10203_v18 = vld [vmem:[#allocation12 + $0x124] ss:$24 sps:$4 sm:$0xff]  }
 0xcdc   :  { %v4124_v59 = vpop.f32.mrf.mxu1 }
 0xcdd   :  { %v6263_v54 = vmul.f32 -1.442695, %v4162_v46  ;;  %v4169_v43 = vadd.f32 %v4124_v59, %v10067_v51  ;;  %v10208_v46 = vld [vmem:[#allocation12 + $0x120] ss:$24 sps:$4 sm:$0xff]   ;;  %v10219_v59 = vld [vmem:[#allocation12 + $0xc4] ss:$24 sps:$4 sm:$0xff]  }
 0xcde   :  { %v4126_v49 = vpop.f32.mrf.mxu1 }
 0xcdf   :  { %7183 = vpow2.f32 %v6263_v54  ;;  %v7182_v30 = vpop.eup %7181  ;;  %v10332_v54 = vld [vmem:[#allocation12 + $0x12c] ss:$24 sps:$4 sm:$0xff]   ;;  %v10338_v49 = vld [vmem:[#allocation12 + $0xfc] ss:$24 sps:$4 sm:$0xff]  }
 0xce0   :  { %v4127_v35 = vpop.f32.mrf.mxu1  ;;  %v4170_v19 = vmul.f32 %v7182_v30, %v4169_v43  ;;  %11858 = vst [vmem:[#allocation37_spill] sm:$0xff] %v10332_v54  ;;  %11860 = vst [vmem:[#allocation39_spill] sm:$0xff] %v10338_v49  ;;  %v10344_v43 = vld [vmem:[#allocation12 + $0xcc] ss:$24 sps:$4 sm:$0xff]   ;;  %v10347_v30 = vld [vmem:[#allocation12 + $0xc8] ss:$24 sps:$4 sm:$0xff]  }
 0xce1   :  { %v10341_v35 = vld [vmem:[#allocation12 + $0xf8] ss:$24 sps:$4 sm:$0xff]   ;;  %11862 = vst [vmem:[#allocation41_spill] sm:$0xff] %v10344_v43  ;;  %11863 = vst [vmem:[#allocation87_spill] sm:$0xff] %v10347_v30 }
 0xce2   :  { %v4173_v28 = vadd.f32 %v4171_v9, %v4170_v19  ;;  %11861 = vst [vmem:[#allocation85_spill] sm:$0xff] %v10341_v35  ;;  %v10350_v19 = vld [vmem:[#allocation12 + $0x9c] ss:$24 sps:$4 sm:$0xff]  }
 0xce3   :  { %11864 = vst [vmem:[#allocation43_spill] sm:$0xff] %v10350_v19  ;;  %v11865_v9 = vld [vmem:[#allocation88_spill] sm:$0xff] }
 0xcec   :  { %v7184_v58 = vpop.eup %7183 }
 0xced   :  { %v4166_v17 = vadd.f32 1.0, %v7184_v58  ;;  %v11866_v58 = vld [vmem:[#allocation44_spill] sm:$0xff] }
 0xcef   :  { %7185 = vrcp.f32 %v4166_v17  ;;  %v11867_v17 = vld [vmem:[#allocation90_spill] sm:$0xff] }
 0xcf0   :  { %7187 = vtanh.f32 %v4173_v28  ;;  %v11876_v28 = vld [vmem:[#allocation93_spill] sm:$0xff] }
 0xcfc   :  { %v7186_v25 = vpop.eup %7185 }
 0xcfd   :  { %v4179_v26 = vsub.f32 1.0, %v7186_v25  ;;  %v7188_v10 = vpop.eup %7187  ;;  %v4181_v27 = vmul.f32 %v7186_v25, %v10070_v52  ;;  %v10200_v52 = vld [vmem:[#allocation12 + $0x150] ss:$24 sps:$4 sm:$0xff]   ;;  %v11877_v25 = vld [vmem:[#allocation94_spill] sm:$0xff] }
 0xcff   :  { %v4180_v53 = vmul.f32 %v7188_v10, %v4179_v26  ;;  %v11878_v26 = vld [vmem:[#allocation95_spill] sm:$0xff]  ;;  %v11879_v10 = vld [vmem:[#allocation96_spill] sm:$0xff] }
 0xd01   :  { %v10187_v60 = vadd.f32 %v4181_v27, %v4180_v53  ;;  %v11880_v53 = vld [vmem:[#allocation61_spill] sm:$0xff] }
 0xd02   :  { %v4185_v27 = vld [vmem:[#allocation2 + $0x2] ss:$8 sm:$0x7] }
 0xd03   :  { %4184 = vst [vmem:[#allocation4 + $0xe] sm:$0x1] %v10187_v60  ;;  %v4188_v13 = vpack.c.bf16 %v10187_v60, %v10187_v60 }
 0xd05   :  { %4221 = vmatprep.mubr.bf16.mxu0 %v4188_v13  ;;  %4262 = vmatprep.mubr.bf16.mxu1 %v4188_v13 }
 0xd06   :  { %4222 = vmatmul.mubr.bf16.vlgmr.msra.gmra.mxu0 %v10194_v0  ;;  %4263 = vmatmul.mubr.bf16.vlgmr.msra.gmra.mxu1 %v10194_v0 }
 0xd07   :  { %4272 = vmatpush1.bf16.msra.mxu0 %v11787_v41  ;;  %4303 = vmatprep.mubr.bf16.mxu0 %v4188_v13  ;;  %v10211_v41 = vld [vmem:[#allocation12 + $0xf4] ss:$24 sps:$4 sm:$0xff]  }
 0xd08   :  { %4273 = vmatprep.subr.bf16.mxu0 %v11788_v44  ;;  %4373 = vmatpush1.bf16.msra.mxu1 %v10200_v52  ;;  %v10216_v44 = vld [vmem:[#allocation12 + $0xf0] ss:$24 sps:$4 sm:$0xff]  }
 0xd09   :  { %4374 = vmatprep.subr.bf16.mxu1 %v10203_v18 }
 0xd0b   :  { %4274 = vmatpush1.bf16.msra.mxu0 %v11789_v22  ;;  %v10224_v22 = vld [vmem:[#allocation12 + $0xc0] ss:$24 sps:$4 sm:$0xff]  }
 0xd0c   :  { %4275 = vmatprep.subr.bf16.mxu0 %v11790_v6  ;;  %4375 = vmatpush1.bf16.msra.mxu1 %v10208_v46  ;;  %v10227_v6 = vld [vmem:[#allocation12 + $0x94] ss:$24 sps:$4 sm:$0xff]  }
 0xd0d   :  { %4376 = vmatprep.subr.bf16.mxu1 %v10211_v41 }
 0xd0f   :  { %4276 = vmatpush1.bf16.msra.mxu0 %v11791_v21  ;;  %v10232_v21 = vld [vmem:[#allocation12 + $0x90] ss:$24 sps:$4 sm:$0xff]  }
 0xd10   :  { %4277 = vmatprep.subr.bf16.mxu0 %v11792_v36  ;;  %4377 = vmatpush1.bf16.msra.mxu1 %v10216_v44  ;;  %v10235_v36 = vld [vmem:[#allocation12 + $0x64] ss:$24 sps:$4 sm:$0xff]  }
 0xd11   :  { %4378 = vmatprep.subr.bf16.mxu1 %v10219_v59 }
 0xd13   :  { %4278 = vmatpush1.bf16.msra.mxu0 %v11793_v45  ;;  %v10240_v45 = vld [vmem:[#allocation12 + $0x60] ss:$24 sps:$4 sm:$0xff]  }
 0xd14   :  { %4279 = vmatprep.subr.bf16.mxu0 %v11794_v50  ;;  %4379 = vmatpush1.bf16.msra.mxu1 %v10224_v22  ;;  %v10243_v50 = vld [vmem:[#allocation12 + $0x34] ss:$24 sps:$4 sm:$0xff]  }
 0xd15   :  { %4380 = vmatprep.subr.bf16.mxu1 %v10227_v6 }
 0xd17   :  { %4280 = vmatpush1.bf16.msra.mxu0 %v11795_v15  ;;  %v10248_v15 = vld [vmem:[#allocation12 + $0x30] ss:$24 sps:$4 sm:$0xff]  }
 0xd18   :  { %4281 = vmatprep.subr.bf16.mxu0 %v11796_v32  ;;  %4381 = vmatpush1.bf16.msra.mxu1 %v10232_v21  ;;  %v10251_v32 = vld [vmem:[#allocation12 + $0x4] ss:$24 sps:$4 sm:$0xff]  }
 0xd19   :  { %4382 = vmatprep.subr.bf16.mxu1 %v10235_v36 }
 0xd1b   :  { %4282 = vmatpush1.bf16.msra.mxu0 %v11797_v31  ;;  %v10256_v31 = vld [vmem:[#allocation12] ss:$24 sps:$4 sm:$0xff]  }
 0xd1c   :  { %4283 = vmatprep.subr.bf16.mxu0 %v11798_v48  ;;  %4383 = vmatpush1.bf16.msra.mxu1 %v10240_v45  ;;  %v10259_v48 = vld [vmem:[#allocation12 + $0x2d4] ss:$24 sps:$4 sm:$0xff]  }
 0xd1d   :  { %4384 = vmatprep.subr.bf16.mxu1 %v10243_v50 }
 0xd1f   :  { %4284 = vmatpush1.bf16.msra.mxu0 %v11799_v11  ;;  %v10264_v11 = vld [vmem:[#allocation12 + $0x2d0] ss:$24 sps:$4 sm:$0xff]  }
 0xd20   :  { %4285 = vmatprep.subr.bf16.mxu0 %v11800_v7  ;;  %4385 = vmatpush1.bf16.msra.mxu1 %v10248_v15  ;;  %v10267_v7 = vld [vmem:[#allocation12 + $0x2a4] ss:$24 sps:$4 sm:$0xff]  }
 0xd21   :  { %4386 = vmatprep.subr.bf16.mxu1 %v10251_v32 }
 0xd23   :  { %4286 = vmatpush1.bf16.msra.mxu0 %v11801_v63  ;;  %v10272_v63 = vld [vmem:[#allocation12 + $0x2a0] ss:$24 sps:$4 sm:$0xff]  }
 0xd24   :  { %4287 = vmatprep.subr.bf16.mxu0 %v11802_v23  ;;  %4387 = vmatpush1.bf16.msra.mxu1 %v10256_v31  ;;  %v10275_v23 = vld [vmem:[#allocation12 + $0x274] ss:$24 sps:$4 sm:$0xff]  }
 0xd25   :  { %4388 = vmatprep.subr.bf16.mxu1 %v10259_v48 }
 0xd27   :  { %4288 = vmatpush2.bf16.msra.mxu0 %v11803_v29  ;;  %v10280_v29 = vld [vmem:[#allocation12 + $0x270] ss:$24 sps:$4 sm:$0xff]  }
 0xd28   :  { %4289 = vmatprep.subr.bf16.mxu0 %v11804_v24  ;;  %4389 = vmatpush2.bf16.msra.mxu1 %v10264_v11  ;;  %11844 = vst [vmem:[#allocation62_spill] sm:$0xff] %v10280_v29  ;;  %v10283_v24 = vld [vmem:[#allocation12 + $0x244] ss:$24 sps:$4 sm:$0xff]  }
 0xd29   :  { %4390 = vmatprep.subr.bf16.mxu1 %v10267_v7  ;;  %11845 = vst [vmem:[#allocation63_spill] sm:$0xff] %v10283_v24 }
 0xd2b   :  { %4290 = vmatpush2.bf16.msra.mxu0 %v11805_v34  ;;  %v10288_v34 = vld [vmem:[#allocation12 + $0x240] ss:$24 sps:$4 sm:$0xff]  }
 0xd2c   :  { %4291 = vmatprep.subr.bf16.mxu0 %v11806_v47  ;;  %4391 = vmatpush2.bf16.msra.mxu1 %v10272_v63  ;;  %11846 = vst [vmem:[#allocation35_spill] sm:$0xff] %v10288_v34  ;;  %v10291_v47 = vld [vmem:[#allocation12 + $0x214] ss:$24 sps:$4 sm:$0xff]  }
 0xd2d   :  { %4392 = vmatprep.subr.bf16.mxu1 %v10275_v23  ;;  %11847 = vst [vmem:[#allocation64_spill] sm:$0xff] %v10291_v47 }
 0xd2f   :  { %4292 = vmatpush2.bf16.msra.mxu0 %v11807_v40  ;;  %v10296_v40 = vld [vmem:[#allocation12 + $0x210] ss:$24 sps:$4 sm:$0xff]  }
 0xd30   :  { %4293 = vmatprep.subr.bf16.mxu0 %v11808_v56  ;;  %4393 = vmatpush2.bf16.msra.mxu1 %v10280_v29  ;;  %11848 = vst [vmem:[#allocation65_spill] sm:$0xff] %v10296_v40  ;;  %v10299_v56 = vld [vmem:[#allocation12 + $0x1e4] ss:$24 sps:$4 sm:$0xff]  }
 0xd31   :  { %4394 = vmatprep.subr.bf16.mxu1 %v10283_v24  ;;  %11849 = vst [vmem:[#allocation66_spill] sm:$0xff] %v10299_v56 }
 0xd33   :  { %4294 = vmatpush2.bf16.msra.mxu0 %v11809_v5  ;;  %v10304_v5 = vld [vmem:[#allocation12 + $0x1e0] ss:$24 sps:$4 sm:$0xff]  }
 0xd34   :  { %4295 = vmatprep.subr.bf16.mxu0 %v11810_v33  ;;  %4395 = vmatpush2.bf16.msra.mxu1 %v10288_v34  ;;  %11850 = vst [vmem:[#allocation67_spill] sm:$0xff] %v10304_v5  ;;  %v10307_v33 = vld [vmem:[#allocation12 + $0x1b4] ss:$24 sps:$4 sm:$0xff]  }
 0xd35   :  { %4396 = vmatprep.subr.bf16.mxu1 %v10291_v47  ;;  %11851 = vst [vmem:[#allocation69_spill] sm:$0xff] %v10307_v33 }
 0xd37   :  { %4296 = vmatpush2.bf16.msra.mxu0 %v11811_v62  ;;  %v10312_v62 = vld [vmem:[#allocation12 + $0x1b0] ss:$24 sps:$4 sm:$0xff]  }
 0xd38   :  { %4297 = vmatprep.subr.bf16.mxu0 %v11812_v12  ;;  %4397 = vmatpush2.bf16.msra.mxu1 %v10296_v40  ;;  %11852 = vst [vmem:[#allocation71_spill] sm:$0xff] %v10312_v62  ;;  %v10315_v12 = vld [vmem:[#allocation12 + $0x184] ss:$24 sps:$4 sm:$0xff]  }
 0xd39   :  { %4398 = vmatprep.subr.bf16.mxu1 %v10299_v56  ;;  %11853 = vst [vmem:[#allocation73_spill] sm:$0xff] %v10315_v12 }
 0xd3b   :  { %4298 = vmatpush2.bf16.msra.mxu0 %v9942_v42  ;;  %v10322_v42 = vld [vmem:[#allocation12 + $0x180] ss:$24 sps:$4 sm:$0xff]  }
 0xd3c   :  { %4299 = vmatprep.subr.bf16.mxu0 %v9948_v3  ;;  %4399 = vmatpush2.bf16.msra.mxu1 %v10304_v5  ;;  %v10319_v3 = vld [vmem:[#allocation12 + $0x15c] ss:$24 sps:$4 sm:$0xff]   ;;  %11855 = vst [vmem:[#allocation77_spill] sm:$0xff] %v10322_v42 }
 0xd3d   :  { %4400 = vmatprep.subr.bf16.mxu1 %v10307_v33  ;;  %11854 = vst [vmem:[#allocation75_spill] sm:$0xff] %v10319_v3 }
 0xd3f   :  { %4300 = vmatpush2.bf16.msra.mxu0 %v9954_v55  ;;  %v10325_v55 = vld [vmem:[#allocation12 + $0x164] ss:$24 sps:$4 sm:$0xff]  }
 0xd40   :  { %4301 = vmatprep.subr.bf16.mxu0 %v9960_v14  ;;  %4401 = vmatpush2.bf16.msra.mxu1 %v10312_v62  ;;  %11856 = vst [vmem:[#allocation79_spill] sm:$0xff] %v10325_v55  ;;  %v10329_v14 = vld [vmem:[#allocation12 + $0x158] ss:$24 sps:$4 sm:$0xff]  }
 0xd41   :  { %4402 = vmatprep.subr.bf16.mxu1 %v10315_v12  ;;  %11857 = vst [vmem:[#allocation81_spill] sm:$0xff] %v10329_v14 }
 0xd43   :  { %4302 = vmatpush2.bf16.msra.mxu0 %v9966_v1  ;;  %v10335_v1 = vld [vmem:[#allocation12 + $0x128] ss:$24 sps:$4 sm:$0xff]  }
 0xd44   :  { %4413 = vmatprep.subr.bf16.mxu0 %v10319_v3  ;;  %4403 = vmatpush2.bf16.msra.mxu1 %v10322_v42  ;;  %11859 = vst [vmem:[#allocation83_spill] sm:$0xff] %v10335_v1 }
 0xd45   :  { %4454 = vmatprep.subr.bf16.mxu1 %v10325_v55 }
 0xd46   :  { %4304 = vmatmul.mubr.bf16.vlgmr.msra.gmra.mxu0 %v10194_v0 }
 0xd47   :  { %4414 = vmatpush1.bf16.msra.mxu0 %v10329_v14 }
 0xd48   :  { %4415 = vmatprep.subr.bf16.mxu0 %v10332_v54 }
 0xd4b   :  { %4416 = vmatpush1.bf16.msra.mxu0 %v10335_v1 }
 0xd4c   :  { %4417 = vmatprep.subr.bf16.mxu0 %v10338_v49 }
 0xd4f   :  { %4418 = vmatpush1.bf16.msra.mxu0 %v10341_v35 }
 0xd50   :  { %4419 = vmatprep.subr.bf16.mxu0 %v10344_v43 }
 0xd53   :  { %4420 = vmatpush1.bf16.msra.mxu0 %v10347_v30 }
 0xd54   :  { %4421 = vmatprep.subr.bf16.mxu0 %v10350_v19  ;;  %v4331_v19 = vrot.slane %v4185_v27, 2 }
 0xd57   :  { %4422 = vmatpush1.bf16.msra.mxu0 %v11819_v37  ;;  %v11868_v37 = vld [vmem:[#allocation46_spill] sm:$0xff] }
 0xd58   :  { %4423 = vmatprep.subr.bf16.mxu0 %v11820_v8  ;;  %v11869_v8 = vld [vmem:[#allocation92_spill] sm:$0xff] }
 0xd5b   :  { %4424 = vmatpush1.bf16.msra.mxu0 %v11821_v2  ;;  %v11870_v2 = vld [vmem:[#allocation49_spill] sm:$0xff] }
 0xd5c   :  { %4425 = vmatprep.subr.bf16.mxu0 %v11822_v57  ;;  %v11871_v57 = vld [vmem:[#allocation51_spill] sm:$0xff] }
 0xd5f   :  { %4426 = vmatpush1.bf16.msra.mxu0 %v11823_v4  ;;  %v11872_v4 = vld [vmem:[#allocation53_spill] sm:$0xff] }
 0xd60   :  { %4427 = vmatprep.subr.bf16.mxu0 %v11824_v38  ;;  %v11873_v38 = vld [vmem:[#allocation55_spill] sm:$0xff] }
 0xd63   :  { %4428 = vmatpush1.bf16.msra.mxu0 %v11825_v16  ;;  %v11874_v16 = vld [vmem:[#allocation57_spill] sm:$0xff] }
 0xd64   :  { %4429 = vmatprep.subr.bf16.mxu0 %v11826_v61  ;;  %v11875_v61 = vld [vmem:[#allocation59_spill] sm:$0xff] }
 0xd67   :  { %4430 = vmatpush2.bf16.msra.mxu0 %v11865_v9 }
 0xd68   :  { %4431 = vmatprep.subr.bf16.mxu0 %v11866_v58 }
 0xd6b   :  { %4432 = vmatpush2.bf16.msra.mxu0 %v11867_v17 }
 0xd6c   :  { %4433 = vmatprep.subr.bf16.mxu0 %v11868_v37 }
 0xd6f   :  { %4434 = vmatpush2.bf16.msra.mxu0 %v11869_v8 }
 0xd70   :  { %4435 = vmatprep.subr.bf16.mxu0 %v11870_v2 }
 0xd73   :  { %4436 = vmatpush2.bf16.msra.mxu0 %v11871_v57  ;;  %v4320_v57 = vrot.slane %v4185_v27, 1 }
 0xd74   :  { %4437 = vmatprep.subr.bf16.mxu0 %v11872_v4 }
 0xd77   :  { %4438 = vmatpush2.bf16.msra.mxu0 %v11873_v38 }
 0xd78   :  { %4439 = vmatprep.subr.bf16.mxu0 %v11874_v16 }
 0xd7b   :  { %4440 = vmatpush2.bf16.msra.mxu0 %v11875_v61 }
 0xd7c   :  { %4441 = vmatprep.subr.bf16.mxu0 %v11876_v28 }
 0xd7f   :  { %4442 = vmatpush2.bf16.msra.mxu0 %v11877_v25 }
 0xd80   :  { %4443 = vmatprep.subr.bf16.mxu0 %v11878_v26 }
 0xd83   :  { %4444 = vmatpush2.bf16.msra.mxu0 %v11879_v10 }
 0xd84   :  { %4555 = vmatprep.subr.bf16.mxu0 %v11880_v53 }
 0xdc6   :  { %v4223_v13 = vpop.f32.mrf.mxu0  ;;  %v4264_v0 = vpop.f32.mrf.mxu1 }
 0xdc7   :  { %v4312_v9 = vadd.f32 %v4223_v13, %v4185_v27  ;;  %v4329_v53 = vadd.f32 %v4264_v0, %v11843_v39 }
 0xdc8   :  { %v4225_v58 = vpop.f32.mrf.mxu0  ;;  %v4266_v17 = vpop.f32.mrf.mxu1 }
 0xdc9   :  { %v6264_v37 = vmul.f32 -1.442695, %v4312_v9  ;;  %v4322_v16 = vadd.f32 %v4320_v57, %v4225_v58  ;;  %v4186_v9 = vld [vmem:[#allocation2 + $0x1d] ss:$8 sm:$0x7] }
 0xdca   :  { %v4227_v8 = vpop.f32.mrf.mxu0  ;;  %v4268_v2 = vpop.f32.mrf.mxu1 }
 0xdcb   :  { %7189 = vpow2.f32 %v6264_v37  ;;  %v6265_v61 = vmul.f32 -1.442695, %v4322_v16  ;;  %v4335_v37 = vadd.f32 %v4266_v17, %v4186_v9 }
 0xdcc   :  { %v4228_v4 = vpop.f32.mrf.mxu0  ;;  %v4269_v38 = vpop.f32.mrf.mxu1 }
 0xdcd   :  { %7191 = vpow2.f32 %v6265_v61  ;;  %v6266_v2 = vmul.f32 -1.442695, %v4335_v37 }
 0xdd8   :  { %v7190_v28 = vpop.eup %7189 }
 0xdd9   :  { %v4316_v25 = vadd.f32 1.0, %v7190_v28 }
 0xdda   :  { %v7192_v26 = vpop.eup %7191 }
 0xddb   :  { %7193 = vrcp.f32 %v4316_v25  ;;  %v4326_v10 = vadd.f32 1.0, %v7192_v26 }
 0xddd   :  { %7195 = vrcp.f32 %v4326_v10 }
 0xde8   :  { %v7194_v13 = vpop.eup %7193 }
 0xde9   :  { %v4330_v30 = vmul.f32 %v7194_v13, %v4329_v53  ;;  %v4343_v53 = vrot.slane %v4186_v9, 1 }
 0xdea   :  { %v7196_v58 = vpop.eup %7195 }
 0xdeb   :  { %v4333_v8 = vadd.f32 %v4331_v19, %v4330_v30  ;;  %v4358_v57 = vsub.f32 1.0, %v7196_v58  ;;  %v4360_v16 = vmul.f32 %v7196_v58, %v10182_v20  ;;  %v4354_v20 = vrot.slane %v4186_v9, 2 }
 0xded   :  { %7197 = vtanh.f32 %v4333_v8 }
 0xdee   :  { %7199 = vpow2.f32 %v6266_v2 }
 0xdfa   :  { %v7198_v4 = vpop.eup %7197 }
 0xdfb   :  { %v4359_v38 = vmul.f32 %v7198_v4, %v4358_v57  ;;  %v7200_v39 = vpop.eup %7199 }
 0xdfc   :  { %v4339_v27 = vadd.f32 1.0, %v7200_v39 }
 0xdfd   :  { %v10379_v61 = vadd.f32 %v4360_v16, %v4359_v38 }
 0xdfe   :  { %7201 = vrcp.f32 %v4339_v27 }
 0xdff   :  { %4366 = vst [vmem:[#allocation4 + $0x2] sm:$0x1] %v10379_v61  ;;  %v10391_v9 = vpack.c.bf16 %v10379_v61, %v10379_v61 }
 0xe06   :  { %v4305_v0 = vpop.f32.mrf.mxu0 }
 0xe07   :  { %v4345_v30 = vadd.f32 %v4343_v53, %v4305_v0  ;;  %v10395_v53 = vld [vmem:[#allocation12 + $0x160] ss:$24 sps:$4 sm:$0xff]   ;;  %v10403_v0 = vld [vmem:[#allocation12 + $0x130] ss:$24 sps:$4 sm:$0xff]  }
 0xe08   :  { %v4307_v19 = vpop.f32.mrf.mxu0 }
 0xe09   :  { %v6267_v17 = vmul.f32 -1.442695, %v4345_v30  ;;  %v4352_v26 = vadd.f32 %v4307_v19, %v10067_v51  ;;  %v10406_v30 = vld [vmem:[#allocation12 + $0x104] ss:$24 sps:$4 sm:$0xff]   ;;  %v10411_v19 = vld [vmem:[#allocation12 + $0x100] ss:$24 sps:$4 sm:$0xff]  }
 0xe0a   :  { %v4309_v28 = vpop.f32.mrf.mxu0 }
 0xe0b   :  { %7203 = vpow2.f32 %v6267_v17  ;;  %v7202_v10 = vpop.eup %7201  ;;  %v10414_v17 = vld [vmem:[#allocation12 + $0xd4] ss:$24 sps:$4 sm:$0xff]   ;;  %v10419_v28 = vld [vmem:[#allocation12 + $0xd0] ss:$24 sps:$4 sm:$0xff]  }
 0xe0c   :  { %v4310_v25 = vpop.f32.mrf.mxu0  ;;  %v4353_v13 = vmul.f32 %v7202_v10, %v4352_v26  ;;  %v10427_v26 = vld [vmem:[#allocation12 + $0xa0] ss:$24 sps:$4 sm:$0xff]   ;;  %v10430_v10 = vld [vmem:[#allocation12 + $0x74] ss:$24 sps:$4 sm:$0xff]  }
 0xe0d   :  { %v10422_v25 = vld [vmem:[#allocation12 + $0xa4] ss:$24 sps:$4 sm:$0xff]  }
 0xe0e   :  { %v4356_v2 = vadd.f32 %v4354_v20, %v4353_v13  ;;  %v10435_v13 = vld [vmem:[#allocation12 + $0x70] ss:$24 sps:$4 sm:$0xff]   ;;  %v10438_v20 = vld [vmem:[#allocation12 + $0x44] ss:$24 sps:$4 sm:$0xff]  }
 0xe18   :  { %v7204_v8 = vpop.eup %7203 }
 0xe19   :  { %v4349_v37 = vadd.f32 1.0, %v7204_v8  ;;  %v10443_v8 = vld [vmem:[#allocation12 + $0x40] ss:$24 sps:$4 sm:$0xff]  }
 0xe1b   :  { %7205 = vrcp.f32 %v4349_v37  ;;  %v10446_v37 = vld [vmem:[#allocation12 + $0x14] ss:$24 sps:$4 sm:$0xff]  }
 0xe1c   :  { %7207 = vtanh.f32 %v4356_v2  ;;  %v10451_v2 = vld [vmem:[#allocation12 + $0x10] ss:$24 sps:$4 sm:$0xff]  }
 0xe28   :  { %v7206_v58 = vpop.eup %7205 }
 0xe29   :  { %v4362_v57 = vsub.f32 1.0, %v7206_v58  ;;  %v7208_v4 = vpop.eup %7207  ;;  %v4364_v16 = vmul.f32 %v7206_v58, %v10187_v60  ;;  %v10398_v60 = vld [vmem:[#allocation12 + $0x134] ss:$24 sps:$4 sm:$0xff]   ;;  %v10454_v58 = vld [vmem:[#allocation12 + $0x2e4] ss:$24 sps:$4 sm:$0xff]  }
 0xe2b   :  { %v4363_v38 = vmul.f32 %v7208_v4, %v4362_v57  ;;  %v10459_v57 = vld [vmem:[#allocation12 + $0x2e0] ss:$24 sps:$4 sm:$0xff]   ;;  %v10462_v4 = vld [vmem:[#allocation12 + $0x2b4] ss:$24 sps:$4 sm:$0xff]  }
 0xe2c   :  { %11881 = vst [vmem:[#allocation89_spill] sm:$0xff] %v10462_v4 }
 0xe2d   :  { %v10384_v39 = vadd.f32 %v4364_v16, %v4363_v38  ;;  %v10467_v38 = vld [vmem:[#allocation12 + $0x2b0] ss:$24 sps:$4 sm:$0xff]   ;;  %v10470_v16 = vld [vmem:[#allocation12 + $0x284] ss:$24 sps:$4 sm:$0xff]  }
 0xe2e   :  { %11882 = vst [vmem:[#allocation45_spill] sm:$0xff] %v10467_v38  ;;  %11883 = vst [vmem:[#allocation91_spill] sm:$0xff] %v10470_v16 }
 0xe2f   :  { %4367 = vst [vmem:[#allocation4 + $0xd] sm:$0x1] %v10384_v39  ;;  %v4371_v27 = vpack.c.bf16 %v10384_v39, %v10384_v39 }
 0xe31   :  { %4404 = vmatprep.mubr.bf16.mxu1 %v4371_v27  ;;  %4445 = vmatprep.mubr.bf16.mxu0 %v4371_v27 }
 0xe32   :  { %4405 = vmatmul.mubr.bf16.vlgmr.msra.gmra.mxu1 %v10391_v9  ;;  %4446 = vmatmul.mubr.bf16.vlgmr.msra.gmra.mxu0 %v10391_v9 }
 0xe33   :  { %4455 = vmatpush1.bf16.msra.mxu1 %v10395_v53  ;;  %4486 = vmatprep.mubr.bf16.mxu1 %v4371_v27  ;;  %v10475_v27 = vld [vmem:[#allocation12 + $0x280] ss:$24 sps:$4 sm:$0xff]  }
 0xe34   :  { %4456 = vmatprep.subr.bf16.mxu1 %v10398_v60  ;;  %4556 = vmatpush1.bf16.msra.mxu0 %v10200_v52  ;;  %11884 = vst [vmem:[#allocation47_spill] sm:$0xff] %v10475_v27 }
 0xe35   :  { %4557 = vmatprep.subr.bf16.mxu0 %v10203_v18 }
 0xe37   :  { %4457 = vmatpush1.bf16.msra.mxu1 %v10403_v0 }
 0xe38   :  { %4458 = vmatprep.subr.bf16.mxu1 %v10406_v30  ;;  %4558 = vmatpush1.bf16.msra.mxu0 %v10208_v46 }
 0xe39   :  { %4559 = vmatprep.subr.bf16.mxu0 %v10211_v41 }
 0xe3b   :  { %4459 = vmatpush1.bf16.msra.mxu1 %v10411_v19 }
 0xe3c   :  { %4460 = vmatprep.subr.bf16.mxu1 %v10414_v17  ;;  %4560 = vmatpush1.bf16.msra.mxu0 %v10216_v44 }
 0xe3d   :  { %4561 = vmatprep.subr.bf16.mxu0 %v10219_v59 }
 0xe3f   :  { %4461 = vmatpush1.bf16.msra.mxu1 %v10419_v28 }
 0xe40   :  { %4462 = vmatprep.subr.bf16.mxu1 %v10422_v25  ;;  %4562 = vmatpush1.bf16.msra.mxu0 %v10224_v22 }
 0xe41   :  { %4563 = vmatprep.subr.bf16.mxu0 %v10227_v6 }
 0xe43   :  { %4463 = vmatpush1.bf16.msra.mxu1 %v10427_v26 }
 0xe44   :  { %4464 = vmatprep.subr.bf16.mxu1 %v10430_v10  ;;  %4564 = vmatpush1.bf16.msra.mxu0 %v10232_v21 }
 0xe45   :  { %4565 = vmatprep.subr.bf16.mxu0 %v10235_v36 }
 0xe47   :  { %4465 = vmatpush1.bf16.msra.mxu1 %v10435_v13 }
 0xe48   :  { %4466 = vmatprep.subr.bf16.mxu1 %v10438_v20  ;;  %4566 = vmatpush1.bf16.msra.mxu0 %v10240_v45 }
 0xe49   :  { %4567 = vmatprep.subr.bf16.mxu0 %v10243_v50 }
 0xe4b   :  { %4467 = vmatpush1.bf16.msra.mxu1 %v10443_v8 }
 0xe4c   :  { %4468 = vmatprep.subr.bf16.mxu1 %v10446_v37  ;;  %4568 = vmatpush1.bf16.msra.mxu0 %v10248_v15 }
 0xe4d   :  { %4569 = vmatprep.subr.bf16.mxu0 %v10251_v32 }
 0xe4f   :  { %4469 = vmatpush1.bf16.msra.mxu1 %v10451_v2 }
 0xe50   :  { %4470 = vmatprep.subr.bf16.mxu1 %v10454_v58  ;;  %4570 = vmatpush1.bf16.msra.mxu0 %v10256_v31 }
 0xe51   :  { %4571 = vmatprep.subr.bf16.mxu0 %v10259_v48 }
 0xe53   :  { %4471 = vmatpush2.bf16.msra.mxu1 %v10459_v57 }
 0xe54   :  { %4472 = vmatprep.subr.bf16.mxu1 %v10462_v4  ;;  %4572 = vmatpush2.bf16.msra.mxu0 %v10264_v11  ;;  %v10478_v4 = vld [vmem:[#allocation12 + $0x254] ss:$24 sps:$4 sm:$0xff]  }
 0xe55   :  { %4573 = vmatprep.subr.bf16.mxu0 %v10267_v7  ;;  %11885 = vst [vmem:[#allocation48_spill] sm:$0xff] %v10478_v4 }
 0xe57   :  { %4473 = vmatpush2.bf16.msra.mxu1 %v10467_v38  ;;  %v10483_v38 = vld [vmem:[#allocation12 + $0x250] ss:$24 sps:$4 sm:$0xff]  }
 0xe58   :  { %4474 = vmatprep.subr.bf16.mxu1 %v10470_v16  ;;  %4574 = vmatpush2.bf16.msra.mxu0 %v10272_v63  ;;  %11886 = vst [vmem:[#allocation50_spill] sm:$0xff] %v10483_v38  ;;  %v10486_v16 = vld [vmem:[#allocation12 + $0x224] ss:$24 sps:$4 sm:$0xff]  }
 0xe59   :  { %4575 = vmatprep.subr.bf16.mxu0 %v10275_v23  ;;  %11887 = vst [vmem:[#allocation52_spill] sm:$0xff] %v10486_v16 }
 0xe5b   :  { %4475 = vmatpush2.bf16.msra.mxu1 %v10475_v27  ;;  %v10491_v27 = vld [vmem:[#allocation12 + $0x220] ss:$24 sps:$4 sm:$0xff]  }
 0xe5c   :  { %4476 = vmatprep.subr.bf16.mxu1 %v10478_v4  ;;  %4576 = vmatpush2.bf16.msra.mxu0 %v10280_v29  ;;  %11888 = vst [vmem:[#allocation54_spill] sm:$0xff] %v10491_v27  ;;  %v10494_v4 = vld [vmem:[#allocation12 + $0x1f4] ss:$24 sps:$4 sm:$0xff]  }
 0xe5d   :  { %4577 = vmatprep.subr.bf16.mxu0 %v10283_v24  ;;  %11889 = vst [vmem:[#allocation56_spill] sm:$0xff] %v10494_v4 }
 0xe5f   :  { %4477 = vmatpush2.bf16.msra.mxu1 %v10483_v38  ;;  %v10499_v38 = vld [vmem:[#allocation12 + $0x1f0] ss:$24 sps:$4 sm:$0xff]  }
 0xe60   :  { %4478 = vmatprep.subr.bf16.mxu1 %v10486_v16  ;;  %4578 = vmatpush2.bf16.msra.mxu0 %v10288_v34  ;;  %11890 = vst [vmem:[#allocation58_spill] sm:$0xff] %v10499_v38  ;;  %v10502_v16 = vld [vmem:[#allocation12 + $0x1c4] ss:$24 sps:$4 sm:$0xff]  }
 0xe61   :  { %4579 = vmatprep.subr.bf16.mxu0 %v10291_v47  ;;  %11891 = vst [vmem:[#allocation68_spill] sm:$0xff] %v10502_v16 }
 0xe63   :  { %4479 = vmatpush2.bf16.msra.mxu1 %v10491_v27  ;;  %v10507_v27 = vld [vmem:[#allocation12 + $0x1c0] ss:$24 sps:$4 sm:$0xff]  }
 0xe64   :  { %4480 = vmatprep.subr.bf16.mxu1 %v10494_v4  ;;  %4580 = vmatpush2.bf16.msra.mxu0 %v10296_v40  ;;  %11892 = vst [vmem:[#allocation70_spill] sm:$0xff] %v10507_v27  ;;  %v10510_v4 = vld [vmem:[#allocation12 + $0x194] ss:$24 sps:$4 sm:$0xff]  }
 0xe65   :  { %4581 = vmatprep.subr.bf16.mxu0 %v10299_v56  ;;  %11893 = vst [vmem:[#allocation72_spill] sm:$0xff] %v10510_v4 }
 0xe67   :  { %4481 = vmatpush2.bf16.msra.mxu1 %v10499_v38  ;;  %v10515_v38 = vld [vmem:[#allocation12 + $0x190] ss:$24 sps:$4 sm:$0xff]  }
 0xe68   :  { %4482 = vmatprep.subr.bf16.mxu1 %v10502_v16  ;;  %4582 = vmatpush2.bf16.msra.mxu0 %v10304_v5  ;;  %11894 = vst [vmem:[#allocation74_spill] sm:$0xff] %v10515_v38 }
 0xe69   :  { %4583 = vmatprep.subr.bf16.mxu0 %v10307_v33 }
 0xe6b   :  { %4483 = vmatpush2.bf16.msra.mxu1 %v10507_v27 }
 0xe6c   :  { %4484 = vmatprep.subr.bf16.mxu1 %v10510_v4  ;;  %4584 = vmatpush2.bf16.msra.mxu0 %v10312_v62 }
 0xe6d   :  { %4585 = vmatprep.subr.bf16.mxu0 %v10315_v12 }
 0xe6f   :  { %4485 = vmatpush2.bf16.msra.mxu1 %v10515_v38  ;;  %v11895_v38 = vld [vmem:[#allocation87_spill] sm:$0xff] }
 0xe70   :  { %4596 = vmatprep.subr.bf16.mxu1 %v10319_v3  ;;  %4586 = vmatpush2.bf16.msra.mxu0 %v10322_v42  ;;  %v11896_v3 = vld [vmem:[#allocation43_spill] sm:$0xff]  ;;  %v10530_v42 = vld [vmem:[#allocation12 + $0x98] ss:$24 sps:$4 sm:$0xff]  }
 0xe71   :  { %4637 = vmatprep.subr.bf16.mxu0 %v10325_v55  ;;  %11897 = vst [vmem:[#allocation76_spill] sm:$0xff] %v10530_v42 }
 0xe72   :  { %4487 = vmatmul.mubr.bf16.vlgmr.msra.gmra.mxu1 %v10391_v9  ;;  %v10533_v9 = vld [vmem:[#allocation12 + $0x6c] ss:$24 sps:$4 sm:$0xff]  }
 0xe73   :  { %4597 = vmatpush1.bf16.msra.mxu1 %v10329_v14  ;;  %11898 = vst [vmem:[#allocation78_spill] sm:$0xff] %v10533_v9 }
 0xe74   :  { %4598 = vmatprep.subr.bf16.mxu1 %v10332_v54  ;;  %v10536_v54 = vld [vmem:[#allocation12 + $0x68] ss:$24 sps:$4 sm:$0xff]  }
 0xe75   :  { %11899 = vst [vmem:[#allocation80_spill] sm:$0xff] %v10536_v54 }
 0xe77   :  { %4599 = vmatpush1.bf16.msra.mxu1 %v10335_v1 }
 0xe78   :  { %4600 = vmatprep.subr.bf16.mxu1 %v10338_v49  ;;  %v10539_v49 = vld [vmem:[#allocation12 + $0x3c] ss:$24 sps:$4 sm:$0xff]  }
 0xe79   :  { %11900 = vst [vmem:[#allocation36_spill] sm:$0xff] %v10539_v49 }
 0xe7b   :  { %4601 = vmatpush1.bf16.msra.mxu1 %v10341_v35 }
 0xe7c   :  { %4602 = vmatprep.subr.bf16.mxu1 %v10344_v43  ;;  %v10542_v43 = vld [vmem:[#allocation12 + $0x38] ss:$24 sps:$4 sm:$0xff]  }
 0xe7d   :  { %11901 = vst [vmem:[#allocation82_spill] sm:$0xff] %v10542_v43 }
 0xe7f   :  { %4603 = vmatpush1.bf16.msra.mxu1 %v11895_v38  ;;  %v4368_v38 = vld [vmem:[#allocation2 + $0x3] ss:$8 sm:$0x7] }
 0xe80   :  { %4604 = vmatprep.subr.bf16.mxu1 %v11896_v3  ;;  %v10545_v3 = vld [vmem:[#allocation12 + $0xc] ss:$24 sps:$4 sm:$0xff]  }
 0xe81   :  { %11902 = vst [vmem:[#allocation38_spill] sm:$0xff] %v10545_v3 }
 0xe83   :  { %4605 = vmatpush1.bf16.msra.mxu1 %v10530_v42  ;;  %v10548_v42 = vld [vmem:[#allocation12 + $0x8] ss:$24 sps:$4 sm:$0xff]  }
 0xe84   :  { %4606 = vmatprep.subr.bf16.mxu1 %v10533_v9  ;;  %11903 = vst [vmem:[#allocation84_spill] sm:$0xff] %v10548_v42  ;;  %v10551_v9 = vld [vmem:[#allocation12 + $0x2dc] ss:$24 sps:$4 sm:$0xff]  }
 0xe85   :  { %11904 = vst [vmem:[#allocation40_spill] sm:$0xff] %v10551_v9 }
 0xe87   :  { %4607 = vmatpush1.bf16.msra.mxu1 %v10536_v54  ;;  %v10554_v54 = vld [vmem:[#allocation12 + $0x2d8] ss:$24 sps:$4 sm:$0xff]  }
 0xe88   :  { %4608 = vmatprep.subr.bf16.mxu1 %v10539_v49  ;;  %11905 = vst [vmem:[#allocation86_spill] sm:$0xff] %v10554_v54  ;;  %v10557_v49 = vld [vmem:[#allocation12 + $0x2ac] ss:$24 sps:$4 sm:$0xff]  }
 0xe89   :  { %11906 = vst [vmem:[#allocation42_spill] sm:$0xff] %v10557_v49 }
 0xe8b   :  { %4609 = vmatpush1.bf16.msra.mxu1 %v10542_v43  ;;  %v10560_v43 = vld [vmem:[#allocation12 + $0x2a8] ss:$24 sps:$4 sm:$0xff]  }
 0xe8c   :  { %4610 = vmatprep.subr.bf16.mxu1 %v10545_v3  ;;  %11907 = vst [vmem:[#allocation60_spill] sm:$0xff] %v10560_v43  ;;  %v10563_v3 = vld [vmem:[#allocation12 + $0x27c] ss:$24 sps:$4 sm:$0xff]  }
 0xe8d   :  { %11908 = vst [vmem:[#allocation88_spill] sm:$0xff] %v10563_v3 }
 0xe8f   :  { %4611 = vmatpush1.bf16.msra.mxu1 %v10548_v42  ;;  %v10566_v42 = vld [vmem:[#allocation12 + $0x278] ss:$24 sps:$4 sm:$0xff]  }
 0xe90   :  { %4612 = vmatprep.subr.bf16.mxu1 %v10551_v9  ;;  %11909 = vst [vmem:[#allocation44_spill] sm:$0xff] %v10566_v42  ;;  %v10569_v9 = vld [vmem:[#allocation12 + $0x24c] ss:$24 sps:$4 sm:$0xff]  }
 0xe91   :  { %11910 = vst [vmem:[#allocation90_spill] sm:$0xff] %v10569_v9 }
 0xe93   :  { %4613 = vmatpush2.bf16.msra.mxu1 %v10554_v54  ;;  %v10572_v54 = vld [vmem:[#allocation12 + $0x248] ss:$24 sps:$4 sm:$0xff]  }
 0xe94   :  { %4614 = vmatprep.subr.bf16.mxu1 %v10557_v49  ;;  %11911 = vst [vmem:[#allocation46_spill] sm:$0xff] %v10572_v54  ;;  %v10575_v49 = vld [vmem:[#allocation12 + $0x21c] ss:$24 sps:$4 sm:$0xff]  }
 0xe95   :  { %11912 = vst [vmem:[#allocation92_spill] sm:$0xff] %v10575_v49 }
 0xe97   :  { %4615 = vmatpush2.bf16.msra.mxu1 %v10560_v43  ;;  %v10578_v43 = vld [vmem:[#allocation12 + $0x218] ss:$24 sps:$4 sm:$0xff]  }
 0xe98   :  { %4616 = vmatprep.subr.bf16.mxu1 %v10563_v3  ;;  %11913 = vst [vmem:[#allocation49_spill] sm:$0xff] %v10578_v43  ;;  %v10581_v3 = vld [vmem:[#allocation12 + $0x1ec] ss:$24 sps:$4 sm:$0xff]  }
 0xe99   :  { %11914 = vst [vmem:[#allocation51_spill] sm:$0xff] %v10581_v3 }
 0xe9b   :  { %4617 = vmatpush2.bf16.msra.mxu1 %v10566_v42  ;;  %v10584_v42 = vld [vmem:[#allocation12 + $0x1e8] ss:$24 sps:$4 sm:$0xff]  }
 0xe9c   :  { %4618 = vmatprep.subr.bf16.mxu1 %v10569_v9  ;;  %11915 = vst [vmem:[#allocation53_spill] sm:$0xff] %v10584_v42  ;;  %v10587_v9 = vld [vmem:[#allocation12 + $0x1bc] ss:$24 sps:$4 sm:$0xff]  }
 0xe9d   :  { %11916 = vst [vmem:[#allocation55_spill] sm:$0xff] %v10587_v9 }
 0xe9f   :  { %4619 = vmatpush2.bf16.msra.mxu1 %v10572_v54  ;;  %v10590_v54 = vld [vmem:[#allocation12 + $0x1b8] ss:$24 sps:$4 sm:$0xff]  }
 0xea0   :  { %4620 = vmatprep.subr.bf16.mxu1 %v10575_v49  ;;  %11917 = vst [vmem:[#allocation57_spill] sm:$0xff] %v10590_v54  ;;  %v10593_v49 = vld [vmem:[#allocation12 + $0x18c] ss:$24 sps:$4 sm:$0xff]  }
 0xea1   :  { %11918 = vst [vmem:[#allocation59_spill] sm:$0xff] %v10593_v49 }
 0xea3   :  { %4621 = vmatpush2.bf16.msra.mxu1 %v10578_v43  ;;  %v10596_v43 = vld [vmem:[#allocation12 + $0x188] ss:$24 sps:$4 sm:$0xff]  }
 0xea4   :  { %4622 = vmatprep.subr.bf16.mxu1 %v10581_v3  ;;  %11919 = vst [vmem:[#allocation93_spill] sm:$0xff] %v10596_v43  ;;  %v11920_v3 = vld [vmem:[#allocation61_spill] sm:$0xff] }
 0xea7   :  { %4623 = vmatpush2.bf16.msra.mxu1 %v10584_v42 }
 0xea8   :  { %4624 = vmatprep.subr.bf16.mxu1 %v10587_v9 }
 0xeab   :  { %4625 = vmatpush2.bf16.msra.mxu1 %v10590_v54  ;;  %v4503_v54 = vrot.slane %v4368_v38, 1 }
 0xeac   :  { %4626 = vmatprep.subr.bf16.mxu1 %v10593_v49 }
 0xeaf   :  { %4627 = vmatpush2.bf16.msra.mxu1 %v10596_v43 }
 0xeb0   :  { %4738 = vmatprep.subr.bf16.mxu1 %v11920_v3 }
 0xef2   :  { %v4406_v42 = vpop.f32.mrf.mxu1  ;;  %v4447_v35 = vpop.f32.mrf.mxu0 }
 0xef3   :  { %v4495_v1 = vadd.f32 %v4406_v42, %v4368_v38  ;;  %v10603_v42 = vld [vmem:[%s10991_s8] sm:$0x1] }
 0xef4   :  { %v4408_v14 = vpop.f32.mrf.mxu1  ;;  %v4449_v9 = vpop.f32.mrf.mxu0  ;;  %11921 = vst [vmem:[#allocation94_spill] sm:$0xff] %v10603_v42 }
 0xef5   :  { %v6268_v55 = vmul.f32 -1.442695, %v4495_v1  ;;  %v4505_v49 = vadd.f32 %v4503_v54, %v4408_v14 }
 0xef6   :  { %v4410_v12 = vpop.f32.mrf.mxu1  ;;  %v4451_v62 = vpop.f32.mrf.mxu0 }
 0xef7   :  { %7209 = vpow2.f32 %v6268_v55  ;;  %v6269_v33 = vmul.f32 -1.442695, %v4505_v49  ;;  %v4512_v12 = vadd.f32 %v10603_v42, %v4447_v35  ;;  %v4514_v55 = vrot.slane %v4368_v38, 2 }
 0xef8   :  { %v4411_v4 = vpop.f32.mrf.mxu1  ;;  %v4452_v27 = vpop.f32.mrf.mxu0 }
 0xef9   :  { %7211 = vpow2.f32 %v6269_v33  ;;  %v4369_v4 = vld [vmem:[#allocation2 + $0x1c] ss:$8 sm:$0x7] }
 0xefa   :  { %v4518_v54 = vadd.f32 %v4449_v9, %v4369_v4 }
 0xefc   :  { %v6270_v33 = vmul.f32 -1.442695, %v4518_v54 }
 0xf04   :  { %v7210_v5 = vpop.eup %7209 }
 0xf05   :  { %v4499_v43 = vadd.f32 1.0, %v7210_v5 }
 0xf06   :  { %v7212_v3 = vpop.eup %7211 }
 0xf07   :  { %7213 = vrcp.f32 %v4499_v43  ;;  %v4509_v16 = vadd.f32 1.0, %v7212_v3 }
 0xf09   :  { %7215 = vrcp.f32 %v4509_v16 }
 0xf14   :  { %v7214_v62 = vpop.eup %7213 }
 0xf15   :  { %v4513_v1 = vmul.f32 %v7214_v62, %v4512_v12  ;;  %v4526_v12 = vrot.slane %v4369_v4, 1 }
 0xf16   :  { %v7216_v5 = vpop.eup %7215 }
 0xf17   :  { %v4516_v14 = vadd.f32 %v4514_v55, %v4513_v1  ;;  %v4541_v49 = vsub.f32 1.0, %v7216_v5  ;;  %v4543_v27 = vmul.f32 %v7216_v5, %v10379_v61  ;;  %v4537_v61 = vrot.slane %v4369_v4, 2 }
 0xf19   :  { %7217 = vtanh.f32 %v4516_v14 }
 0xf1a   :  { %7219 = vpow2.f32 %v6270_v33 }
 0xf26   :  { %v7218_v3 = vpop.eup %7217 }
 0xf27   :  { %v4542_v43 = vmul.f32 %v7218_v3, %v4541_v49  ;;  %v7220_v35 = vpop.eup %7219 }
 0xf28   :  { %v4522_v38 = vadd.f32 1.0, %v7220_v35 }
 0xf29   :  { %v10607_v56 = vadd.f32 %v4543_v27, %v4542_v43 }
 0xf2a   :  { %7221 = vrcp.f32 %v4522_v38 }
 0xf2b   :  { %4549 = vst [vmem:[#allocation4 + $0x3] sm:$0x1] %v10607_v56  ;;  %v10619_v4 = vpack.c.bf16 %v10607_v56, %v10607_v56 }
 0xf32   :  { %v4488_v16 = vpop.f32.mrf.mxu1 }
 0xf33   :  { %v4528_v62 = vadd.f32 %v4526_v12, %v4488_v16 }
 0xf34   :  { %v4490_v9 = vpop.f32.mrf.mxu1 }
 0xf35   :  { %v6271_v55 = vmul.f32 -1.442695, %v4528_v62  ;;  %v4535_v54 = vadd.f32 %v4490_v9, %v10067_v51  ;;  %v11924_v62 = vld [vmem:[#allocation91_spill] sm:$0xff] }
 0xf36   :  { %v4492_v1 = vpop.f32.mrf.mxu1  ;;  %v11925_v9 = vld [vmem:[#allocation47_spill] sm:$0xff] }
 0xf37   :  { %7223 = vpow2.f32 %v6271_v55  ;;  %v7222_v33 = vpop.eup %7221  ;;  %v11926_v55 = vld [vmem:[#allocation48_spill] sm:$0xff]  ;;  %v11927_v1 = vld [vmem:[#allocation50_spill] sm:$0xff] }
 0xf38   :  { %v4493_v14 = vpop.f32.mrf.mxu1  ;;  %v4536_v49 = vmul.f32 %v7222_v33, %v4535_v54  ;;  %v11929_v54 = vld [vmem:[#allocation54_spill] sm:$0xff]  ;;  %v11930_v33 = vld [vmem:[#allocation56_spill] sm:$0xff] }
 0xf39   :  { %v11928_v14 = vld [vmem:[#allocation52_spill] sm:$0xff] }
 0xf3a   :  { %v4539_v43 = vadd.f32 %v4537_v61, %v4536_v49  ;;  %v11931_v49 = vld [vmem:[#allocation66_spill] sm:$0xff] }
 0xf3b   :  { %v11932_v61 = vld [vmem:[#allocation58_spill] sm:$0xff] }
 0xf44   :  { %v7224_v5 = vpop.eup %7223 }
 0xf45   :  { %v4532_v3 = vadd.f32 1.0, %v7224_v5  ;;  %v11933_v5 = vld [vmem:[#allocation68_spill] sm:$0xff] }
 0xf47   :  { %7225 = vrcp.f32 %v4532_v3  ;;  %v11934_v3 = vld [vmem:[#allocation67_spill] sm:$0xff] }
 0xf48   :  { %7227 = vtanh.f32 %v4539_v43  ;;  %v11935_v43 = vld [vmem:[#allocation69_spill] sm:$0xff] }
 0xf54   :  { %v7226_v27 = vpop.eup %7225 }
 0xf55   :  { %v4545_v35 = vsub.f32 1.0, %v7226_v27  ;;  %v7228_v42 = vpop.eup %7227  ;;  %v4547_v12 = vmul.f32 %v7226_v27, %v10384_v39  ;;  %v11922_v39 = vld [vmem:[#allocation89_spill] sm:$0xff]  ;;  %v11936_v27 = vld [vmem:[#allocation70_spill] sm:$0xff] }
 0xf57   :  { %v4546_v38 = vmul.f32 %v7228_v42, %v4545_v35  ;;  %v11923_v42 = vld [vmem:[#allocation45_spill] sm:$0xff]  ;;  %v11937_v35 = vld [vmem:[#allocation72_spill] sm:$0xff] }
 0xf59   :  { %v10612_v16 = vadd.f32 %v4547_v12, %v4546_v38  ;;  %v11938_v38 = vld [vmem:[#allocation71_spill] sm:$0xff]  ;;  %v11939_v12 = vld [vmem:[#allocation73_spill] sm:$0xff] }
 0xf5b   :  { %4550 = vst [vmem:[#allocation4 + $0xc] sm:$0x1] %v10612_v16  ;;  %v4554_v51 = vpack.c.bf16 %v10612_v16, %v10612_v16 }
 0xf5d   :  { %4587 = vmatprep.mubr.bf16.mxu0 %v4554_v51  ;;  %4628 = vmatprep.mubr.bf16.mxu1 %v4554_v51 }
 0xf5e   :  { %4588 = vmatmul.mubr.bf16.vlgmr.msra.gmra.mxu0 %v10619_v4  ;;  %4629 = vmatmul.mubr.bf16.vlgmr.msra.gmra.mxu1 %v10619_v4 }
 0xf5f   :  { %4638 = vmatpush1.bf16.msra.mxu0 %v10395_v53  ;;  %4669 = vmatprep.mubr.bf16.mxu0 %v4554_v51  ;;  %v11940_v51 = vld [vmem:[#allocation74_spill] sm:$0xff] }
 0xf60   :  { %4639 = vmatprep.subr.bf16.mxu0 %v10398_v60  ;;  %4739 = vmatpush1.bf16.msra.mxu1 %v10200_v52 }
 0xf61   :  { %4740 = vmatprep.subr.bf16.mxu1 %v10203_v18 }
 0xf63   :  { %4640 = vmatpush1.bf16.msra.mxu0 %v10403_v0 }
 0xf64   :  { %4641 = vmatprep.subr.bf16.mxu0 %v10406_v30  ;;  %4741 = vmatpush1.bf16.msra.mxu1 %v10208_v46 }
 0xf65   :  { %4742 = vmatprep.subr.bf16.mxu1 %v10211_v41 }
 0xf67   :  { %4642 = vmatpush1.bf16.msra.mxu0 %v10411_v19 }
 0xf68   :  { %4643 = vmatprep.subr.bf16.mxu0 %v10414_v17  ;;  %4743 = vmatpush1.bf16.msra.mxu1 %v10216_v44 }
 0xf69   :  { %4744 = vmatprep.subr.bf16.mxu1 %v10219_v59 }
 0xf6b   :  { %4644 = vmatpush1.bf16.msra.mxu0 %v10419_v28 }
 0xf6c   :  { %4645 = vmatprep.subr.bf16.mxu0 %v10422_v25  ;;  %4745 = vmatpush1.bf16.msra.mxu1 %v10224_v22 }
 0xf6d   :  { %4746 = vmatprep.subr.bf16.mxu1 %v10227_v6 }
 0xf6f   :  { %4646 = vmatpush1.bf16.msra.mxu0 %v10427_v26 }
 0xf70   :  { %4647 = vmatprep.subr.bf16.mxu0 %v10430_v10  ;;  %4747 = vmatpush1.bf16.msra.mxu1 %v10232_v21 }
 0xf71   :  { %4748 = vmatprep.subr.bf16.mxu1 %v10235_v36 }
 0xf73   :  { %4648 = vmatpush1.bf16.msra.mxu0 %v10435_v13 }
 0xf74   :  { %4649 = vmatprep.subr.bf16.mxu0 %v10438_v20  ;;  %4749 = vmatpush1.bf16.msra.mxu1 %v10240_v45 }
 0xf75   :  { %4750 = vmatprep.subr.bf16.mxu1 %v10243_v50 }
 0xf77   :  { %4650 = vmatpush1.bf16.msra.mxu0 %v10443_v8 }
 0xf78   :  { %4651 = vmatprep.subr.bf16.mxu0 %v10446_v37  ;;  %4751 = vmatpush1.bf16.msra.mxu1 %v10248_v15 }
 0xf79   :  { %4752 = vmatprep.subr.bf16.mxu1 %v10251_v32 }
 0xf7b   :  { %4652 = vmatpush1.bf16.msra.mxu0 %v10451_v2 }
 0xf7c   :  { %4653 = vmatprep.subr.bf16.mxu0 %v10454_v58  ;;  %4753 = vmatpush1.bf16.msra.mxu1 %v10256_v31 }
 0xf7d   :  { %4754 = vmatprep.subr.bf16.mxu1 %v10259_v48 }
 0xf7f   :  { %4654 = vmatpush2.bf16.msra.mxu0 %v10459_v57 }
 0xf80   :  { %4655 = vmatprep.subr.bf16.mxu0 %v11922_v39  ;;  %4755 = vmatpush2.bf16.msra.mxu1 %v10264_v11 }
 0xf81   :  { %4756 = vmatprep.subr.bf16.mxu1 %v10267_v7 }
 0xf83   :  { %4656 = vmatpush2.bf16.msra.mxu0 %v11923_v42 }
 0xf84   :  { %4657 = vmatprep.subr.bf16.mxu0 %v11924_v62  ;;  %4757 = vmatpush2.bf16.msra.mxu1 %v10272_v63 }
 0xf85   :  { %4758 = vmatprep.subr.bf16.mxu1 %v10275_v23 }
 0xf87   :  { %4658 = vmatpush2.bf16.msra.mxu0 %v11925_v9 }
 0xf88   :  { %4659 = vmatprep.subr.bf16.mxu0 %v11926_v55  ;;  %4759 = vmatpush2.bf16.msra.mxu1 %v10280_v29 }
 0xf89   :  { %4760 = vmatprep.subr.bf16.mxu1 %v10283_v24  ;;  %v11976_v24 = vld [vmem:[#allocation94_spill] sm:$0xff] }
 0xf8b   :  { %4660 = vmatpush2.bf16.msra.mxu0 %v11927_v1 }
 0xf8c   :  { %4661 = vmatprep.subr.bf16.mxu0 %v11928_v14  ;;  %4761 = vmatpush2.bf16.msra.mxu1 %v10288_v34 }
 0xf8d   :  { %4762 = vmatprep.subr.bf16.mxu1 %v10291_v47 }
 0xf8f   :  { %4662 = vmatpush2.bf16.msra.mxu0 %v11929_v54 }
 0xf90   :  { %4663 = vmatprep.subr.bf16.mxu0 %v11930_v33  ;;  %4763 = vmatpush2.bf16.msra.mxu1 %v10296_v40  ;;  %v11941_v40 = vld [vmem:[#allocation75_spill] sm:$0xff] }
 0xf91   :  { %4764 = vmatprep.subr.bf16.mxu1 %v11931_v49  ;;  %v11942_v49 = vld [vmem:[#allocation77_spill] sm:$0xff] }
 0xf93   :  { %4664 = vmatpush2.bf16.msra.mxu0 %v11932_v61  ;;  %v11943_v61 = vld [vmem:[#allocation79_spill] sm:$0xff] }
 0xf94   :  { %4665 = vmatprep.subr.bf16.mxu0 %v11933_v5  ;;  %4765 = vmatpush2.bf16.msra.mxu1 %v11934_v3  ;;  %v11944_v3 = vld [vmem:[#allocation81_spill] sm:$0xff] }
 0xf95   :  { %4766 = vmatprep.subr.bf16.mxu1 %v11935_v43  ;;  %v11945_v43 = vld [vmem:[#allocation37_spill] sm:$0xff] }
 0xf97   :  { %4666 = vmatpush2.bf16.msra.mxu0 %v11936_v27  ;;  %v11946_v27 = vld [vmem:[#allocation83_spill] sm:$0xff] }
 0xf98   :  { %4667 = vmatprep.subr.bf16.mxu0 %v11937_v35  ;;  %4767 = vmatpush2.bf16.msra.mxu1 %v11938_v38  ;;  %v11947_v35 = vld [vmem:[#allocation39_spill] sm:$0xff]  ;;  %v11948_v38 = vld [vmem:[#allocation85_spill] sm:$0xff] }
 0xf99   :  { %4768 = vmatprep.subr.bf16.mxu1 %v11939_v12  ;;  %v11949_v12 = vld [vmem:[#allocation41_spill] sm:$0xff] }
 0xf9b   :  { %4668 = vmatpush2.bf16.msra.mxu0 %v11940_v51  ;;  %v11950_v51 = vld [vmem:[#allocation87_spill] sm:$0xff] }
 0xf9c   :  { %4779 = vmatprep.subr.bf16.mxu0 %v11941_v40  ;;  %4769 = vmatpush2.bf16.msra.mxu1 %v11942_v49  ;;  %v11951_v40 = vld [vmem:[#allocation43_spill] sm:$0xff]  ;;  %v11952_v49 = vld [vmem:[#allocation76_spill] sm:$0xff] }
 0xf9d   :  { %4820 = vmatprep.subr.bf16.mxu1 %v11943_v61  ;;  %v11953_v61 = vld [vmem:[#allocation78_spill] sm:$0xff] }
 0xf9e   :  { %4670 = vmatmul.mubr.bf16.vlgmr.msra.gmra.mxu0 %v10619_v4  ;;  %v11954_v4 = vld [vmem:[#allocation80_spill] sm:$0xff] }
 0xf9f   :  { %4780 = vmatpush1.bf16.msra.mxu0 %v11944_v3  ;;  %v11955_v3 = vld [vmem:[#allocation36_spill] sm:$0xff] }
 0xfa0   :  { %4781 = vmatprep.subr.bf16.mxu0 %v11945_v43  ;;  %v11956_v43 = vld [vmem:[#allocation82_spill] sm:$0xff] }
 0xfa3   :  { %4782 = vmatpush1.bf16.msra.mxu0 %v11946_v27  ;;  %v11957_v27 = vld [vmem:[#allocation38_spill] sm:$0xff] }
 0xfa4   :  { %4783 = vmatprep.subr.bf16.mxu0 %v11947_v35  ;;  %v11958_v35 = vld [vmem:[#allocation84_spill] sm:$0xff] }
 0xfa7   :  { %4784 = vmatpush1.bf16.msra.mxu0 %v11948_v38  ;;  %v11959_v38 = vld [vmem:[#allocation40_spill] sm:$0xff] }
 0xfa8   :  { %4785 = vmatprep.subr.bf16.mxu0 %v11949_v12  ;;  %v11960_v12 = vld [vmem:[#allocation86_spill] sm:$0xff] }
 0xfab   :  { %4786 = vmatpush1.bf16.msra.mxu0 %v11950_v51  ;;  %v11961_v51 = vld [vmem:[#allocation42_spill] sm:$0xff] }
 0xfac   :  { %4787 = vmatprep.subr.bf16.mxu0 %v11951_v40  ;;  %v11962_v40 = vld [vmem:[#allocation60_spill] sm:$0xff] }
 0xfaf   :  { %4788 = vmatpush1.bf16.msra.mxu0 %v11952_v49  ;;  %v11963_v49 = vld [vmem:[#allocation88_spill] sm:$0xff] }
 0xfb0   :  { %4789 = vmatprep.subr.bf16.mxu0 %v11953_v61  ;;  %v11964_v61 = vld [vmem:[#allocation44_spill] sm:$0xff] }
 0xfb3   :  { %4790 = vmatpush1.bf16.msra.mxu0 %v11954_v4  ;;  %v11965_v4 = vld [vmem:[#allocation90_spill] sm:$0xff] }
 0xfb4   :  { %4791 = vmatprep.subr.bf16.mxu0 %v11955_v3  ;;  %v11966_v3 = vld [vmem:[#allocation46_spill] sm:$0xff] }
 0xfb7   :  { %4792 = vmatpush1.bf16.msra.mxu0 %v11956_v43  ;;  %v11967_v43 = vld [vmem:[#allocation92_spill] sm:$0xff] }
 0xfb8   :  { %4793 = vmatprep.subr.bf16.mxu0 %v11957_v27  ;;  %v11968_v27 = vld [vmem:[#allocation49_spill] sm:$0xff] }
 0xfbb   :  { %4794 = vmatpush1.bf16.msra.mxu0 %v11958_v35  ;;  %v11969_v35 = vld [vmem:[#allocation51_spill] sm:$0xff] }
 0xfbc   :  { %4795 = vmatprep.subr.bf16.mxu0 %v11959_v38  ;;  %v11970_v38 = vld [vmem:[#allocation53_spill] sm:$0xff] }
 0xfbf   :  { %4796 = vmatpush2.bf16.msra.mxu0 %v11960_v12  ;;  %v11971_v12 = vld [vmem:[#allocation55_spill] sm:$0xff] }
 0xfc0   :  { %4797 = vmatprep.subr.bf16.mxu0 %v11961_v51  ;;  %v11972_v51 = vld [vmem:[#allocation57_spill] sm:$0xff] }
 0xfc3   :  { %4798 = vmatpush2.bf16.msra.mxu0 %v11962_v40  ;;  %v11973_v40 = vld [vmem:[#allocation59_spill] sm:$0xff] }
 0xfc4   :  { %4799 = vmatprep.subr.bf16.mxu0 %v11963_v49  ;;  %v11974_v49 = vld [vmem:[#allocation93_spill] sm:$0xff] }
 0xfc7   :  { %4800 = vmatpush2.bf16.msra.mxu0 %v11964_v61  ;;  %v11975_v61 = vld [vmem:[#allocation61_spill] sm:$0xff] }
 0xfc8   :  { %4801 = vmatprep.subr.bf16.mxu0 %v11965_v4  ;;  %v4551_v4 = vld [vmem:[#allocation2 + $0x4] ss:$8 sm:$0x7] }
 0xfc9   :  { %v4697_v55 = vrot.slane %v4551_v4, 2 }
 0xfcb   :  { %4802 = vmatpush2.bf16.msra.mxu0 %v11966_v3 }
 0xfcc   :  { %4803 = vmatprep.subr.bf16.mxu0 %v11967_v43 }
 0xfcf   :  { %4804 = vmatpush2.bf16.msra.mxu0 %v11968_v27 }
 0xfd0   :  { %4805 = vmatprep.subr.bf16.mxu0 %v11969_v35 }
 0xfd3   :  { %4806 = vmatpush2.bf16.msra.mxu0 %v11970_v38  ;;  %v4686_v38 = vrot.slane %v4551_v4, 1 }
 0xfd4   :  { %4807 = vmatprep.subr.bf16.mxu0 %v11971_v12 }
 0xfd7   :  { %4808 = vmatpush2.bf16.msra.mxu0 %v11972_v51 }
 0xfd8   :  { %4809 = vmatprep.subr.bf16.mxu0 %v11973_v40 }
 0xfdb   :  { %4810 = vmatpush2.bf16.msra.mxu0 %v11974_v49 }
 0xfdc   :  { %4921 = vmatprep.subr.bf16.mxu0 %v11975_v61 }
0x101e   :  { %v4589_v3 = vpop.f32.mrf.mxu0  ;;  %v4630_v5 = vpop.f32.mrf.mxu1 }
0x101f   :  { %v4678_v43 = vadd.f32 %v4589_v3, %v4551_v4  ;;  %v4695_v29 = vadd.f32 %v11976_v24, %v4630_v5 }
0x1020   :  { %v4591_v33 = vpop.f32.mrf.mxu0  ;;  %v4632_v27 = vpop.f32.mrf.mxu1 }
0x1021   :  { %v6272_v54 = vmul.f32 -1.442695, %v4678_v43  ;;  %v4688_v51 = vadd.f32 %v4686_v38, %v4591_v33  ;;  %v4552_v43 = vld [vmem:[#allocation2 + $0x1b] ss:$8 sm:$0x7] }
0x1022   :  { %v4593_v35 = vpop.f32.mrf.mxu0  ;;  %v4634_v47 = vpop.f32.mrf.mxu1 }
0x1023   :  { %7229 = vpow2.f32 %v6272_v54  ;;  %v6273_v14 = vmul.f32 -1.442695, %v4688_v51  ;;  %v4701_v54 = vadd.f32 %v4632_v27, %v4552_v43 }
0x1024   :  { %v4594_v12 = vpop.f32.mrf.mxu0  ;;  %v4635_v34 = vpop.f32.mrf.mxu1 }
0x1025   :  { %7231 = vpow2.f32 %v6273_v14  ;;  %v6274_v35 = vmul.f32 -1.442695, %v4701_v54  ;;  %v4720_v54 = vrot.slane %v4552_v43, 2 }
0x1030   :  { %v7230_v40 = vpop.eup %7229 }
0x1031   :  { %v4682_v49 = vadd.f32 1.0, %v7230_v40 }
0x1032   :  { %v7232_v61 = vpop.eup %7231 }
0x1033   :  { %7233 = vrcp.f32 %v4682_v49  ;;  %v4692_v1 = vadd.f32 1.0, %v7232_v61  ;;  %v10728_v61 = vld [vmem:[%s10991_s8 + $0x1] sm:$0x1] }
0x1035   :  { %7235 = vrcp.f32 %v4692_v1 }
0x1040   :  { %v7234_v3 = vpop.eup %7233 }
0x1041   :  { %v4696_v9 = vmul.f32 %v7234_v3, %v4695_v29  ;;  %v4709_v29 = vrot.slane %v4552_v43, 1 }
0x1042   :  { %v7236_v34 = vpop.eup %7235 }
0x1043   :  { %v4699_v47 = vadd.f32 %v4697_v55, %v4696_v9  ;;  %v4724_v33 = vsub.f32 1.0, %v7236_v34  ;;  %v4726_v40 = vmul.f32 %v7236_v34, %v10607_v56 }
0x1045   :  { %7237 = vtanh.f32 %v4699_v47 }
0x1046   :  { %7239 = vpow2.f32 %v6274_v35 }
0x1052   :  { %v7238_v14 = vpop.eup %7237 }
0x1053   :  { %v4725_v38 = vmul.f32 %v7238_v14, %v4724_v33  ;;  %v7240_v5 = vpop.eup %7239 }
0x1054   :  { %v4705_v12 = vadd.f32 1.0, %v7240_v5 }
0x1055   :  { %v10722_v49 = vadd.f32 %v4726_v40, %v4725_v38 }
0x1056   :  { %7241 = vrcp.f32 %v4705_v12 }
0x1057   :  { %4732 = vst [vmem:[#allocation4 + $0x4] sm:$0x1] %v10722_v49  ;;  %v10739_v43 = vpack.c.bf16 %v10722_v49, %v10722_v49 }
0x105e   :  { %v4671_v1 = vpop.f32.mrf.mxu0 }
0x105f   :  { %v4711_v9 = vadd.f32 %v4709_v29, %v4671_v1 }
0x1060   :  { %v4673_v55 = vpop.f32.mrf.mxu0 }
0x1061   :  { %v6275_v27 = vmul.f32 -1.442695, %v4711_v9  ;;  %v4718_v56 = vadd.f32 %v10728_v61, %v4673_v55  ;;  %v11998_v9 = vld [vmem:[#allocation75_spill] sm:$0xff]  ;;  %v11999_v55 = vld [vmem:[#allocation77_spill] sm:$0xff] }
0x1062   :  { %v4675_v51 = vpop.f32.mrf.mxu0 }
0x1063   :  { %7243 = vpow2.f32 %v6275_v27  ;;  %v7242_v3 = vpop.eup %7241  ;;  %v12000_v27 = vld [vmem:[#allocation79_spill] sm:$0xff]  ;;  %v12001_v51 = vld [vmem:[#allocation81_spill] sm:$0xff] }
0x1064   :  { %v4676_v4 = vpop.f32.mrf.mxu0  ;;  %v4719_v47 = vmul.f32 %v7242_v3, %v4718_v56  ;;  %v12003_v56 = vld [vmem:[#allocation83_spill] sm:$0xff] }
0x1065   :  { %v12002_v4 = vld [vmem:[#allocation37_spill] sm:$0xff]  ;;  %v12004_v3 = vld [vmem:[#allocation39_spill] sm:$0xff] }
0x1066   :  { %v4722_v33 = vadd.f32 %v4720_v54, %v4719_v47  ;;  %v12005_v47 = vld [vmem:[#allocation85_spill] sm:$0xff] }
0x1067   :  { %v12006_v54 = vld [vmem:[#allocation41_spill] sm:$0xff] }
0x1070   :  { %v7244_v35 = vpop.eup %7243 }
0x1071   :  { %v4715_v34 = vadd.f32 1.0, %v7244_v35  ;;  %v12007_v35 = vld [vmem:[#allocation87_spill] sm:$0xff] }
0x1073   :  { %7245 = vrcp.f32 %v4715_v34  ;;  %v12008_v34 = vld [vmem:[#allocation43_spill] sm:$0xff] }
0x1074   :  { %7247 = vtanh.f32 %v4722_v33  ;;  %v12009_v33 = vld [vmem:[#allocation76_spill] sm:$0xff] }
0x1080   :  { %v7246_v14 = vpop.eup %7245 }
0x1081   :  { %v4728_v38 = vsub.f32 1.0, %v7246_v14  ;;  %v7248_v40 = vpop.eup %7247  ;;  %v4730_v12 = vmul.f32 %v7246_v14, %v10612_v16  ;;  %v11997_v16 = vld [vmem:[#allocation74_spill] sm:$0xff] }
0x1082   :  { %v12010_v14 = vld [vmem:[#allocation78_spill] sm:$0xff] }
0x1083   :  { %v4729_v5 = vmul.f32 %v7248_v40, %v4728_v38  ;;  %v12011_v38 = vld [vmem:[#allocation80_spill] sm:$0xff] }
0x1084   :  { %v12012_v40 = vld [vmem:[#allocation36_spill] sm:$0xff] }
0x1085   :  { %v10732_v29 = vadd.f32 %v4730_v12, %v4729_v5  ;;  %v12013_v5 = vld [vmem:[#allocation82_spill] sm:$0xff] }
0x1086   :  { %v12014_v12 = vld [vmem:[#allocation38_spill] sm:$0xff] }
0x1087   :  { %4733 = vst [vmem:[#allocation4 + $0xb] sm:$0x1] %v10732_v29  ;;  %v4737_v1 = vpack.c.bf16 %v10732_v29, %v10732_v29 }
0x1089   :  { %4770 = vmatprep.mubr.bf16.mxu1 %v4737_v1  ;;  %4811 = vmatprep.mubr.bf16.mxu0 %v4737_v1 }
0x108a   :  { %4771 = vmatmul.mubr.bf16.vlgmr.msra.gmra.mxu1 %v10739_v43  ;;  %4812 = vmatmul.mubr.bf16.vlgmr.msra.gmra.mxu0 %v10739_v43 }
0x108b   :  { %4821 = vmatpush1.bf16.msra.mxu1 %v10395_v53  ;;  %4852 = vmatprep.mubr.bf16.mxu1 %v4737_v1  ;;  %v12015_v1 = vld [vmem:[#allocation84_spill] sm:$0xff] }
0x108c   :  { %4822 = vmatprep.subr.bf16.mxu1 %v10398_v60  ;;  %4922 = vmatpush1.bf16.msra.mxu0 %v10200_v52  ;;  %v11977_v52 = vld [vmem:[#allocation47_spill] sm:$0xff] }
0x108d   :  { %4923 = vmatprep.subr.bf16.mxu0 %v10203_v18  ;;  %v11978_v18 = vld [vmem:[#allocation48_spill] sm:$0xff] }
0x108f   :  { %4823 = vmatpush1.bf16.msra.mxu1 %v10403_v0 }
0x1090   :  { %4824 = vmatprep.subr.bf16.mxu1 %v10406_v30  ;;  %4924 = vmatpush1.bf16.msra.mxu0 %v10208_v46  ;;  %v11979_v46 = vld [vmem:[#allocation62_spill] sm:$0xff] }
0x1091   :  { %4925 = vmatprep.subr.bf16.mxu0 %v10211_v41  ;;  %v11980_v41 = vld [vmem:[#allocation63_spill] sm:$0xff] }
0x1093   :  { %4825 = vmatpush1.bf16.msra.mxu1 %v10411_v19 }
0x1094   :  { %4826 = vmatprep.subr.bf16.mxu1 %v10414_v17  ;;  %4926 = vmatpush1.bf16.msra.mxu0 %v10216_v44  ;;  %v11981_v44 = vld [vmem:[#allocation50_spill] sm:$0xff] }
0x1095   :  { %4927 = vmatprep.subr.bf16.mxu0 %v10219_v59  ;;  %v11982_v59 = vld [vmem:[#allocation52_spill] sm:$0xff] }
0x1097   :  { %4827 = vmatpush1.bf16.msra.mxu1 %v10419_v28 }
0x1098   :  { %4828 = vmatprep.subr.bf16.mxu1 %v10422_v25  ;;  %4928 = vmatpush1.bf16.msra.mxu0 %v10224_v22  ;;  %v11983_v22 = vld [vmem:[#allocation35_spill] sm:$0xff] }
0x1099   :  { %4929 = vmatprep.subr.bf16.mxu0 %v10227_v6  ;;  %v11984_v6 = vld [vmem:[#allocation64_spill] sm:$0xff] }
0x109b   :  { %4829 = vmatpush1.bf16.msra.mxu1 %v10427_v26 }
0x109c   :  { %4830 = vmatprep.subr.bf16.mxu1 %v10430_v10  ;;  %4930 = vmatpush1.bf16.msra.mxu0 %v10232_v21  ;;  %v11985_v21 = vld [vmem:[#allocation54_spill] sm:$0xff] }
0x109d   :  { %4931 = vmatprep.subr.bf16.mxu0 %v10235_v36  ;;  %v11986_v36 = vld [vmem:[#allocation56_spill] sm:$0xff] }
0x109f   :  { %4831 = vmatpush1.bf16.msra.mxu1 %v10435_v13 }
0x10a0   :  { %4832 = vmatprep.subr.bf16.mxu1 %v10438_v20  ;;  %4932 = vmatpush1.bf16.msra.mxu0 %v10240_v45  ;;  %v11987_v45 = vld [vmem:[#allocation65_spill] sm:$0xff] }
0x10a1   :  { %4933 = vmatprep.subr.bf16.mxu0 %v10243_v50  ;;  %v11988_v50 = vld [vmem:[#allocation66_spill] sm:$0xff] }
0x10a3   :  { %4833 = vmatpush1.bf16.msra.mxu1 %v10443_v8 }
0x10a4   :  { %4834 = vmatprep.subr.bf16.mxu1 %v10446_v37  ;;  %4934 = vmatpush1.bf16.msra.mxu0 %v10248_v15  ;;  %v11989_v15 = vld [vmem:[#allocation58_spill] sm:$0xff] }
0x10a5   :  { %4935 = vmatprep.subr.bf16.mxu0 %v10251_v32  ;;  %v11990_v32 = vld [vmem:[#allocation68_spill] sm:$0xff] }
0x10a7   :  { %4835 = vmatpush1.bf16.msra.mxu1 %v10451_v2 }
0x10a8   :  { %4836 = vmatprep.subr.bf16.mxu1 %v10454_v58  ;;  %4936 = vmatpush1.bf16.msra.mxu0 %v10256_v31  ;;  %v11991_v31 = vld [vmem:[#allocation67_spill] sm:$0xff] }
0x10a9   :  { %4937 = vmatprep.subr.bf16.mxu0 %v10259_v48  ;;  %v11992_v48 = vld [vmem:[#allocation69_spill] sm:$0xff] }
0x10ab   :  { %4837 = vmatpush2.bf16.msra.mxu1 %v10459_v57 }
0x10ac   :  { %4838 = vmatprep.subr.bf16.mxu1 %v11922_v39  ;;  %4938 = vmatpush2.bf16.msra.mxu0 %v10264_v11  ;;  %v11993_v11 = vld [vmem:[#allocation70_spill] sm:$0xff] }
0x10ad   :  { %4939 = vmatprep.subr.bf16.mxu0 %v10267_v7  ;;  %v11994_v7 = vld [vmem:[#allocation72_spill] sm:$0xff] }
0x10af   :  { %4839 = vmatpush2.bf16.msra.mxu1 %v11923_v42 }
0x10b0   :  { %4840 = vmatprep.subr.bf16.mxu1 %v11924_v62  ;;  %4940 = vmatpush2.bf16.msra.mxu0 %v10272_v63  ;;  %v11995_v63 = vld [vmem:[#allocation71_spill] sm:$0xff] }
0x10b1   :  { %4941 = vmatprep.subr.bf16.mxu0 %v10275_v23  ;;  %v11996_v23 = vld [vmem:[#allocation73_spill] sm:$0xff] }
0x10b3   :  { %4841 = vmatpush2.bf16.msra.mxu1 %v11977_v52 }
0x10b4   :  { %4842 = vmatprep.subr.bf16.mxu1 %v11978_v18  ;;  %4942 = vmatpush2.bf16.msra.mxu0 %v11979_v46  ;;  %v12017_v46 = vld [vmem:[#allocation86_spill] sm:$0xff] }
0x10b5   :  { %4943 = vmatprep.subr.bf16.mxu0 %v11980_v41  ;;  %v12018_v41 = vld [vmem:[#allocation42_spill] sm:$0xff] }
0x10b7   :  { %4843 = vmatpush2.bf16.msra.mxu1 %v11981_v44 }
0x10b8   :  { %4844 = vmatprep.subr.bf16.mxu1 %v11982_v59  ;;  %4944 = vmatpush2.bf16.msra.mxu0 %v11983_v22  ;;  %v12019_v22 = vld [vmem:[#allocation60_spill] sm:$0xff] }
0x10b9   :  { %4945 = vmatprep.subr.bf16.mxu0 %v11984_v6  ;;  %v12020_v6 = vld [vmem:[#allocation88_spill] sm:$0xff] }
0x10bb   :  { %4845 = vmatpush2.bf16.msra.mxu1 %v11985_v21 }
0x10bc   :  { %4846 = vmatprep.subr.bf16.mxu1 %v11986_v36  ;;  %4946 = vmatpush2.bf16.msra.mxu0 %v11987_v45  ;;  %v12021_v45 = vld [vmem:[#allocation44_spill] sm:$0xff] }
0x10bd   :  { %4947 = vmatprep.subr.bf16.mxu0 %v11988_v50  ;;  %v12022_v50 = vld [vmem:[#allocation90_spill] sm:$0xff] }
0x10bf   :  { %4847 = vmatpush2.bf16.msra.mxu1 %v11989_v15 }
0x10c0   :  { %4848 = vmatprep.subr.bf16.mxu1 %v11990_v32  ;;  %4948 = vmatpush2.bf16.msra.mxu0 %v11991_v31  ;;  %v12023_v31 = vld [vmem:[#allocation46_spill] sm:$0xff] }
0x10c1   :  { %4949 = vmatprep.subr.bf16.mxu0 %v11992_v48  ;;  %v12024_v48 = vld [vmem:[#allocation92_spill] sm:$0xff] }
0x10c3   :  { %4849 = vmatpush2.bf16.msra.mxu1 %v11993_v11 }
0x10c4   :  { %4850 = vmatprep.subr.bf16.mxu1 %v11994_v7  ;;  %4950 = vmatpush2.bf16.msra.mxu0 %v11995_v63  ;;  %v12025_v63 = vld [vmem:[#allocation49_spill] sm:$0xff] }
0x10c5   :  { %4951 = vmatprep.subr.bf16.mxu0 %v11996_v23  ;;  %v12026_v23 = vld [vmem:[#allocation51_spill] sm:$0xff] }
0x10c7   :  { %4851 = vmatpush2.bf16.msra.mxu1 %v11997_v16 }
0x10c8   :  { %4962 = vmatprep.subr.bf16.mxu1 %v11998_v9  ;;  %4952 = vmatpush2.bf16.msra.mxu0 %v11999_v55  ;;  %v12027_v9 = vld [vmem:[#allocation53_spill] sm:$0xff]  ;;  %v12028_v55 = vld [vmem:[#allocation55_spill] sm:$0xff] }
0x10c9   :  { %5003 = vmatprep.subr.bf16.mxu0 %v12000_v27  ;;  %v12029_v27 = vld [vmem:[#allocation57_spill] sm:$0xff] }
0x10ca   :  { %4853 = vmatmul.mubr.bf16.vlgmr.msra.gmra.mxu1 %v10739_v43  ;;  %v12016_v43 = vld [vmem:[#allocation40_spill] sm:$0xff] }
0x10cb   :  { %4963 = vmatpush1.bf16.msra.mxu1 %v12001_v51  ;;  %v12030_v51 = vld [vmem:[#allocation59_spill] sm:$0xff] }
0x10cc   :  { %4964 = vmatprep.subr.bf16.mxu1 %v12002_v4  ;;  %v12031_v4 = vld [vmem:[#allocation93_spill] sm:$0xff] }
0x10cf   :  { %4965 = vmatpush1.bf16.msra.mxu1 %v12003_v56  ;;  %v7603_v56 = vld [vmem:[#allocation12 + $0x154] ss:$24 sps:$4 sm:$0xff]  }
0x10d0   :  { %4966 = vmatprep.subr.bf16.mxu1 %v12004_v3  ;;  %v4734_v3 = vld [vmem:[#allocation2 + $0x5] ss:$8 sm:$0x7] }
0x10d3   :  { %4967 = vmatpush1.bf16.msra.mxu1 %v12005_v47 }
0x10d4   :  { %4968 = vmatprep.subr.bf16.mxu1 %v12006_v54 }
0x10d7   :  { %4969 = vmatpush1.bf16.msra.mxu1 %v12007_v35 }
0x10d8   :  { %4970 = vmatprep.subr.bf16.mxu1 %v12008_v34 }
0x10db   :  { %4971 = vmatpush1.bf16.msra.mxu1 %v12009_v33 }
0x10dc   :  { %4972 = vmatprep.subr.bf16.mxu1 %v12010_v14 }
0x10df   :  { %4973 = vmatpush1.bf16.msra.mxu1 %v12011_v38 }
0x10e0   :  { %4974 = vmatprep.subr.bf16.mxu1 %v12012_v40 }
0x10e3   :  { %4975 = vmatpush1.bf16.msra.mxu1 %v12013_v5 }
0x10e4   :  { %4976 = vmatprep.subr.bf16.mxu1 %v12014_v12 }
0x10e7   :  { %4977 = vmatpush1.bf16.msra.mxu1 %v12015_v1 }
0x10e8   :  { %4978 = vmatprep.subr.bf16.mxu1 %v12016_v43 }
0x10eb   :  { %4979 = vmatpush2.bf16.msra.mxu1 %v12017_v46 }
0x10ec   :  { %4980 = vmatprep.subr.bf16.mxu1 %v12018_v41  ;;  %v4880_v41 = vrot.slane %v4734_v3, 2 }
0x10ef   :  { %4981 = vmatpush2.bf16.msra.mxu1 %v12019_v22 }
0x10f0   :  { %4982 = vmatprep.subr.bf16.mxu1 %v12020_v6 }
0x10f3   :  { %4983 = vmatpush2.bf16.msra.mxu1 %v12021_v45 }
0x10f4   :  { %4984 = vmatprep.subr.bf16.mxu1 %v12022_v50 }
0x10f7   :  { %4985 = vmatpush2.bf16.msra.mxu1 %v12023_v31 }
0x10f8   :  { %4986 = vmatprep.subr.bf16.mxu1 %v12024_v48 }
0x10fb   :  { %4987 = vmatpush2.bf16.msra.mxu1 %v12025_v63 }
0x10fc   :  { %4988 = vmatprep.subr.bf16.mxu1 %v12026_v23 }
0x10ff   :  { %4989 = vmatpush2.bf16.msra.mxu1 %v12027_v9  ;;  %v4869_v9 = vrot.slane %v4734_v3, 1 }
0x1100   :  { %4990 = vmatprep.subr.bf16.mxu1 %v12028_v55 }
0x1103   :  { %4991 = vmatpush2.bf16.msra.mxu1 %v12029_v27 }
0x1104   :  { %4992 = vmatprep.subr.bf16.mxu1 %v12030_v51 }
0x1107   :  { %4993 = vmatpush2.bf16.msra.mxu1 %v12031_v4 }
0x1108   :  { %5104 = vmatprep.subr.bf16.mxu1 %v7603_v56 }
0x114a   :  { %v4772_v47 = vpop.f32.mrf.mxu1  ;;  %v4813_v54 = vpop.f32.mrf.mxu0 }
0x114b   :  { %v4861_v35 = vadd.f32 %v4772_v47, %v4734_v3  ;;  %v4878_v22 = vadd.f32 %v11976_v24, %v4813_v54 }
0x114c   :  { %v4774_v34 = vpop.f32.mrf.mxu1  ;;  %v4815_v63 = vpop.f32.mrf.mxu0 }
0x114d   :  { %v6276_v48 = vmul.f32 -1.442695, %v4861_v35  ;;  %v4871_v27 = vadd.f32 %v4869_v9, %v4774_v34 }
0x114e   :  { %v4776_v23 = vpop.f32.mrf.mxu1  ;;  %v4817_v31 = vpop.f32.mrf.mxu0 }
0x114f   :  { %7249 = vpow2.f32 %v6276_v48  ;;  %v6277_v45 = vmul.f32 -1.442695, %v4871_v27  ;;  %v4735_v23 = vld [vmem:[#allocation2 + $0x1a] ss:$8 sm:$0x7] }
0x1150   :  { %v4777_v55 = vpop.f32.mrf.mxu1  ;;  %v4818_v50 = vpop.f32.mrf.mxu0  ;;  %v4884_v48 = vadd.f32 %v4815_v63, %v4735_v23 }
0x1151   :  { %7251 = vpow2.f32 %v6277_v45 }
0x1152   :  { %v6278_v55 = vmul.f32 -1.442695, %v4884_v48 }
0x115c   :  { %v7250_v51 = vpop.eup %7249 }
0x115d   :  { %v4865_v4 = vadd.f32 1.0, %v7250_v51 }
0x115e   :  { %v7252_v56 = vpop.eup %7251 }
0x115f   :  { %7253 = vrcp.f32 %v4865_v4  ;;  %v4875_v6 = vadd.f32 1.0, %v7252_v56 }
0x1161   :  { %7255 = vrcp.f32 %v4875_v6 }
0x116c   :  { %v7254_v47 = vpop.eup %7253 }
0x116d   :  { %v4879_v46 = vmul.f32 %v7254_v47, %v4878_v22  ;;  %v4892_v22 = vrot.slane %v4735_v23, 1 }
0x116e   :  { %v7256_v50 = vpop.eup %7255 }
0x116f   :  { %v4882_v31 = vadd.f32 %v4880_v41, %v4879_v46  ;;  %v4907_v9 = vsub.f32 1.0, %v7256_v50  ;;  %v4909_v51 = vmul.f32 %v7256_v50, %v10722_v49  ;;  %v4903_v49 = vrot.slane %v4735_v23, 2 }
0x1171   :  { %7257 = vtanh.f32 %v4882_v31 }
0x1172   :  { %7259 = vpow2.f32 %v6278_v55 }
0x117e   :  { %v7258_v45 = vpop.eup %7257 }
0x117f   :  { %v4908_v27 = vmul.f32 %v7258_v45, %v4907_v9  ;;  %v7260_v54 = vpop.eup %7259 }
0x1180   :  { %v4888_v3 = vadd.f32 1.0, %v7260_v54 }
0x1181   :  { %v10841_v4 = vadd.f32 %v4909_v51, %v4908_v27 }
0x1182   :  { %7261 = vrcp.f32 %v4888_v3 }
0x1183   :  { %4915 = vst [vmem:[#allocation4 + $0x5] sm:$0x1] %v10841_v4  ;;  %v10853_v23 = vpack.c.bf16 %v10841_v4, %v10841_v4 }
0x118a   :  { %v4854_v6 = vpop.f32.mrf.mxu1 }
0x118b   :  { %v4894_v46 = vadd.f32 %v4892_v22, %v4854_v6  ;;  %v7605_v6 = vld [vmem:[#allocation12 + $0x124] ss:$24 sps:$4 sm:$0xff]  }
0x118c   :  { %v4856_v41 = vpop.f32.mrf.mxu1 }
0x118d   :  { %v6279_v63 = vmul.f32 -1.442695, %v4894_v46  ;;  %v4901_v56 = vadd.f32 %v10728_v61, %v4856_v41  ;;  %v7606_v46 = vld [vmem:[#allocation12 + $0x120] ss:$24 sps:$4 sm:$0xff]   ;;  %v7607_v41 = vld [vmem:[#allocation12 + $0xf4] ss:$24 sps:$4 sm:$0xff]  }
0x118e   :  { %v4858_v35 = vpop.f32.mrf.mxu1 }
0x118f   :  { %7263 = vpow2.f32 %v6279_v63  ;;  %v7262_v47 = vpop.eup %7261  ;;  %v7609_v63 = vld [vmem:[#allocation12 + $0xc4] ss:$24 sps:$4 sm:$0xff]   ;;  %v7635_v35 = vld [vmem:[#allocation12 + $0x180] ss:$24 sps:$4 sm:$0xff]  }
0x1190   :  { %v4859_v34 = vpop.f32.mrf.mxu1  ;;  %v4902_v31 = vmul.f32 %v7262_v47, %v4901_v56  ;;  %v7641_v56 = vld [vmem:[#allocation12 + $0xf8] ss:$24 sps:$4 sm:$0xff]   ;;  %v7642_v47 = vld [vmem:[#allocation12 + $0xcc] ss:$24 sps:$4 sm:$0xff]  }
0x1191   :  { %v7638_v34 = vld [vmem:[#allocation12 + $0x12c] ss:$24 sps:$4 sm:$0xff]  }
0x1192   :  { %v4905_v50 = vadd.f32 %v4903_v49, %v4902_v31  ;;  %v7644_v31 = vld [vmem:[#allocation12 + $0x9c] ss:$24 sps:$4 sm:$0xff]   ;;  %v12032_v49 = vld [vmem:[#allocation86_spill] sm:$0xff] }
0x119c   :  { %v7264_v48 = vpop.eup %7263 }
0x119d   :  { %v4898_v55 = vadd.f32 1.0, %v7264_v48  ;;  %v12033_v48 = vld [vmem:[#allocation42_spill] sm:$0xff] }
0x119f   :  { %7265 = vrcp.f32 %v4898_v55  ;;  %v12034_v55 = vld [vmem:[#allocation60_spill] sm:$0xff] }
0x11a0   :  { %7267 = vtanh.f32 %v4905_v50  ;;  %v12043_v50 = vld [vmem:[#allocation55_spill] sm:$0xff] }
0x11ac   :  { %v7266_v9 = vpop.eup %7265 }
0x11ad   :  { %v4911_v45 = vsub.f32 1.0, %v7266_v9  ;;  %v7268_v27 = vpop.eup %7267  ;;  %v4913_v54 = vmul.f32 %v7266_v9, %v10732_v29  ;;  %v7604_v29 = vld [vmem:[#allocation12 + $0x150] ss:$24 sps:$4 sm:$0xff]   ;;  %v12044_v9 = vld [vmem:[#allocation57_spill] sm:$0xff] }
0x11af   :  { %v4912_v51 = vmul.f32 %v7268_v27, %v4911_v45  ;;  %v12045_v45 = vld [vmem:[#allocation59_spill] sm:$0xff]  ;;  %v12046_v27 = vld [vmem:[#allocation93_spill] sm:$0xff] }
0x11b1   :  { %v10846_v3 = vadd.f32 %v4913_v54, %v4912_v51  ;;  %v4917_v51 = vld [vmem:[#allocation2 + $0x6] ss:$8 sm:$0x7] }
0x11b3   :  { %4916 = vst [vmem:[#allocation4 + $0xa] sm:$0x1] %v10846_v3  ;;  %v4920_v22 = vpack.c.bf16 %v10846_v3, %v10846_v3 }
0x11b5   :  { %4953 = vmatprep.mubr.bf16.mxu0 %v4920_v22  ;;  %4994 = vmatprep.mubr.bf16.mxu1 %v4920_v22 }
0x11b6   :  { %4954 = vmatmul.mubr.bf16.vlgmr.msra.gmra.mxu0 %v10853_v23  ;;  %4995 = vmatmul.mubr.bf16.vlgmr.msra.gmra.mxu1 %v10853_v23 }
0x11b7   :  { %5004 = vmatpush1.bf16.msra.mxu0 %v10395_v53  ;;  %5035 = vmatprep.mubr.bf16.mxu0 %v4920_v22  ;;  %v7608_v53 = vld [vmem:[#allocation12 + $0xf0] ss:$24 sps:$4 sm:$0xff]  }
0x11b8   :  { %5005 = vmatprep.subr.bf16.mxu0 %v10398_v60  ;;  %5105 = vmatpush1.bf16.msra.mxu1 %v7604_v29  ;;  %v7610_v60 = vld [vmem:[#allocation12 + $0xc0] ss:$24 sps:$4 sm:$0xff]  }
0x11b9   :  { %5106 = vmatprep.subr.bf16.mxu1 %v7605_v6 }
0x11bb   :  { %5006 = vmatpush1.bf16.msra.mxu0 %v10403_v0  ;;  %v7611_v0 = vld [vmem:[#allocation12 + $0x94] ss:$24 sps:$4 sm:$0xff]  }
0x11bc   :  { %5007 = vmatprep.subr.bf16.mxu0 %v10406_v30  ;;  %5107 = vmatpush1.bf16.msra.mxu1 %v7606_v46  ;;  %v7612_v30 = vld [vmem:[#allocation12 + $0x90] ss:$24 sps:$4 sm:$0xff]  }
0x11bd   :  { %5108 = vmatprep.subr.bf16.mxu1 %v7607_v41 }
0x11bf   :  { %5008 = vmatpush1.bf16.msra.mxu0 %v10411_v19  ;;  %v7613_v19 = vld [vmem:[#allocation12 + $0x64] ss:$24 sps:$4 sm:$0xff]  }
0x11c0   :  { %5009 = vmatprep.subr.bf16.mxu0 %v10414_v17  ;;  %5109 = vmatpush1.bf16.msra.mxu1 %v7608_v53  ;;  %v7614_v17 = vld [vmem:[#allocation12 + $0x60] ss:$24 sps:$4 sm:$0xff]  }
0x11c1   :  { %5110 = vmatprep.subr.bf16.mxu1 %v7609_v63  ;;  %v5052_v63 = vrot.slane %v4917_v51, 1 }
0x11c3   :  { %5010 = vmatpush1.bf16.msra.mxu0 %v10419_v28  ;;  %v7615_v28 = vld [vmem:[#allocation12 + $0x34] ss:$24 sps:$4 sm:$0xff]  }
0x11c4   :  { %5011 = vmatprep.subr.bf16.mxu0 %v10422_v25  ;;  %5111 = vmatpush1.bf16.msra.mxu1 %v7610_v60  ;;  %v7616_v25 = vld [vmem:[#allocation12 + $0x30] ss:$24 sps:$4 sm:$0xff]  }
0x11c5   :  { %5112 = vmatprep.subr.bf16.mxu1 %v7611_v0 }
0x11c7   :  { %5012 = vmatpush1.bf16.msra.mxu0 %v10427_v26  ;;  %v7617_v26 = vld [vmem:[#allocation12 + $0x4] ss:$24 sps:$4 sm:$0xff]  }
0x11c8   :  { %5013 = vmatprep.subr.bf16.mxu0 %v10430_v10  ;;  %5113 = vmatpush1.bf16.msra.mxu1 %v7612_v30  ;;  %v7618_v10 = vld [vmem:[#allocation12] ss:$24 sps:$4 sm:$0xff]  }
0x11c9   :  { %5114 = vmatprep.subr.bf16.mxu1 %v7613_v19 }
0x11cb   :  { %5014 = vmatpush1.bf16.msra.mxu0 %v10435_v13  ;;  %v7619_v13 = vld [vmem:[#allocation12 + $0x2d4] ss:$24 sps:$4 sm:$0xff]  }
0x11cc   :  { %5015 = vmatprep.subr.bf16.mxu0 %v10438_v20  ;;  %5115 = vmatpush1.bf16.msra.mxu1 %v7614_v17  ;;  %v7620_v20 = vld [vmem:[#allocation12 + $0x2d0] ss:$24 sps:$4 sm:$0xff]  }
0x11cd   :  { %5116 = vmatprep.subr.bf16.mxu1 %v7615_v28 }
0x11cf   :  { %5016 = vmatpush1.bf16.msra.mxu0 %v10443_v8  ;;  %v7621_v8 = vld [vmem:[#allocation12 + $0x2a4] ss:$24 sps:$4 sm:$0xff]  }
0x11d0   :  { %5017 = vmatprep.subr.bf16.mxu0 %v10446_v37  ;;  %5117 = vmatpush1.bf16.msra.mxu1 %v7616_v25  ;;  %v7622_v37 = vld [vmem:[#allocation12 + $0x2a0] ss:$24 sps:$4 sm:$0xff]  }
0x11d1   :  { %5118 = vmatprep.subr.bf16.mxu1 %v7617_v26 }
0x11d3   :  { %5018 = vmatpush1.bf16.msra.mxu0 %v10451_v2  ;;  %v7623_v2 = vld [vmem:[#allocation12 + $0x274] ss:$24 sps:$4 sm:$0xff]  }
0x11d4   :  { %5019 = vmatprep.subr.bf16.mxu0 %v10454_v58  ;;  %5119 = vmatpush1.bf16.msra.mxu1 %v7618_v10  ;;  %v7624_v58 = vld [vmem:[#allocation12 + $0x270] ss:$24 sps:$4 sm:$0xff]  }
0x11d5   :  { %5120 = vmatprep.subr.bf16.mxu1 %v7619_v13 }
0x11d7   :  { %5020 = vmatpush2.bf16.msra.mxu0 %v10459_v57  ;;  %v7625_v57 = vld [vmem:[#allocation12 + $0x244] ss:$24 sps:$4 sm:$0xff]  }
0x11d8   :  { %5021 = vmatprep.subr.bf16.mxu0 %v11922_v39  ;;  %5121 = vmatpush2.bf16.msra.mxu1 %v7620_v20  ;;  %v7626_v39 = vld [vmem:[#allocation12 + $0x240] ss:$24 sps:$4 sm:$0xff]   ;;  %v5063_v20 = vrot.slane %v4917_v51, 2 }
0x11d9   :  { %5122 = vmatprep.subr.bf16.mxu1 %v7621_v8 }
0x11db   :  { %5022 = vmatpush2.bf16.msra.mxu0 %v11923_v42  ;;  %v7627_v42 = vld [vmem:[#allocation12 + $0x214] ss:$24 sps:$4 sm:$0xff]  }
0x11dc   :  { %5023 = vmatprep.subr.bf16.mxu0 %v11924_v62  ;;  %5123 = vmatpush2.bf16.msra.mxu1 %v7622_v37  ;;  %v7628_v62 = vld [vmem:[#allocation12 + $0x210] ss:$24 sps:$4 sm:$0xff]  }
0x11dd   :  { %5124 = vmatprep.subr.bf16.mxu1 %v7623_v2  ;;  %v4918_v37 = vld [vmem:[#allocation2 + $0x19] ss:$8 sm:$0x7] }
0x11df   :  { %5024 = vmatpush2.bf16.msra.mxu0 %v11977_v52  ;;  %v7629_v52 = vld [vmem:[#allocation12 + $0x1e4] ss:$24 sps:$4 sm:$0xff]  }
0x11e0   :  { %5025 = vmatprep.subr.bf16.mxu0 %v11978_v18  ;;  %5125 = vmatpush2.bf16.msra.mxu1 %v7624_v58  ;;  %v7630_v18 = vld [vmem:[#allocation12 + $0x1e0] ss:$24 sps:$4 sm:$0xff]  }
0x11e1   :  { %5126 = vmatprep.subr.bf16.mxu1 %v7625_v57 }
0x11e3   :  { %5026 = vmatpush2.bf16.msra.mxu0 %v11981_v44  ;;  %v7631_v44 = vld [vmem:[#allocation12 + $0x1b4] ss:$24 sps:$4 sm:$0xff]  }
0x11e4   :  { %5027 = vmatprep.subr.bf16.mxu0 %v11982_v59  ;;  %5127 = vmatpush2.bf16.msra.mxu1 %v7626_v39  ;;  %v7632_v59 = vld [vmem:[#allocation12 + $0x1b0] ss:$24 sps:$4 sm:$0xff]  }
0x11e5   :  { %5128 = vmatprep.subr.bf16.mxu1 %v7627_v42 }
0x11e7   :  { %5028 = vmatpush2.bf16.msra.mxu0 %v11985_v21  ;;  %v7633_v21 = vld [vmem:[#allocation12 + $0x184] ss:$24 sps:$4 sm:$0xff]  }
0x11e8   :  { %5029 = vmatprep.subr.bf16.mxu0 %v11986_v36  ;;  %5129 = vmatpush2.bf16.msra.mxu1 %v7628_v62  ;;  %v7634_v36 = vld [vmem:[#allocation12 + $0x15c] ss:$24 sps:$4 sm:$0xff]  }
0x11e9   :  { %5130 = vmatprep.subr.bf16.mxu1 %v7629_v52 }
0x11eb   :  { %5030 = vmatpush2.bf16.msra.mxu0 %v11989_v15  ;;  %v7636_v15 = vld [vmem:[#allocation12 + $0x164] ss:$24 sps:$4 sm:$0xff]  }
0x11ec   :  { %5031 = vmatprep.subr.bf16.mxu0 %v11990_v32  ;;  %5131 = vmatpush2.bf16.msra.mxu1 %v7630_v18  ;;  %v7637_v32 = vld [vmem:[#allocation12 + $0x158] ss:$24 sps:$4 sm:$0xff]  }
0x11ed   :  { %5132 = vmatprep.subr.bf16.mxu1 %v7631_v44 }
0x11ef   :  { %5032 = vmatpush2.bf16.msra.mxu0 %v11993_v11  ;;  %v7639_v11 = vld [vmem:[#allocation12 + $0x128] ss:$24 sps:$4 sm:$0xff]  }
0x11f0   :  { %5033 = vmatprep.subr.bf16.mxu0 %v11994_v7  ;;  %5133 = vmatpush2.bf16.msra.mxu1 %v7632_v59  ;;  %v7640_v7 = vld [vmem:[#allocation12 + $0xfc] ss:$24 sps:$4 sm:$0xff]  }
0x11f1   :  { %5134 = vmatprep.subr.bf16.mxu1 %v7633_v21  ;;  %v5075_v21 = vrot.slane %v4918_v37, 1 }
0x11f3   :  { %5034 = vmatpush2.bf16.msra.mxu0 %v11997_v16  ;;  %v7643_v16 = vld [vmem:[#allocation12 + $0xc8] ss:$24 sps:$4 sm:$0xff]  }
0x11f4   :  { %5145 = vmatprep.subr.bf16.mxu0 %v7634_v36  ;;  %5135 = vmatpush2.bf16.msra.mxu1 %v7635_v35 }
0x11f5   :  { %5186 = vmatprep.subr.bf16.mxu1 %v7636_v15 }
0x11f6   :  { %5036 = vmatmul.mubr.bf16.vlgmr.msra.gmra.mxu0 %v10853_v23 }
0x11f7   :  { %5146 = vmatpush1.bf16.msra.mxu0 %v7637_v32 }
0x11f8   :  { %5147 = vmatprep.subr.bf16.mxu0 %v7638_v34 }
0x11fb   :  { %5148 = vmatpush1.bf16.msra.mxu0 %v7639_v11 }
0x11fc   :  { %5149 = vmatprep.subr.bf16.mxu0 %v7640_v7 }
0x11ff   :  { %5150 = vmatpush1.bf16.msra.mxu0 %v7641_v56 }
0x1200   :  { %5151 = vmatprep.subr.bf16.mxu0 %v7642_v47 }
0x1203   :  { %5152 = vmatpush1.bf16.msra.mxu0 %v7643_v16 }
0x1204   :  { %5153 = vmatprep.subr.bf16.mxu0 %v7644_v31 }
0x1207   :  { %5154 = vmatpush1.bf16.msra.mxu0 %v12009_v33  ;;  %v12035_v33 = vld [vmem:[#allocation88_spill] sm:$0xff] }
0x1208   :  { %5155 = vmatprep.subr.bf16.mxu0 %v12010_v14  ;;  %v12036_v14 = vld [vmem:[#allocation44_spill] sm:$0xff] }
0x120b   :  { %5156 = vmatpush1.bf16.msra.mxu0 %v12011_v38  ;;  %v12037_v38 = vld [vmem:[#allocation90_spill] sm:$0xff] }
0x120c   :  { %5157 = vmatprep.subr.bf16.mxu0 %v12012_v40  ;;  %v12038_v40 = vld [vmem:[#allocation46_spill] sm:$0xff] }
0x120f   :  { %5158 = vmatpush1.bf16.msra.mxu0 %v12013_v5  ;;  %v12039_v5 = vld [vmem:[#allocation92_spill] sm:$0xff] }
0x1210   :  { %5159 = vmatprep.subr.bf16.mxu0 %v12014_v12  ;;  %v12040_v12 = vld [vmem:[#allocation49_spill] sm:$0xff] }
0x1213   :  { %5160 = vmatpush1.bf16.msra.mxu0 %v12015_v1  ;;  %v12041_v1 = vld [vmem:[#allocation51_spill] sm:$0xff] }
0x1214   :  { %5161 = vmatprep.subr.bf16.mxu0 %v12016_v43  ;;  %v12042_v43 = vld [vmem:[#allocation53_spill] sm:$0xff] }
0x1217   :  { %5162 = vmatpush2.bf16.msra.mxu0 %v12032_v49 }
0x1218   :  { %5163 = vmatprep.subr.bf16.mxu0 %v12033_v48 }
0x121b   :  { %5164 = vmatpush2.bf16.msra.mxu0 %v12034_v55 }
0x121c   :  { %5165 = vmatprep.subr.bf16.mxu0 %v12035_v33 }
0x121f   :  { %5166 = vmatpush2.bf16.msra.mxu0 %v12036_v14 }
0x1220   :  { %5167 = vmatprep.subr.bf16.mxu0 %v12037_v38 }
0x1223   :  { %5168 = vmatpush2.bf16.msra.mxu0 %v12038_v40 }
0x1224   :  { %5169 = vmatprep.subr.bf16.mxu0 %v12039_v5 }
0x1227   :  { %5170 = vmatpush2.bf16.msra.mxu0 %v12040_v12 }
0x1228   :  { %5171 = vmatprep.subr.bf16.mxu0 %v12041_v1  ;;  %v7645_v1 = vld [vmem:[#allocation12 + $0x160] ss:$24 sps:$4 sm:$0xff]  }
0x122b   :  { %5172 = vmatpush2.bf16.msra.mxu0 %v12042_v43  ;;  %v7647_v43 = vld [vmem:[#allocation12 + $0x130] ss:$24 sps:$4 sm:$0xff]  }
0x122c   :  { %5173 = vmatprep.subr.bf16.mxu0 %v12043_v50  ;;  %v7648_v50 = vld [vmem:[#allocation12 + $0x104] ss:$24 sps:$4 sm:$0xff]  }
0x122f   :  { %5174 = vmatpush2.bf16.msra.mxu0 %v12044_v9  ;;  %v7649_v9 = vld [vmem:[#allocation12 + $0x100] ss:$24 sps:$4 sm:$0xff]  }
0x1230   :  { %5175 = vmatprep.subr.bf16.mxu0 %v12045_v45  ;;  %v7650_v45 = vld [vmem:[#allocation12 + $0xd4] ss:$24 sps:$4 sm:$0xff]  }
0x1233   :  { %5176 = vmatpush2.bf16.msra.mxu0 %v12046_v27  ;;  %v7651_v27 = vld [vmem:[#allocation12 + $0xd0] ss:$24 sps:$4 sm:$0xff]  }
0x1276   :  { %v4955_v54 = vpop.f32.mrf.mxu0  ;;  %v4996_v22 = vpop.f32.mrf.mxu1 }
0x1277   :  { %v5044_v23 = vadd.f32 %v4955_v54, %v4917_v51  ;;  %v5061_v10 = vadd.f32 %v11976_v24, %v4996_v22  ;;  %v7652_v51 = vld [vmem:[#allocation12 + $0xa4] ss:$24 sps:$4 sm:$0xff]   ;;  %v7653_v54 = vld [vmem:[#allocation12 + $0xa0] ss:$24 sps:$4 sm:$0xff]   ;;  %v7654_v22 = vld [vmem:[#allocation12 + $0x74] ss:$24 sps:$4 sm:$0xff]  }
0x1278   :  { %v4957_v29 = vpop.f32.mrf.mxu0  ;;  %v4998_v6 = vpop.f32.mrf.mxu1 }
0x1279   :  { %v6280_v46 = vmul.f32 -1.442695, %v5044_v23  ;;  %v5054_v30 = vadd.f32 %v5052_v63, %v4957_v29  ;;  %v5067_v58 = vadd.f32 %v4998_v6, %v4918_v37  ;;  %v7655_v23 = vld [vmem:[#allocation12 + $0x70] ss:$24 sps:$4 sm:$0xff]   ;;  %v7656_v29 = vld [vmem:[#allocation12 + $0x44] ss:$24 sps:$4 sm:$0xff]  }
0x127a   :  { %v4959_v41 = vpop.f32.mrf.mxu0  ;;  %v5000_v53 = vpop.f32.mrf.mxu1  ;;  %v7657_v6 = vld [vmem:[#allocation12 + $0x40] ss:$24 sps:$4 sm:$0xff]  }
0x127b   :  { %7269 = vpow2.f32 %v6280_v46  ;;  %v6281_v19 = vmul.f32 -1.442695, %v5054_v30  ;;  %v6282_v57 = vmul.f32 -1.442695, %v5067_v58  ;;  %v7658_v46 = vld [vmem:[#allocation12 + $0x14] ss:$24 sps:$4 sm:$0xff]  }
0x127c   :  { %v4960_v60 = vpop.f32.mrf.mxu0  ;;  %v5001_v0 = vpop.f32.mrf.mxu1  ;;  %v7659_v41 = vld [vmem:[#allocation12 + $0x10] ss:$24 sps:$4 sm:$0xff]   ;;  %v7660_v53 = vld [vmem:[#allocation12 + $0x2e4] ss:$24 sps:$4 sm:$0xff]   ;;  %v7661_v63 = vld [vmem:[#allocation12 + $0x2e0] ss:$24 sps:$4 sm:$0xff]  }
0x127d   :  { %7271 = vpow2.f32 %v6281_v19  ;;  %v7662_v60 = vld [vmem:[#allocation12 + $0x2b4] ss:$24 sps:$4 sm:$0xff]   ;;  %v7663_v0 = vld [vmem:[#allocation12 + $0x2b0] ss:$24 sps:$4 sm:$0xff]   ;;  %v7664_v30 = vld [vmem:[#allocation12 + $0x284] ss:$24 sps:$4 sm:$0xff]  }
0x127e   :  { %v7665_v19 = vld [vmem:[#allocation12 + $0x280] ss:$24 sps:$4 sm:$0xff]  }
0x127f   :  { %v6941_v58 = vld [vmem:[#allocation13 + $0x78] sm:$0xff]  }
0x1280   :  { %6341 = vmatprep.subr.bf16.mxu0 %v6941_v58 }
0x1288   :  { %v7270_v17 = vpop.eup %7269 }
0x1289   :  { %v5048_v28 = vadd.f32 1.0, %v7270_v17  ;;  %v7666_v17 = vld [vmem:[#allocation12 + $0x254] ss:$24 sps:$4 sm:$0xff]  }
0x128a   :  { %v7272_v25 = vpop.eup %7271 }
0x128b   :  { %7273 = vrcp.f32 %v5048_v28  ;;  %v5058_v26 = vadd.f32 1.0, %v7272_v25  ;;  %v7667_v28 = vld [vmem:[#allocation12 + $0x250] ss:$24 sps:$4 sm:$0xff]   ;;  %v7668_v25 = vld [vmem:[#allocation12 + $0x224] ss:$24 sps:$4 sm:$0xff]  }
0x128d   :  { %7275 = vrcp.f32 %v5058_v26  ;;  %v7669_v26 = vld [vmem:[#allocation12 + $0x220] ss:$24 sps:$4 sm:$0xff]  }
0x1298   :  { %v7274_v13 = vpop.eup %7273 }
0x1299   :  { %v5062_v8 = vmul.f32 %v7274_v13, %v5061_v10  ;;  %v7670_v10 = vld [vmem:[#allocation12 + $0x1f4] ss:$24 sps:$4 sm:$0xff]   ;;  %v7671_v13 = vld [vmem:[#allocation12 + $0x1f0] ss:$24 sps:$4 sm:$0xff]  }
0x129a   :  { %v7276_v39 = vpop.eup %7275 }
0x129b   :  { %v5065_v2 = vadd.f32 %v5063_v20, %v5062_v8  ;;  %v5090_v42 = vsub.f32 1.0, %v7276_v39  ;;  %v5092_v18 = vmul.f32 %v7276_v39, %v10841_v4  ;;  %v5086_v4 = vrot.slane %v4918_v37, 2  ;;  %v7672_v20 = vld [vmem:[#allocation12 + $0x1c4] ss:$24 sps:$4 sm:$0xff]   ;;  %v7673_v8 = vld [vmem:[#allocation12 + $0x1c0] ss:$24 sps:$4 sm:$0xff]  }
0x129c   :  { %v7674_v37 = vld [vmem:[#allocation12 + $0x194] ss:$24 sps:$4 sm:$0xff]  }
0x129d   :  { %7277 = vtanh.f32 %v5065_v2  ;;  %v7675_v2 = vld [vmem:[#allocation12 + $0x190] ss:$24 sps:$4 sm:$0xff]  }
0x129e   :  { %7279 = vpow2.f32 %v6282_v57  ;;  %v6942_v57 = vld [vmem:[#allocation13 + $0x38] sm:$0xff]   ;;  %v6943_v39 = vld [vmem:[#allocation13 + $0x70] sm:$0xff]  }
0x12aa   :  { %v7278_v62 = vpop.eup %7277 }
0x12ab   :  { %v5091_v52 = vmul.f32 %v7278_v62, %v5090_v42  ;;  %v7280_v24 = vpop.eup %7279  ;;  %v6944_v42 = vld [vmem:[#allocation13 + $0x30] sm:$0xff]   ;;  %v6945_v62 = vld [vmem:[#allocation13 + $0x68] sm:$0xff]  }
0x12ac   :  { %v5071_v59 = vadd.f32 1.0, %v7280_v24  ;;  %v6948_v24 = vld [vmem:[#allocation13 + $0x20] sm:$0xff]  }
0x12ad   :  { %v10914_v44 = vadd.f32 %v5092_v18, %v5091_v52  ;;  %v6946_v52 = vld [vmem:[#allocation13 + $0x28] sm:$0xff]   ;;  %v6947_v18 = vld [vmem:[#allocation13 + $0x60] sm:$0xff]  }
0x12ae   :  { %7281 = vrcp.f32 %v5071_v59  ;;  %v6949_v59 = vld [vmem:[#allocation13 + $0x58] sm:$0xff]  }
0x12af   :  { %5098 = vst [vmem:[#allocation4 + $0x6] sm:$0x1] %v10914_v44  ;;  %v10926_v12 = vpack.c.bf16 %v10914_v44, %v10914_v44 }
0x12b6   :  { %v5037_v36 = vpop.f32.mrf.mxu0 }
0x12b7   :  { %v5077_v35 = vadd.f32 %v5075_v21, %v5037_v36  ;;  %v6950_v21 = vld [vmem:[#allocation13 + $0x18] sm:$0xff]   ;;  %v6951_v36 = vld [vmem:[#allocation13 + $0x50] sm:$0xff]  }
0x12b8   :  { %v5039_v15 = vpop.f32.mrf.mxu0 }
0x12b9   :  { %v6283_v32 = vmul.f32 -1.442695, %v5077_v35  ;;  %v5084_v7 = vadd.f32 %v10728_v61, %v5039_v15  ;;  %v6952_v35 = vld [vmem:[#allocation13 + $0x10] sm:$0xff]   ;;  %v6953_v15 = vld [vmem:[#allocation13 + $0x48] sm:$0xff]  }
0x12ba   :  { %v5041_v34 = vpop.f32.mrf.mxu0 }
0x12bb   :  { %7283 = vpow2.f32 %v6283_v32  ;;  %v7282_v56 = vpop.eup %7281  ;;  %v6954_v32 = vld [vmem:[#allocation13 + $0x8] sm:$0xff]   ;;  %v6955_v34 = vld [vmem:[#allocation13 + $0x40] sm:$0xff]  }
0x12bc   :  { %v5042_v11 = vpop.f32.mrf.mxu0  ;;  %v5085_v47 = vmul.f32 %v7282_v56, %v5084_v7  ;;  %v7995_v7 = vmov 0.0   ;;  %v5100_v56 = vld [vmem:[#allocation2 + $0x7] ss:$8 sm:$0x7] }
0x12bd   :  { %v6956_v11 = vld [vmem:[#allocation13] sm:$0xff]  }
0x12be   :  { %v5088_v49 = vadd.f32 %v5086_v4, %v5085_v47 }
0x12c8   :  { %v7284_v16 = vpop.eup %7283 }
0x12c9   :  { %v5081_v31 = vadd.f32 1.0, %v7284_v16 }
0x12cb   :  { %7285 = vrcp.f32 %v5081_v31 }
0x12cc   :  { %7287 = vtanh.f32 %v5088_v49 }
0x12d8   :  { %v7286_v48 = vpop.eup %7285 }
0x12d9   :  { %v5094_v55 = vsub.f32 1.0, %v7286_v48  ;;  %v7288_v33 = vpop.eup %7287  ;;  %v5096_v38 = vmul.f32 %v7286_v48, %v10846_v3  ;;  %v7646_v3 = vld [vmem:[#allocation12 + $0x134] ss:$24 sps:$4 sm:$0xff]  }
0x12db   :  { %v5095_v14 = vmul.f32 %v7288_v33, %v5094_v55 }
0x12dd   :  { %v10919_v40 = vadd.f32 %v5096_v38, %v5095_v14  ;;  %v5235_v14 = vrot.slane %v5100_v56, 1 }
0x12df   :  { %5099 = vst [vmem:[#allocation4 + $0x9] sm:$0x1] %v10919_v40  ;;  %v5103_v5 = vpack.c.bf16 %v10919_v40, %v10919_v40 }
0x12e1   :  { %5136 = vmatprep.mubr.bf16.mxu1 %v5103_v5  ;;  %5177 = vmatprep.mubr.bf16.mxu0 %v5103_v5 }
0x12e2   :  { %5137 = vmatmul.mubr.bf16.vlgmr.msra.gmra.mxu1 %v10926_v12  ;;  %5178 = vmatmul.mubr.bf16.vlgmr.msra.gmra.mxu0 %v10926_v12 }
0x12e3   :  { %5187 = vmatpush1.bf16.msra.mxu1 %v7645_v1  ;;  %5218 = vmatprep.mubr.bf16.mxu1 %v5103_v5 }
0x12e4   :  { %5188 = vmatprep.subr.bf16.mxu1 %v7646_v3  ;;  %6342 = vmatpush3.bf16.msra.mxu0 %v6942_v57 }
0x12e5   :  { %6343 = vmatprep.subr.bf16.mxu0 %v6943_v39 }
0x12e7   :  { %5189 = vmatpush1.bf16.msra.mxu1 %v7647_v43 }
0x12e8   :  { %5190 = vmatprep.subr.bf16.mxu1 %v7648_v50  ;;  %6344 = vmatpush3.bf16.msra.mxu0 %v6944_v42 }
0x12e9   :  { %6345 = vmatprep.subr.bf16.mxu0 %v6945_v62 }
0x12eb   :  { %5191 = vmatpush1.bf16.msra.mxu1 %v7649_v9 }
0x12ec   :  { %5192 = vmatprep.subr.bf16.mxu1 %v7650_v45  ;;  %6346 = vmatpush3.bf16.msra.mxu0 %v6946_v52  ;;  %v7676_v45 = vld [vmem:[%s10991_s8] sm:$0x1] }
0x12ed   :  { %6347 = vmatprep.subr.bf16.mxu0 %v6947_v18 }
0x12ef   :  { %5193 = vmatpush1.bf16.msra.mxu1 %v7651_v27 }
0x12f0   :  { %5194 = vmatprep.subr.bf16.mxu1 %v7652_v51  ;;  %6348 = vmatpush3.bf16.msra.mxu0 %v6948_v24 }
0x12f1   :  { %6349 = vmatprep.subr.bf16.mxu0 %v6949_v59 }
0x12f3   :  { %5195 = vmatpush1.bf16.msra.mxu1 %v7653_v54  ;;  %v5246_v54 = vrot.slane %v5100_v56, 2 }
0x12f4   :  { %5196 = vmatprep.subr.bf16.mxu1 %v7654_v22  ;;  %6350 = vmatpush3.bf16.msra.mxu0 %v6950_v21 }
0x12f5   :  { %6351 = vmatprep.subr.bf16.mxu0 %v6951_v36 }
0x12f7   :  { %5197 = vmatpush1.bf16.msra.mxu1 %v7655_v23  ;;  %v5101_v23 = vld [vmem:[#allocation2 + $0x18] ss:$8 sm:$0x7] }
0x12f8   :  { %5198 = vmatprep.subr.bf16.mxu1 %v7656_v29  ;;  %6352 = vmatpush3.bf16.msra.mxu0 %v6952_v35  ;;  %v5269_v57 = vrot.slane %v5101_v23, 2 }
0x12f9   :  { %6353 = vmatprep.subr.bf16.mxu0 %v6953_v15 }
0x12fb   :  { %5199 = vmatpush1.bf16.msra.mxu1 %v7657_v6 }
0x12fc   :  { %5200 = vmatprep.subr.bf16.mxu1 %v7658_v46  ;;  %6354 = vmatpush3.bf16.msra.mxu0 %v6954_v32 }
0x12fd   :  { %6355 = vmatprep.subr.bf16.mxu0 %v6955_v34  ;;  %v6958_v34 = vld [vmem:[#allocation16 + $0x30] sm:$0xff]  }
0x12ff   :  { %5201 = vmatpush1.bf16.msra.mxu1 %v7659_v41 }
0x1300   :  { %5202 = vmatprep.subr.bf16.mxu1 %v7660_v53  ;;  %6356 = vmatpush3.bf16.msra.mxu0 %v6956_v11  ;;  %v6959_v11 = vld [vmem:[#allocation16 + $0x28] sm:$0xff]  }
0x1301   :  { %6399 = vmatprep.subr.bf16.mxu0 %v7995_v7 }
0x1303   :  { %5203 = vmatpush2.bf16.msra.mxu1 %v7661_v63 }
0x1304   :  { %5204 = vmatprep.subr.bf16.mxu1 %v7662_v60 }
0x1307   :  { %5205 = vmatpush2.bf16.msra.mxu1 %v7663_v0 }
0x1308   :  { %5206 = vmatprep.subr.bf16.mxu1 %v7664_v30 }
0x130b   :  { %5207 = vmatpush2.bf16.msra.mxu1 %v7665_v19 }
0x130c   :  { %5208 = vmatprep.subr.bf16.mxu1 %v7666_v17 }
0x130f   :  { %5209 = vmatpush2.bf16.msra.mxu1 %v7667_v28  ;;  %v5258_v28 = vrot.slane %v5101_v23, 1 }
0x1310   :  { %5210 = vmatprep.subr.bf16.mxu1 %v7668_v25 }
0x1313   :  { %5211 = vmatpush2.bf16.msra.mxu1 %v7669_v26 }
0x1314   :  { %5212 = vmatprep.subr.bf16.mxu1 %v7670_v10 }
0x1317   :  { %5213 = vmatpush2.bf16.msra.mxu1 %v7671_v13 }
0x1318   :  { %5214 = vmatprep.subr.bf16.mxu1 %v7672_v20 }
0x131b   :  { %5215 = vmatpush2.bf16.msra.mxu1 %v7673_v8 }
0x131c   :  { %5216 = vmatprep.subr.bf16.mxu1 %v7674_v37 }
0x131f   :  { %5217 = vmatpush2.bf16.msra.mxu1 %v7675_v2 }
0x1320   :  { %6419 = vmatprep.subr.bf16.mxu1 %v7995_v7 }
0x1322   :  { %5219 = vmatmul.mubr.bf16.vlgmr.msra.gmra.mxu1 %v10926_v12 }
0x1323   :  { %6435 = vmatprep.mubr.msk.bf16.mxu1 %vm7996_vm1, %v7995_v7 }
0x13a2   :  { %v5138_v47 = vpop.f32.mrf.mxu1  ;;  %v5179_v4 = vpop.f32.mrf.mxu0 }
0x13a3   :  { %v5227_v16 = vadd.f32 %v5138_v47, %v5100_v56  ;;  %v5244_v27 = vadd.f32 %v7676_v45, %v5179_v4  ;;  %v6961_v56 = vld [vmem:[#allocation16 + $0x18] sm:$0xff]   ;;  %v6962_v47 = vld [vmem:[#allocation16 + $0x10] sm:$0xff]   ;;  %v6963_v4 = vld [vmem:[#allocation16 + $0x8] sm:$0xff]  }
0x13a4   :  { %v5140_v31 = vpop.f32.mrf.mxu1  ;;  %v5181_v49 = vpop.f32.mrf.mxu0 }
0x13a5   :  { %v6284_v48 = vmul.f32 -1.442695, %v5227_v16  ;;  %v5237_v12 = vadd.f32 %v5235_v14, %v5140_v31  ;;  %v5250_v6 = vadd.f32 %v5181_v49, %v5101_v23  ;;  %v6964_v16 = vld [vmem:[#allocation16] sm:$0xff]   ;;  %v6966_v49 = vld [vmem:[#allocation19 + $0x30] sm:$0xff]  }
0x13a6   :  { %v5142_v55 = vpop.f32.mrf.mxu1  ;;  %v5183_v33 = vpop.f32.mrf.mxu0  ;;  %v6965_v31 = vld [vmem:[#allocation19 + $0x38] sm:$0xff]   ;;  %v6970_v14 = vld [vmem:[#allocation19 + $0x10] sm:$0xff]  }
0x13a7   :  { %7289 = vpow2.f32 %v6284_v48  ;;  %v6285_v1 = vmul.f32 -1.442695, %v5237_v12  ;;  %v6286_v46 = vmul.f32 -1.442695, %v5250_v6  ;;  %6420 = vmatpush3.bf16.msra.mxu1 %v6965_v31  ;;  %v6967_v48 = vld [vmem:[#allocation19 + $0x28] sm:$0xff]   ;;  %v6968_v55 = vld [vmem:[#allocation19 + $0x20] sm:$0xff]  }
0x13a8   :  { %v5143_v38 = vpop.f32.mrf.mxu1  ;;  %v5184_v5 = vpop.f32.mrf.mxu0  ;;  %6421 = vmatprep.subr.bf16.mxu1 %v7995_v7  ;;  %v6969_v33 = vld [vmem:[#allocation19 + $0x18] sm:$0xff]   ;;  %v6975_v23 = vld [vmem:[#allocation22 + $0x28] sm:$0xff]  }
0x13a9   :  { %7291 = vpow2.f32 %v6285_v1  ;;  %v6288_v5 = vld [vmem:[#allocation15] ss:$0 sm:$0xff] }
0x13aa   :  { %v6977_v6 = vld [vmem:[#allocation22 + $0x18] sm:$0xff]  }
0x13ab   :  { %6422 = vmatpush3.bf16.msra.mxu1 %v6966_v49 }
0x13ac   :  { %6423 = vmatprep.subr.bf16.mxu1 %v7995_v7 }
0x13af   :  { %6424 = vmatpush3.bf16.msra.mxu1 %v6967_v48 }
0x13b0   :  { %6425 = vmatprep.subr.bf16.mxu1 %v7995_v7 }
0x13b3   :  { %6426 = vmatpush3.bf16.msra.mxu1 %v6968_v55 }
0x13b4   :  { %v7290_v3 = vpop.eup %7289  ;;  %6427 = vmatprep.subr.bf16.mxu1 %v7995_v7 }
0x13b5   :  { %v5231_v43 = vadd.f32 1.0, %v7290_v3 }
0x13b6   :  { %v7292_v50 = vpop.eup %7291 }
0x13b7   :  { %7293 = vrcp.f32 %v5231_v43  ;;  %v5241_v9 = vadd.f32 1.0, %v7292_v50  ;;  %6428 = vmatpush3.bf16.msra.mxu1 %v6969_v33 }
0x13b8   :  { %6429 = vmatprep.subr.bf16.mxu1 %v7995_v7 }
0x13b9   :  { %7295 = vrcp.f32 %v5241_v9 }
0x13bb   :  { %6430 = vmatpush3.bf16.msra.mxu1 %v6970_v14 }
0x13bc   :  { %6431 = vmatprep.subr.bf16.mxu1 %v7995_v7 }
0x13c4   :  { %v7294_v51 = vpop.eup %7293 }
0x13c5   :  { %v5245_v22 = vmul.f32 %v7294_v51, %v5244_v27  ;;  %v6971_v27 = vld [vmem:[#allocation19 + $0x8] sm:$0xff]   ;;  %v6972_v51 = vld [vmem:[#allocation19] sm:$0xff]  }
0x13c6   :  { %v7296_v41 = vpop.eup %7295  ;;  %6432 = vmatpush3.bf16.msra.mxu1 %v6971_v27 }
0x13c7   :  { %v5248_v29 = vadd.f32 %v5246_v54, %v5245_v22  ;;  %v5273_v53 = vsub.f32 1.0, %v7296_v41  ;;  %v5275_v0 = vmul.f32 %v7296_v41, %v10914_v44  ;;  %6433 = vmatprep.subr.bf16.mxu1 %v7995_v7  ;;  %v6973_v54 = vld [vmem:[#allocation22 + $0x38] sm:$0xff]   ;;  %v6974_v22 = vld [vmem:[#allocation22 + $0x30] sm:$0xff]  }
0x13c8   :  { %v6305_v41 = vld [vmem:[#allocation18] ss:$0 sm:$0xff] }
0x13c9   :  { %7297 = vtanh.f32 %v5248_v29  ;;  %v6976_v29 = vld [vmem:[#allocation22 + $0x20] sm:$0xff]  }
0x13ca   :  { %7299 = vpow2.f32 %v6286_v46  ;;  %6434 = vmatpush3.bf16.msra.mxu1 %v6972_v51  ;;  %v6978_v46 = vld [vmem:[#allocation22 + $0x10] sm:$0xff]  }
0x13cb   :  { %6459 = vmatprep.subr.bf16.mxu1 %v7995_v7 }
0x13d6   :  { %v7298_v63 = vpop.eup %7297 }
0x13d7   :  { %v5274_v60 = vmul.f32 %v7298_v63, %v5273_v53  ;;  %v7300_v19 = vpop.eup %7299 }
0x13d8   :  { %v5254_v17 = vadd.f32 1.0, %v7300_v19 }
0x13d9   :  { %v5276_v30 = vadd.f32 %v5275_v0, %v5274_v60 }
0x13da   :  { %7301 = vrcp.f32 %v5254_v17 }
0x13db   :  { %5281 = vst [vmem:[#allocation4 + $0x7] sm:$0x1] %v5276_v30 }
0x13e2   :  { %v5220_v25 = vpop.f32.mrf.mxu1  ;;  %v5283_v36 = vld [vmem:[#allocation4] sm:$0xff] }
0x13e3   :  { %v5260_v26 = vadd.f32 %v5258_v28, %v5220_v25  ;;  %v5318_v32 = vpack.c.bf16 %v5283_v36, %v5283_v36  ;;  %v6979_v28 = vld [vmem:[#allocation22 + $0x8] sm:$0xff]   ;;  %v6980_v25 = vld [vmem:[#allocation22] sm:$0xff]  }
0x13e4   :  { %v5222_v10 = vpop.f32.mrf.mxu1 }
0x13e5   :  { %v6287_v13 = vmul.f32 -1.442695, %v5260_v26  ;;  %v5267_v37 = vadd.f32 %v10728_v61, %v5222_v10  ;;  %v6957_v61 = vld [vmem:[#allocation16 + $0x38] sm:$0xff]  }
0x13e6   :  { %v5224_v20 = vpop.f32.mrf.mxu1  ;;  %v6981_v26 = vld [vmem:[#allocation25 + $0x38] sm:$0xff]   ;;  %v6982_v10 = vld [vmem:[#allocation25 + $0x30] sm:$0xff]  }
0x13e7   :  { %7303 = vpow2.f32 %v6287_v13  ;;  %v7302_v2 = vpop.eup %7301  ;;  %v6983_v13 = vld [vmem:[#allocation25 + $0x28] sm:$0xff]   ;;  %v6984_v20 = vld [vmem:[#allocation25 + $0x20] sm:$0xff]  }
0x13e8   :  { %v5225_v8 = vpop.f32.mrf.mxu1  ;;  %v5268_v58 = vmul.f32 %v7302_v2, %v5267_v37  ;;  %v6986_v37 = vld [vmem:[#allocation25 + $0x10] sm:$0xff]   ;;  %v6314_v2 = vld [vmem:[#allocation21] ss:$0 sm:$0xff] }
0x13e9   :  { %v6985_v8 = vld [vmem:[#allocation25 + $0x18] sm:$0xff]  }
0x13ea   :  { %v5271_v42 = vadd.f32 %v5269_v57, %v5268_v58 }
0x13f4   :  { %v7304_v39 = vpop.eup %7303 }
0x13f5   :  { %v5264_v44 = vadd.f32 1.0, %v7304_v39 }
0x13f7   :  { %7305 = vrcp.f32 %v5264_v44 }
0x13f8   :  { %7307 = vtanh.f32 %v5271_v42 }
0x1404   :  { %v7306_v62 = vpop.eup %7305 }
0x1405   :  { %v5277_v52 = vsub.f32 1.0, %v7306_v62  ;;  %v7308_v18 = vpop.eup %7307  ;;  %v5279_v24 = vmul.f32 %v7306_v62, %v10919_v40  ;;  %v6960_v40 = vld [vmem:[#allocation16 + $0x20] sm:$0xff]  }
0x1407   :  { %v5278_v59 = vmul.f32 %v7308_v18, %v5277_v52  ;;  %v6987_v18 = vld [vmem:[#allocation25 + $0x8] sm:$0xff]  }
0x1409   :  { %v5280_v21 = vadd.f32 %v5279_v24, %v5278_v59  ;;  %v6988_v24 = vld [vmem:[#allocation25] sm:$0xff]   ;;  %v6323_v59 = vld [vmem:[#allocation24] ss:$0 sm:$0xff] }
0x140b   :  { %5282 = vst [vmem:[#allocation4 + $0x8] sm:$0x1] %v5280_v21 }
0x1412   :  { %v5284_v35 = vld [vmem:[#allocation4 + $0x8] sm:$0xff] }
0x1413   :  { %v5319_v15 = vpack.c.bf16 %v5284_v35, %v5284_v35 }
0x1415   :  { %5454 = vmatprep.mubr.bf16.mxu0 %v5319_v15 }
0x1416   :  { %5455 = vmatmul.mubr.bf16.vlgmr.msra.gmra.mxu0 %v5318_v32 }
0x1417   :  { %6400 = vmatpush3.bf16.msra.mxu0 %v6957_v61  ;;  %6415 = vmatprep.mubr.msk.bf16.mxu0 %vm7996_vm1, %v7995_v7 }
0x1418   :  { %6401 = vmatprep.subr.bf16.mxu0 %v7995_v7 }
0x141b   :  { %6402 = vmatpush3.bf16.msra.mxu0 %v6958_v34 }
0x141c   :  { %6403 = vmatprep.subr.bf16.mxu0 %v7995_v7 }
0x141f   :  { %6404 = vmatpush3.bf16.msra.mxu0 %v6959_v11  ;;  %v6332_v11 = vld [vmem:[%s11001_s18] ss:$0 sm:$0xff] }
0x1420   :  { %6405 = vmatprep.subr.bf16.mxu0 %v7995_v7 }
0x1423   :  { %6406 = vmatpush3.bf16.msra.mxu0 %v6960_v40 }
0x1424   :  { %6407 = vmatprep.subr.bf16.mxu0 %v7995_v7 }
0x1427   :  { %6408 = vmatpush3.bf16.msra.mxu0 %v6961_v56 }
0x1428   :  { %6409 = vmatprep.subr.bf16.mxu0 %v7995_v7 }
0x142b   :  { %6410 = vmatpush3.bf16.msra.mxu0 %v6962_v47 }
0x142c   :  { %6411 = vmatprep.subr.bf16.mxu0 %v7995_v7 }
0x142f   :  { %6412 = vmatpush3.bf16.msra.mxu0 %v6963_v4 }
0x1430   :  { %6413 = vmatprep.subr.bf16.mxu0 %v7995_v7 }
0x1433   :  { %6414 = vmatpush3.bf16.msra.mxu0 %v6964_v16 }
0x1434   :  { %6439 = vmatprep.subr.bf16.mxu0 %v7995_v7 }
0x14d6   :  { %v6357_v38 = vpop.f32.mrf.mxu0 }
0x14d8   :  { %v6358_v12 = vpop.f32.mrf.mxu0 }
0x14d9   :  { %v6359_v1 = vadd.f32 %v6358_v12, %v6357_v38 }
0x14da   :  { %v6360_v3 = vpop.f32.mrf.mxu0 }
0x14db   :  { %v5457_v43 = vadd.f32 %v6359_v1, %v6288_v5 }
0x14dc   :  { %v6361_v50 = vpop.f32.mrf.mxu0 }
0x14dd   :  { %v5462_v9 = vmax.f32 %v5457_v43, 0.0 }
0x14df   :  { %v5480_v45 = vpack.c.bf16 %v5462_v9, %v5462_v9 }
0x14e1   :  { %6416 = vmatmul.mubr.bf16.vlgmr.msra.gmra.mxu0 %v5480_v45 }
0x14e2   :  { %6455 = vmatprep.mubr.msk.bf16.mxu0 %vm7996_vm1, %v7995_v7  ;;  %6440 = vmatpush3.bf16.msra.mxu0 %v6973_v54 }
0x14e3   :  { %6441 = vmatprep.subr.bf16.mxu0 %v7995_v7 }
0x14e6   :  { %6442 = vmatpush3.bf16.msra.mxu0 %v6974_v22 }
0x14e7   :  { %6443 = vmatprep.subr.bf16.mxu0 %v7995_v7 }
0x14ea   :  { %6444 = vmatpush3.bf16.msra.mxu0 %v6975_v23 }
0x14eb   :  { %6445 = vmatprep.subr.bf16.mxu0 %v7995_v7 }
0x14ee   :  { %6446 = vmatpush3.bf16.msra.mxu0 %v6976_v29 }
0x14ef   :  { %6447 = vmatprep.subr.bf16.mxu0 %v7995_v7 }
0x14f2   :  { %6448 = vmatpush3.bf16.msra.mxu0 %v6977_v6 }
0x14f3   :  { %6449 = vmatprep.subr.bf16.mxu0 %v7995_v7 }
0x14f6   :  { %6450 = vmatpush3.bf16.msra.mxu0 %v6978_v46 }
0x14f7   :  { %6451 = vmatprep.subr.bf16.mxu0 %v7995_v7 }
0x14fa   :  { %6452 = vmatpush3.bf16.msra.mxu0 %v6979_v28 }
0x14fb   :  { %6453 = vmatprep.subr.bf16.mxu0 %v7995_v7 }
0x14fe   :  { %6454 = vmatpush3.bf16.msra.mxu0 %v6980_v25 }
0x15a1   :  { %v5569_v53 = vpop.f32.mrf.mxu0 }
0x15a2   :  { %v5570_v63 = vadd.f32 %v6305_v41, %v5569_v53 }
0x15a3   :  { %v6417_v60 = vpop.f32.mrf.mxu0 }
0x15a4   :  { %v5575_v0 = vmax.f32 %v5570_v63, 0.0 }
0x15a5   :  { %v5572_v30 = vpop.f32.mrf.mxu0 }
0x15a6   :  { %v5593_v19 = vpack.c.bf16 %v5575_v0, %v5575_v0 }
0x15a7   :  { %v6418_v17 = vpop.f32.mrf.mxu0 }
0x15a8   :  { %6436 = vmatmul.mubr.bf16.vlgmr.msra.gmra.mxu1 %v5593_v19 }
0x15a9   :  { %6475 = vmatprep.mubr.msk.bf16.mxu1 %vm7996_vm1, %v7995_v7  ;;  %6460 = vmatpush3.bf16.msra.mxu1 %v6981_v26 }
0x15aa   :  { %6461 = vmatprep.subr.bf16.mxu1 %v7995_v7 }
0x15ad   :  { %6462 = vmatpush3.bf16.msra.mxu1 %v6982_v10 }
0x15ae   :  { %6463 = vmatprep.subr.bf16.mxu1 %v7995_v7 }
0x15b1   :  { %6464 = vmatpush3.bf16.msra.mxu1 %v6983_v13 }
0x15b2   :  { %6465 = vmatprep.subr.bf16.mxu1 %v7995_v7 }
0x15b5   :  { %6466 = vmatpush3.bf16.msra.mxu1 %v6984_v20 }
0x15b6   :  { %6467 = vmatprep.subr.bf16.mxu1 %v7995_v7 }
0x15b9   :  { %6468 = vmatpush3.bf16.msra.mxu1 %v6985_v8 }
0x15ba   :  { %6469 = vmatprep.subr.bf16.mxu1 %v7995_v7 }
0x15bd   :  { %6470 = vmatpush3.bf16.msra.mxu1 %v6986_v37 }
0x15be   :  { %6471 = vmatprep.subr.bf16.mxu1 %v7995_v7 }
0x15c1   :  { %6472 = vmatpush3.bf16.msra.mxu1 %v6987_v18 }
0x15c2   :  { %6473 = vmatprep.subr.bf16.mxu1 %v7995_v7 }
0x15c5   :  { %6474 = vmatpush3.bf16.msra.mxu1 %v6988_v24 }
0x1668   :  { %v5682_v58 = vpop.f32.mrf.mxu1 }
0x1669   :  { %v5683_v57 = vadd.f32 %v6314_v2, %v5682_v58 }
0x166a   :  { %v6437_v39 = vpop.f32.mrf.mxu1 }
0x166b   :  { %v5688_v44 = vmax.f32 %v5683_v57, 0.0 }
0x166c   :  { %v5685_v42 = vpop.f32.mrf.mxu1 }
0x166d   :  { %v5706_v62 = vpack.c.bf16 %v5688_v44, %v5688_v44 }
0x166e   :  { %v6438_v52 = vpop.f32.mrf.mxu1 }
0x166f   :  { %6456 = vmatmul.mubr.bf16.vlgmr.msra.gmra.mxu0 %v5706_v62 }
0x172f   :  { %v5795_v21 = vpop.f32.mrf.mxu0 }
0x1730   :  { %v5796_v36 = vadd.f32 %v6323_v59, %v5795_v21 }
0x1731   :  { %v6457_v35 = vpop.f32.mrf.mxu0 }
0x1732   :  { %v5801_v15 = vmax.f32 %v5796_v36, 0.0 }
0x1733   :  { %v5798_v61 = vpop.f32.mrf.mxu0 }
0x1734   :  { %v5819_v32 = vpack.c.bf16 %v5801_v15, %v5801_v15 }
0x1735   :  { %v6458_v34 = vpop.f32.mrf.mxu0 }
0x1736   :  { %6476 = vmatmul.mubr.bf16.vlgmr.msra.gmra.mxu1 %v5819_v32 }
0x17f6   :  { %v5908_v40 = vpop.f32.mrf.mxu1 }
0x17f7   :  { %v5909_v56 = vadd.f32 %v6332_v11, %v5908_v40 }
0x17f8   :  { %v6477_v47 = vpop.f32.mrf.mxu1 }
0x17f9   :  { %5914 = vst [vmem:[%s11002_s19] sm:$0xff] %v5909_v56 }
0x17fa   :  { %v5911_v7 = vpop.f32.mrf.mxu1 }
0x17fc   :  { %v6478_v4 = vpop.f32.mrf.mxu1 }
0x17fd   :  { %5919 = vsyncpa [#allocation6], 1 }
0x17fe   :  { %5920 = vsyncpa [#allocation8], 1 }
0x17ff   :  { %5921 = vsyncpa [#allocation11], 1 }
0x1800   :  { %5922 = vsyncpa [#allocation14], 1 }
0x1801   :  { %5923 = vsyncpa [#allocation17], 1 }
0x1802   :  { %5924 = vsyncpa [#allocation20], 1 }
0x1803   :  { %5925 = vsyncpa [#allocation23], 1 }
0x1804   :  { %5926 = vsyncpa [#allocation26], 1 }

</bundles_post_ra>
